<compile_context>
chip_gen: v6e
topology: v6e:2x2x1
jax: 0.10.0
libtpu: 0.0.40
codegen_flags: <defaults>
</compile_context>

<pallas_src>
import jax
import jax.numpy as jnp
from jax.experimental import pallas as pl
from jax.experimental.pallas import tpu as pltpu

_NEG_FILL = -3.0e38  # finite stand-in for -inf on padded T rows (avoids inf*0=NaN)


def _round_up(x, m):
    return (x + m - 1) // m * m


def _support_kernel(am_ref, xt_ref, w1t_ref, b1_ref, w2_ref, b2_ref, out_ref, acc_ref):
    # am_ref : [1, t_tile, s_tile]  token->sentence mapping tile (S on lanes)
    # xt_ref : [1, D, t_tile]       context tile, pre-transposed (D sublanes, T lanes)
    # w1t_ref: [D, D]   transposed first linear (h^T = W1^T @ sp^T)
    # b1_ref : [D, 1]
    # w2_ref : [D, 1]
    # b2_ref : [1, 1]
    # out_ref: [1, 1, s_tile]       lane-dense logits row
    # acc_ref: [D, s_tile] f32      running max, resident across the T grid axis
    kt = pl.program_id(2)
    t_tile = am_ref.shape[1]

    @pl.when(kt == 0)
    def _():
        acc_ref[...] = jnp.full(acc_ref.shape, -jnp.inf, acc_ref.dtype)

    # Streamed max: fully static-unrolled 2-D rank-1 updates.  All slices are
    # static, the per-token temporary is a single [D, s_tile] slab consumed
    # immediately, and `acc` stays in vregs for the whole tile.
    acc = acc_ref[...]
    for c in range(t_tile):
        x_col = xt_ref[0, :, pl.ds(c, 1)]     # [D, 1]       static lane slice
        am_row = am_ref[0, pl.ds(c, 1), :]    # [1, s_tile]  static sublane slice
        acc = jnp.maximum(acc, x_col * am_row)
    acc_ref[...] = acc

    @pl.when(kt == pl.num_programs(2) - 1)
    def _():
        sp_t = acc                                                        # [D, s_tile]
        h = jnp.dot(w1t_ref[...], sp_t, preferred_element_type=jnp.float32)
        h = jnp.maximum(h + b1_ref[...], 0.0)                             # [D, s_tile]
        # Linear(D, 1) on the VPU/XLU: weighted sublane reduction -> [1, s_tile].
        logits = jnp.sum(h * w2_ref[...], axis=0, keepdims=True) + b2_ref[...]
        out_ref[0] = logits.astype(out_ref.dtype)


def support_net_forward(all_mapping, context_encoding, w1, b1, w2, b2, *,
                        t_tile=256, s_tile=512):
    """all_mapping: [B, T, S], context_encoding: [B, T, D] -> sp_logits [B, S, 1]."""
    B, T, S = all_mapping.shape
    D = context_encoding.shape[-1]
    assert context_encoding.shape == (B, T, D)
    assert w1.shape == (D, D) and b1.shape == (1, D)
    assert w2.shape == (D, 1) and b2.shape == (1, 1)

    am = all_mapping.astype(jnp.float32)
    x = context_encoding.astype(jnp.float32)

    # --- S tiling (lane axis): multiples of 128.  Multiple S tiles also shard
    # work across both v7x TensorCores when B is small.
    s_tile = min(_round_up(min(s_tile, max(S, 1)), 128), _round_up(S, 128))
    s_pad = _round_up(S, s_tile)
    n_s = s_pad // s_tile

    # --- T tiling (streamed-max axis).  t_tile is also the static unroll
    # length of the in-kernel token loop.
    if T <= t_tile:
        t_tile = _round_up(T, 8)
        t_pad = t_tile
    else:
        t_tile = _round_up(t_tile, 128)
        t_pad = _round_up(T, t_tile)
    n_kt = t_pad // t_tile

    # Pad S with 0 (results for padded sentences are sliced off), then pad the
    # extra T rows of the mapping with a large finite negative value so the
    # streamed max ignores them — this replaces the per-element mask.
    if s_pad != S:
        am = jnp.pad(am, ((0, 0), (0, 0), (0, s_pad - S)))
    if t_pad != T:
        am = jnp.pad(am, ((0, 0), (0, t_pad - T), (0, 0)), constant_values=_NEG_FILL)

    # Pre-transpose the context encoding to [B, D, T]: D on sublanes, T on
    # lanes -> lane-dense DMA tiles and [D, 1] per-token columns with no
    # relayout in the hot loop.  Pad T with 1.0 (finite; 1.0 * -3e38 stays finite).
    xt = jnp.transpose(x, (0, 2, 1))
    if t_pad != T:
        xt = jnp.pad(xt, ((0, 0), (0, 0), (0, t_pad - T)), constant_values=1.0)

    # Reorient parameters so the kernel keeps S on lanes / D on sublanes.
    w1t = jnp.asarray(w1, jnp.float32).T               # [D, D]
    b1c = jnp.asarray(b1, jnp.float32).reshape(D, 1)   # [D, 1]
    w2c = jnp.asarray(w2, jnp.float32).reshape(D, 1)   # [D, 1]
    b2c = jnp.asarray(b2, jnp.float32).reshape(1, 1)   # [1, 1]

    # VMEM budget from actual buffers (double-buffered streamed tiles, resident
    # weights, output row, accumulator) with 2x headroom; capped at 48 MiB so
    # the compiler keeps slack on v7x's 64 MiB physical VMEM.
    est = 4 * (2 * t_tile * s_tile            # all_mapping tile (double-buffered)
               + 2 * D * t_tile               # context tile (double-buffered)
               + 2 * (D * D + 2 * D + 1)      # weights
               + 2 * s_tile                   # output row
               + D * s_tile)                  # accumulator scratch
    vmem_limit = int(min(48 * 1024 * 1024, max(24 * 1024 * 1024, 2 * est)))

    out = pl.pallas_call(
        _support_kernel,
        out_shape=jax.ShapeDtypeStruct((B, 1, s_pad), jnp.float32),
        grid_spec=pltpu.PrefetchScalarGridSpec(
            num_scalar_prefetch=0,
            grid=(B, n_s, n_kt),
            in_specs=[
                pl.BlockSpec((1, t_tile, s_tile), lambda b, si, kt: (b, kt, si)),  # all_mapping
                pl.BlockSpec((1, D, t_tile), lambda b, si, kt: (b, 0, kt)),        # context^T
                pl.BlockSpec((D, D), lambda b, si, kt: (0, 0)),                    # W1^T (resident)
                pl.BlockSpec((D, 1), lambda b, si, kt: (0, 0)),                    # b1
                pl.BlockSpec((D, 1), lambda b, si, kt: (0, 0)),                    # w2
                pl.BlockSpec((1, 1), lambda b, si, kt: (0, 0)),                    # b2
            ],
            out_specs=pl.BlockSpec((1, 1, s_tile), lambda b, si, kt: (b, 0, si)),
            scratch_shapes=[pltpu.VMEM((D, s_tile), jnp.float32)],
        ),
        compiler_params=pltpu.CompilerParams(
            dimension_semantics=("parallel", "parallel", "arbitrary"),
            vmem_limit_bytes=vmem_limit,
        ),
    )(am, xt, w1t, b1c, w2c, b2c)

    # Slice off padding and restore the [B, S, 1] output of the PyTorch module.
    return out[:, 0, :S, None]


def reference_forward(all_mapping, context_encoding, w1, b1, w2, b2):
    # Pure-JAX reference mirroring the PyTorch module.
    sp_state = jnp.max(all_mapping[..., None] * context_encoding[:, :, None, :], axis=1)
    h = jnp.maximum(sp_state @ w1 + b1, 0.0)
    return h @ w2 + b2


if __name__ == "__main__":
    # Small shapes consistent with the module (config.input_dim = 8 => D = 32).
    # T and S deliberately not tile-aligned and larger than one tile so the
    # value-padding, the resident accumulator (multiple T grid steps) and the
    # S-tile sharding are all exercised.
    B, T, S, D = 2, 200, 140, 32

    key = jax.random.PRNGKey(0)
    k_am, k_x, k_w1, k_b1, k_w2, k_b2 = jax.random.split(key, 6)

    # all_mapping is a 0/1 token->sentence mapping in the original model.
    all_mapping = (jax.random.uniform(k_am, (B, T, S)) > 0.5).astype(jnp.float32)
    context_encoding = jax.random.normal(k_x, (B, T, D), dtype=jnp.float32)

    # fc_sf parameters, stored in x @ W + b convention.
    w1 = jax.random.normal(k_w1, (D, D), dtype=jnp.float32) * 0.05
    b1 = jax.random.normal(k_b1, (1, D), dtype=jnp.float32) * 0.05
    w2 = jax.random.normal(k_w2, (D, 1), dtype=jnp.float32) * 0.05
    b2 = jax.random.normal(k_b2, (1, 1), dtype=jnp.float32) * 0.05

    # t_tile=128 -> two streamed T steps; s_tile=128 -> two S tiles.
    out = support_net_forward(all_mapping, context_encoding, w1, b1, w2, b2,
                              t_tile=128, s_tile=128)
    out = jax.block_until_ready(out)

    ref = reference_forward(all_mapping, context_encoding, w1, b1, w2, b2)
    assert out.shape == (B, S, 1)
    assert jnp.allclose(out, ref, atol=2e-4, rtol=2e-4), "mismatch vs reference"

    print("KERNEL_OK")
</pallas_src>

<mosaic_0001>
module attributes {stable_mosaic.version = 11 : i64} {
  func.func @_support_kernel(%arg0: i32, %arg1: i32, %arg2: i32, %arg3: memref<1x128x128xf32, #tpu.memory_space<vmem>>, %arg4: memref<1x32x128xf32, #tpu.memory_space<vmem>>, %arg5: memref<32x32xf32, #tpu.memory_space<vmem>>, %arg6: memref<32x1xf32, #tpu.memory_space<vmem>>, %arg7: memref<32x1xf32, #tpu.memory_space<vmem>>, %arg8: memref<1x1xf32, #tpu.memory_space<vmem>>, %arg9: memref<1x1x128xf32, #tpu.memory_space<vmem>>, %arg10: memref<32x128xf32, #tpu.memory_space<vmem>>) attributes {dimension_semantics = [#tpu.dimension_semantics<parallel>, #tpu.dimension_semantics<parallel>, #tpu.dimension_semantics<arbitrary>], iteration_bounds = array<i64: 2, 2, 2>, scalar_prefetch = 0 : i64, scratch_operands = 1 : i64, tpu.core_type = #tpu.core_type<tc>, window_params = [{transform_indices = @transform_0, window_bounds = array<i64: 1, 128, 128>}, {transform_indices = @transform_1, window_bounds = array<i64: 1, 32, 128>}, {pipeline_mode = #tpu.pipeline_mode<synchronous>, transform_indices = @transform_2, window_bounds = array<i64: 32, 32>}, {pipeline_mode = #tpu.pipeline_mode<synchronous>, transform_indices = @transform_3, window_bounds = array<i64: 32, 1>}, {pipeline_mode = #tpu.pipeline_mode<synchronous>, transform_indices = @transform_4, window_bounds = array<i64: 32, 1>}, {pipeline_mode = #tpu.pipeline_mode<synchronous>, transform_indices = @transform_5, window_bounds = array<i64: 1, 1>}, {transform_indices = @transform_6, window_bounds = array<i64: 1, 1, 128>}]} {
    %c0_i32 = arith.constant 0 : i32
    %0 = arith.cmpi eq, %arg2, %c0_i32 : i32
    %1 = arith.extui %0 : i1 to i32
    %c0_i32_0 = arith.constant 0 : i32
    %2 = arith.cmpi ne, %1, %c0_i32_0 : i32
    scf.if %2 {
      %cst = arith.constant 0xFF800000 : f32
      %1032 = vector.broadcast %cst : f32 to vector<32x128xf32>
      %c0_646 = arith.constant 0 : index
      %c0_647 = arith.constant 0 : index
      %1033 = vector.load %arg10[%c0_646, %c0_647] : memref<32x128xf32, #tpu.memory_space<vmem>>, vector<32x128xf32>
      tpu.vector_store %arg10[%c0_646, %c0_647], %1032 {strides = array<i32>} : memref<32x128xf32, #tpu.memory_space<vmem>>, vector<32x128xf32>,
    } else {
    }
    %c0 = arith.constant 0 : index
    %c0_1 = arith.constant 0 : index
    %3 = vector.load %arg10[%c0, %c0_1] : memref<32x128xf32, #tpu.memory_space<vmem>>, vector<32x128xf32>
    %c0_2 = arith.constant 0 : index
    %c0_3 = arith.constant 0 : index
    %c0_4 = arith.constant 0 : index
    %4 = vector.load %arg4[%c0_2, %c0_3, %c0_4] : memref<1x32x128xf32, #tpu.memory_space<vmem>>, vector<1x32x1xf32>
    %5 = vector.shape_cast %4 : vector<1x32x1xf32> to vector<32x1xf32>
    %c0_5 = arith.constant 0 : index
    %c0_6 = arith.constant 0 : index
    %c0_7 = arith.constant 0 : index
    %6 = vector.load %arg3[%c0_5, %c0_6, %c0_7] : memref<1x128x128xf32, #tpu.memory_space<vmem>>, vector<1x1x128xf32>
    %7 = vector.shape_cast %6 : vector<1x1x128xf32> to vector<1x128xf32>
    %8 = vector.broadcast %5 : vector<32x1xf32> to vector<32x128xf32>
    %9 = vector.broadcast %7 : vector<1x128xf32> to vector<32x128xf32>
    %10 = arith.mulf %8, %9 : vector<32x128xf32>
    %11 = arith.maximumf %3, %10 : vector<32x128xf32>
    %c0_8 = arith.constant 0 : index
    %c0_9 = arith.constant 0 : index
    %c1 = arith.constant 1 : index
    %12 = vector.load %arg4[%c0_8, %c0_9, %c1] : memref<1x32x128xf32, #tpu.memory_space<vmem>>, vector<1x32x1xf32>
    %13 = vector.shape_cast %12 : vector<1x32x1xf32> to vector<32x1xf32>
    %c0_10 = arith.constant 0 : index
    %c1_11 = arith.constant 1 : index
    %c0_12 = arith.constant 0 : index
    %14 = vector.load %arg3[%c0_10, %c1_11, %c0_12] : memref<1x128x128xf32, #tpu.memory_space<vmem>>, vector<1x1x128xf32>
    %15 = vector.shape_cast %14 : vector<1x1x128xf32> to vector<1x128xf32>
    %16 = vector.broadcast %13 : vector<32x1xf32> to vector<32x128xf32>
    %17 = vector.broadcast %15 : vector<1x128xf32> to vector<32x128xf32>
    %18 = arith.mulf %16, %17 : vector<32x128xf32>
    %19 = arith.maximumf %11, %18 : vector<32x128xf32>
    %c0_13 = arith.constant 0 : index
    %c0_14 = arith.constant 0 : index
    %c2 = arith.constant 2 : index
    %20 = vector.load %arg4[%c0_13, %c0_14, %c2] : memref<1x32x128xf32, #tpu.memory_space<vmem>>, vector<1x32x1xf32>
    %21 = vector.shape_cast %20 : vector<1x32x1xf32> to vector<32x1xf32>
    %c0_15 = arith.constant 0 : index
    %c2_16 = arith.constant 2 : index
    %c0_17 = arith.constant 0 : index
    %22 = vector.load %arg3[%c0_15, %c2_16, %c0_17] : memref<1x128x128xf32, #tpu.memory_space<vmem>>, vector<1x1x128xf32>
    %23 = vector.shape_cast %22 : vector<1x1x128xf32> to vector<1x128xf32>
    %24 = vector.broadcast %21 : vector<32x1xf32> to vector<32x128xf32>
    %25 = vector.broadcast %23 : vector<1x128xf32> to vector<32x128xf32>
    %26 = arith.mulf %24, %25 : vector<32x128xf32>
    %27 = arith.maximumf %19, %26 : vector<32x128xf32>
    %c0_18 = arith.constant 0 : index
    %c0_19 = arith.constant 0 : index
    %c3 = arith.constant 3 : index
    %28 = vector.load %arg4[%c0_18, %c0_19, %c3] : memref<1x32x128xf32, #tpu.memory_space<vmem>>, vector<1x32x1xf32>
    %29 = vector.shape_cast %28 : vector<1x32x1xf32> to vector<32x1xf32>
    %c0_20 = arith.constant 0 : index
    %c3_21 = arith.constant 3 : index
    %c0_22 = arith.constant 0 : index
    %30 = vector.load %arg3[%c0_20, %c3_21, %c0_22] : memref<1x128x128xf32, #tpu.memory_space<vmem>>, vector<1x1x128xf32>
    %31 = vector.shape_cast %30 : vector<1x1x128xf32> to vector<1x128xf32>
    %32 = vector.broadcast %29 : vector<32x1xf32> to vector<32x128xf32>
    %33 = vector.broadcast %31 : vector<1x128xf32> to vector<32x128xf32>
    %34 = arith.mulf %32, %33 : vector<32x128xf32>
    %35 = arith.maximumf %27, %34 : vector<32x128xf32>
    %c0_23 = arith.constant 0 : index
    %c0_24 = arith.constant 0 : index
    %c4 = arith.constant 4 : index
    %36 = vector.load %arg4[%c0_23, %c0_24, %c4] : memref<1x32x128xf32, #tpu.memory_space<vmem>>, vector<1x32x1xf32>
    %37 = vector.shape_cast %36 : vector<1x32x1xf32> to vector<32x1xf32>
    %c0_25 = arith.constant 0 : index
    %c4_26 = arith.constant 4 : index
    %c0_27 = arith.constant 0 : index
    %38 = vector.load %arg3[%c0_25, %c4_26, %c0_27] : memref<1x128x128xf32, #tpu.memory_space<vmem>>, vector<1x1x128xf32>
    %39 = vector.shape_cast %38 : vector<1x1x128xf32> to vector<1x128xf32>
    %40 = vector.broadcast %37 : vector<32x1xf32> to vector<32x128xf32>
    %41 = vector.broadcast %39 : vector<1x128xf32> to vector<32x128xf32>
    %42 = arith.mulf %40, %41 : vector<32x128xf32>
    %43 = arith.maximumf %35, %42 : vector<32x128xf32>
    %c0_28 = arith.constant 0 : index
    %c0_29 = arith.constant 0 : index
    %c5 = arith.constant 5 : index
    %44 = vector.load %arg4[%c0_28, %c0_29, %c5] : memref<1x32x128xf32, #tpu.memory_space<vmem>>, vector<1x32x1xf32>
    %45 = vector.shape_cast %44 : vector<1x32x1xf32> to vector<32x1xf32>
    %c0_30 = arith.constant 0 : index
    %c5_31 = arith.constant 5 : index
    %c0_32 = arith.constant 0 : index
    %46 = vector.load %arg3[%c0_30, %c5_31, %c0_32] : memref<1x128x128xf32, #tpu.memory_space<vmem>>, vector<1x1x128xf32>
    %47 = vector.shape_cast %46 : vector<1x1x128xf32> to vector<1x128xf32>
    %48 = vector.broadcast %45 : vector<32x1xf32> to vector<32x128xf32>
    %49 = vector.broadcast %47 : vector<1x128xf32> to vector<32x128xf32>
    %50 = arith.mulf %48, %49 : vector<32x128xf32>
    %51 = arith.maximumf %43, %50 : vector<32x128xf32>
    %c0_33 = arith.constant 0 : index
    %c0_34 = arith.constant 0 : index
    %c6 = arith.constant 6 : index
    %52 = vector.load %arg4[%c0_33, %c0_34, %c6] : memref<1x32x128xf32, #tpu.memory_space<vmem>>, vector<1x32x1xf32>
    %53 = vector.shape_cast %52 : vector<1x32x1xf32> to vector<32x1xf32>
    %c0_35 = arith.constant 0 : index
    %c6_36 = arith.constant 6 : index
    %c0_37 = arith.constant 0 : index
    %54 = vector.load %arg3[%c0_35, %c6_36, %c0_37] : memref<1x128x128xf32, #tpu.memory_space<vmem>>, vector<1x1x128xf32>
    %55 = vector.shape_cast %54 : vector<1x1x128xf32> to vector<1x128xf32>
    %56 = vector.broadcast %53 : vector<32x1xf32> to vector<32x128xf32>
    %57 = vector.broadcast %55 : vector<1x128xf32> to vector<32x128xf32>
    %58 = arith.mulf %56, %57 : vector<32x128xf32>
    %59 = arith.maximumf %51, %58 : vector<32x128xf32>
    %c0_38 = arith.constant 0 : index
    %c0_39 = arith.constant 0 : index
    %c7 = arith.constant 7 : index
    %60 = vector.load %arg4[%c0_38, %c0_39, %c7] : memref<1x32x128xf32, #tpu.memory_space<vmem>>, vector<1x32x1xf32>
    %61 = vector.shape_cast %60 : vector<1x32x1xf32> to vector<32x1xf32>
    %c0_40 = arith.constant 0 : index
    %c7_41 = arith.constant 7 : index
    %c0_42 = arith.constant 0 : index
    %62 = vector.load %arg3[%c0_40, %c7_41, %c0_42] : memref<1x128x128xf32, #tpu.memory_space<vmem>>, vector<1x1x128xf32>
    %63 = vector.shape_cast %62 : vector<1x1x128xf32> to vector<1x128xf32>
    %64 = vector.broadcast %61 : vector<32x1xf32> to vector<32x128xf32>
    %65 = vector.broadcast %63 : vector<1x128xf32> to vector<32x128xf32>
    %66 = arith.mulf %64, %65 : vector<32x128xf32>
    %67 = arith.maximumf %59, %66 : vector<32x128xf32>
    %c0_43 = arith.constant 0 : index
    %c0_44 = arith.constant 0 : index
    %c8 = arith.constant 8 : index
    %68 = vector.load %arg4[%c0_43, %c0_44, %c8] : memref<1x32x128xf32, #tpu.memory_space<vmem>>, vector<1x32x1xf32>
    %69 = vector.shape_cast %68 : vector<1x32x1xf32> to vector<32x1xf32>
    %c0_45 = arith.constant 0 : index
    %c8_46 = arith.constant 8 : index
    %c0_47 = arith.constant 0 : index
    %70 = vector.load %arg3[%c0_45, %c8_46, %c0_47] : memref<1x128x128xf32, #tpu.memory_space<vmem>>, vector<1x1x128xf32>
    %71 = vector.shape_cast %70 : vector<1x1x128xf32> to vector<1x128xf32>
    %72 = vector.broadcast %69 : vector<32x1xf32> to vector<32x128xf32>
    %73 = vector.broadcast %71 : vector<1x128xf32> to vector<32x128xf32>
    %74 = arith.mulf %72, %73 : vector<32x128xf32>
    %75 = arith.maximumf %67, %74 : vector<32x128xf32>
    %c0_48 = arith.constant 0 : index
    %c0_49 = arith.constant 0 : index
    %c9 = arith.constant 9 : index
    %76 = vector.load %arg4[%c0_48, %c0_49, %c9] : memref<1x32x128xf32, #tpu.memory_space<vmem>>, vector<1x32x1xf32>
    %77 = vector.shape_cast %76 : vector<1x32x1xf32> to vector<32x1xf32>
    %c0_50 = arith.constant 0 : index
    %c9_51 = arith.constant 9 : index
    %c0_52 = arith.constant 0 : index
    %78 = vector.load %arg3[%c0_50, %c9_51, %c0_52] : memref<1x128x128xf32, #tpu.memory_space<vmem>>, vector<1x1x128xf32>
    %79 = vector.shape_cast %78 : vector<1x1x128xf32> to vector<1x128xf32>
    %80 = vector.broadcast %77 : vector<32x1xf32> to vector<32x128xf32>
    %81 = vector.broadcast %79 : vector<1x128xf32> to vector<32x128xf32>
    %82 = arith.mulf %80, %81 : vector<32x128xf32>
    %83 = arith.maximumf %75, %82 : vector<32x128xf32>
    %c0_53 = arith.constant 0 : index
    %c0_54 = arith.constant 0 : index
    %c10 = arith.constant 10 : index
    %84 = vector.load %arg4[%c0_53, %c0_54, %c10] : memref<1x32x128xf32, #tpu.memory_space<vmem>>, vector<1x32x1xf32>
    %85 = vector.shape_cast %84 : vector<1x32x1xf32> to vector<32x1xf32>
    %c0_55 = arith.constant 0 : index
    %c10_56 = arith.constant 10 : index
    %c0_57 = arith.constant 0 : index
    %86 = vector.load %arg3[%c0_55, %c10_56, %c0_57] : memref<1x128x128xf32, #tpu.memory_space<vmem>>, vector<1x1x128xf32>
    %87 = vector.shape_cast %86 : vector<1x1x128xf32> to vector<1x128xf32>
    %88 = vector.broadcast %85 : vector<32x1xf32> to vector<32x128xf32>
    %89 = vector.broadcast %87 : vector<1x128xf32> to vector<32x128xf32>
    %90 = arith.mulf %88, %89 : vector<32x128xf32>
    %91 = arith.maximumf %83, %90 : vector<32x128xf32>
    %c0_58 = arith.constant 0 : index
    %c0_59 = arith.constant 0 : index
    %c11 = arith.constant 11 : index
    %92 = vector.load %arg4[%c0_58, %c0_59, %c11] : memref<1x32x128xf32, #tpu.memory_space<vmem>>, vector<1x32x1xf32>
    %93 = vector.shape_cast %92 : vector<1x32x1xf32> to vector<32x1xf32>
    %c0_60 = arith.constant 0 : index
    %c11_61 = arith.constant 11 : index
    %c0_62 = arith.constant 0 : index
    %94 = vector.load %arg3[%c0_60, %c11_61, %c0_62] : memref<1x128x128xf32, #tpu.memory_space<vmem>>, vector<1x1x128xf32>
    %95 = vector.shape_cast %94 : vector<1x1x128xf32> to vector<1x128xf32>
    %96 = vector.broadcast %93 : vector<32x1xf32> to vector<32x128xf32>
    %97 = vector.broadcast %95 : vector<1x128xf32> to vector<32x128xf32>
    %98 = arith.mulf %96, %97 : vector<32x128xf32>
    %99 = arith.maximumf %91, %98 : vector<32x128xf32>
    %c0_63 = arith.constant 0 : index
    %c0_64 = arith.constant 0 : index
    %c12 = arith.constant 12 : index
    %100 = vector.load %arg4[%c0_63, %c0_64, %c12] : memref<1x32x128xf32, #tpu.memory_space<vmem>>, vector<1x32x1xf32>
    %101 = vector.shape_cast %100 : vector<1x32x1xf32> to vector<32x1xf32>
    %c0_65 = arith.constant 0 : index
    %c12_66 = arith.constant 12 : index
    %c0_67 = arith.constant 0 : index
    %102 = vector.load %arg3[%c0_65, %c12_66, %c0_67] : memref<1x128x128xf32, #tpu.memory_space<vmem>>, vector<1x1x128xf32>
    %103 = vector.shape_cast %102 : vector<1x1x128xf32> to vector<1x128xf32>
    %104 = vector.broadcast %101 : vector<32x1xf32> to vector<32x128xf32>
    %105 = vector.broadcast %103 : vector<1x128xf32> to vector<32x128xf32>
    %106 = arith.mulf %104, %105 : vector<32x128xf32>
    %107 = arith.maximumf %99, %106 : vector<32x128xf32>
    %c0_68 = arith.constant 0 : index
    %c0_69 = arith.constant 0 : index
    %c13 = arith.constant 13 : index
    %108 = vector.load %arg4[%c0_68, %c0_69, %c13] : memref<1x32x128xf32, #tpu.memory_space<vmem>>, vector<1x32x1xf32>
    %109 = vector.shape_cast %108 : vector<1x32x1xf32> to vector<32x1xf32>
    %c0_70 = arith.constant 0 : index
    %c13_71 = arith.constant 13 : index
    %c0_72 = arith.constant 0 : index
    %110 = vector.load %arg3[%c0_70, %c13_71, %c0_72] : memref<1x128x128xf32, #tpu.memory_space<vmem>>, vector<1x1x128xf32>
    %111 = vector.shape_cast %110 : vector<1x1x128xf32> to vector<1x128xf32>
    %112 = vector.broadcast %109 : vector<32x1xf32> to vector<32x128xf32>
    %113 = vector.broadcast %111 : vector<1x128xf32> to vector<32x128xf32>
    %114 = arith.mulf %112, %113 : vector<32x128xf32>
    %115 = arith.maximumf %107, %114 : vector<32x128xf32>
    %c0_73 = arith.constant 0 : index
    %c0_74 = arith.constant 0 : index
    %c14 = arith.constant 14 : index
    %116 = vector.load %arg4[%c0_73, %c0_74, %c14] : memref<1x32x128xf32, #tpu.memory_space<vmem>>, vector<1x32x1xf32>
    %117 = vector.shape_cast %116 : vector<1x32x1xf32> to vector<32x1xf32>
    %c0_75 = arith.constant 0 : index
    %c14_76 = arith.constant 14 : index
    %c0_77 = arith.constant 0 : index
    %118 = vector.load %arg3[%c0_75, %c14_76, %c0_77] : memref<1x128x128xf32, #tpu.memory_space<vmem>>, vector<1x1x128xf32>
    %119 = vector.shape_cast %118 : vector<1x1x128xf32> to vector<1x128xf32>
    %120 = vector.broadcast %117 : vector<32x1xf32> to vector<32x128xf32>
    %121 = vector.broadcast %119 : vector<1x128xf32> to vector<32x128xf32>
    %122 = arith.mulf %120, %121 : vector<32x128xf32>
    %123 = arith.maximumf %115, %122 : vector<32x128xf32>
    %c0_78 = arith.constant 0 : index
    %c0_79 = arith.constant 0 : index
    %c15 = arith.constant 15 : index
    %124 = vector.load %arg4[%c0_78, %c0_79, %c15] : memref<1x32x128xf32, #tpu.memory_space<vmem>>, vector<1x32x1xf32>
    %125 = vector.shape_cast %124 : vector<1x32x1xf32> to vector<32x1xf32>
    %c0_80 = arith.constant 0 : index
    %c15_81 = arith.constant 15 : index
    %c0_82 = arith.constant 0 : index
    %126 = vector.load %arg3[%c0_80, %c15_81, %c0_82] : memref<1x128x128xf32, #tpu.memory_space<vmem>>, vector<1x1x128xf32>
    %127 = vector.shape_cast %126 : vector<1x1x128xf32> to vector<1x128xf32>
    %128 = vector.broadcast %125 : vector<32x1xf32> to vector<32x128xf32>
    %129 = vector.broadcast %127 : vector<1x128xf32> to vector<32x128xf32>
    %130 = arith.mulf %128, %129 : vector<32x128xf32>
    %131 = arith.maximumf %123, %130 : vector<32x128xf32>
    %c0_83 = arith.constant 0 : index
    %c0_84 = arith.constant 0 : index
    %c16 = arith.constant 16 : index
    %132 = vector.load %arg4[%c0_83, %c0_84, %c16] : memref<1x32x128xf32, #tpu.memory_space<vmem>>, vector<1x32x1xf32>
    %133 = vector.shape_cast %132 : vector<1x32x1xf32> to vector<32x1xf32>
    %c0_85 = arith.constant 0 : index
    %c16_86 = arith.constant 16 : index
    %c0_87 = arith.constant 0 : index
    %134 = vector.load %arg3[%c0_85, %c16_86, %c0_87] : memref<1x128x128xf32, #tpu.memory_space<vmem>>, vector<1x1x128xf32>
    %135 = vector.shape_cast %134 : vector<1x1x128xf32> to vector<1x128xf32>
    %136 = vector.broadcast %133 : vector<32x1xf32> to vector<32x128xf32>
    %137 = vector.broadcast %135 : vector<1x128xf32> to vector<32x128xf32>
    %138 = arith.mulf %136, %137 : vector<32x128xf32>
    %139 = arith.maximumf %131, %138 : vector<32x128xf32>
    %c0_88 = arith.constant 0 : index
    %c0_89 = arith.constant 0 : index
    %c17 = arith.constant 17 : index
    %140 = vector.load %arg4[%c0_88, %c0_89, %c17] : memref<1x32x128xf32, #tpu.memory_space<vmem>>, vector<1x32x1xf32>
    %141 = vector.shape_cast %140 : vector<1x32x1xf32> to vector<32x1xf32>
    %c0_90 = arith.constant 0 : index
    %c17_91 = arith.constant 17 : index
    %c0_92 = arith.constant 0 : index
    %142 = vector.load %arg3[%c0_90, %c17_91, %c0_92] : memref<1x128x128xf32, #tpu.memory_space<vmem>>, vector<1x1x128xf32>
    %143 = vector.shape_cast %142 : vector<1x1x128xf32> to vector<1x128xf32>
    %144 = vector.broadcast %141 : vector<32x1xf32> to vector<32x128xf32>
    %145 = vector.broadcast %143 : vector<1x128xf32> to vector<32x128xf32>
    %146 = arith.mulf %144, %145 : vector<32x128xf32>
    %147 = arith.maximumf %139, %146 : vector<32x128xf32>
    %c0_93 = arith.constant 0 : index
    %c0_94 = arith.constant 0 : index
    %c18 = arith.constant 18 : index
    %148 = vector.load %arg4[%c0_93, %c0_94, %c18] : memref<1x32x128xf32, #tpu.memory_space<vmem>>, vector<1x32x1xf32>
    %149 = vector.shape_cast %148 : vector<1x32x1xf32> to vector<32x1xf32>
    %c0_95 = arith.constant 0 : index
    %c18_96 = arith.constant 18 : index
    %c0_97 = arith.constant 0 : index
    %150 = vector.load %arg3[%c0_95, %c18_96, %c0_97] : memref<1x128x128xf32, #tpu.memory_space<vmem>>, vector<1x1x128xf32>
    %151 = vector.shape_cast %150 : vector<1x1x128xf32> to vector<1x128xf32>
    %152 = vector.broadcast %149 : vector<32x1xf32> to vector<32x128xf32>
    %153 = vector.broadcast %151 : vector<1x128xf32> to vector<32x128xf32>
    %154 = arith.mulf %152, %153 : vector<32x128xf32>
    %155 = arith.maximumf %147, %154 : vector<32x128xf32>
    %c0_98 = arith.constant 0 : index
    %c0_99 = arith.constant 0 : index
    %c19 = arith.constant 19 : index
    %156 = vector.load %arg4[%c0_98, %c0_99, %c19] : memref<1x32x128xf32, #tpu.memory_space<vmem>>, vector<1x32x1xf32>
    %157 = vector.shape_cast %156 : vector<1x32x1xf32> to vector<32x1xf32>
    %c0_100 = arith.constant 0 : index
    %c19_101 = arith.constant 19 : index
    %c0_102 = arith.constant 0 : index
    %158 = vector.load %arg3[%c0_100, %c19_101, %c0_102] : memref<1x128x128xf32, #tpu.memory_space<vmem>>, vector<1x1x128xf32>
    %159 = vector.shape_cast %158 : vector<1x1x128xf32> to vector<1x128xf32>
    %160 = vector.broadcast %157 : vector<32x1xf32> to vector<32x128xf32>
    %161 = vector.broadcast %159 : vector<1x128xf32> to vector<32x128xf32>
    %162 = arith.mulf %160, %161 : vector<32x128xf32>
    %163 = arith.maximumf %155, %162 : vector<32x128xf32>
    %c0_103 = arith.constant 0 : index
    %c0_104 = arith.constant 0 : index
    %c20 = arith.constant 20 : index
    %164 = vector.load %arg4[%c0_103, %c0_104, %c20] : memref<1x32x128xf32, #tpu.memory_space<vmem>>, vector<1x32x1xf32>
    %165 = vector.shape_cast %164 : vector<1x32x1xf32> to vector<32x1xf32>
    %c0_105 = arith.constant 0 : index
    %c20_106 = arith.constant 20 : index
    %c0_107 = arith.constant 0 : index
    %166 = vector.load %arg3[%c0_105, %c20_106, %c0_107] : memref<1x128x128xf32, #tpu.memory_space<vmem>>, vector<1x1x128xf32>
    %167 = vector.shape_cast %166 : vector<1x1x128xf32> to vector<1x128xf32>
    %168 = vector.broadcast %165 : vector<32x1xf32> to vector<32x128xf32>
    %169 = vector.broadcast %167 : vector<1x128xf32> to vector<32x128xf32>
    %170 = arith.mulf %168, %169 : vector<32x128xf32>
    %171 = arith.maximumf %163, %170 : vector<32x128xf32>
    %c0_108 = arith.constant 0 : index
    %c0_109 = arith.constant 0 : index
    %c21 = arith.constant 21 : index
    %172 = vector.load %arg4[%c0_108, %c0_109, %c21] : memref<1x32x128xf32, #tpu.memory_space<vmem>>, vector<1x32x1xf32>
    %173 = vector.shape_cast %172 : vector<1x32x1xf32> to vector<32x1xf32>
    %c0_110 = arith.constant 0 : index
    %c21_111 = arith.constant 21 : index
    %c0_112 = arith.constant 0 : index
    %174 = vector.load %arg3[%c0_110, %c21_111, %c0_112] : memref<1x128x128xf32, #tpu.memory_space<vmem>>, vector<1x1x128xf32>
    %175 = vector.shape_cast %174 : vector<1x1x128xf32> to vector<1x128xf32>
    %176 = vector.broadcast %173 : vector<32x1xf32> to vector<32x128xf32>
    %177 = vector.broadcast %175 : vector<1x128xf32> to vector<32x128xf32>
    %178 = arith.mulf %176, %177 : vector<32x128xf32>
    %179 = arith.maximumf %171, %178 : vector<32x128xf32>
    %c0_113 = arith.constant 0 : index
    %c0_114 = arith.constant 0 : index
    %c22 = arith.constant 22 : index
    %180 = vector.load %arg4[%c0_113, %c0_114, %c22] : memref<1x32x128xf32, #tpu.memory_space<vmem>>, vector<1x32x1xf32>
    %181 = vector.shape_cast %180 : vector<1x32x1xf32> to vector<32x1xf32>
    %c0_115 = arith.constant 0 : index
    %c22_116 = arith.constant 22 : index
    %c0_117 = arith.constant 0 : index
    %182 = vector.load %arg3[%c0_115, %c22_116, %c0_117] : memref<1x128x128xf32, #tpu.memory_space<vmem>>, vector<1x1x128xf32>
    %183 = vector.shape_cast %182 : vector<1x1x128xf32> to vector<1x128xf32>
    %184 = vector.broadcast %181 : vector<32x1xf32> to vector<32x128xf32>
    %185 = vector.broadcast %183 : vector<1x128xf32> to vector<32x128xf32>
    %186 = arith.mulf %184, %185 : vector<32x128xf32>
    %187 = arith.maximumf %179, %186 : vector<32x128xf32>
    %c0_118 = arith.constant 0 : index
    %c0_119 = arith.constant 0 : index
    %c23 = arith.constant 23 : index
    %188 = vector.load %arg4[%c0_118, %c0_119, %c23] : memref<1x32x128xf32, #tpu.memory_space<vmem>>, vector<1x32x1xf32>
    %189 = vector.shape_cast %188 : vector<1x32x1xf32> to vector<32x1xf32>
    %c0_120 = arith.constant 0 : index
    %c23_121 = arith.constant 23 : index
    %c0_122 = arith.constant 0 : index
    %190 = vector.load %arg3[%c0_120, %c23_121, %c0_122] : memref<1x128x128xf32, #tpu.memory_space<vmem>>, vector<1x1x128xf32>
    %191 = vector.shape_cast %190 : vector<1x1x128xf32> to vector<1x128xf32>
    %192 = vector.broadcast %189 : vector<32x1xf32> to vector<32x128xf32>
    %193 = vector.broadcast %191 : vector<1x128xf32> to vector<32x128xf32>
    %194 = arith.mulf %192, %193 : vector<32x128xf32>
    %195 = arith.maximumf %187, %194 : vector<32x128xf32>
    %c0_123 = arith.constant 0 : index
    %c0_124 = arith.constant 0 : index
    %c24 = arith.constant 24 : index
    %196 = vector.load %arg4[%c0_123, %c0_124, %c24] : memref<1x32x128xf32, #tpu.memory_space<vmem>>, vector<1x32x1xf32>
    %197 = vector.shape_cast %196 : vector<1x32x1xf32> to vector<32x1xf32>
    %c0_125 = arith.constant 0 : index
    %c24_126 = arith.constant 24 : index
    %c0_127 = arith.constant 0 : index
    %198 = vector.load %arg3[%c0_125, %c24_126, %c0_127] : memref<1x128x128xf32, #tpu.memory_space<vmem>>, vector<1x1x128xf32>
    %199 = vector.shape_cast %198 : vector<1x1x128xf32> to vector<1x128xf32>
    %200 = vector.broadcast %197 : vector<32x1xf32> to vector<32x128xf32>
    %201 = vector.broadcast %199 : vector<1x128xf32> to vector<32x128xf32>
    %202 = arith.mulf %200, %201 : vector<32x128xf32>
    %203 = arith.maximumf %195, %202 : vector<32x128xf32>
    %c0_128 = arith.constant 0 : index
    %c0_129 = arith.constant 0 : index
    %c25 = arith.constant 25 : index
    %204 = vector.load %arg4[%c0_128, %c0_129, %c25] : memref<1x32x128xf32, #tpu.memory_space<vmem>>, vector<1x32x1xf32>
    %205 = vector.shape_cast %204 : vector<1x32x1xf32> to vector<32x1xf32>
    %c0_130 = arith.constant 0 : index
    %c25_131 = arith.constant 25 : index
    %c0_132 = arith.constant 0 : index
    %206 = vector.load %arg3[%c0_130, %c25_131, %c0_132] : memref<1x128x128xf32, #tpu.memory_space<vmem>>, vector<1x1x128xf32>
    %207 = vector.shape_cast %206 : vector<1x1x128xf32> to vector<1x128xf32>
    %208 = vector.broadcast %205 : vector<32x1xf32> to vector<32x128xf32>
    %209 = vector.broadcast %207 : vector<1x128xf32> to vector<32x128xf32>
    %210 = arith.mulf %208, %209 : vector<32x128xf32>
    %211 = arith.maximumf %203, %210 : vector<32x128xf32>
    %c0_133 = arith.constant 0 : index
    %c0_134 = arith.constant 0 : index
    %c26 = arith.constant 26 : index
    %212 = vector.load %arg4[%c0_133, %c0_134, %c26] : memref<1x32x128xf32, #tpu.memory_space<vmem>>, vector<1x32x1xf32>
    %213 = vector.shape_cast %212 : vector<1x32x1xf32> to vector<32x1xf32>
    %c0_135 = arith.constant 0 : index
    %c26_136 = arith.constant 26 : index
    %c0_137 = arith.constant 0 : index
    %214 = vector.load %arg3[%c0_135, %c26_136, %c0_137] : memref<1x128x128xf32, #tpu.memory_space<vmem>>, vector<1x1x128xf32>
    %215 = vector.shape_cast %214 : vector<1x1x128xf32> to vector<1x128xf32>
    %216 = vector.broadcast %213 : vector<32x1xf32> to vector<32x128xf32>
    %217 = vector.broadcast %215 : vector<1x128xf32> to vector<32x128xf32>
    %218 = arith.mulf %216, %217 : vector<32x128xf32>
    %219 = arith.maximumf %211, %218 : vector<32x128xf32>
    %c0_138 = arith.constant 0 : index
    %c0_139 = arith.constant 0 : index
    %c27 = arith.constant 27 : index
    %220 = vector.load %arg4[%c0_138, %c0_139, %c27] : memref<1x32x128xf32, #tpu.memory_space<vmem>>, vector<1x32x1xf32>
    %221 = vector.shape_cast %220 : vector<1x32x1xf32> to vector<32x1xf32>
    %c0_140 = arith.constant 0 : index
    %c27_141 = arith.constant 27 : index
    %c0_142 = arith.constant 0 : index
    %222 = vector.load %arg3[%c0_140, %c27_141, %c0_142] : memref<1x128x128xf32, #tpu.memory_space<vmem>>, vector<1x1x128xf32>
    %223 = vector.shape_cast %222 : vector<1x1x128xf32> to vector<1x128xf32>
    %224 = vector.broadcast %221 : vector<32x1xf32> to vector<32x128xf32>
    %225 = vector.broadcast %223 : vector<1x128xf32> to vector<32x128xf32>
    %226 = arith.mulf %224, %225 : vector<32x128xf32>
    %227 = arith.maximumf %219, %226 : vector<32x128xf32>
    %c0_143 = arith.constant 0 : index
    %c0_144 = arith.constant 0 : index
    %c28 = arith.constant 28 : index
    %228 = vector.load %arg4[%c0_143, %c0_144, %c28] : memref<1x32x128xf32, #tpu.memory_space<vmem>>, vector<1x32x1xf32>
    %229 = vector.shape_cast %228 : vector<1x32x1xf32> to vector<32x1xf32>
    %c0_145 = arith.constant 0 : index
    %c28_146 = arith.constant 28 : index
    %c0_147 = arith.constant 0 : index
    %230 = vector.load %arg3[%c0_145, %c28_146, %c0_147] : memref<1x128x128xf32, #tpu.memory_space<vmem>>, vector<1x1x128xf32>
    %231 = vector.shape_cast %230 : vector<1x1x128xf32> to vector<1x128xf32>
    %232 = vector.broadcast %229 : vector<32x1xf32> to vector<32x128xf32>
    %233 = vector.broadcast %231 : vector<1x128xf32> to vector<32x128xf32>
    %234 = arith.mulf %232, %233 : vector<32x128xf32>
    %235 = arith.maximumf %227, %234 : vector<32x128xf32>
    %c0_148 = arith.constant 0 : index
    %c0_149 = arith.constant 0 : index
    %c29 = arith.constant 29 : index
    %236 = vector.load %arg4[%c0_148, %c0_149, %c29] : memref<1x32x128xf32, #tpu.memory_space<vmem>>, vector<1x32x1xf32>
    %237 = vector.shape_cast %236 : vector<1x32x1xf32> to vector<32x1xf32>
    %c0_150 = arith.constant 0 : index
    %c29_151 = arith.constant 29 : index
    %c0_152 = arith.constant 0 : index
    %238 = vector.load %arg3[%c0_150, %c29_151, %c0_152] : memref<1x128x128xf32, #tpu.memory_space<vmem>>, vector<1x1x128xf32>
    %239 = vector.shape_cast %238 : vector<1x1x128xf32> to vector<1x128xf32>
    %240 = vector.broadcast %237 : vector<32x1xf32> to vector<32x128xf32>
    %241 = vector.broadcast %239 : vector<1x128xf32> to vector<32x128xf32>
    %242 = arith.mulf %240, %241 : vector<32x128xf32>
    %243 = arith.maximumf %235, %242 : vector<32x128xf32>
    %c0_153 = arith.constant 0 : index
    %c0_154 = arith.constant 0 : index
    %c30 = arith.constant 30 : index
    %244 = vector.load %arg4[%c0_153, %c0_154, %c30] : memref<1x32x128xf32, #tpu.memory_space<vmem>>, vector<1x32x1xf32>
    %245 = vector.shape_cast %244 : vector<1x32x1xf32> to vector<32x1xf32>
    %c0_155 = arith.constant 0 : index
    %c30_156 = arith.constant 30 : index
    %c0_157 = arith.constant 0 : index
    %246 = vector.load %arg3[%c0_155, %c30_156, %c0_157] : memref<1x128x128xf32, #tpu.memory_space<vmem>>, vector<1x1x128xf32>
    %247 = vector.shape_cast %246 : vector<1x1x128xf32> to vector<1x128xf32>
    %248 = vector.broadcast %245 : vector<32x1xf32> to vector<32x128xf32>
    %249 = vector.broadcast %247 : vector<1x128xf32> to vector<32x128xf32>
    %250 = arith.mulf %248, %249 : vector<32x128xf32>
    %251 = arith.maximumf %243, %250 : vector<32x128xf32>
    %c0_158 = arith.constant 0 : index
    %c0_159 = arith.constant 0 : index
    %c31 = arith.constant 31 : index
    %252 = vector.load %arg4[%c0_158, %c0_159, %c31] : memref<1x32x128xf32, #tpu.memory_space<vmem>>, vector<1x32x1xf32>
    %253 = vector.shape_cast %252 : vector<1x32x1xf32> to vector<32x1xf32>
    %c0_160 = arith.constant 0 : index
    %c31_161 = arith.constant 31 : index
    %c0_162 = arith.constant 0 : index
    %254 = vector.load %arg3[%c0_160, %c31_161, %c0_162] : memref<1x128x128xf32, #tpu.memory_space<vmem>>, vector<1x1x128xf32>
    %255 = vector.shape_cast %254 : vector<1x1x128xf32> to vector<1x128xf32>
    %256 = vector.broadcast %253 : vector<32x1xf32> to vector<32x128xf32>
    %257 = vector.broadcast %255 : vector<1x128xf32> to vector<32x128xf32>
    %258 = arith.mulf %256, %257 : vector<32x128xf32>
    %259 = arith.maximumf %251, %258 : vector<32x128xf32>
    %c0_163 = arith.constant 0 : index
    %c0_164 = arith.constant 0 : index
    %c32 = arith.constant 32 : index
    %260 = vector.load %arg4[%c0_163, %c0_164, %c32] : memref<1x32x128xf32, #tpu.memory_space<vmem>>, vector<1x32x1xf32>
    %261 = vector.shape_cast %260 : vector<1x32x1xf32> to vector<32x1xf32>
    %c0_165 = arith.constant 0 : index
    %c32_166 = arith.constant 32 : index
    %c0_167 = arith.constant 0 : index
    %262 = vector.load %arg3[%c0_165, %c32_166, %c0_167] : memref<1x128x128xf32, #tpu.memory_space<vmem>>, vector<1x1x128xf32>
    %263 = vector.shape_cast %262 : vector<1x1x128xf32> to vector<1x128xf32>
    %264 = vector.broadcast %261 : vector<32x1xf32> to vector<32x128xf32>
    %265 = vector.broadcast %263 : vector<1x128xf32> to vector<32x128xf32>
    %266 = arith.mulf %264, %265 : vector<32x128xf32>
    %267 = arith.maximumf %259, %266 : vector<32x128xf32>
    %c0_168 = arith.constant 0 : index
    %c0_169 = arith.constant 0 : index
    %c33 = arith.constant 33 : index
    %268 = vector.load %arg4[%c0_168, %c0_169, %c33] : memref<1x32x128xf32, #tpu.memory_space<vmem>>, vector<1x32x1xf32>
    %269 = vector.shape_cast %268 : vector<1x32x1xf32> to vector<32x1xf32>
    %c0_170 = arith.constant 0 : index
    %c33_171 = arith.constant 33 : index
    %c0_172 = arith.constant 0 : index
    %270 = vector.load %arg3[%c0_170, %c33_171, %c0_172] : memref<1x128x128xf32, #tpu.memory_space<vmem>>, vector<1x1x128xf32>
    %271 = vector.shape_cast %270 : vector<1x1x128xf32> to vector<1x128xf32>
    %272 = vector.broadcast %269 : vector<32x1xf32> to vector<32x128xf32>
    %273 = vector.broadcast %271 : vector<1x128xf32> to vector<32x128xf32>
    %274 = arith.mulf %272, %273 : vector<32x128xf32>
    %275 = arith.maximumf %267, %274 : vector<32x128xf32>
    %c0_173 = arith.constant 0 : index
    %c0_174 = arith.constant 0 : index
    %c34 = arith.constant 34 : index
    %276 = vector.load %arg4[%c0_173, %c0_174, %c34] : memref<1x32x128xf32, #tpu.memory_space<vmem>>, vector<1x32x1xf32>
    %277 = vector.shape_cast %276 : vector<1x32x1xf32> to vector<32x1xf32>
    %c0_175 = arith.constant 0 : index
    %c34_176 = arith.constant 34 : index
    %c0_177 = arith.constant 0 : index
    %278 = vector.load %arg3[%c0_175, %c34_176, %c0_177] : memref<1x128x128xf32, #tpu.memory_space<vmem>>, vector<1x1x128xf32>
    %279 = vector.shape_cast %278 : vector<1x1x128xf32> to vector<1x128xf32>
    %280 = vector.broadcast %277 : vector<32x1xf32> to vector<32x128xf32>
    %281 = vector.broadcast %279 : vector<1x128xf32> to vector<32x128xf32>
    %282 = arith.mulf %280, %281 : vector<32x128xf32>
    %283 = arith.maximumf %275, %282 : vector<32x128xf32>
    %c0_178 = arith.constant 0 : index
    %c0_179 = arith.constant 0 : index
    %c35 = arith.constant 35 : index
    %284 = vector.load %arg4[%c0_178, %c0_179, %c35] : memref<1x32x128xf32, #tpu.memory_space<vmem>>, vector<1x32x1xf32>
    %285 = vector.shape_cast %284 : vector<1x32x1xf32> to vector<32x1xf32>
    %c0_180 = arith.constant 0 : index
    %c35_181 = arith.constant 35 : index
    %c0_182 = arith.constant 0 : index
    %286 = vector.load %arg3[%c0_180, %c35_181, %c0_182] : memref<1x128x128xf32, #tpu.memory_space<vmem>>, vector<1x1x128xf32>
    %287 = vector.shape_cast %286 : vector<1x1x128xf32> to vector<1x128xf32>
    %288 = vector.broadcast %285 : vector<32x1xf32> to vector<32x128xf32>
    %289 = vector.broadcast %287 : vector<1x128xf32> to vector<32x128xf32>
    %290 = arith.mulf %288, %289 : vector<32x128xf32>
    %291 = arith.maximumf %283, %290 : vector<32x128xf32>
    %c0_183 = arith.constant 0 : index
    %c0_184 = arith.constant 0 : index
    %c36 = arith.constant 36 : index
    %292 = vector.load %arg4[%c0_183, %c0_184, %c36] : memref<1x32x128xf32, #tpu.memory_space<vmem>>, vector<1x32x1xf32>
    %293 = vector.shape_cast %292 : vector<1x32x1xf32> to vector<32x1xf32>
    %c0_185 = arith.constant 0 : index
    %c36_186 = arith.constant 36 : index
    %c0_187 = arith.constant 0 : index
    %294 = vector.load %arg3[%c0_185, %c36_186, %c0_187] : memref<1x128x128xf32, #tpu.memory_space<vmem>>, vector<1x1x128xf32>
    %295 = vector.shape_cast %294 : vector<1x1x128xf32> to vector<1x128xf32>
    %296 = vector.broadcast %293 : vector<32x1xf32> to vector<32x128xf32>
    %297 = vector.broadcast %295 : vector<1x128xf32> to vector<32x128xf32>
    %298 = arith.mulf %296, %297 : vector<32x128xf32>
    %299 = arith.maximumf %291, %298 : vector<32x128xf32>
    %c0_188 = arith.constant 0 : index
    %c0_189 = arith.constant 0 : index
    %c37 = arith.constant 37 : index
    %300 = vector.load %arg4[%c0_188, %c0_189, %c37] : memref<1x32x128xf32, #tpu.memory_space<vmem>>, vector<1x32x1xf32>
    %301 = vector.shape_cast %300 : vector<1x32x1xf32> to vector<32x1xf32>
    %c0_190 = arith.constant 0 : index
    %c37_191 = arith.constant 37 : index
    %c0_192 = arith.constant 0 : index
    %302 = vector.load %arg3[%c0_190, %c37_191, %c0_192] : memref<1x128x128xf32, #tpu.memory_space<vmem>>, vector<1x1x128xf32>
    %303 = vector.shape_cast %302 : vector<1x1x128xf32> to vector<1x128xf32>
    %304 = vector.broadcast %301 : vector<32x1xf32> to vector<32x128xf32>
    %305 = vector.broadcast %303 : vector<1x128xf32> to vector<32x128xf32>
    %306 = arith.mulf %304, %305 : vector<32x128xf32>
    %307 = arith.maximumf %299, %306 : vector<32x128xf32>
    %c0_193 = arith.constant 0 : index
    %c0_194 = arith.constant 0 : index
    %c38 = arith.constant 38 : index
    %308 = vector.load %arg4[%c0_193, %c0_194, %c38] : memref<1x32x128xf32, #tpu.memory_space<vmem>>, vector<1x32x1xf32>
    %309 = vector.shape_cast %308 : vector<1x32x1xf32> to vector<32x1xf32>
    %c0_195 = arith.constant 0 : index
    %c38_196 = arith.constant 38 : index
    %c0_197 = arith.constant 0 : index
    %310 = vector.load %arg3[%c0_195, %c38_196, %c0_197] : memref<1x128x128xf32, #tpu.memory_space<vmem>>, vector<1x1x128xf32>
    %311 = vector.shape_cast %310 : vector<1x1x128xf32> to vector<1x128xf32>
    %312 = vector.broadcast %309 : vector<32x1xf32> to vector<32x128xf32>
    %313 = vector.broadcast %311 : vector<1x128xf32> to vector<32x128xf32>
    %314 = arith.mulf %312, %313 : vector<32x128xf32>
    %315 = arith.maximumf %307, %314 : vector<32x128xf32>
    %c0_198 = arith.constant 0 : index
    %c0_199 = arith.constant 0 : index
    %c39 = arith.constant 39 : index
    %316 = vector.load %arg4[%c0_198, %c0_199, %c39] : memref<1x32x128xf32, #tpu.memory_space<vmem>>, vector<1x32x1xf32>
    %317 = vector.shape_cast %316 : vector<1x32x1xf32> to vector<32x1xf32>
    %c0_200 = arith.constant 0 : index
    %c39_201 = arith.constant 39 : index
    %c0_202 = arith.constant 0 : index
    %318 = vector.load %arg3[%c0_200, %c39_201, %c0_202] : memref<1x128x128xf32, #tpu.memory_space<vmem>>, vector<1x1x128xf32>
    %319 = vector.shape_cast %318 : vector<1x1x128xf32> to vector<1x128xf32>
    %320 = vector.broadcast %317 : vector<32x1xf32> to vector<32x128xf32>
    %321 = vector.broadcast %319 : vector<1x128xf32> to vector<32x128xf32>
    %322 = arith.mulf %320, %321 : vector<32x128xf32>
    %323 = arith.maximumf %315, %322 : vector<32x128xf32>
    %c0_203 = arith.constant 0 : index
    %c0_204 = arith.constant 0 : index
    %c40 = arith.constant 40 : index
    %324 = vector.load %arg4[%c0_203, %c0_204, %c40] : memref<1x32x128xf32, #tpu.memory_space<vmem>>, vector<1x32x1xf32>
    %325 = vector.shape_cast %324 : vector<1x32x1xf32> to vector<32x1xf32>
    %c0_205 = arith.constant 0 : index
    %c40_206 = arith.constant 40 : index
    %c0_207 = arith.constant 0 : index
    %326 = vector.load %arg3[%c0_205, %c40_206, %c0_207] : memref<1x128x128xf32, #tpu.memory_space<vmem>>, vector<1x1x128xf32>
    %327 = vector.shape_cast %326 : vector<1x1x128xf32> to vector<1x128xf32>
    %328 = vector.broadcast %325 : vector<32x1xf32> to vector<32x128xf32>
    %329 = vector.broadcast %327 : vector<1x128xf32> to vector<32x128xf32>
    %330 = arith.mulf %328, %329 : vector<32x128xf32>
    %331 = arith.maximumf %323, %330 : vector<32x128xf32>
    %c0_208 = arith.constant 0 : index
    %c0_209 = arith.constant 0 : index
    %c41 = arith.constant 41 : index
    %332 = vector.load %arg4[%c0_208, %c0_209, %c41] : memref<1x32x128xf32, #tpu.memory_space<vmem>>, vector<1x32x1xf32>
    %333 = vector.shape_cast %332 : vector<1x32x1xf32> to vector<32x1xf32>
    %c0_210 = arith.constant 0 : index
    %c41_211 = arith.constant 41 : index
    %c0_212 = arith.constant 0 : index
    %334 = vector.load %arg3[%c0_210, %c41_211, %c0_212] : memref<1x128x128xf32, #tpu.memory_space<vmem>>, vector<1x1x128xf32>
    %335 = vector.shape_cast %334 : vector<1x1x128xf32> to vector<1x128xf32>
    %336 = vector.broadcast %333 : vector<32x1xf32> to vector<32x128xf32>
    %337 = vector.broadcast %335 : vector<1x128xf32> to vector<32x128xf32>
    %338 = arith.mulf %336, %337 : vector<32x128xf32>
    %339 = arith.maximumf %331, %338 : vector<32x128xf32>
    %c0_213 = arith.constant 0 : index
    %c0_214 = arith.constant 0 : index
    %c42 = arith.constant 42 : index
    %340 = vector.load %arg4[%c0_213, %c0_214, %c42] : memref<1x32x128xf32, #tpu.memory_space<vmem>>, vector<1x32x1xf32>
    %341 = vector.shape_cast %340 : vector<1x32x1xf32> to vector<32x1xf32>
    %c0_215 = arith.constant 0 : index
    %c42_216 = arith.constant 42 : index
    %c0_217 = arith.constant 0 : index
    %342 = vector.load %arg3[%c0_215, %c42_216, %c0_217] : memref<1x128x128xf32, #tpu.memory_space<vmem>>, vector<1x1x128xf32>
    %343 = vector.shape_cast %342 : vector<1x1x128xf32> to vector<1x128xf32>
    %344 = vector.broadcast %341 : vector<32x1xf32> to vector<32x128xf32>
    %345 = vector.broadcast %343 : vector<1x128xf32> to vector<32x128xf32>
    %346 = arith.mulf %344, %345 : vector<32x128xf32>
    %347 = arith.maximumf %339, %346 : vector<32x128xf32>
    %c0_218 = arith.constant 0 : index
    %c0_219 = arith.constant 0 : index
    %c43 = arith.constant 43 : index
    %348 = vector.load %arg4[%c0_218, %c0_219, %c43] : memref<1x32x128xf32, #tpu.memory_space<vmem>>, vector<1x32x1xf32>
    %349 = vector.shape_cast %348 : vector<1x32x1xf32> to vector<32x1xf32>
    %c0_220 = arith.constant 0 : index
    %c43_221 = arith.constant 43 : index
    %c0_222 = arith.constant 0 : index
    %350 = vector.load %arg3[%c0_220, %c43_221, %c0_222] : memref<1x128x128xf32, #tpu.memory_space<vmem>>, vector<1x1x128xf32>
    %351 = vector.shape_cast %350 : vector<1x1x128xf32> to vector<1x128xf32>
    %352 = vector.broadcast %349 : vector<32x1xf32> to vector<32x128xf32>
    %353 = vector.broadcast %351 : vector<1x128xf32> to vector<32x128xf32>
    %354 = arith.mulf %352, %353 : vector<32x128xf32>
    %355 = arith.maximumf %347, %354 : vector<32x128xf32>
    %c0_223 = arith.constant 0 : index
    %c0_224 = arith.constant 0 : index
    %c44 = arith.constant 44 : index
    %356 = vector.load %arg4[%c0_223, %c0_224, %c44] : memref<1x32x128xf32, #tpu.memory_space<vmem>>, vector<1x32x1xf32>
    %357 = vector.shape_cast %356 : vector<1x32x1xf32> to vector<32x1xf32>
    %c0_225 = arith.constant 0 : index
    %c44_226 = arith.constant 44 : index
    %c0_227 = arith.constant 0 : index
    %358 = vector.load %arg3[%c0_225, %c44_226, %c0_227] : memref<1x128x128xf32, #tpu.memory_space<vmem>>, vector<1x1x128xf32>
    %359 = vector.shape_cast %358 : vector<1x1x128xf32> to vector<1x128xf32>
    %360 = vector.broadcast %357 : vector<32x1xf32> to vector<32x128xf32>
    %361 = vector.broadcast %359 : vector<1x128xf32> to vector<32x128xf32>
    %362 = arith.mulf %360, %361 : vector<32x128xf32>
    %363 = arith.maximumf %355, %362 : vector<32x128xf32>
    %c0_228 = arith.constant 0 : index
    %c0_229 = arith.constant 0 : index
    %c45 = arith.constant 45 : index
    %364 = vector.load %arg4[%c0_228, %c0_229, %c45] : memref<1x32x128xf32, #tpu.memory_space<vmem>>, vector<1x32x1xf32>
    %365 = vector.shape_cast %364 : vector<1x32x1xf32> to vector<32x1xf32>
    %c0_230 = arith.constant 0 : index
    %c45_231 = arith.constant 45 : index
    %c0_232 = arith.constant 0 : index
    %366 = vector.load %arg3[%c0_230, %c45_231, %c0_232] : memref<1x128x128xf32, #tpu.memory_space<vmem>>, vector<1x1x128xf32>
    %367 = vector.shape_cast %366 : vector<1x1x128xf32> to vector<1x128xf32>
    %368 = vector.broadcast %365 : vector<32x1xf32> to vector<32x128xf32>
    %369 = vector.broadcast %367 : vector<1x128xf32> to vector<32x128xf32>
    %370 = arith.mulf %368, %369 : vector<32x128xf32>
    %371 = arith.maximumf %363, %370 : vector<32x128xf32>
    %c0_233 = arith.constant 0 : index
    %c0_234 = arith.constant 0 : index
    %c46 = arith.constant 46 : index
    %372 = vector.load %arg4[%c0_233, %c0_234, %c46] : memref<1x32x128xf32, #tpu.memory_space<vmem>>, vector<1x32x1xf32>
    %373 = vector.shape_cast %372 : vector<1x32x1xf32> to vector<32x1xf32>
    %c0_235 = arith.constant 0 : index
    %c46_236 = arith.constant 46 : index
    %c0_237 = arith.constant 0 : index
    %374 = vector.load %arg3[%c0_235, %c46_236, %c0_237] : memref<1x128x128xf32, #tpu.memory_space<vmem>>, vector<1x1x128xf32>
    %375 = vector.shape_cast %374 : vector<1x1x128xf32> to vector<1x128xf32>
    %376 = vector.broadcast %373 : vector<32x1xf32> to vector<32x128xf32>
    %377 = vector.broadcast %375 : vector<1x128xf32> to vector<32x128xf32>
    %378 = arith.mulf %376, %377 : vector<32x128xf32>
    %379 = arith.maximumf %371, %378 : vector<32x128xf32>
    %c0_238 = arith.constant 0 : index
    %c0_239 = arith.constant 0 : index
    %c47 = arith.constant 47 : index
    %380 = vector.load %arg4[%c0_238, %c0_239, %c47] : memref<1x32x128xf32, #tpu.memory_space<vmem>>, vector<1x32x1xf32>
    %381 = vector.shape_cast %380 : vector<1x32x1xf32> to vector<32x1xf32>
    %c0_240 = arith.constant 0 : index
    %c47_241 = arith.constant 47 : index
    %c0_242 = arith.constant 0 : index
    %382 = vector.load %arg3[%c0_240, %c47_241, %c0_242] : memref<1x128x128xf32, #tpu.memory_space<vmem>>, vector<1x1x128xf32>
    %383 = vector.shape_cast %382 : vector<1x1x128xf32> to vector<1x128xf32>
    %384 = vector.broadcast %381 : vector<32x1xf32> to vector<32x128xf32>
    %385 = vector.broadcast %383 : vector<1x128xf32> to vector<32x128xf32>
    %386 = arith.mulf %384, %385 : vector<32x128xf32>
    %387 = arith.maximumf %379, %386 : vector<32x128xf32>
    %c0_243 = arith.constant 0 : index
    %c0_244 = arith.constant 0 : index
    %c48 = arith.constant 48 : index
    %388 = vector.load %arg4[%c0_243, %c0_244, %c48] : memref<1x32x128xf32, #tpu.memory_space<vmem>>, vector<1x32x1xf32>
    %389 = vector.shape_cast %388 : vector<1x32x1xf32> to vector<32x1xf32>
    %c0_245 = arith.constant 0 : index
    %c48_246 = arith.constant 48 : index
    %c0_247 = arith.constant 0 : index
    %390 = vector.load %arg3[%c0_245, %c48_246, %c0_247] : memref<1x128x128xf32, #tpu.memory_space<vmem>>, vector<1x1x128xf32>
    %391 = vector.shape_cast %390 : vector<1x1x128xf32> to vector<1x128xf32>
    %392 = vector.broadcast %389 : vector<32x1xf32> to vector<32x128xf32>
    %393 = vector.broadcast %391 : vector<1x128xf32> to vector<32x128xf32>
    %394 = arith.mulf %392, %393 : vector<32x128xf32>
    %395 = arith.maximumf %387, %394 : vector<32x128xf32>
    %c0_248 = arith.constant 0 : index
    %c0_249 = arith.constant 0 : index
    %c49 = arith.constant 49 : index
    %396 = vector.load %arg4[%c0_248, %c0_249, %c49] : memref<1x32x128xf32, #tpu.memory_space<vmem>>, vector<1x32x1xf32>
    %397 = vector.shape_cast %396 : vector<1x32x1xf32> to vector<32x1xf32>
    %c0_250 = arith.constant 0 : index
    %c49_251 = arith.constant 49 : index
    %c0_252 = arith.constant 0 : index
    %398 = vector.load %arg3[%c0_250, %c49_251, %c0_252] : memref<1x128x128xf32, #tpu.memory_space<vmem>>, vector<1x1x128xf32>
    %399 = vector.shape_cast %398 : vector<1x1x128xf32> to vector<1x128xf32>
    %400 = vector.broadcast %397 : vector<32x1xf32> to vector<32x128xf32>
    %401 = vector.broadcast %399 : vector<1x128xf32> to vector<32x128xf32>
    %402 = arith.mulf %400, %401 : vector<32x128xf32>
    %403 = arith.maximumf %395, %402 : vector<32x128xf32>
    %c0_253 = arith.constant 0 : index
    %c0_254 = arith.constant 0 : index
    %c50 = arith.constant 50 : index
    %404 = vector.load %arg4[%c0_253, %c0_254, %c50] : memref<1x32x128xf32, #tpu.memory_space<vmem>>, vector<1x32x1xf32>
    %405 = vector.shape_cast %404 : vector<1x32x1xf32> to vector<32x1xf32>
    %c0_255 = arith.constant 0 : index
    %c50_256 = arith.constant 50 : index
    %c0_257 = arith.constant 0 : index
    %406 = vector.load %arg3[%c0_255, %c50_256, %c0_257] : memref<1x128x128xf32, #tpu.memory_space<vmem>>, vector<1x1x128xf32>
    %407 = vector.shape_cast %406 : vector<1x1x128xf32> to vector<1x128xf32>
    %408 = vector.broadcast %405 : vector<32x1xf32> to vector<32x128xf32>
    %409 = vector.broadcast %407 : vector<1x128xf32> to vector<32x128xf32>
    %410 = arith.mulf %408, %409 : vector<32x128xf32>
    %411 = arith.maximumf %403, %410 : vector<32x128xf32>
    %c0_258 = arith.constant 0 : index
    %c0_259 = arith.constant 0 : index
    %c51 = arith.constant 51 : index
    %412 = vector.load %arg4[%c0_258, %c0_259, %c51] : memref<1x32x128xf32, #tpu.memory_space<vmem>>, vector<1x32x1xf32>
    %413 = vector.shape_cast %412 : vector<1x32x1xf32> to vector<32x1xf32>
    %c0_260 = arith.constant 0 : index
    %c51_261 = arith.constant 51 : index
    %c0_262 = arith.constant 0 : index
    %414 = vector.load %arg3[%c0_260, %c51_261, %c0_262] : memref<1x128x128xf32, #tpu.memory_space<vmem>>, vector<1x1x128xf32>
    %415 = vector.shape_cast %414 : vector<1x1x128xf32> to vector<1x128xf32>
    %416 = vector.broadcast %413 : vector<32x1xf32> to vector<32x128xf32>
    %417 = vector.broadcast %415 : vector<1x128xf32> to vector<32x128xf32>
    %418 = arith.mulf %416, %417 : vector<32x128xf32>
    %419 = arith.maximumf %411, %418 : vector<32x128xf32>
    %c0_263 = arith.constant 0 : index
    %c0_264 = arith.constant 0 : index
    %c52 = arith.constant 52 : index
    %420 = vector.load %arg4[%c0_263, %c0_264, %c52] : memref<1x32x128xf32, #tpu.memory_space<vmem>>, vector<1x32x1xf32>
    %421 = vector.shape_cast %420 : vector<1x32x1xf32> to vector<32x1xf32>
    %c0_265 = arith.constant 0 : index
    %c52_266 = arith.constant 52 : index
    %c0_267 = arith.constant 0 : index
    %422 = vector.load %arg3[%c0_265, %c52_266, %c0_267] : memref<1x128x128xf32, #tpu.memory_space<vmem>>, vector<1x1x128xf32>
    %423 = vector.shape_cast %422 : vector<1x1x128xf32> to vector<1x128xf32>
    %424 = vector.broadcast %421 : vector<32x1xf32> to vector<32x128xf32>
    %425 = vector.broadcast %423 : vector<1x128xf32> to vector<32x128xf32>
    %426 = arith.mulf %424, %425 : vector<32x128xf32>
    %427 = arith.maximumf %419, %426 : vector<32x128xf32>
    %c0_268 = arith.constant 0 : index
    %c0_269 = arith.constant 0 : index
    %c53 = arith.constant 53 : index
    %428 = vector.load %arg4[%c0_268, %c0_269, %c53] : memref<1x32x128xf32, #tpu.memory_space<vmem>>, vector<1x32x1xf32>
    %429 = vector.shape_cast %428 : vector<1x32x1xf32> to vector<32x1xf32>
    %c0_270 = arith.constant 0 : index
    %c53_271 = arith.constant 53 : index
    %c0_272 = arith.constant 0 : index
    %430 = vector.load %arg3[%c0_270, %c53_271, %c0_272] : memref<1x128x128xf32, #tpu.memory_space<vmem>>, vector<1x1x128xf32>
    %431 = vector.shape_cast %430 : vector<1x1x128xf32> to vector<1x128xf32>
    %432 = vector.broadcast %429 : vector<32x1xf32> to vector<32x128xf32>
    %433 = vector.broadcast %431 : vector<1x128xf32> to vector<32x128xf32>
    %434 = arith.mulf %432, %433 : vector<32x128xf32>
    %435 = arith.maximumf %427, %434 : vector<32x128xf32>
    %c0_273 = arith.constant 0 : index
    %c0_274 = arith.constant 0 : index
    %c54 = arith.constant 54 : index
    %436 = vector.load %arg4[%c0_273, %c0_274, %c54] : memref<1x32x128xf32, #tpu.memory_space<vmem>>, vector<1x32x1xf32>
    %437 = vector.shape_cast %436 : vector<1x32x1xf32> to vector<32x1xf32>
    %c0_275 = arith.constant 0 : index
    %c54_276 = arith.constant 54 : index
    %c0_277 = arith.constant 0 : index
    %438 = vector.load %arg3[%c0_275, %c54_276, %c0_277] : memref<1x128x128xf32, #tpu.memory_space<vmem>>, vector<1x1x128xf32>
    %439 = vector.shape_cast %438 : vector<1x1x128xf32> to vector<1x128xf32>
    %440 = vector.broadcast %437 : vector<32x1xf32> to vector<32x128xf32>
    %441 = vector.broadcast %439 : vector<1x128xf32> to vector<32x128xf32>
    %442 = arith.mulf %440, %441 : vector<32x128xf32>
    %443 = arith.maximumf %435, %442 : vector<32x128xf32>
    %c0_278 = arith.constant 0 : index
    %c0_279 = arith.constant 0 : index
    %c55 = arith.constant 55 : index
    %444 = vector.load %arg4[%c0_278, %c0_279, %c55] : memref<1x32x128xf32, #tpu.memory_space<vmem>>, vector<1x32x1xf32>
    %445 = vector.shape_cast %444 : vector<1x32x1xf32> to vector<32x1xf32>
    %c0_280 = arith.constant 0 : index
    %c55_281 = arith.constant 55 : index
    %c0_282 = arith.constant 0 : index
    %446 = vector.load %arg3[%c0_280, %c55_281, %c0_282] : memref<1x128x128xf32, #tpu.memory_space<vmem>>, vector<1x1x128xf32>
    %447 = vector.shape_cast %446 : vector<1x1x128xf32> to vector<1x128xf32>
    %448 = vector.broadcast %445 : vector<32x1xf32> to vector<32x128xf32>
    %449 = vector.broadcast %447 : vector<1x128xf32> to vector<32x128xf32>
    %450 = arith.mulf %448, %449 : vector<32x128xf32>
    %451 = arith.maximumf %443, %450 : vector<32x128xf32>
    %c0_283 = arith.constant 0 : index
    %c0_284 = arith.constant 0 : index
    %c56 = arith.constant 56 : index
    %452 = vector.load %arg4[%c0_283, %c0_284, %c56] : memref<1x32x128xf32, #tpu.memory_space<vmem>>, vector<1x32x1xf32>
    %453 = vector.shape_cast %452 : vector<1x32x1xf32> to vector<32x1xf32>
    %c0_285 = arith.constant 0 : index
    %c56_286 = arith.constant 56 : index
    %c0_287 = arith.constant 0 : index
    %454 = vector.load %arg3[%c0_285, %c56_286, %c0_287] : memref<1x128x128xf32, #tpu.memory_space<vmem>>, vector<1x1x128xf32>
    %455 = vector.shape_cast %454 : vector<1x1x128xf32> to vector<1x128xf32>
    %456 = vector.broadcast %453 : vector<32x1xf32> to vector<32x128xf32>
    %457 = vector.broadcast %455 : vector<1x128xf32> to vector<32x128xf32>
    %458 = arith.mulf %456, %457 : vector<32x128xf32>
    %459 = arith.maximumf %451, %458 : vector<32x128xf32>
    %c0_288 = arith.constant 0 : index
    %c0_289 = arith.constant 0 : index
    %c57 = arith.constant 57 : index
    %460 = vector.load %arg4[%c0_288, %c0_289, %c57] : memref<1x32x128xf32, #tpu.memory_space<vmem>>, vector<1x32x1xf32>
    %461 = vector.shape_cast %460 : vector<1x32x1xf32> to vector<32x1xf32>
    %c0_290 = arith.constant 0 : index
    %c57_291 = arith.constant 57 : index
    %c0_292 = arith.constant 0 : index
    %462 = vector.load %arg3[%c0_290, %c57_291, %c0_292] : memref<1x128x128xf32, #tpu.memory_space<vmem>>, vector<1x1x128xf32>
    %463 = vector.shape_cast %462 : vector<1x1x128xf32> to vector<1x128xf32>
    %464 = vector.broadcast %461 : vector<32x1xf32> to vector<32x128xf32>
    %465 = vector.broadcast %463 : vector<1x128xf32> to vector<32x128xf32>
    %466 = arith.mulf %464, %465 : vector<32x128xf32>
    %467 = arith.maximumf %459, %466 : vector<32x128xf32>
    %c0_293 = arith.constant 0 : index
    %c0_294 = arith.constant 0 : index
    %c58 = arith.constant 58 : index
    %468 = vector.load %arg4[%c0_293, %c0_294, %c58] : memref<1x32x128xf32, #tpu.memory_space<vmem>>, vector<1x32x1xf32>
    %469 = vector.shape_cast %468 : vector<1x32x1xf32> to vector<32x1xf32>
    %c0_295 = arith.constant 0 : index
    %c58_296 = arith.constant 58 : index
    %c0_297 = arith.constant 0 : index
    %470 = vector.load %arg3[%c0_295, %c58_296, %c0_297] : memref<1x128x128xf32, #tpu.memory_space<vmem>>, vector<1x1x128xf32>
    %471 = vector.shape_cast %470 : vector<1x1x128xf32> to vector<1x128xf32>
    %472 = vector.broadcast %469 : vector<32x1xf32> to vector<32x128xf32>
    %473 = vector.broadcast %471 : vector<1x128xf32> to vector<32x128xf32>
    %474 = arith.mulf %472, %473 : vector<32x128xf32>
    %475 = arith.maximumf %467, %474 : vector<32x128xf32>
    %c0_298 = arith.constant 0 : index
    %c0_299 = arith.constant 0 : index
    %c59 = arith.constant 59 : index
    %476 = vector.load %arg4[%c0_298, %c0_299, %c59] : memref<1x32x128xf32, #tpu.memory_space<vmem>>, vector<1x32x1xf32>
    %477 = vector.shape_cast %476 : vector<1x32x1xf32> to vector<32x1xf32>
    %c0_300 = arith.constant 0 : index
    %c59_301 = arith.constant 59 : index
    %c0_302 = arith.constant 0 : index
    %478 = vector.load %arg3[%c0_300, %c59_301, %c0_302] : memref<1x128x128xf32, #tpu.memory_space<vmem>>, vector<1x1x128xf32>
    %479 = vector.shape_cast %478 : vector<1x1x128xf32> to vector<1x128xf32>
    %480 = vector.broadcast %477 : vector<32x1xf32> to vector<32x128xf32>
    %481 = vector.broadcast %479 : vector<1x128xf32> to vector<32x128xf32>
    %482 = arith.mulf %480, %481 : vector<32x128xf32>
    %483 = arith.maximumf %475, %482 : vector<32x128xf32>
    %c0_303 = arith.constant 0 : index
    %c0_304 = arith.constant 0 : index
    %c60 = arith.constant 60 : index
    %484 = vector.load %arg4[%c0_303, %c0_304, %c60] : memref<1x32x128xf32, #tpu.memory_space<vmem>>, vector<1x32x1xf32>
    %485 = vector.shape_cast %484 : vector<1x32x1xf32> to vector<32x1xf32>
    %c0_305 = arith.constant 0 : index
    %c60_306 = arith.constant 60 : index
    %c0_307 = arith.constant 0 : index
    %486 = vector.load %arg3[%c0_305, %c60_306, %c0_307] : memref<1x128x128xf32, #tpu.memory_space<vmem>>, vector<1x1x128xf32>
    %487 = vector.shape_cast %486 : vector<1x1x128xf32> to vector<1x128xf32>
    %488 = vector.broadcast %485 : vector<32x1xf32> to vector<32x128xf32>
    %489 = vector.broadcast %487 : vector<1x128xf32> to vector<32x128xf32>
    %490 = arith.mulf %488, %489 : vector<32x128xf32>
    %491 = arith.maximumf %483, %490 : vector<32x128xf32>
    %c0_308 = arith.constant 0 : index
    %c0_309 = arith.constant 0 : index
    %c61 = arith.constant 61 : index
    %492 = vector.load %arg4[%c0_308, %c0_309, %c61] : memref<1x32x128xf32, #tpu.memory_space<vmem>>, vector<1x32x1xf32>
    %493 = vector.shape_cast %492 : vector<1x32x1xf32> to vector<32x1xf32>
    %c0_310 = arith.constant 0 : index
    %c61_311 = arith.constant 61 : index
    %c0_312 = arith.constant 0 : index
    %494 = vector.load %arg3[%c0_310, %c61_311, %c0_312] : memref<1x128x128xf32, #tpu.memory_space<vmem>>, vector<1x1x128xf32>
    %495 = vector.shape_cast %494 : vector<1x1x128xf32> to vector<1x128xf32>
    %496 = vector.broadcast %493 : vector<32x1xf32> to vector<32x128xf32>
    %497 = vector.broadcast %495 : vector<1x128xf32> to vector<32x128xf32>
    %498 = arith.mulf %496, %497 : vector<32x128xf32>
    %499 = arith.maximumf %491, %498 : vector<32x128xf32>
    %c0_313 = arith.constant 0 : index
    %c0_314 = arith.constant 0 : index
    %c62 = arith.constant 62 : index
    %500 = vector.load %arg4[%c0_313, %c0_314, %c62] : memref<1x32x128xf32, #tpu.memory_space<vmem>>, vector<1x32x1xf32>
    %501 = vector.shape_cast %500 : vector<1x32x1xf32> to vector<32x1xf32>
    %c0_315 = arith.constant 0 : index
    %c62_316 = arith.constant 62 : index
    %c0_317 = arith.constant 0 : index
    %502 = vector.load %arg3[%c0_315, %c62_316, %c0_317] : memref<1x128x128xf32, #tpu.memory_space<vmem>>, vector<1x1x128xf32>
    %503 = vector.shape_cast %502 : vector<1x1x128xf32> to vector<1x128xf32>
    %504 = vector.broadcast %501 : vector<32x1xf32> to vector<32x128xf32>
    %505 = vector.broadcast %503 : vector<1x128xf32> to vector<32x128xf32>
    %506 = arith.mulf %504, %505 : vector<32x128xf32>
    %507 = arith.maximumf %499, %506 : vector<32x128xf32>
    %c0_318 = arith.constant 0 : index
    %c0_319 = arith.constant 0 : index
    %c63 = arith.constant 63 : index
    %508 = vector.load %arg4[%c0_318, %c0_319, %c63] : memref<1x32x128xf32, #tpu.memory_space<vmem>>, vector<1x32x1xf32>
    %509 = vector.shape_cast %508 : vector<1x32x1xf32> to vector<32x1xf32>
    %c0_320 = arith.constant 0 : index
    %c63_321 = arith.constant 63 : index
    %c0_322 = arith.constant 0 : index
    %510 = vector.load %arg3[%c0_320, %c63_321, %c0_322] : memref<1x128x128xf32, #tpu.memory_space<vmem>>, vector<1x1x128xf32>
    %511 = vector.shape_cast %510 : vector<1x1x128xf32> to vector<1x128xf32>
    %512 = vector.broadcast %509 : vector<32x1xf32> to vector<32x128xf32>
    %513 = vector.broadcast %511 : vector<1x128xf32> to vector<32x128xf32>
    %514 = arith.mulf %512, %513 : vector<32x128xf32>
    %515 = arith.maximumf %507, %514 : vector<32x128xf32>
    %c0_323 = arith.constant 0 : index
    %c0_324 = arith.constant 0 : index
    %c64 = arith.constant 64 : index
    %516 = vector.load %arg4[%c0_323, %c0_324, %c64] : memref<1x32x128xf32, #tpu.memory_space<vmem>>, vector<1x32x1xf32>
    %517 = vector.shape_cast %516 : vector<1x32x1xf32> to vector<32x1xf32>
    %c0_325 = arith.constant 0 : index
    %c64_326 = arith.constant 64 : index
    %c0_327 = arith.constant 0 : index
    %518 = vector.load %arg3[%c0_325, %c64_326, %c0_327] : memref<1x128x128xf32, #tpu.memory_space<vmem>>, vector<1x1x128xf32>
    %519 = vector.shape_cast %518 : vector<1x1x128xf32> to vector<1x128xf32>
    %520 = vector.broadcast %517 : vector<32x1xf32> to vector<32x128xf32>
    %521 = vector.broadcast %519 : vector<1x128xf32> to vector<32x128xf32>
    %522 = arith.mulf %520, %521 : vector<32x128xf32>
    %523 = arith.maximumf %515, %522 : vector<32x128xf32>
    %c0_328 = arith.constant 0 : index
    %c0_329 = arith.constant 0 : index
    %c65 = arith.constant 65 : index
    %524 = vector.load %arg4[%c0_328, %c0_329, %c65] : memref<1x32x128xf32, #tpu.memory_space<vmem>>, vector<1x32x1xf32>
    %525 = vector.shape_cast %524 : vector<1x32x1xf32> to vector<32x1xf32>
    %c0_330 = arith.constant 0 : index
    %c65_331 = arith.constant 65 : index
    %c0_332 = arith.constant 0 : index
    %526 = vector.load %arg3[%c0_330, %c65_331, %c0_332] : memref<1x128x128xf32, #tpu.memory_space<vmem>>, vector<1x1x128xf32>
    %527 = vector.shape_cast %526 : vector<1x1x128xf32> to vector<1x128xf32>
    %528 = vector.broadcast %525 : vector<32x1xf32> to vector<32x128xf32>
    %529 = vector.broadcast %527 : vector<1x128xf32> to vector<32x128xf32>
    %530 = arith.mulf %528, %529 : vector<32x128xf32>
    %531 = arith.maximumf %523, %530 : vector<32x128xf32>
    %c0_333 = arith.constant 0 : index
    %c0_334 = arith.constant 0 : index
    %c66 = arith.constant 66 : index
    %532 = vector.load %arg4[%c0_333, %c0_334, %c66] : memref<1x32x128xf32, #tpu.memory_space<vmem>>, vector<1x32x1xf32>
    %533 = vector.shape_cast %532 : vector<1x32x1xf32> to vector<32x1xf32>
    %c0_335 = arith.constant 0 : index
    %c66_336 = arith.constant 66 : index
    %c0_337 = arith.constant 0 : index
    %534 = vector.load %arg3[%c0_335, %c66_336, %c0_337] : memref<1x128x128xf32, #tpu.memory_space<vmem>>, vector<1x1x128xf32>
    %535 = vector.shape_cast %534 : vector<1x1x128xf32> to vector<1x128xf32>
    %536 = vector.broadcast %533 : vector<32x1xf32> to vector<32x128xf32>
    %537 = vector.broadcast %535 : vector<1x128xf32> to vector<32x128xf32>
    %538 = arith.mulf %536, %537 : vector<32x128xf32>
    %539 = arith.maximumf %531, %538 : vector<32x128xf32>
    %c0_338 = arith.constant 0 : index
    %c0_339 = arith.constant 0 : index
    %c67 = arith.constant 67 : index
    %540 = vector.load %arg4[%c0_338, %c0_339, %c67] : memref<1x32x128xf32, #tpu.memory_space<vmem>>, vector<1x32x1xf32>
    %541 = vector.shape_cast %540 : vector<1x32x1xf32> to vector<32x1xf32>
    %c0_340 = arith.constant 0 : index
    %c67_341 = arith.constant 67 : index
    %c0_342 = arith.constant 0 : index
    %542 = vector.load %arg3[%c0_340, %c67_341, %c0_342] : memref<1x128x128xf32, #tpu.memory_space<vmem>>, vector<1x1x128xf32>
    %543 = vector.shape_cast %542 : vector<1x1x128xf32> to vector<1x128xf32>
    %544 = vector.broadcast %541 : vector<32x1xf32> to vector<32x128xf32>
    %545 = vector.broadcast %543 : vector<1x128xf32> to vector<32x128xf32>
    %546 = arith.mulf %544, %545 : vector<32x128xf32>
    %547 = arith.maximumf %539, %546 : vector<32x128xf32>
    %c0_343 = arith.constant 0 : index
    %c0_344 = arith.constant 0 : index
    %c68 = arith.constant 68 : index
    %548 = vector.load %arg4[%c0_343, %c0_344, %c68] : memref<1x32x128xf32, #tpu.memory_space<vmem>>, vector<1x32x1xf32>
    %549 = vector.shape_cast %548 : vector<1x32x1xf32> to vector<32x1xf32>
    %c0_345 = arith.constant 0 : index
    %c68_346 = arith.constant 68 : index
    %c0_347 = arith.constant 0 : index
    %550 = vector.load %arg3[%c0_345, %c68_346, %c0_347] : memref<1x128x128xf32, #tpu.memory_space<vmem>>, vector<1x1x128xf32>
    %551 = vector.shape_cast %550 : vector<1x1x128xf32> to vector<1x128xf32>
    %552 = vector.broadcast %549 : vector<32x1xf32> to vector<32x128xf32>
    %553 = vector.broadcast %551 : vector<1x128xf32> to vector<32x128xf32>
    %554 = arith.mulf %552, %553 : vector<32x128xf32>
    %555 = arith.maximumf %547, %554 : vector<32x128xf32>
    %c0_348 = arith.constant 0 : index
    %c0_349 = arith.constant 0 : index
    %c69 = arith.constant 69 : index
    %556 = vector.load %arg4[%c0_348, %c0_349, %c69] : memref<1x32x128xf32, #tpu.memory_space<vmem>>, vector<1x32x1xf32>
    %557 = vector.shape_cast %556 : vector<1x32x1xf32> to vector<32x1xf32>
    %c0_350 = arith.constant 0 : index
    %c69_351 = arith.constant 69 : index
    %c0_352 = arith.constant 0 : index
    %558 = vector.load %arg3[%c0_350, %c69_351, %c0_352] : memref<1x128x128xf32, #tpu.memory_space<vmem>>, vector<1x1x128xf32>
    %559 = vector.shape_cast %558 : vector<1x1x128xf32> to vector<1x128xf32>
    %560 = vector.broadcast %557 : vector<32x1xf32> to vector<32x128xf32>
    %561 = vector.broadcast %559 : vector<1x128xf32> to vector<32x128xf32>
    %562 = arith.mulf %560, %561 : vector<32x128xf32>
    %563 = arith.maximumf %555, %562 : vector<32x128xf32>
    %c0_353 = arith.constant 0 : index
    %c0_354 = arith.constant 0 : index
    %c70 = arith.constant 70 : index
    %564 = vector.load %arg4[%c0_353, %c0_354, %c70] : memref<1x32x128xf32, #tpu.memory_space<vmem>>, vector<1x32x1xf32>
    %565 = vector.shape_cast %564 : vector<1x32x1xf32> to vector<32x1xf32>
    %c0_355 = arith.constant 0 : index
    %c70_356 = arith.constant 70 : index
    %c0_357 = arith.constant 0 : index
    %566 = vector.load %arg3[%c0_355, %c70_356, %c0_357] : memref<1x128x128xf32, #tpu.memory_space<vmem>>, vector<1x1x128xf32>
    %567 = vector.shape_cast %566 : vector<1x1x128xf32> to vector<1x128xf32>
    %568 = vector.broadcast %565 : vector<32x1xf32> to vector<32x128xf32>
    %569 = vector.broadcast %567 : vector<1x128xf32> to vector<32x128xf32>
    %570 = arith.mulf %568, %569 : vector<32x128xf32>
    %571 = arith.maximumf %563, %570 : vector<32x128xf32>
    %c0_358 = arith.constant 0 : index
    %c0_359 = arith.constant 0 : index
    %c71 = arith.constant 71 : index
    %572 = vector.load %arg4[%c0_358, %c0_359, %c71] : memref<1x32x128xf32, #tpu.memory_space<vmem>>, vector<1x32x1xf32>
    %573 = vector.shape_cast %572 : vector<1x32x1xf32> to vector<32x1xf32>
    %c0_360 = arith.constant 0 : index
    %c71_361 = arith.constant 71 : index
    %c0_362 = arith.constant 0 : index
    %574 = vector.load %arg3[%c0_360, %c71_361, %c0_362] : memref<1x128x128xf32, #tpu.memory_space<vmem>>, vector<1x1x128xf32>
    %575 = vector.shape_cast %574 : vector<1x1x128xf32> to vector<1x128xf32>
    %576 = vector.broadcast %573 : vector<32x1xf32> to vector<32x128xf32>
    %577 = vector.broadcast %575 : vector<1x128xf32> to vector<32x128xf32>
    %578 = arith.mulf %576, %577 : vector<32x128xf32>
    %579 = arith.maximumf %571, %578 : vector<32x128xf32>
    %c0_363 = arith.constant 0 : index
    %c0_364 = arith.constant 0 : index
    %c72 = arith.constant 72 : index
    %580 = vector.load %arg4[%c0_363, %c0_364, %c72] : memref<1x32x128xf32, #tpu.memory_space<vmem>>, vector<1x32x1xf32>
    %581 = vector.shape_cast %580 : vector<1x32x1xf32> to vector<32x1xf32>
    %c0_365 = arith.constant 0 : index
    %c72_366 = arith.constant 72 : index
    %c0_367 = arith.constant 0 : index
    %582 = vector.load %arg3[%c0_365, %c72_366, %c0_367] : memref<1x128x128xf32, #tpu.memory_space<vmem>>, vector<1x1x128xf32>
    %583 = vector.shape_cast %582 : vector<1x1x128xf32> to vector<1x128xf32>
    %584 = vector.broadcast %581 : vector<32x1xf32> to vector<32x128xf32>
    %585 = vector.broadcast %583 : vector<1x128xf32> to vector<32x128xf32>
    %586 = arith.mulf %584, %585 : vector<32x128xf32>
    %587 = arith.maximumf %579, %586 : vector<32x128xf32>
    %c0_368 = arith.constant 0 : index
    %c0_369 = arith.constant 0 : index
    %c73 = arith.constant 73 : index
    %588 = vector.load %arg4[%c0_368, %c0_369, %c73] : memref<1x32x128xf32, #tpu.memory_space<vmem>>, vector<1x32x1xf32>
    %589 = vector.shape_cast %588 : vector<1x32x1xf32> to vector<32x1xf32>
    %c0_370 = arith.constant 0 : index
    %c73_371 = arith.constant 73 : index
    %c0_372 = arith.constant 0 : index
    %590 = vector.load %arg3[%c0_370, %c73_371, %c0_372] : memref<1x128x128xf32, #tpu.memory_space<vmem>>, vector<1x1x128xf32>
    %591 = vector.shape_cast %590 : vector<1x1x128xf32> to vector<1x128xf32>
    %592 = vector.broadcast %589 : vector<32x1xf32> to vector<32x128xf32>
    %593 = vector.broadcast %591 : vector<1x128xf32> to vector<32x128xf32>
    %594 = arith.mulf %592, %593 : vector<32x128xf32>
    %595 = arith.maximumf %587, %594 : vector<32x128xf32>
    %c0_373 = arith.constant 0 : index
    %c0_374 = arith.constant 0 : index
    %c74 = arith.constant 74 : index
    %596 = vector.load %arg4[%c0_373, %c0_374, %c74] : memref<1x32x128xf32, #tpu.memory_space<vmem>>, vector<1x32x1xf32>
    %597 = vector.shape_cast %596 : vector<1x32x1xf32> to vector<32x1xf32>
    %c0_375 = arith.constant 0 : index
    %c74_376 = arith.constant 74 : index
    %c0_377 = arith.constant 0 : index
    %598 = vector.load %arg3[%c0_375, %c74_376, %c0_377] : memref<1x128x128xf32, #tpu.memory_space<vmem>>, vector<1x1x128xf32>
    %599 = vector.shape_cast %598 : vector<1x1x128xf32> to vector<1x128xf32>
    %600 = vector.broadcast %597 : vector<32x1xf32> to vector<32x128xf32>
    %601 = vector.broadcast %599 : vector<1x128xf32> to vector<32x128xf32>
    %602 = arith.mulf %600, %601 : vector<32x128xf32>
    %603 = arith.maximumf %595, %602 : vector<32x128xf32>
    %c0_378 = arith.constant 0 : index
    %c0_379 = arith.constant 0 : index
    %c75 = arith.constant 75 : index
    %604 = vector.load %arg4[%c0_378, %c0_379, %c75] : memref<1x32x128xf32, #tpu.memory_space<vmem>>, vector<1x32x1xf32>
    %605 = vector.shape_cast %604 : vector<1x32x1xf32> to vector<32x1xf32>
    %c0_380 = arith.constant 0 : index
    %c75_381 = arith.constant 75 : index
    %c0_382 = arith.constant 0 : index
    %606 = vector.load %arg3[%c0_380, %c75_381, %c0_382] : memref<1x128x128xf32, #tpu.memory_space<vmem>>, vector<1x1x128xf32>
    %607 = vector.shape_cast %606 : vector<1x1x128xf32> to vector<1x128xf32>
    %608 = vector.broadcast %605 : vector<32x1xf32> to vector<32x128xf32>
    %609 = vector.broadcast %607 : vector<1x128xf32> to vector<32x128xf32>
    %610 = arith.mulf %608, %609 : vector<32x128xf32>
    %611 = arith.maximumf %603, %610 : vector<32x128xf32>
    %c0_383 = arith.constant 0 : index
    %c0_384 = arith.constant 0 : index
    %c76 = arith.constant 76 : index
    %612 = vector.load %arg4[%c0_383, %c0_384, %c76] : memref<1x32x128xf32, #tpu.memory_space<vmem>>, vector<1x32x1xf32>
    %613 = vector.shape_cast %612 : vector<1x32x1xf32> to vector<32x1xf32>
    %c0_385 = arith.constant 0 : index
    %c76_386 = arith.constant 76 : index
    %c0_387 = arith.constant 0 : index
    %614 = vector.load %arg3[%c0_385, %c76_386, %c0_387] : memref<1x128x128xf32, #tpu.memory_space<vmem>>, vector<1x1x128xf32>
    %615 = vector.shape_cast %614 : vector<1x1x128xf32> to vector<1x128xf32>
    %616 = vector.broadcast %613 : vector<32x1xf32> to vector<32x128xf32>
    %617 = vector.broadcast %615 : vector<1x128xf32> to vector<32x128xf32>
    %618 = arith.mulf %616, %617 : vector<32x128xf32>
    %619 = arith.maximumf %611, %618 : vector<32x128xf32>
    %c0_388 = arith.constant 0 : index
    %c0_389 = arith.constant 0 : index
    %c77 = arith.constant 77 : index
    %620 = vector.load %arg4[%c0_388, %c0_389, %c77] : memref<1x32x128xf32, #tpu.memory_space<vmem>>, vector<1x32x1xf32>
    %621 = vector.shape_cast %620 : vector<1x32x1xf32> to vector<32x1xf32>
    %c0_390 = arith.constant 0 : index
    %c77_391 = arith.constant 77 : index
    %c0_392 = arith.constant 0 : index
    %622 = vector.load %arg3[%c0_390, %c77_391, %c0_392] : memref<1x128x128xf32, #tpu.memory_space<vmem>>, vector<1x1x128xf32>
    %623 = vector.shape_cast %622 : vector<1x1x128xf32> to vector<1x128xf32>
    %624 = vector.broadcast %621 : vector<32x1xf32> to vector<32x128xf32>
    %625 = vector.broadcast %623 : vector<1x128xf32> to vector<32x128xf32>
    %626 = arith.mulf %624, %625 : vector<32x128xf32>
    %627 = arith.maximumf %619, %626 : vector<32x128xf32>
    %c0_393 = arith.constant 0 : index
    %c0_394 = arith.constant 0 : index
    %c78 = arith.constant 78 : index
    %628 = vector.load %arg4[%c0_393, %c0_394, %c78] : memref<1x32x128xf32, #tpu.memory_space<vmem>>, vector<1x32x1xf32>
    %629 = vector.shape_cast %628 : vector<1x32x1xf32> to vector<32x1xf32>
    %c0_395 = arith.constant 0 : index
    %c78_396 = arith.constant 78 : index
    %c0_397 = arith.constant 0 : index
    %630 = vector.load %arg3[%c0_395, %c78_396, %c0_397] : memref<1x128x128xf32, #tpu.memory_space<vmem>>, vector<1x1x128xf32>
    %631 = vector.shape_cast %630 : vector<1x1x128xf32> to vector<1x128xf32>
    %632 = vector.broadcast %629 : vector<32x1xf32> to vector<32x128xf32>
    %633 = vector.broadcast %631 : vector<1x128xf32> to vector<32x128xf32>
    %634 = arith.mulf %632, %633 : vector<32x128xf32>
    %635 = arith.maximumf %627, %634 : vector<32x128xf32>
    %c0_398 = arith.constant 0 : index
    %c0_399 = arith.constant 0 : index
    %c79 = arith.constant 79 : index
    %636 = vector.load %arg4[%c0_398, %c0_399, %c79] : memref<1x32x128xf32, #tpu.memory_space<vmem>>, vector<1x32x1xf32>
    %637 = vector.shape_cast %636 : vector<1x32x1xf32> to vector<32x1xf32>
    %c0_400 = arith.constant 0 : index
    %c79_401 = arith.constant 79 : index
    %c0_402 = arith.constant 0 : index
    %638 = vector.load %arg3[%c0_400, %c79_401, %c0_402] : memref<1x128x128xf32, #tpu.memory_space<vmem>>, vector<1x1x128xf32>
    %639 = vector.shape_cast %638 : vector<1x1x128xf32> to vector<1x128xf32>
    %640 = vector.broadcast %637 : vector<32x1xf32> to vector<32x128xf32>
    %641 = vector.broadcast %639 : vector<1x128xf32> to vector<32x128xf32>
    %642 = arith.mulf %640, %641 : vector<32x128xf32>
    %643 = arith.maximumf %635, %642 : vector<32x128xf32>
    %c0_403 = arith.constant 0 : index
    %c0_404 = arith.constant 0 : index
    %c80 = arith.constant 80 : index
    %644 = vector.load %arg4[%c0_403, %c0_404, %c80] : memref<1x32x128xf32, #tpu.memory_space<vmem>>, vector<1x32x1xf32>
    %645 = vector.shape_cast %644 : vector<1x32x1xf32> to vector<32x1xf32>
    %c0_405 = arith.constant 0 : index
    %c80_406 = arith.constant 80 : index
    %c0_407 = arith.constant 0 : index
    %646 = vector.load %arg3[%c0_405, %c80_406, %c0_407] : memref<1x128x128xf32, #tpu.memory_space<vmem>>, vector<1x1x128xf32>
    %647 = vector.shape_cast %646 : vector<1x1x128xf32> to vector<1x128xf32>
    %648 = vector.broadcast %645 : vector<32x1xf32> to vector<32x128xf32>
    %649 = vector.broadcast %647 : vector<1x128xf32> to vector<32x128xf32>
    %650 = arith.mulf %648, %649 : vector<32x128xf32>
    %651 = arith.maximumf %643, %650 : vector<32x128xf32>
    %c0_408 = arith.constant 0 : index
    %c0_409 = arith.constant 0 : index
    %c81 = arith.constant 81 : index
    %652 = vector.load %arg4[%c0_408, %c0_409, %c81] : memref<1x32x128xf32, #tpu.memory_space<vmem>>, vector<1x32x1xf32>
    %653 = vector.shape_cast %652 : vector<1x32x1xf32> to vector<32x1xf32>
    %c0_410 = arith.constant 0 : index
    %c81_411 = arith.constant 81 : index
    %c0_412 = arith.constant 0 : index
    %654 = vector.load %arg3[%c0_410, %c81_411, %c0_412] : memref<1x128x128xf32, #tpu.memory_space<vmem>>, vector<1x1x128xf32>
    %655 = vector.shape_cast %654 : vector<1x1x128xf32> to vector<1x128xf32>
    %656 = vector.broadcast %653 : vector<32x1xf32> to vector<32x128xf32>
    %657 = vector.broadcast %655 : vector<1x128xf32> to vector<32x128xf32>
    %658 = arith.mulf %656, %657 : vector<32x128xf32>
    %659 = arith.maximumf %651, %658 : vector<32x128xf32>
    %c0_413 = arith.constant 0 : index
    %c0_414 = arith.constant 0 : index
    %c82 = arith.constant 82 : index
    %660 = vector.load %arg4[%c0_413, %c0_414, %c82] : memref<1x32x128xf32, #tpu.memory_space<vmem>>, vector<1x32x1xf32>
    %661 = vector.shape_cast %660 : vector<1x32x1xf32> to vector<32x1xf32>
    %c0_415 = arith.constant 0 : index
    %c82_416 = arith.constant 82 : index
    %c0_417 = arith.constant 0 : index
    %662 = vector.load %arg3[%c0_415, %c82_416, %c0_417] : memref<1x128x128xf32, #tpu.memory_space<vmem>>, vector<1x1x128xf32>
    %663 = vector.shape_cast %662 : vector<1x1x128xf32> to vector<1x128xf32>
    %664 = vector.broadcast %661 : vector<32x1xf32> to vector<32x128xf32>
    %665 = vector.broadcast %663 : vector<1x128xf32> to vector<32x128xf32>
    %666 = arith.mulf %664, %665 : vector<32x128xf32>
    %667 = arith.maximumf %659, %666 : vector<32x128xf32>
    %c0_418 = arith.constant 0 : index
    %c0_419 = arith.constant 0 : index
    %c83 = arith.constant 83 : index
    %668 = vector.load %arg4[%c0_418, %c0_419, %c83] : memref<1x32x128xf32, #tpu.memory_space<vmem>>, vector<1x32x1xf32>
    %669 = vector.shape_cast %668 : vector<1x32x1xf32> to vector<32x1xf32>
    %c0_420 = arith.constant 0 : index
    %c83_421 = arith.constant 83 : index
    %c0_422 = arith.constant 0 : index
    %670 = vector.load %arg3[%c0_420, %c83_421, %c0_422] : memref<1x128x128xf32, #tpu.memory_space<vmem>>, vector<1x1x128xf32>
    %671 = vector.shape_cast %670 : vector<1x1x128xf32> to vector<1x128xf32>
    %672 = vector.broadcast %669 : vector<32x1xf32> to vector<32x128xf32>
    %673 = vector.broadcast %671 : vector<1x128xf32> to vector<32x128xf32>
    %674 = arith.mulf %672, %673 : vector<32x128xf32>
    %675 = arith.maximumf %667, %674 : vector<32x128xf32>
    %c0_423 = arith.constant 0 : index
    %c0_424 = arith.constant 0 : index
    %c84 = arith.constant 84 : index
    %676 = vector.load %arg4[%c0_423, %c0_424, %c84] : memref<1x32x128xf32, #tpu.memory_space<vmem>>, vector<1x32x1xf32>
    %677 = vector.shape_cast %676 : vector<1x32x1xf32> to vector<32x1xf32>
    %c0_425 = arith.constant 0 : index
    %c84_426 = arith.constant 84 : index
    %c0_427 = arith.constant 0 : index
    %678 = vector.load %arg3[%c0_425, %c84_426, %c0_427] : memref<1x128x128xf32, #tpu.memory_space<vmem>>, vector<1x1x128xf32>
    %679 = vector.shape_cast %678 : vector<1x1x128xf32> to vector<1x128xf32>
    %680 = vector.broadcast %677 : vector<32x1xf32> to vector<32x128xf32>
    %681 = vector.broadcast %679 : vector<1x128xf32> to vector<32x128xf32>
    %682 = arith.mulf %680, %681 : vector<32x128xf32>
    %683 = arith.maximumf %675, %682 : vector<32x128xf32>
    %c0_428 = arith.constant 0 : index
    %c0_429 = arith.constant 0 : index
    %c85 = arith.constant 85 : index
    %684 = vector.load %arg4[%c0_428, %c0_429, %c85] : memref<1x32x128xf32, #tpu.memory_space<vmem>>, vector<1x32x1xf32>
    %685 = vector.shape_cast %684 : vector<1x32x1xf32> to vector<32x1xf32>
    %c0_430 = arith.constant 0 : index
    %c85_431 = arith.constant 85 : index
    %c0_432 = arith.constant 0 : index
    %686 = vector.load %arg3[%c0_430, %c85_431, %c0_432] : memref<1x128x128xf32, #tpu.memory_space<vmem>>, vector<1x1x128xf32>
    %687 = vector.shape_cast %686 : vector<1x1x128xf32> to vector<1x128xf32>
    %688 = vector.broadcast %685 : vector<32x1xf32> to vector<32x128xf32>
    %689 = vector.broadcast %687 : vector<1x128xf32> to vector<32x128xf32>
    %690 = arith.mulf %688, %689 : vector<32x128xf32>
    %691 = arith.maximumf %683, %690 : vector<32x128xf32>
    %c0_433 = arith.constant 0 : index
    %c0_434 = arith.constant 0 : index
    %c86 = arith.constant 86 : index
    %692 = vector.load %arg4[%c0_433, %c0_434, %c86] : memref<1x32x128xf32, #tpu.memory_space<vmem>>, vector<1x32x1xf32>
    %693 = vector.shape_cast %692 : vector<1x32x1xf32> to vector<32x1xf32>
    %c0_435 = arith.constant 0 : index
    %c86_436 = arith.constant 86 : index
    %c0_437 = arith.constant 0 : index
    %694 = vector.load %arg3[%c0_435, %c86_436, %c0_437] : memref<1x128x128xf32, #tpu.memory_space<vmem>>, vector<1x1x128xf32>
    %695 = vector.shape_cast %694 : vector<1x1x128xf32> to vector<1x128xf32>
    %696 = vector.broadcast %693 : vector<32x1xf32> to vector<32x128xf32>
    %697 = vector.broadcast %695 : vector<1x128xf32> to vector<32x128xf32>
    %698 = arith.mulf %696, %697 : vector<32x128xf32>
    %699 = arith.maximumf %691, %698 : vector<32x128xf32>
    %c0_438 = arith.constant 0 : index
    %c0_439 = arith.constant 0 : index
    %c87 = arith.constant 87 : index
    %700 = vector.load %arg4[%c0_438, %c0_439, %c87] : memref<1x32x128xf32, #tpu.memory_space<vmem>>, vector<1x32x1xf32>
    %701 = vector.shape_cast %700 : vector<1x32x1xf32> to vector<32x1xf32>
    %c0_440 = arith.constant 0 : index
    %c87_441 = arith.constant 87 : index
    %c0_442 = arith.constant 0 : index
    %702 = vector.load %arg3[%c0_440, %c87_441, %c0_442] : memref<1x128x128xf32, #tpu.memory_space<vmem>>, vector<1x1x128xf32>
    %703 = vector.shape_cast %702 : vector<1x1x128xf32> to vector<1x128xf32>
    %704 = vector.broadcast %701 : vector<32x1xf32> to vector<32x128xf32>
    %705 = vector.broadcast %703 : vector<1x128xf32> to vector<32x128xf32>
    %706 = arith.mulf %704, %705 : vector<32x128xf32>
    %707 = arith.maximumf %699, %706 : vector<32x128xf32>
    %c0_443 = arith.constant 0 : index
    %c0_444 = arith.constant 0 : index
    %c88 = arith.constant 88 : index
    %708 = vector.load %arg4[%c0_443, %c0_444, %c88] : memref<1x32x128xf32, #tpu.memory_space<vmem>>, vector<1x32x1xf32>
    %709 = vector.shape_cast %708 : vector<1x32x1xf32> to vector<32x1xf32>
    %c0_445 = arith.constant 0 : index
    %c88_446 = arith.constant 88 : index
    %c0_447 = arith.constant 0 : index
    %710 = vector.load %arg3[%c0_445, %c88_446, %c0_447] : memref<1x128x128xf32, #tpu.memory_space<vmem>>, vector<1x1x128xf32>
    %711 = vector.shape_cast %710 : vector<1x1x128xf32> to vector<1x128xf32>
    %712 = vector.broadcast %709 : vector<32x1xf32> to vector<32x128xf32>
    %713 = vector.broadcast %711 : vector<1x128xf32> to vector<32x128xf32>
    %714 = arith.mulf %712, %713 : vector<32x128xf32>
    %715 = arith.maximumf %707, %714 : vector<32x128xf32>
    %c0_448 = arith.constant 0 : index
    %c0_449 = arith.constant 0 : index
    %c89 = arith.constant 89 : index
    %716 = vector.load %arg4[%c0_448, %c0_449, %c89] : memref<1x32x128xf32, #tpu.memory_space<vmem>>, vector<1x32x1xf32>
    %717 = vector.shape_cast %716 : vector<1x32x1xf32> to vector<32x1xf32>
    %c0_450 = arith.constant 0 : index
    %c89_451 = arith.constant 89 : index
    %c0_452 = arith.constant 0 : index
    %718 = vector.load %arg3[%c0_450, %c89_451, %c0_452] : memref<1x128x128xf32, #tpu.memory_space<vmem>>, vector<1x1x128xf32>
    %719 = vector.shape_cast %718 : vector<1x1x128xf32> to vector<1x128xf32>
    %720 = vector.broadcast %717 : vector<32x1xf32> to vector<32x128xf32>
    %721 = vector.broadcast %719 : vector<1x128xf32> to vector<32x128xf32>
    %722 = arith.mulf %720, %721 : vector<32x128xf32>
    %723 = arith.maximumf %715, %722 : vector<32x128xf32>
    %c0_453 = arith.constant 0 : index
    %c0_454 = arith.constant 0 : index
    %c90 = arith.constant 90 : index
    %724 = vector.load %arg4[%c0_453, %c0_454, %c90] : memref<1x32x128xf32, #tpu.memory_space<vmem>>, vector<1x32x1xf32>
    %725 = vector.shape_cast %724 : vector<1x32x1xf32> to vector<32x1xf32>
    %c0_455 = arith.constant 0 : index
    %c90_456 = arith.constant 90 : index
    %c0_457 = arith.constant 0 : index
    %726 = vector.load %arg3[%c0_455, %c90_456, %c0_457] : memref<1x128x128xf32, #tpu.memory_space<vmem>>, vector<1x1x128xf32>
    %727 = vector.shape_cast %726 : vector<1x1x128xf32> to vector<1x128xf32>
    %728 = vector.broadcast %725 : vector<32x1xf32> to vector<32x128xf32>
    %729 = vector.broadcast %727 : vector<1x128xf32> to vector<32x128xf32>
    %730 = arith.mulf %728, %729 : vector<32x128xf32>
    %731 = arith.maximumf %723, %730 : vector<32x128xf32>
    %c0_458 = arith.constant 0 : index
    %c0_459 = arith.constant 0 : index
    %c91 = arith.constant 91 : index
    %732 = vector.load %arg4[%c0_458, %c0_459, %c91] : memref<1x32x128xf32, #tpu.memory_space<vmem>>, vector<1x32x1xf32>
    %733 = vector.shape_cast %732 : vector<1x32x1xf32> to vector<32x1xf32>
    %c0_460 = arith.constant 0 : index
    %c91_461 = arith.constant 91 : index
    %c0_462 = arith.constant 0 : index
    %734 = vector.load %arg3[%c0_460, %c91_461, %c0_462] : memref<1x128x128xf32, #tpu.memory_space<vmem>>, vector<1x1x128xf32>
    %735 = vector.shape_cast %734 : vector<1x1x128xf32> to vector<1x128xf32>
    %736 = vector.broadcast %733 : vector<32x1xf32> to vector<32x128xf32>
    %737 = vector.broadcast %735 : vector<1x128xf32> to vector<32x128xf32>
    %738 = arith.mulf %736, %737 : vector<32x128xf32>
    %739 = arith.maximumf %731, %738 : vector<32x128xf32>
    %c0_463 = arith.constant 0 : index
    %c0_464 = arith.constant 0 : index
    %c92 = arith.constant 92 : index
    %740 = vector.load %arg4[%c0_463, %c0_464, %c92] : memref<1x32x128xf32, #tpu.memory_space<vmem>>, vector<1x32x1xf32>
    %741 = vector.shape_cast %740 : vector<1x32x1xf32> to vector<32x1xf32>
    %c0_465 = arith.constant 0 : index
    %c92_466 = arith.constant 92 : index
    %c0_467 = arith.constant 0 : index
    %742 = vector.load %arg3[%c0_465, %c92_466, %c0_467] : memref<1x128x128xf32, #tpu.memory_space<vmem>>, vector<1x1x128xf32>
    %743 = vector.shape_cast %742 : vector<1x1x128xf32> to vector<1x128xf32>
    %744 = vector.broadcast %741 : vector<32x1xf32> to vector<32x128xf32>
    %745 = vector.broadcast %743 : vector<1x128xf32> to vector<32x128xf32>
    %746 = arith.mulf %744, %745 : vector<32x128xf32>
    %747 = arith.maximumf %739, %746 : vector<32x128xf32>
    %c0_468 = arith.constant 0 : index
    %c0_469 = arith.constant 0 : index
    %c93 = arith.constant 93 : index
    %748 = vector.load %arg4[%c0_468, %c0_469, %c93] : memref<1x32x128xf32, #tpu.memory_space<vmem>>, vector<1x32x1xf32>
    %749 = vector.shape_cast %748 : vector<1x32x1xf32> to vector<32x1xf32>
    %c0_470 = arith.constant 0 : index
    %c93_471 = arith.constant 93 : index
    %c0_472 = arith.constant 0 : index
    %750 = vector.load %arg3[%c0_470, %c93_471, %c0_472] : memref<1x128x128xf32, #tpu.memory_space<vmem>>, vector<1x1x128xf32>
    %751 = vector.shape_cast %750 : vector<1x1x128xf32> to vector<1x128xf32>
    %752 = vector.broadcast %749 : vector<32x1xf32> to vector<32x128xf32>
    %753 = vector.broadcast %751 : vector<1x128xf32> to vector<32x128xf32>
    %754 = arith.mulf %752, %753 : vector<32x128xf32>
    %755 = arith.maximumf %747, %754 : vector<32x128xf32>
    %c0_473 = arith.constant 0 : index
    %c0_474 = arith.constant 0 : index
    %c94 = arith.constant 94 : index
    %756 = vector.load %arg4[%c0_473, %c0_474, %c94] : memref<1x32x128xf32, #tpu.memory_space<vmem>>, vector<1x32x1xf32>
    %757 = vector.shape_cast %756 : vector<1x32x1xf32> to vector<32x1xf32>
    %c0_475 = arith.constant 0 : index
    %c94_476 = arith.constant 94 : index
    %c0_477 = arith.constant 0 : index
    %758 = vector.load %arg3[%c0_475, %c94_476, %c0_477] : memref<1x128x128xf32, #tpu.memory_space<vmem>>, vector<1x1x128xf32>
    %759 = vector.shape_cast %758 : vector<1x1x128xf32> to vector<1x128xf32>
    %760 = vector.broadcast %757 : vector<32x1xf32> to vector<32x128xf32>
    %761 = vector.broadcast %759 : vector<1x128xf32> to vector<32x128xf32>
    %762 = arith.mulf %760, %761 : vector<32x128xf32>
    %763 = arith.maximumf %755, %762 : vector<32x128xf32>
    %c0_478 = arith.constant 0 : index
    %c0_479 = arith.constant 0 : index
    %c95 = arith.constant 95 : index
    %764 = vector.load %arg4[%c0_478, %c0_479, %c95] : memref<1x32x128xf32, #tpu.memory_space<vmem>>, vector<1x32x1xf32>
    %765 = vector.shape_cast %764 : vector<1x32x1xf32> to vector<32x1xf32>
    %c0_480 = arith.constant 0 : index
    %c95_481 = arith.constant 95 : index
    %c0_482 = arith.constant 0 : index
    %766 = vector.load %arg3[%c0_480, %c95_481, %c0_482] : memref<1x128x128xf32, #tpu.memory_space<vmem>>, vector<1x1x128xf32>
    %767 = vector.shape_cast %766 : vector<1x1x128xf32> to vector<1x128xf32>
    %768 = vector.broadcast %765 : vector<32x1xf32> to vector<32x128xf32>
    %769 = vector.broadcast %767 : vector<1x128xf32> to vector<32x128xf32>
    %770 = arith.mulf %768, %769 : vector<32x128xf32>
    %771 = arith.maximumf %763, %770 : vector<32x128xf32>
    %c0_483 = arith.constant 0 : index
    %c0_484 = arith.constant 0 : index
    %c96 = arith.constant 96 : index
    %772 = vector.load %arg4[%c0_483, %c0_484, %c96] : memref<1x32x128xf32, #tpu.memory_space<vmem>>, vector<1x32x1xf32>
    %773 = vector.shape_cast %772 : vector<1x32x1xf32> to vector<32x1xf32>
    %c0_485 = arith.constant 0 : index
    %c96_486 = arith.constant 96 : index
    %c0_487 = arith.constant 0 : index
    %774 = vector.load %arg3[%c0_485, %c96_486, %c0_487] : memref<1x128x128xf32, #tpu.memory_space<vmem>>, vector<1x1x128xf32>
    %775 = vector.shape_cast %774 : vector<1x1x128xf32> to vector<1x128xf32>
    %776 = vector.broadcast %773 : vector<32x1xf32> to vector<32x128xf32>
    %777 = vector.broadcast %775 : vector<1x128xf32> to vector<32x128xf32>
    %778 = arith.mulf %776, %777 : vector<32x128xf32>
    %779 = arith.maximumf %771, %778 : vector<32x128xf32>
    %c0_488 = arith.constant 0 : index
    %c0_489 = arith.constant 0 : index
    %c97 = arith.constant 97 : index
    %780 = vector.load %arg4[%c0_488, %c0_489, %c97] : memref<1x32x128xf32, #tpu.memory_space<vmem>>, vector<1x32x1xf32>
    %781 = vector.shape_cast %780 : vector<1x32x1xf32> to vector<32x1xf32>
    %c0_490 = arith.constant 0 : index
    %c97_491 = arith.constant 97 : index
    %c0_492 = arith.constant 0 : index
    %782 = vector.load %arg3[%c0_490, %c97_491, %c0_492] : memref<1x128x128xf32, #tpu.memory_space<vmem>>, vector<1x1x128xf32>
    %783 = vector.shape_cast %782 : vector<1x1x128xf32> to vector<1x128xf32>
    %784 = vector.broadcast %781 : vector<32x1xf32> to vector<32x128xf32>
    %785 = vector.broadcast %783 : vector<1x128xf32> to vector<32x128xf32>
    %786 = arith.mulf %784, %785 : vector<32x128xf32>
    %787 = arith.maximumf %779, %786 : vector<32x128xf32>
    %c0_493 = arith.constant 0 : index
    %c0_494 = arith.constant 0 : index
    %c98 = arith.constant 98 : index
    %788 = vector.load %arg4[%c0_493, %c0_494, %c98] : memref<1x32x128xf32, #tpu.memory_space<vmem>>, vector<1x32x1xf32>
    %789 = vector.shape_cast %788 : vector<1x32x1xf32> to vector<32x1xf32>
    %c0_495 = arith.constant 0 : index
    %c98_496 = arith.constant 98 : index
    %c0_497 = arith.constant 0 : index
    %790 = vector.load %arg3[%c0_495, %c98_496, %c0_497] : memref<1x128x128xf32, #tpu.memory_space<vmem>>, vector<1x1x128xf32>
    %791 = vector.shape_cast %790 : vector<1x1x128xf32> to vector<1x128xf32>
    %792 = vector.broadcast %789 : vector<32x1xf32> to vector<32x128xf32>
    %793 = vector.broadcast %791 : vector<1x128xf32> to vector<32x128xf32>
    %794 = arith.mulf %792, %793 : vector<32x128xf32>
    %795 = arith.maximumf %787, %794 : vector<32x128xf32>
    %c0_498 = arith.constant 0 : index
    %c0_499 = arith.constant 0 : index
    %c99 = arith.constant 99 : index
    %796 = vector.load %arg4[%c0_498, %c0_499, %c99] : memref<1x32x128xf32, #tpu.memory_space<vmem>>, vector<1x32x1xf32>
    %797 = vector.shape_cast %796 : vector<1x32x1xf32> to vector<32x1xf32>
    %c0_500 = arith.constant 0 : index
    %c99_501 = arith.constant 99 : index
    %c0_502 = arith.constant 0 : index
    %798 = vector.load %arg3[%c0_500, %c99_501, %c0_502] : memref<1x128x128xf32, #tpu.memory_space<vmem>>, vector<1x1x128xf32>
    %799 = vector.shape_cast %798 : vector<1x1x128xf32> to vector<1x128xf32>
    %800 = vector.broadcast %797 : vector<32x1xf32> to vector<32x128xf32>
    %801 = vector.broadcast %799 : vector<1x128xf32> to vector<32x128xf32>
    %802 = arith.mulf %800, %801 : vector<32x128xf32>
    %803 = arith.maximumf %795, %802 : vector<32x128xf32>
    %c0_503 = arith.constant 0 : index
    %c0_504 = arith.constant 0 : index
    %c100 = arith.constant 100 : index
    %804 = vector.load %arg4[%c0_503, %c0_504, %c100] : memref<1x32x128xf32, #tpu.memory_space<vmem>>, vector<1x32x1xf32>
    %805 = vector.shape_cast %804 : vector<1x32x1xf32> to vector<32x1xf32>
    %c0_505 = arith.constant 0 : index
    %c100_506 = arith.constant 100 : index
    %c0_507 = arith.constant 0 : index
    %806 = vector.load %arg3[%c0_505, %c100_506, %c0_507] : memref<1x128x128xf32, #tpu.memory_space<vmem>>, vector<1x1x128xf32>
    %807 = vector.shape_cast %806 : vector<1x1x128xf32> to vector<1x128xf32>
    %808 = vector.broadcast %805 : vector<32x1xf32> to vector<32x128xf32>
    %809 = vector.broadcast %807 : vector<1x128xf32> to vector<32x128xf32>
    %810 = arith.mulf %808, %809 : vector<32x128xf32>
    %811 = arith.maximumf %803, %810 : vector<32x128xf32>
    %c0_508 = arith.constant 0 : index
    %c0_509 = arith.constant 0 : index
    %c101 = arith.constant 101 : index
    %812 = vector.load %arg4[%c0_508, %c0_509, %c101] : memref<1x32x128xf32, #tpu.memory_space<vmem>>, vector<1x32x1xf32>
    %813 = vector.shape_cast %812 : vector<1x32x1xf32> to vector<32x1xf32>
    %c0_510 = arith.constant 0 : index
    %c101_511 = arith.constant 101 : index
    %c0_512 = arith.constant 0 : index
    %814 = vector.load %arg3[%c0_510, %c101_511, %c0_512] : memref<1x128x128xf32, #tpu.memory_space<vmem>>, vector<1x1x128xf32>
    %815 = vector.shape_cast %814 : vector<1x1x128xf32> to vector<1x128xf32>
    %816 = vector.broadcast %813 : vector<32x1xf32> to vector<32x128xf32>
    %817 = vector.broadcast %815 : vector<1x128xf32> to vector<32x128xf32>
    %818 = arith.mulf %816, %817 : vector<32x128xf32>
    %819 = arith.maximumf %811, %818 : vector<32x128xf32>
    %c0_513 = arith.constant 0 : index
    %c0_514 = arith.constant 0 : index
    %c102 = arith.constant 102 : index
    %820 = vector.load %arg4[%c0_513, %c0_514, %c102] : memref<1x32x128xf32, #tpu.memory_space<vmem>>, vector<1x32x1xf32>
    %821 = vector.shape_cast %820 : vector<1x32x1xf32> to vector<32x1xf32>
    %c0_515 = arith.constant 0 : index
    %c102_516 = arith.constant 102 : index
    %c0_517 = arith.constant 0 : index
    %822 = vector.load %arg3[%c0_515, %c102_516, %c0_517] : memref<1x128x128xf32, #tpu.memory_space<vmem>>, vector<1x1x128xf32>
    %823 = vector.shape_cast %822 : vector<1x1x128xf32> to vector<1x128xf32>
    %824 = vector.broadcast %821 : vector<32x1xf32> to vector<32x128xf32>
    %825 = vector.broadcast %823 : vector<1x128xf32> to vector<32x128xf32>
    %826 = arith.mulf %824, %825 : vector<32x128xf32>
    %827 = arith.maximumf %819, %826 : vector<32x128xf32>
    %c0_518 = arith.constant 0 : index
    %c0_519 = arith.constant 0 : index
    %c103 = arith.constant 103 : index
    %828 = vector.load %arg4[%c0_518, %c0_519, %c103] : memref<1x32x128xf32, #tpu.memory_space<vmem>>, vector<1x32x1xf32>
    %829 = vector.shape_cast %828 : vector<1x32x1xf32> to vector<32x1xf32>
    %c0_520 = arith.constant 0 : index
    %c103_521 = arith.constant 103 : index
    %c0_522 = arith.constant 0 : index
    %830 = vector.load %arg3[%c0_520, %c103_521, %c0_522] : memref<1x128x128xf32, #tpu.memory_space<vmem>>, vector<1x1x128xf32>
    %831 = vector.shape_cast %830 : vector<1x1x128xf32> to vector<1x128xf32>
    %832 = vector.broadcast %829 : vector<32x1xf32> to vector<32x128xf32>
    %833 = vector.broadcast %831 : vector<1x128xf32> to vector<32x128xf32>
    %834 = arith.mulf %832, %833 : vector<32x128xf32>
    %835 = arith.maximumf %827, %834 : vector<32x128xf32>
    %c0_523 = arith.constant 0 : index
    %c0_524 = arith.constant 0 : index
    %c104 = arith.constant 104 : index
    %836 = vector.load %arg4[%c0_523, %c0_524, %c104] : memref<1x32x128xf32, #tpu.memory_space<vmem>>, vector<1x32x1xf32>
    %837 = vector.shape_cast %836 : vector<1x32x1xf32> to vector<32x1xf32>
    %c0_525 = arith.constant 0 : index
    %c104_526 = arith.constant 104 : index
    %c0_527 = arith.constant 0 : index
    %838 = vector.load %arg3[%c0_525, %c104_526, %c0_527] : memref<1x128x128xf32, #tpu.memory_space<vmem>>, vector<1x1x128xf32>
    %839 = vector.shape_cast %838 : vector<1x1x128xf32> to vector<1x128xf32>
    %840 = vector.broadcast %837 : vector<32x1xf32> to vector<32x128xf32>
    %841 = vector.broadcast %839 : vector<1x128xf32> to vector<32x128xf32>
    %842 = arith.mulf %840, %841 : vector<32x128xf32>
    %843 = arith.maximumf %835, %842 : vector<32x128xf32>
    %c0_528 = arith.constant 0 : index
    %c0_529 = arith.constant 0 : index
    %c105 = arith.constant 105 : index
    %844 = vector.load %arg4[%c0_528, %c0_529, %c105] : memref<1x32x128xf32, #tpu.memory_space<vmem>>, vector<1x32x1xf32>
    %845 = vector.shape_cast %844 : vector<1x32x1xf32> to vector<32x1xf32>
    %c0_530 = arith.constant 0 : index
    %c105_531 = arith.constant 105 : index
    %c0_532 = arith.constant 0 : index
    %846 = vector.load %arg3[%c0_530, %c105_531, %c0_532] : memref<1x128x128xf32, #tpu.memory_space<vmem>>, vector<1x1x128xf32>
    %847 = vector.shape_cast %846 : vector<1x1x128xf32> to vector<1x128xf32>
    %848 = vector.broadcast %845 : vector<32x1xf32> to vector<32x128xf32>
    %849 = vector.broadcast %847 : vector<1x128xf32> to vector<32x128xf32>
    %850 = arith.mulf %848, %849 : vector<32x128xf32>
    %851 = arith.maximumf %843, %850 : vector<32x128xf32>
    %c0_533 = arith.constant 0 : index
    %c0_534 = arith.constant 0 : index
    %c106 = arith.constant 106 : index
    %852 = vector.load %arg4[%c0_533, %c0_534, %c106] : memref<1x32x128xf32, #tpu.memory_space<vmem>>, vector<1x32x1xf32>
    %853 = vector.shape_cast %852 : vector<1x32x1xf32> to vector<32x1xf32>
    %c0_535 = arith.constant 0 : index
    %c106_536 = arith.constant 106 : index
    %c0_537 = arith.constant 0 : index
    %854 = vector.load %arg3[%c0_535, %c106_536, %c0_537] : memref<1x128x128xf32, #tpu.memory_space<vmem>>, vector<1x1x128xf32>
    %855 = vector.shape_cast %854 : vector<1x1x128xf32> to vector<1x128xf32>
    %856 = vector.broadcast %853 : vector<32x1xf32> to vector<32x128xf32>
    %857 = vector.broadcast %855 : vector<1x128xf32> to vector<32x128xf32>
    %858 = arith.mulf %856, %857 : vector<32x128xf32>
    %859 = arith.maximumf %851, %858 : vector<32x128xf32>
    %c0_538 = arith.constant 0 : index
    %c0_539 = arith.constant 0 : index
    %c107 = arith.constant 107 : index
    %860 = vector.load %arg4[%c0_538, %c0_539, %c107] : memref<1x32x128xf32, #tpu.memory_space<vmem>>, vector<1x32x1xf32>
    %861 = vector.shape_cast %860 : vector<1x32x1xf32> to vector<32x1xf32>
    %c0_540 = arith.constant 0 : index
    %c107_541 = arith.constant 107 : index
    %c0_542 = arith.constant 0 : index
    %862 = vector.load %arg3[%c0_540, %c107_541, %c0_542] : memref<1x128x128xf32, #tpu.memory_space<vmem>>, vector<1x1x128xf32>
    %863 = vector.shape_cast %862 : vector<1x1x128xf32> to vector<1x128xf32>
    %864 = vector.broadcast %861 : vector<32x1xf32> to vector<32x128xf32>
    %865 = vector.broadcast %863 : vector<1x128xf32> to vector<32x128xf32>
    %866 = arith.mulf %864, %865 : vector<32x128xf32>
    %867 = arith.maximumf %859, %866 : vector<32x128xf32>
    %c0_543 = arith.constant 0 : index
    %c0_544 = arith.constant 0 : index
    %c108 = arith.constant 108 : index
    %868 = vector.load %arg4[%c0_543, %c0_544, %c108] : memref<1x32x128xf32, #tpu.memory_space<vmem>>, vector<1x32x1xf32>
    %869 = vector.shape_cast %868 : vector<1x32x1xf32> to vector<32x1xf32>
    %c0_545 = arith.constant 0 : index
    %c108_546 = arith.constant 108 : index
    %c0_547 = arith.constant 0 : index
    %870 = vector.load %arg3[%c0_545, %c108_546, %c0_547] : memref<1x128x128xf32, #tpu.memory_space<vmem>>, vector<1x1x128xf32>
    %871 = vector.shape_cast %870 : vector<1x1x128xf32> to vector<1x128xf32>
    %872 = vector.broadcast %869 : vector<32x1xf32> to vector<32x128xf32>
    %873 = vector.broadcast %871 : vector<1x128xf32> to vector<32x128xf32>
    %874 = arith.mulf %872, %873 : vector<32x128xf32>
    %875 = arith.maximumf %867, %874 : vector<32x128xf32>
    %c0_548 = arith.constant 0 : index
    %c0_549 = arith.constant 0 : index
    %c109 = arith.constant 109 : index
    %876 = vector.load %arg4[%c0_548, %c0_549, %c109] : memref<1x32x128xf32, #tpu.memory_space<vmem>>, vector<1x32x1xf32>
    %877 = vector.shape_cast %876 : vector<1x32x1xf32> to vector<32x1xf32>
    %c0_550 = arith.constant 0 : index
    %c109_551 = arith.constant 109 : index
    %c0_552 = arith.constant 0 : index
    %878 = vector.load %arg3[%c0_550, %c109_551, %c0_552] : memref<1x128x128xf32, #tpu.memory_space<vmem>>, vector<1x1x128xf32>
    %879 = vector.shape_cast %878 : vector<1x1x128xf32> to vector<1x128xf32>
    %880 = vector.broadcast %877 : vector<32x1xf32> to vector<32x128xf32>
    %881 = vector.broadcast %879 : vector<1x128xf32> to vector<32x128xf32>
    %882 = arith.mulf %880, %881 : vector<32x128xf32>
    %883 = arith.maximumf %875, %882 : vector<32x128xf32>
    %c0_553 = arith.constant 0 : index
    %c0_554 = arith.constant 0 : index
    %c110 = arith.constant 110 : index
    %884 = vector.load %arg4[%c0_553, %c0_554, %c110] : memref<1x32x128xf32, #tpu.memory_space<vmem>>, vector<1x32x1xf32>
    %885 = vector.shape_cast %884 : vector<1x32x1xf32> to vector<32x1xf32>
    %c0_555 = arith.constant 0 : index
    %c110_556 = arith.constant 110 : index
    %c0_557 = arith.constant 0 : index
    %886 = vector.load %arg3[%c0_555, %c110_556, %c0_557] : memref<1x128x128xf32, #tpu.memory_space<vmem>>, vector<1x1x128xf32>
    %887 = vector.shape_cast %886 : vector<1x1x128xf32> to vector<1x128xf32>
    %888 = vector.broadcast %885 : vector<32x1xf32> to vector<32x128xf32>
    %889 = vector.broadcast %887 : vector<1x128xf32> to vector<32x128xf32>
    %890 = arith.mulf %888, %889 : vector<32x128xf32>
    %891 = arith.maximumf %883, %890 : vector<32x128xf32>
    %c0_558 = arith.constant 0 : index
    %c0_559 = arith.constant 0 : index
    %c111 = arith.constant 111 : index
    %892 = vector.load %arg4[%c0_558, %c0_559, %c111] : memref<1x32x128xf32, #tpu.memory_space<vmem>>, vector<1x32x1xf32>
    %893 = vector.shape_cast %892 : vector<1x32x1xf32> to vector<32x1xf32>
    %c0_560 = arith.constant 0 : index
    %c111_561 = arith.constant 111 : index
    %c0_562 = arith.constant 0 : index
    %894 = vector.load %arg3[%c0_560, %c111_561, %c0_562] : memref<1x128x128xf32, #tpu.memory_space<vmem>>, vector<1x1x128xf32>
    %895 = vector.shape_cast %894 : vector<1x1x128xf32> to vector<1x128xf32>
    %896 = vector.broadcast %893 : vector<32x1xf32> to vector<32x128xf32>
    %897 = vector.broadcast %895 : vector<1x128xf32> to vector<32x128xf32>
    %898 = arith.mulf %896, %897 : vector<32x128xf32>
    %899 = arith.maximumf %891, %898 : vector<32x128xf32>
    %c0_563 = arith.constant 0 : index
    %c0_564 = arith.constant 0 : index
    %c112 = arith.constant 112 : index
    %900 = vector.load %arg4[%c0_563, %c0_564, %c112] : memref<1x32x128xf32, #tpu.memory_space<vmem>>, vector<1x32x1xf32>
    %901 = vector.shape_cast %900 : vector<1x32x1xf32> to vector<32x1xf32>
    %c0_565 = arith.constant 0 : index
    %c112_566 = arith.constant 112 : index
    %c0_567 = arith.constant 0 : index
    %902 = vector.load %arg3[%c0_565, %c112_566, %c0_567] : memref<1x128x128xf32, #tpu.memory_space<vmem>>, vector<1x1x128xf32>
    %903 = vector.shape_cast %902 : vector<1x1x128xf32> to vector<1x128xf32>
    %904 = vector.broadcast %901 : vector<32x1xf32> to vector<32x128xf32>
    %905 = vector.broadcast %903 : vector<1x128xf32> to vector<32x128xf32>
    %906 = arith.mulf %904, %905 : vector<32x128xf32>
    %907 = arith.maximumf %899, %906 : vector<32x128xf32>
    %c0_568 = arith.constant 0 : index
    %c0_569 = arith.constant 0 : index
    %c113 = arith.constant 113 : index
    %908 = vector.load %arg4[%c0_568, %c0_569, %c113] : memref<1x32x128xf32, #tpu.memory_space<vmem>>, vector<1x32x1xf32>
    %909 = vector.shape_cast %908 : vector<1x32x1xf32> to vector<32x1xf32>
    %c0_570 = arith.constant 0 : index
    %c113_571 = arith.constant 113 : index
    %c0_572 = arith.constant 0 : index
    %910 = vector.load %arg3[%c0_570, %c113_571, %c0_572] : memref<1x128x128xf32, #tpu.memory_space<vmem>>, vector<1x1x128xf32>
    %911 = vector.shape_cast %910 : vector<1x1x128xf32> to vector<1x128xf32>
    %912 = vector.broadcast %909 : vector<32x1xf32> to vector<32x128xf32>
    %913 = vector.broadcast %911 : vector<1x128xf32> to vector<32x128xf32>
    %914 = arith.mulf %912, %913 : vector<32x128xf32>
    %915 = arith.maximumf %907, %914 : vector<32x128xf32>
    %c0_573 = arith.constant 0 : index
    %c0_574 = arith.constant 0 : index
    %c114 = arith.constant 114 : index
    %916 = vector.load %arg4[%c0_573, %c0_574, %c114] : memref<1x32x128xf32, #tpu.memory_space<vmem>>, vector<1x32x1xf32>
    %917 = vector.shape_cast %916 : vector<1x32x1xf32> to vector<32x1xf32>
    %c0_575 = arith.constant 0 : index
    %c114_576 = arith.constant 114 : index
    %c0_577 = arith.constant 0 : index
    %918 = vector.load %arg3[%c0_575, %c114_576, %c0_577] : memref<1x128x128xf32, #tpu.memory_space<vmem>>, vector<1x1x128xf32>
    %919 = vector.shape_cast %918 : vector<1x1x128xf32> to vector<1x128xf32>
    %920 = vector.broadcast %917 : vector<32x1xf32> to vector<32x128xf32>
    %921 = vector.broadcast %919 : vector<1x128xf32> to vector<32x128xf32>
    %922 = arith.mulf %920, %921 : vector<32x128xf32>
    %923 = arith.maximumf %915, %922 : vector<32x128xf32>
    %c0_578 = arith.constant 0 : index
    %c0_579 = arith.constant 0 : index
    %c115 = arith.constant 115 : index
    %924 = vector.load %arg4[%c0_578, %c0_579, %c115] : memref<1x32x128xf32, #tpu.memory_space<vmem>>, vector<1x32x1xf32>
    %925 = vector.shape_cast %924 : vector<1x32x1xf32> to vector<32x1xf32>
    %c0_580 = arith.constant 0 : index
    %c115_581 = arith.constant 115 : index
    %c0_582 = arith.constant 0 : index
    %926 = vector.load %arg3[%c0_580, %c115_581, %c0_582] : memref<1x128x128xf32, #tpu.memory_space<vmem>>, vector<1x1x128xf32>
    %927 = vector.shape_cast %926 : vector<1x1x128xf32> to vector<1x128xf32>
    %928 = vector.broadcast %925 : vector<32x1xf32> to vector<32x128xf32>
    %929 = vector.broadcast %927 : vector<1x128xf32> to vector<32x128xf32>
    %930 = arith.mulf %928, %929 : vector<32x128xf32>
    %931 = arith.maximumf %923, %930 : vector<32x128xf32>
    %c0_583 = arith.constant 0 : index
    %c0_584 = arith.constant 0 : index
    %c116 = arith.constant 116 : index
    %932 = vector.load %arg4[%c0_583, %c0_584, %c116] : memref<1x32x128xf32, #tpu.memory_space<vmem>>, vector<1x32x1xf32>
    %933 = vector.shape_cast %932 : vector<1x32x1xf32> to vector<32x1xf32>
    %c0_585 = arith.constant 0 : index
    %c116_586 = arith.constant 116 : index
    %c0_587 = arith.constant 0 : index
    %934 = vector.load %arg3[%c0_585, %c116_586, %c0_587] : memref<1x128x128xf32, #tpu.memory_space<vmem>>, vector<1x1x128xf32>
    %935 = vector.shape_cast %934 : vector<1x1x128xf32> to vector<1x128xf32>
    %936 = vector.broadcast %933 : vector<32x1xf32> to vector<32x128xf32>
    %937 = vector.broadcast %935 : vector<1x128xf32> to vector<32x128xf32>
    %938 = arith.mulf %936, %937 : vector<32x128xf32>
    %939 = arith.maximumf %931, %938 : vector<32x128xf32>
    %c0_588 = arith.constant 0 : index
    %c0_589 = arith.constant 0 : index
    %c117 = arith.constant 117 : index
    %940 = vector.load %arg4[%c0_588, %c0_589, %c117] : memref<1x32x128xf32, #tpu.memory_space<vmem>>, vector<1x32x1xf32>
    %941 = vector.shape_cast %940 : vector<1x32x1xf32> to vector<32x1xf32>
    %c0_590 = arith.constant 0 : index
    %c117_591 = arith.constant 117 : index
    %c0_592 = arith.constant 0 : index
    %942 = vector.load %arg3[%c0_590, %c117_591, %c0_592] : memref<1x128x128xf32, #tpu.memory_space<vmem>>, vector<1x1x128xf32>
    %943 = vector.shape_cast %942 : vector<1x1x128xf32> to vector<1x128xf32>
    %944 = vector.broadcast %941 : vector<32x1xf32> to vector<32x128xf32>
    %945 = vector.broadcast %943 : vector<1x128xf32> to vector<32x128xf32>
    %946 = arith.mulf %944, %945 : vector<32x128xf32>
    %947 = arith.maximumf %939, %946 : vector<32x128xf32>
    %c0_593 = arith.constant 0 : index
    %c0_594 = arith.constant 0 : index
    %c118 = arith.constant 118 : index
    %948 = vector.load %arg4[%c0_593, %c0_594, %c118] : memref<1x32x128xf32, #tpu.memory_space<vmem>>, vector<1x32x1xf32>
    %949 = vector.shape_cast %948 : vector<1x32x1xf32> to vector<32x1xf32>
    %c0_595 = arith.constant 0 : index
    %c118_596 = arith.constant 118 : index
    %c0_597 = arith.constant 0 : index
    %950 = vector.load %arg3[%c0_595, %c118_596, %c0_597] : memref<1x128x128xf32, #tpu.memory_space<vmem>>, vector<1x1x128xf32>
    %951 = vector.shape_cast %950 : vector<1x1x128xf32> to vector<1x128xf32>
    %952 = vector.broadcast %949 : vector<32x1xf32> to vector<32x128xf32>
    %953 = vector.broadcast %951 : vector<1x128xf32> to vector<32x128xf32>
    %954 = arith.mulf %952, %953 : vector<32x128xf32>
    %955 = arith.maximumf %947, %954 : vector<32x128xf32>
    %c0_598 = arith.constant 0 : index
    %c0_599 = arith.constant 0 : index
    %c119 = arith.constant 119 : index
    %956 = vector.load %arg4[%c0_598, %c0_599, %c119] : memref<1x32x128xf32, #tpu.memory_space<vmem>>, vector<1x32x1xf32>
    %957 = vector.shape_cast %956 : vector<1x32x1xf32> to vector<32x1xf32>
    %c0_600 = arith.constant 0 : index
    %c119_601 = arith.constant 119 : index
    %c0_602 = arith.constant 0 : index
    %958 = vector.load %arg3[%c0_600, %c119_601, %c0_602] : memref<1x128x128xf32, #tpu.memory_space<vmem>>, vector<1x1x128xf32>
    %959 = vector.shape_cast %958 : vector<1x1x128xf32> to vector<1x128xf32>
    %960 = vector.broadcast %957 : vector<32x1xf32> to vector<32x128xf32>
    %961 = vector.broadcast %959 : vector<1x128xf32> to vector<32x128xf32>
    %962 = arith.mulf %960, %961 : vector<32x128xf32>
    %963 = arith.maximumf %955, %962 : vector<32x128xf32>
    %c0_603 = arith.constant 0 : index
    %c0_604 = arith.constant 0 : index
    %c120 = arith.constant 120 : index
    %964 = vector.load %arg4[%c0_603, %c0_604, %c120] : memref<1x32x128xf32, #tpu.memory_space<vmem>>, vector<1x32x1xf32>
    %965 = vector.shape_cast %964 : vector<1x32x1xf32> to vector<32x1xf32>
    %c0_605 = arith.constant 0 : index
    %c120_606 = arith.constant 120 : index
    %c0_607 = arith.constant 0 : index
    %966 = vector.load %arg3[%c0_605, %c120_606, %c0_607] : memref<1x128x128xf32, #tpu.memory_space<vmem>>, vector<1x1x128xf32>
    %967 = vector.shape_cast %966 : vector<1x1x128xf32> to vector<1x128xf32>
    %968 = vector.broadcast %965 : vector<32x1xf32> to vector<32x128xf32>
    %969 = vector.broadcast %967 : vector<1x128xf32> to vector<32x128xf32>
    %970 = arith.mulf %968, %969 : vector<32x128xf32>
    %971 = arith.maximumf %963, %970 : vector<32x128xf32>
    %c0_608 = arith.constant 0 : index
    %c0_609 = arith.constant 0 : index
    %c121 = arith.constant 121 : index
    %972 = vector.load %arg4[%c0_608, %c0_609, %c121] : memref<1x32x128xf32, #tpu.memory_space<vmem>>, vector<1x32x1xf32>
    %973 = vector.shape_cast %972 : vector<1x32x1xf32> to vector<32x1xf32>
    %c0_610 = arith.constant 0 : index
    %c121_611 = arith.constant 121 : index
    %c0_612 = arith.constant 0 : index
    %974 = vector.load %arg3[%c0_610, %c121_611, %c0_612] : memref<1x128x128xf32, #tpu.memory_space<vmem>>, vector<1x1x128xf32>
    %975 = vector.shape_cast %974 : vector<1x1x128xf32> to vector<1x128xf32>
    %976 = vector.broadcast %973 : vector<32x1xf32> to vector<32x128xf32>
    %977 = vector.broadcast %975 : vector<1x128xf32> to vector<32x128xf32>
    %978 = arith.mulf %976, %977 : vector<32x128xf32>
    %979 = arith.maximumf %971, %978 : vector<32x128xf32>
    %c0_613 = arith.constant 0 : index
    %c0_614 = arith.constant 0 : index
    %c122 = arith.constant 122 : index
    %980 = vector.load %arg4[%c0_613, %c0_614, %c122] : memref<1x32x128xf32, #tpu.memory_space<vmem>>, vector<1x32x1xf32>
    %981 = vector.shape_cast %980 : vector<1x32x1xf32> to vector<32x1xf32>
    %c0_615 = arith.constant 0 : index
    %c122_616 = arith.constant 122 : index
    %c0_617 = arith.constant 0 : index
    %982 = vector.load %arg3[%c0_615, %c122_616, %c0_617] : memref<1x128x128xf32, #tpu.memory_space<vmem>>, vector<1x1x128xf32>
    %983 = vector.shape_cast %982 : vector<1x1x128xf32> to vector<1x128xf32>
    %984 = vector.broadcast %981 : vector<32x1xf32> to vector<32x128xf32>
    %985 = vector.broadcast %983 : vector<1x128xf32> to vector<32x128xf32>
    %986 = arith.mulf %984, %985 : vector<32x128xf32>
    %987 = arith.maximumf %979, %986 : vector<32x128xf32>
    %c0_618 = arith.constant 0 : index
    %c0_619 = arith.constant 0 : index
    %c123 = arith.constant 123 : index
    %988 = vector.load %arg4[%c0_618, %c0_619, %c123] : memref<1x32x128xf32, #tpu.memory_space<vmem>>, vector<1x32x1xf32>
    %989 = vector.shape_cast %988 : vector<1x32x1xf32> to vector<32x1xf32>
    %c0_620 = arith.constant 0 : index
    %c123_621 = arith.constant 123 : index
    %c0_622 = arith.constant 0 : index
    %990 = vector.load %arg3[%c0_620, %c123_621, %c0_622] : memref<1x128x128xf32, #tpu.memory_space<vmem>>, vector<1x1x128xf32>
    %991 = vector.shape_cast %990 : vector<1x1x128xf32> to vector<1x128xf32>
    %992 = vector.broadcast %989 : vector<32x1xf32> to vector<32x128xf32>
    %993 = vector.broadcast %991 : vector<1x128xf32> to vector<32x128xf32>
    %994 = arith.mulf %992, %993 : vector<32x128xf32>
    %995 = arith.maximumf %987, %994 : vector<32x128xf32>
    %c0_623 = arith.constant 0 : index
    %c0_624 = arith.constant 0 : index
    %c124 = arith.constant 124 : index
    %996 = vector.load %arg4[%c0_623, %c0_624, %c124] : memref<1x32x128xf32, #tpu.memory_space<vmem>>, vector<1x32x1xf32>
    %997 = vector.shape_cast %996 : vector<1x32x1xf32> to vector<32x1xf32>
    %c0_625 = arith.constant 0 : index
    %c124_626 = arith.constant 124 : index
    %c0_627 = arith.constant 0 : index
    %998 = vector.load %arg3[%c0_625, %c124_626, %c0_627] : memref<1x128x128xf32, #tpu.memory_space<vmem>>, vector<1x1x128xf32>
    %999 = vector.shape_cast %998 : vector<1x1x128xf32> to vector<1x128xf32>
    %1000 = vector.broadcast %997 : vector<32x1xf32> to vector<32x128xf32>
    %1001 = vector.broadcast %999 : vector<1x128xf32> to vector<32x128xf32>
    %1002 = arith.mulf %1000, %1001 : vector<32x128xf32>
    %1003 = arith.maximumf %995, %1002 : vector<32x128xf32>
    %c0_628 = arith.constant 0 : index
    %c0_629 = arith.constant 0 : index
    %c125 = arith.constant 125 : index
    %1004 = vector.load %arg4[%c0_628, %c0_629, %c125] : memref<1x32x128xf32, #tpu.memory_space<vmem>>, vector<1x32x1xf32>
    %1005 = vector.shape_cast %1004 : vector<1x32x1xf32> to vector<32x1xf32>
    %c0_630 = arith.constant 0 : index
    %c125_631 = arith.constant 125 : index
    %c0_632 = arith.constant 0 : index
    %1006 = vector.load %arg3[%c0_630, %c125_631, %c0_632] : memref<1x128x128xf32, #tpu.memory_space<vmem>>, vector<1x1x128xf32>
    %1007 = vector.shape_cast %1006 : vector<1x1x128xf32> to vector<1x128xf32>
    %1008 = vector.broadcast %1005 : vector<32x1xf32> to vector<32x128xf32>
    %1009 = vector.broadcast %1007 : vector<1x128xf32> to vector<32x128xf32>
    %1010 = arith.mulf %1008, %1009 : vector<32x128xf32>
    %1011 = arith.maximumf %1003, %1010 : vector<32x128xf32>
    %c0_633 = arith.constant 0 : index
    %c0_634 = arith.constant 0 : index
    %c126 = arith.constant 126 : index
    %1012 = vector.load %arg4[%c0_633, %c0_634, %c126] : memref<1x32x128xf32, #tpu.memory_space<vmem>>, vector<1x32x1xf32>
    %1013 = vector.shape_cast %1012 : vector<1x32x1xf32> to vector<32x1xf32>
    %c0_635 = arith.constant 0 : index
    %c126_636 = arith.constant 126 : index
    %c0_637 = arith.constant 0 : index
    %1014 = vector.load %arg3[%c0_635, %c126_636, %c0_637] : memref<1x128x128xf32, #tpu.memory_space<vmem>>, vector<1x1x128xf32>
    %1015 = vector.shape_cast %1014 : vector<1x1x128xf32> to vector<1x128xf32>
    %1016 = vector.broadcast %1013 : vector<32x1xf32> to vector<32x128xf32>
    %1017 = vector.broadcast %1015 : vector<1x128xf32> to vector<32x128xf32>
    %1018 = arith.mulf %1016, %1017 : vector<32x128xf32>
    %1019 = arith.maximumf %1011, %1018 : vector<32x128xf32>
    %c0_638 = arith.constant 0 : index
    %c0_639 = arith.constant 0 : index
    %c127 = arith.constant 127 : index
    %1020 = vector.load %arg4[%c0_638, %c0_639, %c127] : memref<1x32x128xf32, #tpu.memory_space<vmem>>, vector<1x32x1xf32>
    %1021 = vector.shape_cast %1020 : vector<1x32x1xf32> to vector<32x1xf32>
    %c0_640 = arith.constant 0 : index
    %c127_641 = arith.constant 127 : index
    %c0_642 = arith.constant 0 : index
    %1022 = vector.load %arg3[%c0_640, %c127_641, %c0_642] : memref<1x128x128xf32, #tpu.memory_space<vmem>>, vector<1x1x128xf32>
    %1023 = vector.shape_cast %1022 : vector<1x1x128xf32> to vector<1x128xf32>
    %1024 = vector.broadcast %1021 : vector<32x1xf32> to vector<32x128xf32>
    %1025 = vector.broadcast %1023 : vector<1x128xf32> to vector<32x128xf32>
    %1026 = arith.mulf %1024, %1025 : vector<32x128xf32>
    %1027 = arith.maximumf %1019, %1026 : vector<32x128xf32>
    %c0_643 = arith.constant 0 : index
    %c0_644 = arith.constant 0 : index
    %1028 = vector.load %arg10[%c0_643, %c0_644] : memref<32x128xf32, #tpu.memory_space<vmem>>, vector<32x128xf32>
    tpu.vector_store %arg10[%c0_643, %c0_644], %1027 {strides = array<i32>} : memref<32x128xf32, #tpu.memory_space<vmem>>, vector<32x128xf32>,
    %c1_i32 = arith.constant 1 : i32
    %1029 = arith.cmpi eq, %arg2, %c1_i32 : i32
    %1030 = arith.extui %1029 : i1 to i32
    %c0_i32_645 = arith.constant 0 : i32
    %1031 = arith.cmpi ne, %1030, %c0_i32_645 : i32
    scf.if %1031 {
      %c0_646 = arith.constant 0 : index
      %c0_647 = arith.constant 0 : index
      %1032 = vector.load %arg5[%c0_646, %c0_647] : memref<32x32xf32, #tpu.memory_space<vmem>>, vector<32x32xf32>
      %cst = arith.constant dense<0.000000e+00> : vector<32x128xf32>
      %1033 = tpu.matmul %1032, %1027, %cst {dimension_numbers = #tpu.dot_dimension_numbers<[1], [0], [0], [1], [0, 0, 1, 1], [], []>} : vector<32x32xf32>, vector<32x128xf32>, vector<32x128xf32> -> vector<32x128xf32>
      %c0_648 = arith.constant 0 : index
      %c0_649 = arith.constant 0 : index
      %1034 = vector.load %arg6[%c0_648, %c0_649] : memref<32x1xf32, #tpu.memory_space<vmem>>, vector<32x1xf32>
      %1035 = vector.broadcast %1034 : vector<32x1xf32> to vector<32x128xf32>
      %1036 = arith.addf %1033, %1035 : vector<32x128xf32>
      %cst_650 = arith.constant 0.000000e+00 : f32
      %1037 = vector.broadcast %cst_650 : f32 to vector<32x128xf32>
      %1038 = arith.maximumf %1036, %1037 : vector<32x128xf32>
      %c0_651 = arith.constant 0 : index
      %c0_652 = arith.constant 0 : index
      %1039 = vector.load %arg7[%c0_651, %c0_652] : memref<32x1xf32, #tpu.memory_space<vmem>>, vector<32x1xf32>
      %1040 = vector.broadcast %1039 : vector<32x1xf32> to vector<32x128xf32>
      %1041 = arith.mulf %1038, %1040 : vector<32x128xf32>
      %cst_653 = arith.constant dense<0.000000e+00> : vector<128xf32>
      %1042 = vector.multi_reduction <add>, %1041, %cst_653 [0] : vector<32x128xf32> to vector<128xf32>
      %1043 = vector.shape_cast %1042 : vector<128xf32> to vector<1x128xf32>
      %c0_654 = arith.constant 0 : index
      %c0_655 = arith.constant 0 : index
      %1044 = vector.load %arg8[%c0_654, %c0_655] : memref<1x1xf32, #tpu.memory_space<vmem>>, vector<1x1xf32>
      %1045 = vector.broadcast %1044 : vector<1x1xf32> to vector<1x128xf32>
      %1046 = arith.addf %1043, %1045 : vector<1x128xf32>
      %c0_656 = arith.constant 0 : index
      %c0_657 = arith.constant 0 : index
      %c0_658 = arith.constant 0 : index
      %1047 = vector.load %arg9[%c0_656, %c0_657, %c0_658] : memref<1x1x128xf32, #tpu.memory_space<vmem>>, vector<1x1x128xf32>
      %1048 = vector.shape_cast %1047 : vector<1x1x128xf32> to vector<1x128xf32>
      %1049 = vector.shape_cast %1046 : vector<1x128xf32> to vector<1x1x128xf32>
      tpu.vector_store %arg9[%c0_656, %c0_657, %c0_658], %1049 {strides = array<i32>} : memref<1x1x128xf32, #tpu.memory_space<vmem>>, vector<1x1x128xf32>,
    } else {
    }
    return
  }
  func.func @transform_0(%arg0: i32, %arg1: i32, %arg2: i32) -> (i32, i32, i32) {
    %c0_i32 = arith.constant 0 : i32
    return %arg0, %arg2, %arg1 : i32, i32, i32
  }
  func.func @transform_1(%arg0: i32, %arg1: i32, %arg2: i32) -> (i32, i32, i32) {
    %c0_i32 = arith.constant 0 : i32
    %c0_i32_0 = arith.constant 0 : i32
    return %arg0, %c0_i32, %arg2 : i32, i32, i32
  }
  func.func @transform_2(%arg0: i32, %arg1: i32, %arg2: i32) -> (i32, i32) {
    %c0_i32 = arith.constant 0 : i32
    %c0_i32_0 = arith.constant 0 : i32
    %c0_i32_1 = arith.constant 0 : i32
    return %c0_i32, %c0_i32_0 : i32, i32
  }
  func.func @transform_3(%arg0: i32, %arg1: i32, %arg2: i32) -> (i32, i32) {
    %c0_i32 = arith.constant 0 : i32
    %c0_i32_0 = arith.constant 0 : i32
    %c0_i32_1 = arith.constant 0 : i32
    return %c0_i32, %c0_i32_0 : i32, i32
  }
  func.func @transform_4(%arg0: i32, %arg1: i32, %arg2: i32) -> (i32, i32) {
    %c0_i32 = arith.constant 0 : i32
    %c0_i32_0 = arith.constant 0 : i32
    %c0_i32_1 = arith.constant 0 : i32
    return %c0_i32, %c0_i32_0 : i32, i32
  }
  func.func @transform_5(%arg0: i32, %arg1: i32, %arg2: i32) -> (i32, i32) {
    %c0_i32 = arith.constant 0 : i32
    %c0_i32_0 = arith.constant 0 : i32
    %c0_i32_1 = arith.constant 0 : i32
    return %c0_i32, %c0_i32_0 : i32, i32
  }
  func.func @transform_6(%arg0: i32, %arg1: i32, %arg2: i32) -> (i32, i32, i32) {
    %c0_i32 = arith.constant 0 : i32
    %c0_i32_0 = arith.constant 0 : i32
    return %arg0, %c0_i32, %arg1 : i32, i32, i32
  }
}

</mosaic_0001>

<bundles_post_ra>
// kernel: tpu_custom_call.1
= control target key start
LH: loop header
LB: loop body
LE: loop exit
PB: predicated region body
PF: predicated region fallthrough
CT: control target
= control target key end

     0   :  { %s8406_s0 = inlined_call_operand.hbm [shape: f32[2,256,256], index: 0, kind: input, shape index: {}]   ;;  %s8407_s1 = inlined_call_operand.hbm [shape: f32[2,32,256], index: 1, kind: input, shape index: {}]   ;;  %s8408_s2 = inlined_call_operand.vmem [shape: f32[32,32], index: 2, kind: input, shape index: {}]   ;;  %s8409_s3 = inlined_call_operand.vmem [shape: f32[32,1], index: 3, kind: input, shape index: {}]   ;;  %s8410_s4 = inlined_call_operand.vmem [shape: f32[32,1], index: 4, kind: input, shape index: {}]   ;;  %s8411_s5 = inlined_call_operand.<no memory space> [shape: f32[1,1], index: 5, kind: input, shape index: {}]   ;;  %s8412_s6 = inlined_call_operand.hbm [shape: f32[2,1,256], index: 6, kind: output, shape index: {}]  }
   0x1   :  { %8534 = sst [smem:[#allocation255_spill]] %s8406_s0  ;;  %v11_v0 = vstv %s8411_s5 }
   0x2   :  { %8535 = sst [smem:[#allocation256_spill]] %s8407_s1  ;;  %12 = vst [vmem:[#allocation3] sm:$0x1] %v11_v0 }
   0x3   :  { %8536 = sst [smem:[#allocation257_spill]] %s8408_s2 }
   0x4   :  { %8537 = sst [smem:[#allocation258_spill]] %s8409_s3 }
   0x5   :  { %8538 = sst [smem:[#allocation259_spill]] %s8410_s4 }
   0x6   :  { %8539 = sst [smem:[#allocation260_spill]] %s8412_s6 }
   0x7   :  { %13 = vsyncpa [#allocation5], 0 }
   0x8   :  { %15 = vsyncpa [#allocation5 + $0x1], 0 }
   0x9   :  { %16 = vsyncpa [#allocation8], 0 }
   0xa   :  { %18 = vsyncpa [#allocation8 + $0x1], 0 }
   0xb   :  { %19 = vsyncpa [#allocation6], 0 }
   0xc   :  { %21 = vsyncpa [#allocation6 + $0x1], 0  ;;  %s5598_s23 = smov 0   ;;  %s5600_s24 = smov 0  }
   0xd   :  { %s5602_s25 = smov 0   ;;  %s5604_s26 = smov 0  }
   0xe   :  { %s5606_s27 = smov 0   ;;  %s5608_s28 = smov 0  }
   0xf   :  { %s5610_s5 = smov 0   ;;  %s5612_s29 = smov 0  }
  0x10   :  { %s5614_s30 = smov 0   ;;  %s5616_s7 = smov 0  }
  0x11   :  { %s5618_s8 = smov 0   ;;  %s5620_s9 = smov 0  }
  0x12   :  { %s5622_s10 = smov 0   ;;  %s5624_s11 = smov 0  }
  0x13   :  { %s5626_s12 = smov 0   ;;  %s5628_s13 = smov 0  }
  0x14 LB: > { %8540 = sst [smem:[#allocation13_spill]] %s5362_s23  ;;  %s4392_s14 = sadd.s32 4294967295, %s5422_s13   ;;  %s5422_s13 = sphi %s5628_s13, %s27_s13   ;;  %s5418_s12 = sphi %s5626_s12, %s9250_s12   ;;  %s5414_s11 = sphi %s5624_s11, %s9249_s11   ;;  %s5410_s10 = sphi %s5622_s10, %s9248_s10   ;;  %s5406_s9 = sphi %s5620_s9, %s9247_s9   ;;  %s5402_s8 = sphi %s5618_s8, %s9246_s8   ;;  %s5398_s7 = sphi %s5616_s7, %s9245_s7   ;;  %s5394_s30 = sphi %s5614_s30, %s9244_s30   ;;  %s5390_s29 = sphi %s5612_s29, %s9243_s29   ;;  %s5386_s5 = sphi %s5610_s5, %s9242_s5   ;;  %s5382_s28 = sphi %s5608_s28, %s9241_s28   ;;  %s5378_s27 = sphi %s5606_s27, %s9240_s27   ;;  %s5374_s26 = sphi %s5604_s26, %s9239_s26   ;;  %s5370_s25 = sphi %s5602_s25, %s9238_s25   ;;  %s5366_s24 = sphi %s5600_s24, %s9237_s24   ;;  %s5362_s23 = sphi %s5598_s23, %s9232_s23  }
  0x15   : > { %8541 = sst [smem:[#allocation14_spill]] %s5366_s24  ;;  %s4393_s15 = sadd.s32 4294967294, %s5422_s13  }
  0x16   : > { %8542 = sst [smem:[#allocation15_spill]] %s5398_s7  ;;  %s39_s16 = sadd.s32 1, %s5410_s10 }
  0x17   : > { %8543 = sst [smem:[#allocation16_spill]] %s5402_s8  ;;  %s42_s17 = sadd.s32 1, %s5414_s11 }
  0x18   : > { %8544 = sst [smem:[#allocation17_spill]] %s5406_s9  ;;  %p40_p0 = scmp.ge.s32.totalorder %s39_s16, 2 }
  0x19   : > { %s46_s18 = sadd.s32 1, %s5418_s12  ;;  %p64_p1 = scmp.ne.s32.totalorder %s5394_s30, %s5390_s29 }
  0x1a   : > { %s9252_s16 = smov (%p40_p0, %s39_s16), 0  ;;  %s9254_s17 = smov (!%p40_p0, %s42_s17), %s5414_s11 }
  0x1b   : > { %8545 = sst [smem:[#allocation18_spill]] %s9252_s16  ;;  %s51_s20 = ssub.s32 %s5410_s10, %s9252_s16 }
  0x1c   : > { %p8428_p2 = scmp.eq.s32.totalorder %s5422_s13, 0  ;;  %p44_p3 = scmp.ge.s32.totalorder %s9254_s17, 2 }
  0x1d   : > { %p70_p4 = scmp.ne.s32.totalorder %s5390_s29, %s5386_s5  ;;  %p5700_p6 = scmp.eq.s32.totalorder %s4392_s14, 0 }
  0x1e   : > { %p5696_p5 = por %p8428_p2, %p64_p1  ;;  %s9256_s17 = smov (%p44_p3, %s9254_s17), 0 }
  0x1f   : > { %8548 = sst [smem:[#allocation19_spill]] %s9256_s17  ;;  %s9258_s18 = smov (!%p44_p3, %s46_s18), %s5418_s12 }
  0x20   : > { %s53_s19 = ssub.s32 %s5414_s11, %s9256_s17  ;;  %p5711_p7 = por %p5700_p6, %p70_p4 }
  0x21   : > { %p48_p8 = scmp.ge.s32.totalorder %s9258_s18, 2  ;;  %s197_s5 = sadd.s32 1, %s5370_s25 }
  0x22   : > { %s8549_s16 = scalar_select %p5711_p7, 1, 0 }
  0x23   : > { %p207_p9 = scmp.ne.s32.totalorder %s5370_s25, %s5366_s24  ;;  %p208_p10 = scmp.eq.s32.totalorder %s4392_s14, 7 }
  0x24   : > { %8550 = sst [smem:[#allocation20_spill]] %s8549_s16  ;;  %s9260_s18 = smov (%p48_p8, %s9258_s18), 0 }
  0x25   : > { %8551 = sst [smem:[#allocation21_spill]] %s9260_s18  ;;  %p5720_p11 = por %p208_p10, %p207_p9 }
  0x26   : > { %p213_p12 = scmp.ne.s32.totalorder %s5366_s24, %s5362_s23  ;;  %s50_s17 = ssub.s32 %s5418_s12, %s9260_s18 }
  0x27   : > { %s8552_s6 = scalar_select %p5720_p11, 1, 0 }
  0x28   : > { %p214_p13 = scmp.eq.s32.totalorder %s4393_s15, 7  ;;  %s5728_s8 = sor.u32 %s51_s20, %s50_s17 }
  0x29   : > { %8553 = sst [smem:[#allocation22_spill]] %s8552_s6  ;;  %s194_s9 = sor.u32 %s53_s19, %s50_s17 }
  0x2a   : > { %s54_s14 = sor.u32 %s53_s19, %s5728_s8  ;;  %p195_p3 = scmp.eq.s32.totalorder %s194_s9, 0 }
  0x2b   : > { %p55_p1 = scmp.eq.s32.totalorder %s54_s14, 0  ;;  %p5732_p4 = por %p214_p13, %p213_p12 }
  0x2c   : > { %s8556_s23 = sadd.s32 1, %s5394_s30  ;;  %p4593_p8 = scmp.lt.s32.totalorder %s5422_s13, 8 }
  0x2d   : > { %s8554_s4 = scalar_select %p5732_p4, 1, 0 }
  0x2e   : > { %s5739_s6 = scalar_select %p55_p1, %s5394_s30, %s8556_s23  }
  0x2f   : > { %8555 = sst [smem:[#allocation23_spill]] %s8554_s4  ;;  %s246_s15 = sand.u32 1, %s5394_s30  }
  0x30   : > { %s5742_s18 = scalar_select %p195_p3, %s5370_s25, %s197_s5  }
  0x31   : > { %s4396_s20 = sshll.u32 %s246_s15, 7  ;;  %s4545_s3 = sshll.u32 %s5410_s10, 5 }
  0x32   : > { %s256_s17 = sadd.s32 %s5414_s11, %s4545_s3  ;;  %s4399_s19 = sshll.u32 %s5418_s12, 6 }
  0x33   : > { %s258_s2 = sadd.s32 %s4399_s19, %s256_s17  ;;  %s250_s14 = scalar_lea.vmem [#allocation4], %s4396_s20 }
  0x34   : > { %s261_s9 = sshll.u32 %s250_s14, 4  ;;  %s4400_s7 = sshll.u32 %s258_s2, 7  ;;  %s262_s9 = int_to_ptr.vmem [resolvable:$true] %s261_s9 }
  0x35   : > { %s8557_s0 = sld [smem:[#allocation255_spill]]  ;;  %p5756_p9 = pnand %p4593_p8, %p5696_p5 }
  0x36   : > { %s247_s5 = scalar_lea.sflag [#allocation5], %s246_s15  ;;  %s5215_s3 = scalar_lea.vmem %s262_s9, 2048 }
  0x37   : > { %p5204_p10 = pneg %p5756_p9  ;;  %p5216_p12 = scmp.ne.s32.totalorder %s262_s9, %s5215_s3 }
  0x38   : > { %s5424_s2 = smov [#allocation4]  }
  0x39   : > { %p5218_p13 = pnand %p5216_p12, %p5204_p10  ;;  %s5220_s20 = sshll.u32 %s5424_s2, 4  ;;  %s5221_s20 = int_to_ptr.vmem [resolvable:$false] %s5220_s20 }
  0x3a   : > { %s5222_s17 = scalar_lea.vmem %s5221_s20, 4096  ;;  %p5223_p3 = scmp.lt.s32.totalorder %s262_s9, %s5221_s20 }
  0x3b   : > { %s260_s4 = scalar_lea.hbm %s8557_s0, %s4400_s7  ;;  %p5219_p1 = pneg %p5218_p13 }
  0x3c   : > { %p5224_p2 = scmp.lt.s32.totalorder %s5222_s17, %s5215_s3 }
  0x3e   : > { %p5225_p0 = por %p5224_p2, %p5223_p3 }
  0x40   : > { %p5226_p4 = pnand %p5225_p0, %p5219_p1 }
  0x42   : > { %5229 = shalt.err (!%p5226_p4)
}
  0x43   : > { %s8429_s24 = smov 256   ;;  %s5426_s7 = smov 128  }
  0x44   : > { %s5427_s16 = smov 8   ;;  %p4404_p2 = scmp.ge.s32.totalorder %s5422_s13, 1 }
  0x45   : > { %4585 = dma.hbm_to_vmem [thread:$0]  (!%p5756_p9), %s260_s4, 2048, %s262_s9, %s247_s5, %s8429_s24, %s5426_s7, %s5427_s16  }
  0x46   : > { %p291_p5 = scmp.lt.s32.totalorder %s5422_s13, 9  ;;  %s85_s15 = sadd.s32 1, %s5382_s28 }
  0x47   : > { %p8560_p4 = scmp.eq.s32.totalorder %s5728_s8, 0  ;;  %p92_p10 = scmp.ne.s32.totalorder %s5382_s28, %s5378_s27 }
  0x48   : > { %p5769_p0 = pnand %p4404_p2, %p291_p5  ;;  %p98_p12 = scmp.ne.s32.totalorder %s5378_s27, %s5374_s26 }
  0x49   : > { %s5777_s19 = scalar_select %p8560_p4, %s5382_s28, %s85_s15  }
  0x4a   : > { %s271_s14 = sand.u32 1, %s5382_s28   ;;  %s4402_s3 = sshll.u32 %s5418_s12, 3 }
  0x4b   : > { %p5787_p13 = por %p98_p12, %p5700_p6  ;;  %p8562_p9 = scmp.eq.s32.totalorder %s5422_s13, 0 }
  0x4c   : > { %s4401_s4 = sshll.u32 %s271_s14, 5  ;;  %s280_s9 = sadd.s32 %s5410_s10, %s4402_s3 }
  0x4d   : > { %p94_p1 = por %p92_p10, %p8562_p9  ;;  %s4403_s5 = sshll.u32 %s280_s9, 7 }
  0x4e   : > { %s275_s2 = scalar_lea.vmem [#allocation7], %s4401_s4  ;;  %s8563_s1 = sld [smem:[#allocation256_spill]] }
  0x4f   : > { %s283_s20 = sshll.u32 %s275_s2, 4  ;;  %p5799_p3 = pnand %p4593_p8, %p94_p1  ;;  %s284_s20 = int_to_ptr.vmem [resolvable:$true] %s283_s20 }
  0x50   : > { %s272_s22 = scalar_lea.sflag [#allocation8], %s271_s14  ;;  %s5243_s24 = scalar_lea.vmem %s284_s20, 512 }
  0x51   : > { %p5232_p6 = pneg %p5799_p3  ;;  %p5244_p2 = scmp.ne.s32.totalorder %s284_s20, %s5243_s24 }
  0x52   : > { %s5428_s3 = smov [#allocation7]  }
  0x53   : > { %p5246_p5 = pnand %p5244_p2, %p5232_p6  ;;  %s5248_s4 = sshll.u32 %s5428_s3, 4  ;;  %s5249_s4 = int_to_ptr.vmem [resolvable:$false] %s5248_s4 }
  0x54   : > { %s282_s15 = scalar_lea.hbm %s8563_s1, %s4403_s5  ;;  %s5250_s9 = scalar_lea.vmem %s5249_s4, 1024 }
  0x55   : > { %p5247_p4 = pneg %p5246_p5  ;;  %p5251_p10 = scmp.lt.s32.totalorder %s284_s20, %s5249_s4 }
  0x56   : > { %p5252_p12 = scmp.lt.s32.totalorder %s5250_s9, %s5243_s24 }
  0x58   : > { %p5253_p9 = por %p5252_p12, %p5251_p10 }
  0x5a   : > { %p5254_p11 = pnand %p5253_p9, %p5247_p4 }
  0x5c   : > { %5257 = shalt.err (!%p5254_p11)
}
  0x5d   : > { %s8565_s14 = smov 256   ;;  %295 = sbr.rel (%p5769_p0) target bundleno = 1912 (0x778), region = 44 }
  0x5e   : > { %4588 = dma.hbm_to_vmem [thread:$0]  (!%p5799_p3), %s282_s15, 512, %s284_s20, %s272_s22, %s8565_s14, %s5426_s7, %s5427_s16  }
  0x62   : > { %s297_s2 = sand.u32 1, %s5390_s29  }
  0x63   : > { %s4405_s17 = sshll.u32 %s297_s2, 7  ;;  %s298_s8 = scalar_lea.sflag [#allocation5], %s297_s2 }
  0x64   : > { %s5813_s3 = scalar_lea.vmem [#allocation4], %s4405_s17 }
  0x65   : > { %5349 = dma.done.wait (%p5711_p7), %s298_s8, 2048  }
  0x66   : > { %5351 = vsyncadd (%p5711_p7), %s298_s8, 4294965248  ;;  %s306_s24 = sand.u32 1, %s5378_s27  }
  0x67   : > { %s4406_s26 = sshll.u32 %s306_s24, 5  ;;  %s307_s7 = scalar_lea.sflag [#allocation8], %s306_s24 }
  0x68   : > { %s5820_s16 = scalar_lea.vmem [#allocation7], %s4406_s26 }
  0x69   : > { %5353 = dma.done.wait (%p5787_p13), %s307_s7, 512  }
  0x6a   : > { %5355 = vsyncadd (%p5787_p13), %s307_s7, 4294966784  ;;  %s8567_s21 = sld [smem:[#allocation14_spill]] }
  0x6b   : > { %s8568_s22 = sld [smem:[#allocation15_spill]] }
  0x70   : > { %s341_s20 = sand.u32 1, %s8567_s21  }
  0x71   : > { %s5829_s15 = scalar_lea.vmem [#allocation9], %s341_s20  ;;  %p4407_p7 = scmp.ne.s32.totalorder %s8568_s22, 0 }
  0x73   : > { %347 = sbr.rel (%p4407_p7) target bundleno = 123 (0x7b), region = 56 }
  0x78   : > { %v5429_v1 = vmov -inf  }
  0x79   : > { %348 = vst [vmem:[#allocation2 + $0x10] sm:$0xff] %v5429_v1  ;;  %349 = vst [vmem:[#allocation2] sm:$0xff] %v5429_v1 }
  0x7a   : > { %350 = vst [vmem:[#allocation2 + $0x18] sm:$0xff] %v5429_v1  ;;  %351 = vst [vmem:[#allocation2 + $0x8] sm:$0xff] %v5429_v1 }
  0x7b PF: > { %v5833_v2 = vld [vmem:[%s5820_s16 + $0x10] sm:$0xff]  ;;  %v5836_v3 = vld [vmem:[%s5820_s16] sm:$0xff]  ;;  %v5430_v4 = vmov 0   ;;  %v5841_v5 = vld [vmem:[%s5820_s16 + $0x18] sm:$0xff]  ;;  %v5431_v7 = vmov 1   ;;  %v5432_v8 = vmov 2  }
  0x7c   : > { %4857 = vset.pattern.permute.xlu1 %v5430_v4  ;;  %4856 = vset.pattern.permute.xlu0 %v5430_v4  ;;  %v5844_v6 = vld [vmem:[%s5820_s16 + $0x8] sm:$0xff]  ;;  %v5433_v9 = vmov 3   ;;  %v5434_v10 = vmov 4   ;;  %v5435_v11 = vmov 5   ;;  %v5436_v12 = vmov 6   ;;  %s9217_s23 = sld [smem:[#allocation15_spill]] }
  0x7d   : > { %373 = vperm.xlu1 %4857, %v5833_v2   ;;  %363 = vperm.xlu0 %4856, %v5836_v3   ;;  %v5437_v13 = vmov 7   ;;  %v5438_v14 = vmov 8   ;;  %v5439_v15 = vmov 9   ;;  %v5440_v16 = vmov 10  }
  0x7e   : > { %v5441_v17 = vmov 11   ;;  %v5442_v18 = vmov 12   ;;  %v5443_v19 = vmov 13   ;;  %v5444_v20 = vmov 14  }
  0x7f   : > { %v5445_v21 = vmov 15   ;;  %v5446_v22 = vmov 16   ;;  %v5447_v23 = vmov 17   ;;  %v5448_v26 = vmov 18  }
  0x80   : > { %v5449_v28 = vmov 19   ;;  %v5450_v31 = vmov 20   ;;  %v5451_v33 = vmov 21   ;;  %v5452_v36 = vmov 22  }
  0x81   : > { %378 = vperm.xlu1 %4857, %v5841_v5   ;;  %368 = vperm.xlu0 %4856, %v5844_v6   ;;  %v5453_v38 = vmov 23   ;;  %v5454_v42 = vmov 24   ;;  %v5455_v44 = vmov 25   ;;  %v5456_v47 = vmov 26  }
  0x82   : > { %v5457_v49 = vmov 27   ;;  %v5458_v52 = vmov 28   ;;  %v8441_v54 = vmov 29   ;;  %v8440_v57 = vmov 30   ;;  %p4536_p11 = scmp.ne.s32.totalorder %s9217_s23, 1 }
  0x83   : > { %v8439_v59 = vmov 31   ;;  %v8438_v0 = vmov 32   ;;  %v8437_v4 = vmov 33   ;;  %s9218_s14 = sld [smem:[#allocation257_spill]] (!%p4536_p11) }
  0x84   : > { %s9220_s8 = sld [smem:[#allocation259_spill]] (!%p4536_p11) }
  0x85   : > { %4859 = vset.pattern.permute.xlu1 %v5431_v7  ;;  %4858 = vset.pattern.permute.xlu0 %v5431_v7 }
  0x86   : > { %399 = vperm.xlu1 %4859, %v5844_v6   ;;  %395 = vperm.xlu0 %4858, %v5836_v3  }
  0x8a   : > { %403 = vperm.xlu1 %4859, %v5833_v2   ;;  %407 = vperm.xlu0 %4858, %v5841_v5  }
  0x8e   : > { %4860 = vset.pattern.permute.xlu1 %v5432_v8  ;;  %4861 = vset.pattern.permute.xlu0 %v5432_v8 }
  0x8f   : > { %424 = vperm.xlu1 %4860, %v5836_v3   ;;  %428 = vperm.xlu0 %4861, %v5844_v6  }
  0x93   : > { %432 = vperm.xlu1 %4860, %v5833_v2   ;;  %4862 = vset.pattern.permute.xlu0 %v5433_v9 }
  0x94   : > { %453 = vperm.xlu0 %4862, %v5836_v3  }
  0x97   : > { %436 = vperm.xlu1 %4860, %v5841_v5  }
  0x98   : > { %465 = vperm.xlu0 %4862, %v5841_v5  }
  0x9b   : > { %4863 = vset.pattern.permute.xlu1 %v5433_v9 }
  0x9c   : > { %457 = vperm.xlu1 %4863, %v5844_v6   ;;  %4865 = vset.pattern.permute.xlu0 %v5434_v10 }
  0x9d   : > { %486 = vperm.xlu0 %4865, %v5844_v6  }
  0xa0   : > { %461 = vperm.xlu1 %4863, %v5833_v2  }
  0xa1   : > { %4866 = vset.pattern.permute.xlu0 %v5435_v11 }
  0xa2   : > { %511 = vperm.xlu0 %4866, %v5836_v3  }
  0xa4   : > { %4864 = vset.pattern.permute.xlu1 %v5434_v10 }
  0xa5   : > { %482 = vperm.xlu1 %4864, %v5836_v3  }
  0xa6   : > { %523 = vperm.xlu0 %4866, %v5841_v5  }
  0xa9   : > { %490 = vperm.xlu1 %4864, %v5833_v2  }
  0xaa   : > { %4869 = vset.pattern.permute.xlu0 %v5436_v12 }
  0xab   : > { %544 = vperm.xlu0 %4869, %v5844_v6  }
  0xad   : > { %494 = vperm.xlu1 %4864, %v5841_v5  }
  0xaf   : > { %4870 = vset.pattern.permute.xlu0 %v5437_v13 }
  0xb0   : > { %569 = vperm.xlu0 %4870, %v5836_v3  }
  0xb1   : > { %4867 = vset.pattern.permute.xlu1 %v5435_v11  ;;  %v8435_v11 = vmov 34  }
  0xb2   : > { %515 = vperm.xlu1 %4867, %v5844_v6  }
  0xb4   : > { %581 = vperm.xlu0 %4870, %v5841_v5  }
  0xb6   : > { %519 = vperm.xlu1 %4867, %v5833_v2  }
  0xb8   : > { %4873 = vset.pattern.permute.xlu0 %v5438_v14 }
  0xb9   : > { %602 = vperm.xlu0 %4873, %v5844_v6  }
  0xba   : > { %4868 = vset.pattern.permute.xlu1 %v5436_v12 }
  0xbb   : > { %540 = vperm.xlu1 %4868, %v5836_v3  }
  0xbd   : > { %4874 = vset.pattern.permute.xlu0 %v5439_v15 }
  0xbe   : > { %627 = vperm.xlu0 %4874, %v5836_v3  }
  0xbf   : > { %548 = vperm.xlu1 %4868, %v5833_v2  }
  0xc2   : > { %639 = vperm.xlu0 %4874, %v5841_v5  }
  0xc3   : > { %552 = vperm.xlu1 %4868, %v5841_v5  }
  0xc6   : > { %4877 = vset.pattern.permute.xlu0 %v5440_v16 }
  0xc7   : > { %4871 = vset.pattern.permute.xlu1 %v5437_v13  ;;  %660 = vperm.xlu0 %4877, %v5844_v6  }
  0xc8   : > { %573 = vperm.xlu1 %4871, %v5844_v6  }
  0xcb   : > { %4878 = vset.pattern.permute.xlu0 %v5441_v17 }
  0xcc   : > { %577 = vperm.xlu1 %4871, %v5833_v2   ;;  %685 = vperm.xlu0 %4878, %v5836_v3  }
  0xd0   : > { %4872 = vset.pattern.permute.xlu1 %v5438_v14  ;;  %697 = vperm.xlu0 %4878, %v5841_v5  }
  0xd1   : > { %598 = vperm.xlu1 %4872, %v5836_v3  }
  0xd4   : > { %4881 = vset.pattern.permute.xlu0 %v5442_v18 }
  0xd5   : > { %606 = vperm.xlu1 %4872, %v5833_v2   ;;  %718 = vperm.xlu0 %4881, %v5844_v6  }
  0xd9   : > { %610 = vperm.xlu1 %4872, %v5841_v5   ;;  %4882 = vset.pattern.permute.xlu0 %v5443_v19 }
  0xda   : > { %743 = vperm.xlu0 %4882, %v5836_v3  }
  0xdd   : > { %4875 = vset.pattern.permute.xlu1 %v5439_v15  ;;  %v8433_v15 = vmov 35  }
  0xde   : > { %631 = vperm.xlu1 %4875, %v5844_v6   ;;  %755 = vperm.xlu0 %4882, %v5841_v5  }
  0xe2   : > { %635 = vperm.xlu1 %4875, %v5833_v2   ;;  %4885 = vset.pattern.permute.xlu0 %v5444_v20 }
  0xe3   : > { %776 = vperm.xlu0 %4885, %v5844_v6  }
  0xe6   : > { %4876 = vset.pattern.permute.xlu1 %v5440_v16 }
  0xe7   : > { %656 = vperm.xlu1 %4876, %v5836_v3   ;;  %4886 = vset.pattern.permute.xlu0 %v5445_v21 }
  0xe8   : > { %801 = vperm.xlu0 %4886, %v5836_v3  }
  0xeb   : > { %664 = vperm.xlu1 %4876, %v5833_v2  }
  0xec   : > { %813 = vperm.xlu0 %4886, %v5841_v5  }
  0xef   : > { %668 = vperm.xlu1 %4876, %v5841_v5  }
  0xf0   : > { %4889 = vset.pattern.permute.xlu0 %v5446_v22 }
  0xf1   : > { %834 = vperm.xlu0 %4889, %v5844_v6  }
  0xf3   : > { %4879 = vset.pattern.permute.xlu1 %v5441_v17 }
  0xf4   : > { %689 = vperm.xlu1 %4879, %v5844_v6  }
  0xf5   : > { %4890 = vset.pattern.permute.xlu0 %v5447_v23 }
  0xf6   : > { %859 = vperm.xlu0 %4890, %v5836_v3  }
  0xf8   : > { %v5900_v24 = vpop.permute.xlu1 %373  ;;  %693 = vperm.xlu1 %4879, %v5833_v2   ;;  %v6008_v61 = vpop.permute.xlu0 %363 }
  0xf9   : > { %8569 = vst [vmem:[#allocation24_spill] sm:$0xff] %v5900_v24 }
  0xfa   : > { %871 = vperm.xlu0 %4890, %v5841_v5  }
  0xfc   : > { %v5904_v25 = vpop.permute.xlu1 %378  ;;  %4880 = vset.pattern.permute.xlu1 %v5442_v18  ;;  %v6014_v63 = vpop.permute.xlu0 %368 }
  0xfd   : > { %714 = vperm.xlu1 %4880, %v5836_v3  }
  0xfe   : > { %4893 = vset.pattern.permute.xlu0 %v5448_v26 }
  0xff   : > { %892 = vperm.xlu0 %4893, %v5844_v6  }
 0x101   : > { %v5909_v27 = vpop.permute.xlu1 %399  ;;  %722 = vperm.xlu1 %4880, %v5833_v2   ;;  %v6023_v7 = vpop.permute.xlu0 %395 }
 0x103   : > { %4894 = vset.pattern.permute.xlu0 %v5449_v28 }
 0x104   : > { %917 = vperm.xlu0 %4894, %v5836_v3  }
 0x105   : > { %v5914_v29 = vpop.permute.xlu1 %403  ;;  %726 = vperm.xlu1 %4880, %v5841_v5   ;;  %v6034_v10 = vpop.permute.xlu0 %407 }
 0x106   : > { %8570 = vst [vmem:[#allocation25_spill] sm:$0xff] %v5914_v29 }
 0x108   : > { %929 = vperm.xlu0 %4894, %v5841_v5  }
 0x109   : > { %4883 = vset.pattern.permute.xlu1 %v5443_v19  ;;  %v8432_v19 = vmov 36  }
 0x10a   : > { %747 = vperm.xlu1 %4883, %v5844_v6   ;;  %v5919_v30 = vpop.permute.xlu1 %424  ;;  %v6041_v13 = vpop.permute.xlu0 %428 }
 0x10c   : > { %4897 = vset.pattern.permute.xlu0 %v5450_v31 }
 0x10d   : > { %950 = vperm.xlu0 %4897, %v5844_v6  }
 0x10e   : > { %751 = vperm.xlu1 %4883, %v5833_v2   ;;  %v5924_v32 = vpop.permute.xlu1 %432 }
 0x10f   : > { %8571 = vst [vmem:[#allocation26_spill] sm:$0xff] %v5924_v32  ;;  %v6049_v16 = vpop.permute.xlu0 %453  ;;  %v8448_v32 = vmov 46  }
 0x111   : > { %4898 = vset.pattern.permute.xlu0 %v5451_v33 }
 0x112   : > { %4884 = vset.pattern.permute.xlu1 %v5444_v20  ;;  %v5927_v34 = vpop.permute.xlu1 %436  ;;  %975 = vperm.xlu0 %4898, %v5836_v3  }
 0x113   : > { %772 = vperm.xlu1 %4884, %v5836_v3   ;;  %v6059_v20 = vpop.permute.xlu0 %465 }
 0x116   : > { %987 = vperm.xlu0 %4898, %v5841_v5  }
 0x117   : > { %780 = vperm.xlu1 %4884, %v5833_v2   ;;  %v5933_v35 = vpop.permute.xlu1 %457 }
 0x11a   : > { %4901 = vset.pattern.permute.xlu0 %v5452_v36 }
 0x11b   : > { %784 = vperm.xlu1 %4884, %v5841_v5   ;;  %v5937_v37 = vpop.permute.xlu1 %461  ;;  %1008 = vperm.xlu0 %4901, %v5844_v6  }
 0x11c   : > { %8572 = vst [vmem:[#allocation27_spill] sm:$0xff] %v5937_v37 }
 0x11f   : > { %4887 = vset.pattern.permute.xlu1 %v5445_v21  ;;  %4902 = vset.pattern.permute.xlu0 %v5453_v38 }
 0x120   : > { %805 = vperm.xlu1 %4887, %v5844_v6   ;;  %v5942_v39 = vpop.permute.xlu1 %482  ;;  %1033 = vperm.xlu0 %4902, %v5836_v3  }
 0x124   : > { %809 = vperm.xlu1 %4887, %v5833_v2   ;;  %v5946_v40 = vpop.permute.xlu1 %490  ;;  %1045 = vperm.xlu0 %4902, %v5841_v5  }
 0x125   : > { %8573 = vst [vmem:[#allocation28_spill] sm:$0xff] %v5946_v40  ;;  %v8607_v40 = vmov 33  }
 0x128   : > { %4888 = vset.pattern.permute.xlu1 %v5446_v22  ;;  %v5949_v41 = vpop.permute.xlu1 %494  ;;  %4905 = vset.pattern.permute.xlu0 %v5454_v42 }
 0x129   : > { %830 = vperm.xlu1 %4888, %v5836_v3   ;;  %1066 = vperm.xlu0 %4905, %v5844_v6  }
 0x12d   : > { %838 = vperm.xlu1 %4888, %v5833_v2   ;;  %v5955_v43 = vpop.permute.xlu1 %515  ;;  %4906 = vset.pattern.permute.xlu0 %v5455_v44 }
 0x12e   : > { %1091 = vperm.xlu0 %4906, %v5836_v3  }
 0x131   : > { %842 = vperm.xlu1 %4888, %v5841_v5   ;;  %v5960_v45 = vpop.permute.xlu1 %519 }
 0x132   : > { %8574 = vst [vmem:[#allocation29_spill] sm:$0xff] %v5960_v45  ;;  %1103 = vperm.xlu0 %4906, %v5841_v5   ;;  %v8447_v45 = vmov 45  }
 0x135   : > { %4891 = vset.pattern.permute.xlu1 %v5447_v23  ;;  %v8431_v23 = vmov 37  }
 0x136   : > { %863 = vperm.xlu1 %4891, %v5844_v6   ;;  %v5965_v46 = vpop.permute.xlu1 %540  ;;  %4909 = vset.pattern.permute.xlu0 %v5456_v47 }
 0x137   : > { %1124 = vperm.xlu0 %4909, %v5844_v6  }
 0x13a   : > { %867 = vperm.xlu1 %4891, %v5833_v2   ;;  %v5970_v48 = vpop.permute.xlu1 %548 }
 0x13b   : > { %8575 = vst [vmem:[#allocation30_spill] sm:$0xff] %v5970_v48  ;;  %4910 = vset.pattern.permute.xlu0 %v5457_v49 }
 0x13c   : > { %1149 = vperm.xlu0 %4910, %v5836_v3  }
 0x13e   : > { %4892 = vset.pattern.permute.xlu1 %v5448_v26  ;;  %v5975_v50 = vpop.permute.xlu1 %552  ;;  %v6070_v26 = vpop.permute.xlu0 %486 }
 0x13f   : > { %888 = vperm.xlu1 %4892, %v5836_v3  }
 0x140   : > { %1161 = vperm.xlu0 %4910, %v5841_v5  }
 0x143   : > { %896 = vperm.xlu1 %4892, %v5833_v2   ;;  %v5980_v51 = vpop.permute.xlu1 %573 }
 0x144   : > { %4913 = vset.pattern.permute.xlu0 %v5458_v52 }
 0x145   : > { %1182 = vperm.xlu0 %4913, %v5844_v6  }
 0x147   : > { %900 = vperm.xlu1 %4892, %v5841_v5   ;;  %v5985_v53 = vpop.permute.xlu1 %577 }
 0x148   : > { %8576 = vst [vmem:[#allocation31_spill] sm:$0xff] %v5985_v53 }
 0x149   : > { %4914 = vset.pattern.permute.xlu0 %v8441_v54 }
 0x14a   : > { %1207 = vperm.xlu0 %4914, %v5836_v3  }
 0x14b   : > { %4895 = vset.pattern.permute.xlu1 %v5449_v28 }
 0x14c   : > { %921 = vperm.xlu1 %4895, %v5844_v6   ;;  %v5991_v55 = vpop.permute.xlu1 %598 }
 0x14e   : > { %1219 = vperm.xlu0 %4914, %v5841_v5  }
 0x150   : > { %925 = vperm.xlu1 %4895, %v5833_v2   ;;  %v5995_v56 = vpop.permute.xlu1 %606 }
 0x151   : > { %8577 = vst [vmem:[#allocation32_spill] sm:$0xff] %v5995_v56  ;;  %v8446_v56 = vmov 44  }
 0x152   : > { %4917 = vset.pattern.permute.xlu0 %v8440_v57  ;;  %v8443_v57 = vmov 41  }
 0x153   : > { %1240 = vperm.xlu0 %4917, %v5844_v6  }
 0x154   : > { %4896 = vset.pattern.permute.xlu1 %v5450_v31  ;;  %v6000_v58 = vpop.permute.xlu1 %610  ;;  %v6076_v31 = vpop.permute.xlu0 %511 }
 0x155   : > { %946 = vperm.xlu1 %4896, %v5836_v3  }
 0x157   : > { %4918 = vset.pattern.permute.xlu0 %v8439_v59 }
 0x158   : > { %1265 = vperm.xlu0 %4918, %v5836_v3  }
 0x159   : > { %954 = vperm.xlu1 %4896, %v5833_v2   ;;  %v6006_v60 = vpop.permute.xlu1 %631 }
 0x15c   : > { %1277 = vperm.xlu0 %4918, %v5841_v5  }
 0x15d   : > { %958 = vperm.xlu1 %4896, %v5841_v5   ;;  %v6012_v62 = vpop.permute.xlu1 %635 }
 0x15e   : > { %8578 = vst [vmem:[#allocation33_spill] sm:$0xff] %v6012_v62 }
 0x160   : > { %4921 = vset.pattern.permute.xlu0 %v8438_v0 }
 0x161   : > { %4899 = vset.pattern.permute.xlu1 %v5451_v33  ;;  %1298 = vperm.xlu0 %4921, %v5844_v6  }
 0x162   : > { %979 = vperm.xlu1 %4899, %v5844_v6   ;;  %v6020_v1 = vpop.permute.xlu1 %656 }
 0x165   : > { %4922 = vset.pattern.permute.xlu0 %v8437_v4  ;;  %v8442_v4 = vmov 40  }
 0x166   : > { %983 = vperm.xlu1 %4899, %v5833_v2   ;;  %v6026_v8 = vpop.permute.xlu1 %664  ;;  %1323 = vperm.xlu0 %4922, %v5836_v3  }
 0x167   : > { %8579 = vst [vmem:[#allocation34_spill] sm:$0xff] %v6026_v8  ;;  %v8599_v8 = vmov 31  }
 0x16a   : > { %4900 = vset.pattern.permute.xlu1 %v5452_v36  ;;  %v6030_v9 = vpop.permute.xlu1 %668  ;;  %1335 = vperm.xlu0 %4922, %v5841_v5  }
 0x16b   : > { %1004 = vperm.xlu1 %4900, %v5836_v3  }
 0x16e   : > { %4925 = vset.pattern.permute.xlu0 %v8435_v11 }
 0x16f   : > { %1012 = vperm.xlu1 %4900, %v5833_v2   ;;  %v6038_v12 = vpop.permute.xlu1 %689  ;;  %1356 = vperm.xlu0 %4925, %v5844_v6  }
 0x173   : > { %1016 = vperm.xlu1 %4900, %v5841_v5   ;;  %v6044_v14 = vpop.permute.xlu1 %693  ;;  %4926 = vset.pattern.permute.xlu0 %v8433_v15 }
 0x174   : > { %8580 = vst [vmem:[#allocation35_spill] sm:$0xff] %v6044_v14  ;;  %1381 = vperm.xlu0 %4926, %v5836_v3   ;;  %v8445_v14 = vmov 43  }
 0x177   : > { %4903 = vset.pattern.permute.xlu1 %v5453_v38  ;;  %v8434_v38 = vmov 38  }
 0x178   : > { %1037 = vperm.xlu1 %4903, %v5844_v6   ;;  %v6052_v17 = vpop.permute.xlu1 %714  ;;  %1393 = vperm.xlu0 %4926, %v5841_v5  }
 0x17c   : > { %1041 = vperm.xlu1 %4903, %v5833_v2   ;;  %v6056_v18 = vpop.permute.xlu1 %722  ;;  %4929 = vset.pattern.permute.xlu0 %v8432_v19  ;;  %v8436_v19 = vmov 39  }
 0x17d   : > { %8581 = vst [vmem:[#allocation36_spill] sm:$0xff] %v6056_v18  ;;  %1414 = vperm.xlu0 %4929, %v5844_v6  }
 0x180   : > { %4904 = vset.pattern.permute.xlu1 %v5454_v42  ;;  %v6063_v21 = vpop.permute.xlu1 %726  ;;  %v6087_v42 = vpop.permute.xlu0 %523 }
 0x181   : > { %1062 = vperm.xlu1 %4904, %v5836_v3   ;;  %4930 = vset.pattern.permute.xlu0 %v8431_v23 }
 0x182   : > { %1439 = vperm.xlu0 %4930, %v5836_v3  }
 0x184   : > { %v6098_v15 = vpop.permute.xlu0 %544 }
 0x185   : > { %1070 = vperm.xlu1 %4904, %v5833_v2   ;;  %v6067_v22 = vpop.permute.xlu1 %747 }
 0x186   : > { %1451 = vperm.xlu0 %4930, %v5841_v5  }
 0x189   : > { %1074 = vperm.xlu1 %4904, %v5841_v5   ;;  %v6074_v28 = vpop.permute.xlu1 %751 }
 0x18a   : > { %8582 = vst [vmem:[#allocation37_spill] sm:$0xff] %v6074_v28  ;;  %4933 = vset.pattern.permute.xlu0 %v8434_v38 }
 0x18b   : > { %1472 = vperm.xlu0 %4933, %v5844_v6  }
 0x18d   : > { %4907 = vset.pattern.permute.xlu1 %v5455_v44 }
 0x18e   : > { %1095 = vperm.xlu1 %4907, %v5844_v6   ;;  %v6081_v33 = vpop.permute.xlu1 %772 }
 0x18f   : > { %8583 = vst [vmem:[#allocation38_spill] sm:$0xff] %v6081_v33  ;;  %4934 = vset.pattern.permute.xlu0 %v8436_v19 }
 0x190   : > { %1497 = vperm.xlu0 %4934, %v5836_v3  }
 0x192   : > { %1099 = vperm.xlu1 %4907, %v5833_v2   ;;  %v6084_v36 = vpop.permute.xlu1 %780 }
 0x193   : > { %8584 = vst [vmem:[#allocation39_spill] sm:$0xff] %v6084_v36  ;;  %v8444_v36 = vmov 42  }
 0x196   : > { %4908 = vset.pattern.permute.xlu1 %v5456_v47  ;;  %v6091_v23 = vpop.permute.xlu1 %784  ;;  %v6104_v47 = vpop.permute.xlu0 %569  ;;  %1509 = vperm.xlu0 %4934, %v5841_v5  }
 0x197   : > { %1120 = vperm.xlu1 %4908, %v5836_v3  }
 0x19a   : > { %4937 = vset.pattern.permute.xlu0 %v8442_v4  ;;  %v6115_v0 = vpop.permute.xlu0 %581 }
 0x19b   : > { %1128 = vperm.xlu1 %4908, %v5833_v2   ;;  %v6095_v44 = vpop.permute.xlu1 %805  ;;  %1530 = vperm.xlu0 %4937, %v5844_v6  }
 0x19c   : > { %8585 = vst [vmem:[#allocation40_spill] sm:$0xff] %v6095_v44  ;;  %v8504_v44 = vmov 95  }
 0x19e   : > { %v6126_v54 = vpop.permute.xlu0 %602 }
 0x19f   : > { %1132 = vperm.xlu1 %4908, %v5841_v5   ;;  %v6102_v38 = vpop.permute.xlu1 %809  ;;  %4938 = vset.pattern.permute.xlu0 %v8443_v57 }
 0x1a0   : > { %8586 = vst [vmem:[#allocation41_spill] sm:$0xff] %v6102_v38  ;;  %1555 = vperm.xlu0 %4938, %v5836_v3  }
 0x1a3   : > { %4911 = vset.pattern.permute.xlu1 %v5457_v49 }
 0x1a4   : > { %1153 = vperm.xlu1 %4911, %v5844_v6   ;;  %v6109_v11 = vpop.permute.xlu1 %830 }
 0x1a5   : > { %8587 = vst [vmem:[#allocation42_spill] sm:$0xff] %v6109_v11 }
 0x1a8   : > { %1157 = vperm.xlu1 %4911, %v5833_v2   ;;  %v6112_v19 = vpop.permute.xlu1 %838 }
 0x1a9   : > { %8588 = vst [vmem:[#allocation43_spill] sm:$0xff] %v6112_v19  ;;  %v8592_v19 = vmov 29  }
 0x1ac   : > { %4912 = vset.pattern.permute.xlu1 %v5458_v52  ;;  %v6119_v59 = vpop.permute.xlu1 %842  ;;  %v6132_v52 = vpop.permute.xlu0 %627  ;;  %1567 = vperm.xlu0 %4938, %v5841_v5  }
 0x1ad   : > { %8589 = vst [vmem:[#allocation44_spill] sm:$0xff] %v6119_v59  ;;  %1178 = vperm.xlu1 %4912, %v5836_v3  }
 0x1b0   : > { %4941 = vset.pattern.permute.xlu0 %v8444_v36  ;;  %v6143_v28 = vpop.permute.xlu0 %639 }
 0x1b1   : > { %1186 = vperm.xlu1 %4912, %v5833_v2   ;;  %v6123_v49 = vpop.permute.xlu1 %863  ;;  %1588 = vperm.xlu0 %4941, %v5844_v6  }
 0x1b2   : > { %8590 = vst [vmem:[#allocation45_spill] sm:$0xff] %v6123_v49 }
 0x1b5   : > { %1190 = vperm.xlu1 %4912, %v5841_v5   ;;  %v6130_v4 = vpop.permute.xlu1 %867  ;;  %4942 = vset.pattern.permute.xlu0 %v8445_v14 }
 0x1b6   : > { %8591 = vst [vmem:[#allocation46_spill] sm:$0xff] %v6130_v4  ;;  %v8595_v4 = vmov 30  }
 0x1b9   : > { %4915 = vset.pattern.permute.xlu1 %v8592_v19 }
 0x1ba   : > { %1211 = vperm.xlu1 %4915, %v5844_v6   ;;  %v6137_v38 = vpop.permute.xlu1 %888 }
 0x1bb   : > { %8593 = vst [vmem:[#allocation47_spill] sm:$0xff] %v6137_v38 }
 0x1be   : > { %1215 = vperm.xlu1 %4915, %v5833_v2   ;;  %v6140_v57 = vpop.permute.xlu1 %896 }
 0x1bf   : > { %8594 = vst [vmem:[#allocation48_spill] sm:$0xff] %v6140_v57  ;;  %v6154_v57 = vpop.permute.xlu0 %660  ;;  %1613 = vperm.xlu0 %4942, %v5836_v3  }
 0x1c2   : > { %4916 = vset.pattern.permute.xlu1 %v8595_v4  ;;  %v6147_v18 = vpop.permute.xlu1 %900 }
 0x1c3   : > { %8596 = vst [vmem:[#allocation49_spill] sm:$0xff] %v6147_v18  ;;  %1236 = vperm.xlu1 %4916, %v5836_v3   ;;  %v6160_v4 = vpop.permute.xlu0 %685  ;;  %1625 = vperm.xlu0 %4942, %v5841_v5  }
 0x1c7   : > { %1244 = vperm.xlu1 %4916, %v5833_v2   ;;  %v6151_v19 = vpop.permute.xlu1 %921  ;;  %4945 = vset.pattern.permute.xlu0 %v8446_v56  ;;  %v6171_v53 = vpop.permute.xlu0 %697 }
 0x1c8   : > { %8597 = vst [vmem:[#allocation50_spill] sm:$0xff] %v6151_v19  ;;  %1646 = vperm.xlu0 %4945, %v5844_v6  }
 0x1cb   : > { %1248 = vperm.xlu1 %4916, %v5841_v5   ;;  %v6158_v36 = vpop.permute.xlu1 %925 }
 0x1cc   : > { %8598 = vst [vmem:[#allocation51_spill] sm:$0xff] %v6158_v36  ;;  %v8602_v36 = vmov 32   ;;  %4946 = vset.pattern.permute.xlu0 %v8447_v45 }
 0x1cf   : > { %4919 = vset.pattern.permute.xlu1 %v8599_v8 }
 0x1d0   : > { %1269 = vperm.xlu1 %4919, %v5844_v6   ;;  %v6165_v62 = vpop.permute.xlu1 %946 }
 0x1d1   : > { %8600 = vst [vmem:[#allocation52_spill] sm:$0xff] %v6165_v62  ;;  %v8615_v62 = vmov 35  }
 0x1d4   : > { %1273 = vperm.xlu1 %4919, %v5833_v2   ;;  %v6168_v14 = vpop.permute.xlu1 %954 }
 0x1d5   : > { %8601 = vst [vmem:[#allocation53_spill] sm:$0xff] %v6168_v14  ;;  %v6182_v14 = vpop.permute.xlu0 %718  ;;  %1671 = vperm.xlu0 %4946, %v5836_v3  }
 0x1d8   : > { %4920 = vset.pattern.permute.xlu1 %v8602_v36  ;;  %v6175_v48 = vpop.permute.xlu1 %958 }
 0x1d9   : > { %8603 = vst [vmem:[#allocation54_spill] sm:$0xff] %v6175_v48  ;;  %1294 = vperm.xlu1 %4920, %v5836_v3   ;;  %v6188_v36 = vpop.permute.xlu0 %743  ;;  %1683 = vperm.xlu0 %4946, %v5841_v5   ;;  %v8452_v48 = vmov 50  }
 0x1da   : > { %8606 = vst [vmem:[#allocation57_spill] sm:$0xff] %v6188_v36  ;;  %v4411_v36 = vld [vmem:[%s5813_s3 + $0x3] ss:$0 sm:$0xff] }
 0x1dd   : > { %1302 = vperm.xlu1 %4920, %v5833_v2   ;;  %v6179_v8 = vpop.permute.xlu1 %979  ;;  %4949 = vset.pattern.permute.xlu0 %v8448_v32  ;;  %v6199_v29 = vpop.permute.xlu0 %755 }
 0x1de   : > { %8604 = vst [vmem:[#allocation55_spill] sm:$0xff] %v6179_v8  ;;  %1704 = vperm.xlu0 %4949, %v5844_v6  }
 0x1e1   : > { %1306 = vperm.xlu1 %4920, %v5841_v5   ;;  %v6186_v56 = vpop.permute.xlu1 %983 }
 0x1e2   : > { %8605 = vst [vmem:[#allocation56_spill] sm:$0xff] %v6186_v56  ;;  %v8610_v56 = vmov 34  }
 0x1e5   : > { %4923 = vset.pattern.permute.xlu1 %v8607_v40 }
 0x1e6   : > { %1327 = vperm.xlu1 %4923, %v5844_v6   ;;  %v6193_v37 = vpop.permute.xlu1 %1004 }
 0x1e7   : > { %8608 = vst [vmem:[#allocation58_spill] sm:$0xff] %v6193_v37  ;;  %v8449_v37 = vmov 47  }
 0x1e8   : > { %4950 = vset.pattern.permute.xlu0 %v8449_v37 }
 0x1ea   : > { %1331 = vperm.xlu1 %4923, %v5833_v2   ;;  %v6196_v45 = vpop.permute.xlu1 %1012 }
 0x1eb   : > { %8609 = vst [vmem:[#allocation59_spill] sm:$0xff] %v6196_v45  ;;  %v6210_v45 = vpop.permute.xlu0 %776  ;;  %1729 = vperm.xlu0 %4950, %v5836_v3  }
 0x1ee   : > { %4924 = vset.pattern.permute.xlu1 %v8610_v56  ;;  %v6203_v24 = vpop.permute.xlu1 %1016 }
 0x1ef   : > { %8611 = vst [vmem:[#allocation60_spill] sm:$0xff] %v6203_v24  ;;  %1352 = vperm.xlu1 %4924, %v5836_v3   ;;  %v6216_v56 = vpop.permute.xlu0 %801  ;;  %1741 = vperm.xlu0 %4950, %v5841_v5   ;;  %v8450_v24 = vmov 48  }
 0x1f0   : > { %8614 = vst [vmem:[#allocation63_spill] sm:$0xff] %v6216_v56  ;;  %v4409_v56 = vld [vmem:[%s5813_s3 + $0x1] ss:$0 sm:$0xff] }
 0x1f3   : > { %1360 = vperm.xlu1 %4924, %v5833_v2   ;;  %v6207_v40 = vpop.permute.xlu1 %1037  ;;  %4953 = vset.pattern.permute.xlu0 %v8450_v24  ;;  %v6227_v8 = vpop.permute.xlu0 %813 }
 0x1f4   : > { %8612 = vst [vmem:[#allocation61_spill] sm:$0xff] %v6207_v40  ;;  %1762 = vperm.xlu0 %4953, %v5844_v6  }
 0x1f7   : > { %1364 = vperm.xlu1 %4924, %v5841_v5   ;;  %v6214_v32 = vpop.permute.xlu1 %1041 }
 0x1f8   : > { %8613 = vst [vmem:[#allocation62_spill] sm:$0xff] %v6214_v32  ;;  %v8618_v32 = vmov 36  }
 0x1fb   : > { %4927 = vset.pattern.permute.xlu1 %v8615_v62 }
 0x1fc   : > { %1385 = vperm.xlu1 %4927, %v5844_v6   ;;  %v6221_v40 = vpop.permute.xlu1 %1062 }
 0x1fd   : > { %8616 = vst [vmem:[#allocation64_spill] sm:$0xff] %v6221_v40  ;;  %v8451_v40 = vmov 49  }
 0x1fe   : > { %4954 = vset.pattern.permute.xlu0 %v8451_v40 }
 0x200   : > { %1389 = vperm.xlu1 %4927, %v5833_v2   ;;  %v6224_v37 = vpop.permute.xlu1 %1070 }
 0x201   : > { %8617 = vst [vmem:[#allocation65_spill] sm:$0xff] %v6224_v37  ;;  %v6238_v37 = vpop.permute.xlu0 %834  ;;  %1787 = vperm.xlu0 %4954, %v5836_v3  }
 0x202   : > { %8621 = vst [vmem:[#allocation68_spill] sm:$0xff] %v6238_v37 }
 0x204   : > { %4928 = vset.pattern.permute.xlu1 %v8618_v32  ;;  %v6231_v38 = vpop.permute.xlu1 %1074 }
 0x205   : > { %8619 = vst [vmem:[#allocation66_spill] sm:$0xff] %v6231_v38  ;;  %1410 = vperm.xlu1 %4928, %v5836_v3   ;;  %v6244_v32 = vpop.permute.xlu0 %859  ;;  %1799 = vperm.xlu0 %4954, %v5841_v5   ;;  %v8624_v38 = vmov 37  }
 0x206   : > { %8623 = vst [vmem:[#allocation70_spill] sm:$0xff] %v6244_v32 }
 0x209   : > { %1418 = vperm.xlu1 %4928, %v5833_v2   ;;  %v6235_v62 = vpop.permute.xlu1 %1095  ;;  %4957 = vset.pattern.permute.xlu0 %v8452_v48  ;;  %v6255_v19 = vpop.permute.xlu0 %871 }
 0x20a   : > { %8620 = vst [vmem:[#allocation67_spill] sm:$0xff] %v6235_v62  ;;  %8627 = vst [vmem:[#allocation73_spill] sm:$0xff] %v6255_v19  ;;  %1820 = vperm.xlu0 %4957, %v5844_v6   ;;  %v417_v19 = vmul.f32 %v4409_v56, %v6034_v10 }
 0x20d   : > { %1422 = vperm.xlu1 %4928, %v5841_v5   ;;  %v6242_v24 = vpop.permute.xlu1 %1099 }
 0x20e   : > { %8622 = vst [vmem:[#allocation69_spill] sm:$0xff] %v6242_v24  ;;  %v8628_v24 = vmov 38  }
 0x211   : > { %4931 = vset.pattern.permute.xlu1 %v8624_v38 }
 0x212   : > { %1443 = vperm.xlu1 %4931, %v5844_v6   ;;  %v6249_v62 = vpop.permute.xlu1 %1120 }
 0x213   : > { %8625 = vst [vmem:[#allocation71_spill] sm:$0xff] %v6249_v62  ;;  %v8453_v62 = vmov 51  }
 0x214   : > { %4958 = vset.pattern.permute.xlu0 %v8453_v62 }
 0x216   : > { %1447 = vperm.xlu1 %4931, %v5833_v2   ;;  %v6252_v40 = vpop.permute.xlu1 %1128 }
 0x217   : > { %8626 = vst [vmem:[#allocation72_spill] sm:$0xff] %v6252_v40  ;;  %v6266_v40 = vpop.permute.xlu0 %892  ;;  %1845 = vperm.xlu0 %4958, %v5836_v3  }
 0x218   : > { %8631 = vst [vmem:[#allocation76_spill] sm:$0xff] %v6266_v40  ;;  %v8454_v40 = vmov 52  }
 0x21a   : > { %4932 = vset.pattern.permute.xlu1 %v8628_v24  ;;  %v6259_v32 = vpop.permute.xlu1 %1132 }
 0x21b   : > { %8629 = vst [vmem:[#allocation74_spill] sm:$0xff] %v6259_v32  ;;  %1468 = vperm.xlu1 %4932, %v5836_v3   ;;  %v6272_v24 = vpop.permute.xlu0 %917  ;;  %1857 = vperm.xlu0 %4958, %v5841_v5   ;;  %v8634_v32 = vmov 39  }
 0x21c   : > { %8633 = vst [vmem:[#allocation78_spill] sm:$0xff] %v6272_v24 }
 0x21f   : > { %1476 = vperm.xlu1 %4932, %v5833_v2   ;;  %v6263_v38 = vpop.permute.xlu1 %1153  ;;  %4961 = vset.pattern.permute.xlu0 %v8454_v40  ;;  %v6283_v11 = vpop.permute.xlu0 %929 }
 0x220   : > { %8630 = vst [vmem:[#allocation75_spill] sm:$0xff] %v6263_v38  ;;  %8637 = vst [vmem:[#allocation81_spill] sm:$0xff] %v6283_v11  ;;  %1878 = vperm.xlu0 %4961, %v5844_v6  }
 0x223   : > { %1480 = vperm.xlu1 %4932, %v5841_v5   ;;  %v6270_v48 = vpop.permute.xlu1 %1157 }
 0x224   : > { %8632 = vst [vmem:[#allocation77_spill] sm:$0xff] %v6270_v48  ;;  %v8638_v48 = vmov 40  }
 0x227   : > { %4935 = vset.pattern.permute.xlu1 %v8634_v32 }
 0x228   : > { %1501 = vperm.xlu1 %4935, %v5844_v6   ;;  %v6277_v38 = vpop.permute.xlu1 %1178 }
 0x229   : > { %8635 = vst [vmem:[#allocation79_spill] sm:$0xff] %v6277_v38  ;;  %v8455_v38 = vmov 53  }
 0x22a   : > { %4962 = vset.pattern.permute.xlu0 %v8455_v38 }
 0x22c   : > { %1505 = vperm.xlu1 %4935, %v5833_v2   ;;  %v6280_v62 = vpop.permute.xlu1 %1186 }
 0x22d   : > { %8636 = vst [vmem:[#allocation80_spill] sm:$0xff] %v6280_v62  ;;  %v6294_v62 = vpop.permute.xlu0 %950  ;;  %1903 = vperm.xlu0 %4962, %v5836_v3  }
 0x22e   : > { %8641 = vst [vmem:[#allocation84_spill] sm:$0xff] %v6294_v62  ;;  %v8456_v62 = vmov 54  }
 0x230   : > { %4936 = vset.pattern.permute.xlu1 %v8638_v48  ;;  %v6287_v24 = vpop.permute.xlu1 %1190 }
 0x231   : > { %8639 = vst [vmem:[#allocation82_spill] sm:$0xff] %v6287_v24  ;;  %1526 = vperm.xlu1 %4936, %v5836_v3   ;;  %v6300_v48 = vpop.permute.xlu0 %975  ;;  %1915 = vperm.xlu0 %4962, %v5841_v5   ;;  %v8644_v24 = vmov 41  }
 0x232   : > { %8643 = vst [vmem:[#allocation86_spill] sm:$0xff] %v6300_v48 }
 0x235   : > { %1534 = vperm.xlu1 %4936, %v5833_v2   ;;  %v6291_v32 = vpop.permute.xlu1 %1211  ;;  %4965 = vset.pattern.permute.xlu0 %v8456_v62  ;;  %v6311_v11 = vpop.permute.xlu0 %987 }
 0x236   : > { %8640 = vst [vmem:[#allocation83_spill] sm:$0xff] %v6291_v32  ;;  %8647 = vst [vmem:[#allocation89_spill] sm:$0xff] %v6311_v11  ;;  %1936 = vperm.xlu0 %4965, %v5844_v6  }
 0x239   : > { %1538 = vperm.xlu1 %4936, %v5841_v5   ;;  %v6298_v40 = vpop.permute.xlu1 %1215 }
 0x23a   : > { %8642 = vst [vmem:[#allocation85_spill] sm:$0xff] %v6298_v40  ;;  %v8648_v40 = vmov 42  }
 0x23d   : > { %4939 = vset.pattern.permute.xlu1 %v8644_v24 }
 0x23e   : > { %1559 = vperm.xlu1 %4939, %v5844_v6   ;;  %v6305_v32 = vpop.permute.xlu1 %1236 }
 0x23f   : > { %8645 = vst [vmem:[#allocation87_spill] sm:$0xff] %v6305_v32  ;;  %v8457_v32 = vmov 55  }
 0x240   : > { %4966 = vset.pattern.permute.xlu0 %v8457_v32 }
 0x242   : > { %1563 = vperm.xlu1 %4939, %v5833_v2   ;;  %v6308_v38 = vpop.permute.xlu1 %1244 }
 0x243   : > { %8646 = vst [vmem:[#allocation88_spill] sm:$0xff] %v6308_v38  ;;  %v6322_v38 = vpop.permute.xlu0 %1008  ;;  %1961 = vperm.xlu0 %4966, %v5836_v3  }
 0x244   : > { %8651 = vst [vmem:[#allocation92_spill] sm:$0xff] %v6322_v38  ;;  %v8458_v38 = vmov 56  }
 0x246   : > { %4940 = vset.pattern.permute.xlu1 %v8648_v40  ;;  %v6315_v48 = vpop.permute.xlu1 %1248 }
 0x247   : > { %8649 = vst [vmem:[#allocation90_spill] sm:$0xff] %v6315_v48  ;;  %1584 = vperm.xlu1 %4940, %v5836_v3   ;;  %v6328_v40 = vpop.permute.xlu0 %1033  ;;  %1973 = vperm.xlu0 %4966, %v5841_v5   ;;  %v8654_v48 = vmov 43  }
 0x248   : > { %8653 = vst [vmem:[#allocation94_spill] sm:$0xff] %v6328_v40 }
 0x24b   : > { %1592 = vperm.xlu1 %4940, %v5833_v2   ;;  %v6319_v24 = vpop.permute.xlu1 %1269  ;;  %4969 = vset.pattern.permute.xlu0 %v8458_v38  ;;  %v6339_v11 = vpop.permute.xlu0 %1045 }
 0x24c   : > { %8650 = vst [vmem:[#allocation91_spill] sm:$0xff] %v6319_v24  ;;  %8657 = vst [vmem:[#allocation97_spill] sm:$0xff] %v6339_v11  ;;  %1994 = vperm.xlu0 %4969, %v5844_v6  }
 0x24f   : > { %1596 = vperm.xlu1 %4940, %v5841_v5   ;;  %v6326_v62 = vpop.permute.xlu1 %1273 }
 0x250   : > { %8652 = vst [vmem:[#allocation93_spill] sm:$0xff] %v6326_v62  ;;  %v8658_v62 = vmov 44  }
 0x253   : > { %4943 = vset.pattern.permute.xlu1 %v8654_v48 }
 0x254   : > { %1617 = vperm.xlu1 %4943, %v5844_v6   ;;  %v6333_v24 = vpop.permute.xlu1 %1294 }
 0x255   : > { %8655 = vst [vmem:[#allocation95_spill] sm:$0xff] %v6333_v24  ;;  %v8459_v24 = vmov 57  }
 0x256   : > { %4970 = vset.pattern.permute.xlu0 %v8459_v24 }
 0x258   : > { %1621 = vperm.xlu1 %4943, %v5833_v2   ;;  %v6336_v32 = vpop.permute.xlu1 %1302 }
 0x259   : > { %8656 = vst [vmem:[#allocation96_spill] sm:$0xff] %v6336_v32  ;;  %v6350_v32 = vpop.permute.xlu0 %1066  ;;  %2019 = vperm.xlu0 %4970, %v5836_v3  }
 0x25a   : > { %8661 = vst [vmem:[#allocation100_spill] sm:$0xff] %v6350_v32  ;;  %v8460_v32 = vmov 58  }
 0x25c   : > { %4944 = vset.pattern.permute.xlu1 %v8658_v62  ;;  %v6343_v40 = vpop.permute.xlu1 %1306 }
 0x25d   : > { %8659 = vst [vmem:[#allocation98_spill] sm:$0xff] %v6343_v40  ;;  %1642 = vperm.xlu1 %4944, %v5836_v3   ;;  %v6356_v62 = vpop.permute.xlu0 %1091  ;;  %2031 = vperm.xlu0 %4970, %v5841_v5   ;;  %v8664_v40 = vmov 45  }
 0x25e   : > { %8663 = vst [vmem:[#allocation102_spill] sm:$0xff] %v6356_v62 }
 0x261   : > { %1650 = vperm.xlu1 %4944, %v5833_v2   ;;  %v6347_v48 = vpop.permute.xlu1 %1327  ;;  %4973 = vset.pattern.permute.xlu0 %v8460_v32  ;;  %v6367_v11 = vpop.permute.xlu0 %1103 }
 0x262   : > { %8660 = vst [vmem:[#allocation99_spill] sm:$0xff] %v6347_v48  ;;  %8667 = vst [vmem:[#allocation105_spill] sm:$0xff] %v6367_v11  ;;  %2052 = vperm.xlu0 %4973, %v5844_v6   ;;  %v8465_v11 = vmov 63  }
 0x265   : > { %1654 = vperm.xlu1 %4944, %v5841_v5   ;;  %v6354_v38 = vpop.permute.xlu1 %1331 }
 0x266   : > { %8662 = vst [vmem:[#allocation101_spill] sm:$0xff] %v6354_v38  ;;  %v8668_v38 = vmov 46  }
 0x269   : > { %4947 = vset.pattern.permute.xlu1 %v8664_v40 }
 0x26a   : > { %1675 = vperm.xlu1 %4947, %v5844_v6   ;;  %v6361_v48 = vpop.permute.xlu1 %1352 }
 0x26b   : > { %8665 = vst [vmem:[#allocation103_spill] sm:$0xff] %v6361_v48  ;;  %v8461_v48 = vmov 59  }
 0x26c   : > { %4974 = vset.pattern.permute.xlu0 %v8461_v48  ;;  %v6392_v48 = vld [vmem:[%s5820_s16 + $0x10] sm:$0xff] }
 0x26e   : > { %1679 = vperm.xlu1 %4947, %v5833_v2   ;;  %v6364_v24 = vpop.permute.xlu1 %1360 }
 0x26f   : > { %8666 = vst [vmem:[#allocation104_spill] sm:$0xff] %v6364_v24  ;;  %v6378_v24 = vpop.permute.xlu0 %1124  ;;  %2077 = vperm.xlu0 %4974, %v5836_v3  }
 0x270   : > { %8671 = vst [vmem:[#allocation108_spill] sm:$0xff] %v6378_v24  ;;  %v8464_v24 = vmov 62  }
 0x272   : > { %4948 = vset.pattern.permute.xlu1 %v8668_v38  ;;  %v6371_v62 = vpop.permute.xlu1 %1364 }
 0x273   : > { %8669 = vst [vmem:[#allocation106_spill] sm:$0xff] %v6371_v62  ;;  %1700 = vperm.xlu1 %4948, %v5836_v3   ;;  %v6384_v32 = vpop.permute.xlu0 %1149  ;;  %2089 = vperm.xlu0 %4974, %v5841_v5   ;;  %v8674_v62 = vmov 47  }
 0x274   : > { %8673 = vst [vmem:[#allocation110_spill] sm:$0xff] %v6384_v32 }
 0x277   : > { %1708 = vperm.xlu1 %4948, %v5833_v2   ;;  %v6375_v40 = vpop.permute.xlu1 %1385 }
 0x278   : > { %8670 = vst [vmem:[#allocation107_spill] sm:$0xff] %v6375_v40  ;;  %v8462_v40 = vmov 60  }
 0x279   : > { %4977 = vset.pattern.permute.xlu0 %v8462_v40 }
 0x27b   : > { %1712 = vperm.xlu1 %4948, %v5841_v5   ;;  %v6382_v38 = vpop.permute.xlu1 %1389  ;;  %v8678_v5 = vmov 48  }
 0x27c   : > { %8672 = vst [vmem:[#allocation109_spill] sm:$0xff] %v6382_v38  ;;  %v6398_v38 = vpop.permute.xlu0 %1161  ;;  %2110 = vperm.xlu0 %4977, %v5844_v6  }
 0x27d   : > { %8677 = vst [vmem:[#allocation113_spill] sm:$0xff] %v6398_v38  ;;  %v8684_v38 = vmov 49  }
 0x27f   : > { %4951 = vset.pattern.permute.xlu1 %v8674_v62 }
 0x280   : > { %1733 = vperm.xlu1 %4951, %v5844_v6   ;;  %v6389_v2 = vpop.permute.xlu1 %1410  ;;  %v6412_v40 = vpop.permute.xlu0 %1182  ;;  %v6416_v6 = vld [vmem:[%s5820_s16 + $0x18] sm:$0xff] }
 0x281   : > { %8675 = vst [vmem:[#allocation111_spill] sm:$0xff] %v6389_v2  ;;  %v6405_v2 = vld [vmem:[%s5820_s16] sm:$0xff]  ;;  %8681 = vst [vmem:[#allocation116_spill] sm:$0xff] %v6412_v40 }
 0x284   : > { %1737 = vperm.xlu1 %4951, %v6392_v48   ;;  %v6395_v3 = vpop.permute.xlu1 %1418 }
 0x285   : > { %8676 = vst [vmem:[#allocation112_spill] sm:$0xff] %v6395_v3  ;;  %v8463_v3 = vmov 61  }
 0x286   : > { %4978 = vset.pattern.permute.xlu0 %v8463_v3 }
 0x287   : > { %2135 = vperm.xlu0 %4978, %v6405_v2  }
 0x288   : > { %4952 = vset.pattern.permute.xlu1 %v8678_v5  ;;  %v6402_v62 = vpop.permute.xlu1 %1422 }
 0x289   : > { %8679 = vst [vmem:[#allocation114_spill] sm:$0xff] %v6402_v62  ;;  %1758 = vperm.xlu1 %4952, %v6405_v2   ;;  %v6421_v62 = vpop.permute.xlu0 %1207 }
 0x28a   : > { %8683 = vst [vmem:[#allocation118_spill] sm:$0xff] %v6421_v62  ;;  %v8688_v62 = vmov 50  }
 0x28b   : > { %2147 = vperm.xlu0 %4978, %v6416_v6  }
 0x28d   : > { %1766 = vperm.xlu1 %4952, %v6392_v48   ;;  %v6409_v32 = vpop.permute.xlu1 %1443 }
 0x28e   : > { %8680 = vst [vmem:[#allocation115_spill] sm:$0xff] %v6409_v32  ;;  %v6426_v32 = vld [vmem:[%s5820_s16 + $0x8] sm:$0xff] }
 0x28f   : > { %4981 = vset.pattern.permute.xlu0 %v8464_v24 }
 0x291   : > { %1770 = vperm.xlu1 %4952, %v6416_v6   ;;  %v6419_v5 = vpop.permute.xlu1 %1447 }
 0x292   : > { %8682 = vst [vmem:[#allocation117_spill] sm:$0xff] %v6419_v5  ;;  %v6435_v5 = vpop.permute.xlu0 %1219  ;;  %2168 = vperm.xlu0 %4981, %v6426_v32  }
 0x293   : > { %8687 = vst [vmem:[#allocation121_spill] sm:$0xff] %v6435_v5 }
 0x295   : > { %4955 = vset.pattern.permute.xlu1 %v8684_v38 }
 0x296   : > { %1791 = vperm.xlu1 %4955, %v6426_v32   ;;  %v6429_v3 = vpop.permute.xlu1 %1468  ;;  %4982 = vset.pattern.permute.xlu0 %v8465_v11 }
 0x297   : > { %8685 = vst [vmem:[#allocation119_spill] sm:$0xff] %v6429_v3 }
 0x29a   : > { %1795 = vperm.xlu1 %4955, %v6392_v48   ;;  %v6432_v40 = vpop.permute.xlu1 %1476 }
 0x29b   : > { %8686 = vst [vmem:[#allocation120_spill] sm:$0xff] %v6432_v40  ;;  %v6446_v40 = vpop.permute.xlu0 %1240  ;;  %2193 = vperm.xlu0 %4982, %v6405_v2  }
 0x29c   : > { %8691 = vst [vmem:[#allocation124_spill] sm:$0xff] %v6446_v40  ;;  %v8466_v40 = vmov 64  }
 0x29e   : > { %4956 = vset.pattern.permute.xlu1 %v8688_v62  ;;  %v6439_v38 = vpop.permute.xlu1 %1480 }
 0x29f   : > { %8689 = vst [vmem:[#allocation122_spill] sm:$0xff] %v6439_v38  ;;  %1816 = vperm.xlu1 %4956, %v6405_v2   ;;  %v6452_v62 = vpop.permute.xlu0 %1265  ;;  %2205 = vperm.xlu0 %4982, %v6416_v6   ;;  %v8694_v38 = vmov 51  }
 0x2a0   : > { %8693 = vst [vmem:[#allocation126_spill] sm:$0xff] %v6452_v62 }
 0x2a3   : > { %1824 = vperm.xlu1 %4956, %v6392_v48   ;;  %v6443_v3 = vpop.permute.xlu1 %1501  ;;  %4985 = vset.pattern.permute.xlu0 %v8466_v40  ;;  %v6463_v5 = vpop.permute.xlu0 %1277 }
 0x2a4   : > { %8690 = vst [vmem:[#allocation123_spill] sm:$0xff] %v6443_v3  ;;  %8697 = vst [vmem:[#allocation129_spill] sm:$0xff] %v6463_v5  ;;  %2226 = vperm.xlu0 %4985, %v6426_v32  }
 0x2a7   : > { %1828 = vperm.xlu1 %4956, %v6416_v6   ;;  %v6450_v24 = vpop.permute.xlu1 %1505 }
 0x2a8   : > { %8692 = vst [vmem:[#allocation125_spill] sm:$0xff] %v6450_v24  ;;  %v8698_v24 = vmov 52  }
 0x2ab   : > { %4959 = vset.pattern.permute.xlu1 %v8694_v38 }
 0x2ac   : > { %1849 = vperm.xlu1 %4959, %v6426_v32   ;;  %v6457_v3 = vpop.permute.xlu1 %1526 }
 0x2ad   : > { %8695 = vst [vmem:[#allocation127_spill] sm:$0xff] %v6457_v3  ;;  %v8467_v3 = vmov 65  }
 0x2ae   : > { %4986 = vset.pattern.permute.xlu0 %v8467_v3 }
 0x2b0   : > { %1853 = vperm.xlu1 %4959, %v6392_v48   ;;  %v6460_v11 = vpop.permute.xlu1 %1534 }
 0x2b1   : > { %8696 = vst [vmem:[#allocation128_spill] sm:$0xff] %v6460_v11  ;;  %v6474_v11 = vpop.permute.xlu0 %1298  ;;  %2251 = vperm.xlu0 %4986, %v6405_v2  }
 0x2b2   : > { %8701 = vst [vmem:[#allocation132_spill] sm:$0xff] %v6474_v11  ;;  %v8468_v11 = vmov 66  }
 0x2b4   : > { %4960 = vset.pattern.permute.xlu1 %v8698_v24  ;;  %v6467_v62 = vpop.permute.xlu1 %1538 }
 0x2b5   : > { %8699 = vst [vmem:[#allocation130_spill] sm:$0xff] %v6467_v62  ;;  %1874 = vperm.xlu1 %4960, %v6405_v2   ;;  %v6480_v24 = vpop.permute.xlu0 %1323  ;;  %2263 = vperm.xlu0 %4986, %v6416_v6   ;;  %v8704_v62 = vmov 53  }
 0x2b6   : > { %8703 = vst [vmem:[#allocation134_spill] sm:$0xff] %v6480_v24 }
 0x2b9   : > { %1882 = vperm.xlu1 %4960, %v6392_v48   ;;  %v6471_v38 = vpop.permute.xlu1 %1559  ;;  %4989 = vset.pattern.permute.xlu0 %v8468_v11  ;;  %v6491_v5 = vpop.permute.xlu0 %1335 }
 0x2ba   : > { %8700 = vst [vmem:[#allocation131_spill] sm:$0xff] %v6471_v38  ;;  %8707 = vst [vmem:[#allocation137_spill] sm:$0xff] %v6491_v5  ;;  %2284 = vperm.xlu0 %4989, %v6426_v32  }
 0x2bd   : > { %1886 = vperm.xlu1 %4960, %v6416_v6   ;;  %v6478_v40 = vpop.permute.xlu1 %1563 }
 0x2be   : > { %8702 = vst [vmem:[#allocation133_spill] sm:$0xff] %v6478_v40  ;;  %v8708_v40 = vmov 54  }
 0x2c1   : > { %4963 = vset.pattern.permute.xlu1 %v8704_v62 }
 0x2c2   : > { %1907 = vperm.xlu1 %4963, %v6426_v32   ;;  %v6485_v38 = vpop.permute.xlu1 %1584 }
 0x2c3   : > { %8705 = vst [vmem:[#allocation135_spill] sm:$0xff] %v6485_v38  ;;  %v8469_v38 = vmov 67  }
 0x2c4   : > { %4990 = vset.pattern.permute.xlu0 %v8469_v38 }
 0x2c6   : > { %1911 = vperm.xlu1 %4963, %v6392_v48   ;;  %v6488_v3 = vpop.permute.xlu1 %1592 }
 0x2c7   : > { %8706 = vst [vmem:[#allocation136_spill] sm:$0xff] %v6488_v3  ;;  %v6502_v3 = vpop.permute.xlu0 %1356  ;;  %2309 = vperm.xlu0 %4990, %v6405_v2  }
 0x2c8   : > { %8711 = vst [vmem:[#allocation140_spill] sm:$0xff] %v6502_v3  ;;  %v8470_v3 = vmov 68  }
 0x2ca   : > { %4964 = vset.pattern.permute.xlu1 %v8708_v40  ;;  %v6495_v24 = vpop.permute.xlu1 %1596 }
 0x2cb   : > { %8709 = vst [vmem:[#allocation138_spill] sm:$0xff] %v6495_v24  ;;  %1932 = vperm.xlu1 %4964, %v6405_v2   ;;  %v6508_v40 = vpop.permute.xlu0 %1381  ;;  %2321 = vperm.xlu0 %4990, %v6416_v6   ;;  %v8714_v24 = vmov 55  }
 0x2cc   : > { %8713 = vst [vmem:[#allocation142_spill] sm:$0xff] %v6508_v40 }
 0x2cf   : > { %1940 = vperm.xlu1 %4964, %v6392_v48   ;;  %v6499_v62 = vpop.permute.xlu1 %1617  ;;  %4993 = vset.pattern.permute.xlu0 %v8470_v3  ;;  %v6519_v5 = vpop.permute.xlu0 %1393 }
 0x2d0   : > { %8710 = vst [vmem:[#allocation139_spill] sm:$0xff] %v6499_v62  ;;  %8717 = vst [vmem:[#allocation145_spill] sm:$0xff] %v6519_v5  ;;  %2342 = vperm.xlu0 %4993, %v6426_v32  }
 0x2d3   : > { %1944 = vperm.xlu1 %4964, %v6416_v6   ;;  %v6506_v11 = vpop.permute.xlu1 %1621 }
 0x2d4   : > { %8712 = vst [vmem:[#allocation141_spill] sm:$0xff] %v6506_v11  ;;  %v8718_v11 = vmov 56  }
 0x2d7   : > { %4967 = vset.pattern.permute.xlu1 %v8714_v24 }
 0x2d8   : > { %1965 = vperm.xlu1 %4967, %v6426_v32   ;;  %v6513_v62 = vpop.permute.xlu1 %1642 }
 0x2d9   : > { %8715 = vst [vmem:[#allocation143_spill] sm:$0xff] %v6513_v62  ;;  %v8471_v62 = vmov 69  }
 0x2da   : > { %4994 = vset.pattern.permute.xlu0 %v8471_v62 }
 0x2dc   : > { %1969 = vperm.xlu1 %4967, %v6392_v48   ;;  %v6516_v38 = vpop.permute.xlu1 %1650 }
 0x2dd   : > { %8716 = vst [vmem:[#allocation144_spill] sm:$0xff] %v6516_v38  ;;  %v6530_v38 = vpop.permute.xlu0 %1414  ;;  %2367 = vperm.xlu0 %4994, %v6405_v2  }
 0x2de   : > { %8721 = vst [vmem:[#allocation148_spill] sm:$0xff] %v6530_v38  ;;  %v8472_v38 = vmov 70  }
 0x2e0   : > { %4968 = vset.pattern.permute.xlu1 %v8718_v11  ;;  %v6523_v40 = vpop.permute.xlu1 %1654 }
 0x2e1   : > { %8719 = vst [vmem:[#allocation146_spill] sm:$0xff] %v6523_v40  ;;  %1990 = vperm.xlu1 %4968, %v6405_v2   ;;  %v6536_v11 = vpop.permute.xlu0 %1439  ;;  %2379 = vperm.xlu0 %4994, %v6416_v6   ;;  %v8724_v40 = vmov 57  }
 0x2e2   : > { %8723 = vst [vmem:[#allocation150_spill] sm:$0xff] %v6536_v11 }
 0x2e5   : > { %1998 = vperm.xlu1 %4968, %v6392_v48   ;;  %v6527_v24 = vpop.permute.xlu1 %1675  ;;  %4997 = vset.pattern.permute.xlu0 %v8472_v38  ;;  %v6547_v5 = vpop.permute.xlu0 %1451 }
 0x2e6   : > { %8720 = vst [vmem:[#allocation147_spill] sm:$0xff] %v6527_v24  ;;  %8727 = vst [vmem:[#allocation153_spill] sm:$0xff] %v6547_v5  ;;  %2400 = vperm.xlu0 %4997, %v6426_v32  }
 0x2e9   : > { %2002 = vperm.xlu1 %4968, %v6416_v6   ;;  %v6534_v3 = vpop.permute.xlu1 %1679 }
 0x2ea   : > { %8722 = vst [vmem:[#allocation149_spill] sm:$0xff] %v6534_v3  ;;  %v8728_v3 = vmov 58  }
 0x2ed   : > { %4971 = vset.pattern.permute.xlu1 %v8724_v40 }
 0x2ee   : > { %2023 = vperm.xlu1 %4971, %v6426_v32   ;;  %v6541_v24 = vpop.permute.xlu1 %1700 }
 0x2ef   : > { %8725 = vst [vmem:[#allocation151_spill] sm:$0xff] %v6541_v24  ;;  %v8473_v24 = vmov 71  }
 0x2f0   : > { %4998 = vset.pattern.permute.xlu0 %v8473_v24 }
 0x2f2   : > { %2027 = vperm.xlu1 %4971, %v6392_v48   ;;  %v6544_v62 = vpop.permute.xlu1 %1708 }
 0x2f3   : > { %8726 = vst [vmem:[#allocation152_spill] sm:$0xff] %v6544_v62  ;;  %v6558_v62 = vpop.permute.xlu0 %1472  ;;  %2425 = vperm.xlu0 %4998, %v6405_v2  }
 0x2f4   : > { %8731 = vst [vmem:[#allocation156_spill] sm:$0xff] %v6558_v62  ;;  %v8474_v62 = vmov 72  }
 0x2f6   : > { %4972 = vset.pattern.permute.xlu1 %v8728_v3  ;;  %v6551_v11 = vpop.permute.xlu1 %1712 }
 0x2f7   : > { %8729 = vst [vmem:[#allocation154_spill] sm:$0xff] %v6551_v11  ;;  %2048 = vperm.xlu1 %4972, %v6405_v2   ;;  %v6564_v3 = vpop.permute.xlu0 %1497  ;;  %2437 = vperm.xlu0 %4998, %v6416_v6   ;;  %v8734_v11 = vmov 59  }
 0x2f8   : > { %8733 = vst [vmem:[#allocation158_spill] sm:$0xff] %v6564_v3 }
 0x2fb   : > { %2056 = vperm.xlu1 %4972, %v6392_v48   ;;  %v6555_v40 = vpop.permute.xlu1 %1733  ;;  %5001 = vset.pattern.permute.xlu0 %v8474_v62  ;;  %v6575_v5 = vpop.permute.xlu0 %1509 }
 0x2fc   : > { %8730 = vst [vmem:[#allocation155_spill] sm:$0xff] %v6555_v40  ;;  %8737 = vst [vmem:[#allocation161_spill] sm:$0xff] %v6575_v5  ;;  %2458 = vperm.xlu0 %5001, %v6426_v32  }
 0x2ff   : > { %2060 = vperm.xlu1 %4972, %v6416_v6   ;;  %v6562_v38 = vpop.permute.xlu1 %1737 }
 0x300   : > { %8732 = vst [vmem:[#allocation157_spill] sm:$0xff] %v6562_v38  ;;  %v8738_v38 = vmov 60  }
 0x303   : > { %4975 = vset.pattern.permute.xlu1 %v8734_v11 }
 0x304   : > { %2081 = vperm.xlu1 %4975, %v6426_v32   ;;  %v6569_v40 = vpop.permute.xlu1 %1758 }
 0x305   : > { %8735 = vst [vmem:[#allocation159_spill] sm:$0xff] %v6569_v40  ;;  %v8475_v40 = vmov 73  }
 0x306   : > { %5002 = vset.pattern.permute.xlu0 %v8475_v40 }
 0x308   : > { %2085 = vperm.xlu1 %4975, %v6392_v48   ;;  %v6572_v24 = vpop.permute.xlu1 %1766 }
 0x309   : > { %8736 = vst [vmem:[#allocation160_spill] sm:$0xff] %v6572_v24  ;;  %v6586_v24 = vpop.permute.xlu0 %1530  ;;  %2483 = vperm.xlu0 %5002, %v6405_v2  }
 0x30a   : > { %8741 = vst [vmem:[#allocation164_spill] sm:$0xff] %v6586_v24  ;;  %v8476_v24 = vmov 74  }
 0x30c   : > { %4976 = vset.pattern.permute.xlu1 %v8738_v38  ;;  %v6579_v3 = vpop.permute.xlu1 %1770 }
 0x30d   : > { %8739 = vst [vmem:[#allocation162_spill] sm:$0xff] %v6579_v3  ;;  %2106 = vperm.xlu1 %4976, %v6405_v2   ;;  %v6592_v38 = vpop.permute.xlu0 %1555  ;;  %2495 = vperm.xlu0 %5002, %v6416_v6   ;;  %v8744_v3 = vmov 61  }
 0x30e   : > { %8743 = vst [vmem:[#allocation166_spill] sm:$0xff] %v6592_v38 }
 0x311   : > { %2114 = vperm.xlu1 %4976, %v6392_v48   ;;  %v6583_v11 = vpop.permute.xlu1 %1791  ;;  %5005 = vset.pattern.permute.xlu0 %v8476_v24  ;;  %v6603_v5 = vpop.permute.xlu0 %1567 }
 0x312   : > { %8740 = vst [vmem:[#allocation163_spill] sm:$0xff] %v6583_v11  ;;  %8747 = vst [vmem:[#allocation169_spill] sm:$0xff] %v6603_v5  ;;  %2516 = vperm.xlu0 %5005, %v6426_v32  }
 0x315   : > { %2118 = vperm.xlu1 %4976, %v6416_v6   ;;  %v6590_v62 = vpop.permute.xlu1 %1795 }
 0x316   : > { %8742 = vst [vmem:[#allocation165_spill] sm:$0xff] %v6590_v62  ;;  %v8748_v62 = vmov 62  }
 0x319   : > { %4979 = vset.pattern.permute.xlu1 %v8744_v3 }
 0x31a   : > { %2139 = vperm.xlu1 %4979, %v6426_v32   ;;  %v6597_v11 = vpop.permute.xlu1 %1816 }
 0x31b   : > { %8745 = vst [vmem:[#allocation167_spill] sm:$0xff] %v6597_v11  ;;  %v8477_v11 = vmov 75  }
 0x31c   : > { %5006 = vset.pattern.permute.xlu0 %v8477_v11 }
 0x31e   : > { %2143 = vperm.xlu1 %4979, %v6392_v48   ;;  %v6600_v40 = vpop.permute.xlu1 %1824 }
 0x31f   : > { %8746 = vst [vmem:[#allocation168_spill] sm:$0xff] %v6600_v40  ;;  %v6614_v40 = vpop.permute.xlu0 %1588  ;;  %2541 = vperm.xlu0 %5006, %v6405_v2  }
 0x320   : > { %8751 = vst [vmem:[#allocation172_spill] sm:$0xff] %v6614_v40  ;;  %v8478_v40 = vmov 76  }
 0x322   : > { %4980 = vset.pattern.permute.xlu1 %v8748_v62  ;;  %v6607_v38 = vpop.permute.xlu1 %1828 }
 0x323   : > { %8749 = vst [vmem:[#allocation170_spill] sm:$0xff] %v6607_v38  ;;  %2164 = vperm.xlu1 %4980, %v6405_v2   ;;  %v6620_v62 = vpop.permute.xlu0 %1613  ;;  %2553 = vperm.xlu0 %5006, %v6416_v6   ;;  %v8754_v38 = vmov 63  }
 0x324   : > { %8753 = vst [vmem:[#allocation174_spill] sm:$0xff] %v6620_v62 }
 0x327   : > { %2172 = vperm.xlu1 %4980, %v6392_v48   ;;  %v6611_v3 = vpop.permute.xlu1 %1849  ;;  %5009 = vset.pattern.permute.xlu0 %v8478_v40  ;;  %v6631_v5 = vpop.permute.xlu0 %1625 }
 0x328   : > { %8750 = vst [vmem:[#allocation171_spill] sm:$0xff] %v6611_v3  ;;  %8757 = vst [vmem:[#allocation177_spill] sm:$0xff] %v6631_v5  ;;  %2574 = vperm.xlu0 %5009, %v6426_v32  }
 0x32b   : > { %2176 = vperm.xlu1 %4980, %v6416_v6   ;;  %v6618_v24 = vpop.permute.xlu1 %1853 }
 0x32c   : > { %8752 = vst [vmem:[#allocation173_spill] sm:$0xff] %v6618_v24  ;;  %v8758_v24 = vmov 64  }
 0x32f   : > { %4983 = vset.pattern.permute.xlu1 %v8754_v38 }
 0x330   : > { %2197 = vperm.xlu1 %4983, %v6426_v32   ;;  %v6625_v3 = vpop.permute.xlu1 %1874 }
 0x331   : > { %8755 = vst [vmem:[#allocation175_spill] sm:$0xff] %v6625_v3  ;;  %v8479_v3 = vmov 77  }
 0x332   : > { %5010 = vset.pattern.permute.xlu0 %v8479_v3 }
 0x334   : > { %2201 = vperm.xlu1 %4983, %v6392_v48   ;;  %v6628_v11 = vpop.permute.xlu1 %1882 }
 0x335   : > { %8756 = vst [vmem:[#allocation176_spill] sm:$0xff] %v6628_v11  ;;  %v6642_v11 = vpop.permute.xlu0 %1646  ;;  %2599 = vperm.xlu0 %5010, %v6405_v2  }
 0x336   : > { %8761 = vst [vmem:[#allocation180_spill] sm:$0xff] %v6642_v11  ;;  %v8480_v11 = vmov 78  }
 0x338   : > { %4984 = vset.pattern.permute.xlu1 %v8758_v24  ;;  %v6635_v62 = vpop.permute.xlu1 %1886 }
 0x339   : > { %8759 = vst [vmem:[#allocation178_spill] sm:$0xff] %v6635_v62  ;;  %2222 = vperm.xlu1 %4984, %v6405_v2   ;;  %v6648_v24 = vpop.permute.xlu0 %1671  ;;  %2611 = vperm.xlu0 %5010, %v6416_v6   ;;  %v8764_v62 = vmov 65  }
 0x33a   : > { %8763 = vst [vmem:[#allocation182_spill] sm:$0xff] %v6648_v24 }
 0x33d   : > { %2230 = vperm.xlu1 %4984, %v6392_v48   ;;  %v6639_v38 = vpop.permute.xlu1 %1907  ;;  %5013 = vset.pattern.permute.xlu0 %v8480_v11  ;;  %v6659_v5 = vpop.permute.xlu0 %1683 }
 0x33e   : > { %8760 = vst [vmem:[#allocation179_spill] sm:$0xff] %v6639_v38  ;;  %8767 = vst [vmem:[#allocation185_spill] sm:$0xff] %v6659_v5  ;;  %2632 = vperm.xlu0 %5013, %v6426_v32  }
 0x341   : > { %2234 = vperm.xlu1 %4984, %v6416_v6   ;;  %v6646_v40 = vpop.permute.xlu1 %1911 }
 0x342   : > { %8762 = vst [vmem:[#allocation181_spill] sm:$0xff] %v6646_v40  ;;  %v8768_v40 = vmov 66  }
 0x345   : > { %4987 = vset.pattern.permute.xlu1 %v8764_v62 }
 0x346   : > { %2255 = vperm.xlu1 %4987, %v6426_v32   ;;  %v6653_v38 = vpop.permute.xlu1 %1932 }
 0x347   : > { %8765 = vst [vmem:[#allocation183_spill] sm:$0xff] %v6653_v38  ;;  %v8481_v38 = vmov 79  }
 0x348   : > { %5014 = vset.pattern.permute.xlu0 %v8481_v38 }
 0x34a   : > { %2259 = vperm.xlu1 %4987, %v6392_v48   ;;  %v6656_v3 = vpop.permute.xlu1 %1940 }
 0x34b   : > { %8766 = vst [vmem:[#allocation184_spill] sm:$0xff] %v6656_v3  ;;  %v6670_v3 = vpop.permute.xlu0 %1704  ;;  %2657 = vperm.xlu0 %5014, %v6405_v2  }
 0x34c   : > { %8771 = vst [vmem:[#allocation188_spill] sm:$0xff] %v6670_v3  ;;  %v8482_v3 = vmov 80  }
 0x34e   : > { %4988 = vset.pattern.permute.xlu1 %v8768_v40  ;;  %v6663_v24 = vpop.permute.xlu1 %1944 }
 0x34f   : > { %8769 = vst [vmem:[#allocation186_spill] sm:$0xff] %v6663_v24  ;;  %2280 = vperm.xlu1 %4988, %v6405_v2   ;;  %v6676_v40 = vpop.permute.xlu0 %1729  ;;  %2669 = vperm.xlu0 %5014, %v6416_v6   ;;  %v8774_v24 = vmov 67  }
 0x350   : > { %8773 = vst [vmem:[#allocation190_spill] sm:$0xff] %v6676_v40 }
 0x353   : > { %2288 = vperm.xlu1 %4988, %v6392_v48   ;;  %v6667_v62 = vpop.permute.xlu1 %1965  ;;  %5017 = vset.pattern.permute.xlu0 %v8482_v3  ;;  %v6687_v5 = vpop.permute.xlu0 %1741 }
 0x354   : > { %8770 = vst [vmem:[#allocation187_spill] sm:$0xff] %v6667_v62  ;;  %8777 = vst [vmem:[#allocation193_spill] sm:$0xff] %v6687_v5  ;;  %2690 = vperm.xlu0 %5017, %v6426_v32  }
 0x357   : > { %2292 = vperm.xlu1 %4988, %v6416_v6   ;;  %v6674_v11 = vpop.permute.xlu1 %1969 }
 0x358   : > { %8772 = vst [vmem:[#allocation189_spill] sm:$0xff] %v6674_v11  ;;  %v8778_v11 = vmov 68  }
 0x35b   : > { %4991 = vset.pattern.permute.xlu1 %v8774_v24 }
 0x35c   : > { %2313 = vperm.xlu1 %4991, %v6426_v32   ;;  %v6681_v62 = vpop.permute.xlu1 %1990 }
 0x35d   : > { %8775 = vst [vmem:[#allocation191_spill] sm:$0xff] %v6681_v62  ;;  %v8483_v62 = vmov 81  }
 0x35e   : > { %5018 = vset.pattern.permute.xlu0 %v8483_v62 }
 0x360   : > { %2317 = vperm.xlu1 %4991, %v6392_v48   ;;  %v6684_v38 = vpop.permute.xlu1 %1998 }
 0x361   : > { %8776 = vst [vmem:[#allocation192_spill] sm:$0xff] %v6684_v38  ;;  %v6698_v38 = vpop.permute.xlu0 %1762  ;;  %2715 = vperm.xlu0 %5018, %v6405_v2  }
 0x362   : > { %8781 = vst [vmem:[#allocation196_spill] sm:$0xff] %v6698_v38  ;;  %v8484_v38 = vmov 82  }
 0x364   : > { %4992 = vset.pattern.permute.xlu1 %v8778_v11  ;;  %v6691_v40 = vpop.permute.xlu1 %2002 }
 0x365   : > { %8779 = vst [vmem:[#allocation194_spill] sm:$0xff] %v6691_v40  ;;  %2338 = vperm.xlu1 %4992, %v6405_v2   ;;  %v6704_v11 = vpop.permute.xlu0 %1787  ;;  %2727 = vperm.xlu0 %5018, %v6416_v6   ;;  %v8784_v40 = vmov 69  }
 0x366   : > { %8783 = vst [vmem:[#allocation198_spill] sm:$0xff] %v6704_v11 }
 0x369   : > { %2346 = vperm.xlu1 %4992, %v6392_v48   ;;  %v6695_v24 = vpop.permute.xlu1 %2023  ;;  %5021 = vset.pattern.permute.xlu0 %v8484_v38  ;;  %v6715_v5 = vpop.permute.xlu0 %1799 }
 0x36a   : > { %8780 = vst [vmem:[#allocation195_spill] sm:$0xff] %v6695_v24  ;;  %8787 = vst [vmem:[#allocation201_spill] sm:$0xff] %v6715_v5  ;;  %2748 = vperm.xlu0 %5021, %v6426_v32  }
 0x36d   : > { %2350 = vperm.xlu1 %4992, %v6416_v6   ;;  %v6702_v3 = vpop.permute.xlu1 %2027 }
 0x36e   : > { %8782 = vst [vmem:[#allocation197_spill] sm:$0xff] %v6702_v3  ;;  %v8788_v3 = vmov 70  }
 0x371   : > { %4995 = vset.pattern.permute.xlu1 %v8784_v40 }
 0x372   : > { %2371 = vperm.xlu1 %4995, %v6426_v32   ;;  %v6709_v24 = vpop.permute.xlu1 %2048 }
 0x373   : > { %8785 = vst [vmem:[#allocation199_spill] sm:$0xff] %v6709_v24  ;;  %v8485_v24 = vmov 83  }
 0x374   : > { %5022 = vset.pattern.permute.xlu0 %v8485_v24 }
 0x376   : > { %2375 = vperm.xlu1 %4995, %v6392_v48   ;;  %v6712_v62 = vpop.permute.xlu1 %2056 }
 0x377   : > { %8786 = vst [vmem:[#allocation200_spill] sm:$0xff] %v6712_v62  ;;  %v6726_v62 = vpop.permute.xlu0 %1820  ;;  %2773 = vperm.xlu0 %5022, %v6405_v2  }
 0x378   : > { %8791 = vst [vmem:[#allocation204_spill] sm:$0xff] %v6726_v62  ;;  %v8486_v62 = vmov 84  }
 0x37a   : > { %4996 = vset.pattern.permute.xlu1 %v8788_v3  ;;  %v6719_v11 = vpop.permute.xlu1 %2060 }
 0x37b   : > { %8789 = vst [vmem:[#allocation202_spill] sm:$0xff] %v6719_v11  ;;  %2396 = vperm.xlu1 %4996, %v6405_v2   ;;  %v6732_v3 = vpop.permute.xlu0 %1845  ;;  %2785 = vperm.xlu0 %5022, %v6416_v6   ;;  %v8794_v11 = vmov 71  }
 0x37c   : > { %8793 = vst [vmem:[#allocation206_spill] sm:$0xff] %v6732_v3 }
 0x37f   : > { %2404 = vperm.xlu1 %4996, %v6392_v48   ;;  %v6723_v40 = vpop.permute.xlu1 %2081  ;;  %5025 = vset.pattern.permute.xlu0 %v8486_v62  ;;  %v6743_v5 = vpop.permute.xlu0 %1857 }
 0x380   : > { %8790 = vst [vmem:[#allocation203_spill] sm:$0xff] %v6723_v40  ;;  %8797 = vst [vmem:[#allocation209_spill] sm:$0xff] %v6743_v5  ;;  %2806 = vperm.xlu0 %5025, %v6426_v32  }
 0x383   : > { %2408 = vperm.xlu1 %4996, %v6416_v6   ;;  %v6730_v38 = vpop.permute.xlu1 %2085 }
 0x384   : > { %8792 = vst [vmem:[#allocation205_spill] sm:$0xff] %v6730_v38  ;;  %v8798_v38 = vmov 72  }
 0x387   : > { %4999 = vset.pattern.permute.xlu1 %v8794_v11 }
 0x388   : > { %2429 = vperm.xlu1 %4999, %v6426_v32   ;;  %v6737_v40 = vpop.permute.xlu1 %2106 }
 0x389   : > { %8795 = vst [vmem:[#allocation207_spill] sm:$0xff] %v6737_v40  ;;  %v8487_v40 = vmov 85  }
 0x38a   : > { %5026 = vset.pattern.permute.xlu0 %v8487_v40 }
 0x38c   : > { %2433 = vperm.xlu1 %4999, %v6392_v48   ;;  %v6740_v24 = vpop.permute.xlu1 %2114 }
 0x38d   : > { %8796 = vst [vmem:[#allocation208_spill] sm:$0xff] %v6740_v24  ;;  %v6754_v24 = vpop.permute.xlu0 %1878  ;;  %2831 = vperm.xlu0 %5026, %v6405_v2  }
 0x38e   : > { %8801 = vst [vmem:[#allocation212_spill] sm:$0xff] %v6754_v24  ;;  %v8488_v24 = vmov 86  }
 0x390   : > { %5000 = vset.pattern.permute.xlu1 %v8798_v38  ;;  %v6747_v3 = vpop.permute.xlu1 %2118 }
 0x391   : > { %8799 = vst [vmem:[#allocation210_spill] sm:$0xff] %v6747_v3  ;;  %2454 = vperm.xlu1 %5000, %v6405_v2   ;;  %v6760_v38 = vpop.permute.xlu0 %1903  ;;  %2843 = vperm.xlu0 %5026, %v6416_v6   ;;  %v8804_v3 = vmov 73  }
 0x392   : > { %8803 = vst [vmem:[#allocation214_spill] sm:$0xff] %v6760_v38 }
 0x395   : > { %2462 = vperm.xlu1 %5000, %v6392_v48   ;;  %v6751_v11 = vpop.permute.xlu1 %2139  ;;  %5029 = vset.pattern.permute.xlu0 %v8488_v24  ;;  %v6771_v5 = vpop.permute.xlu0 %1915 }
 0x396   : > { %8800 = vst [vmem:[#allocation211_spill] sm:$0xff] %v6751_v11  ;;  %8807 = vst [vmem:[#allocation217_spill] sm:$0xff] %v6771_v5  ;;  %2864 = vperm.xlu0 %5029, %v6426_v32  }
 0x399   : > { %2466 = vperm.xlu1 %5000, %v6416_v6   ;;  %v6758_v62 = vpop.permute.xlu1 %2143 }
 0x39a   : > { %8802 = vst [vmem:[#allocation213_spill] sm:$0xff] %v6758_v62  ;;  %v8808_v62 = vmov 74  }
 0x39d   : > { %5003 = vset.pattern.permute.xlu1 %v8804_v3 }
 0x39e   : > { %2487 = vperm.xlu1 %5003, %v6426_v32   ;;  %v6765_v11 = vpop.permute.xlu1 %2164 }
 0x39f   : > { %8805 = vst [vmem:[#allocation215_spill] sm:$0xff] %v6765_v11  ;;  %v8489_v11 = vmov 87  }
 0x3a0   : > { %5030 = vset.pattern.permute.xlu0 %v8489_v11 }
 0x3a2   : > { %2491 = vperm.xlu1 %5003, %v6392_v48   ;;  %v6768_v40 = vpop.permute.xlu1 %2172 }
 0x3a3   : > { %8806 = vst [vmem:[#allocation216_spill] sm:$0xff] %v6768_v40  ;;  %v6782_v40 = vpop.permute.xlu0 %1936  ;;  %2889 = vperm.xlu0 %5030, %v6405_v2  }
 0x3a4   : > { %8811 = vst [vmem:[#allocation220_spill] sm:$0xff] %v6782_v40  ;;  %v8490_v40 = vmov 88  }
 0x3a6   : > { %5004 = vset.pattern.permute.xlu1 %v8808_v62  ;;  %v6775_v38 = vpop.permute.xlu1 %2176 }
 0x3a7   : > { %8809 = vst [vmem:[#allocation218_spill] sm:$0xff] %v6775_v38  ;;  %2512 = vperm.xlu1 %5004, %v6405_v2   ;;  %v6788_v62 = vpop.permute.xlu0 %1961  ;;  %2901 = vperm.xlu0 %5030, %v6416_v6   ;;  %v8814_v38 = vmov 75  }
 0x3a8   : > { %8813 = vst [vmem:[#allocation222_spill] sm:$0xff] %v6788_v62 }
 0x3ab   : > { %2520 = vperm.xlu1 %5004, %v6392_v48   ;;  %v6779_v3 = vpop.permute.xlu1 %2197  ;;  %5033 = vset.pattern.permute.xlu0 %v8490_v40  ;;  %v6799_v5 = vpop.permute.xlu0 %1973 }
 0x3ac   : > { %8810 = vst [vmem:[#allocation219_spill] sm:$0xff] %v6779_v3  ;;  %8817 = vst [vmem:[#allocation225_spill] sm:$0xff] %v6799_v5  ;;  %2922 = vperm.xlu0 %5033, %v6426_v32  }
 0x3af   : > { %2524 = vperm.xlu1 %5004, %v6416_v6   ;;  %v6786_v24 = vpop.permute.xlu1 %2201 }
 0x3b0   : > { %8812 = vst [vmem:[#allocation221_spill] sm:$0xff] %v6786_v24  ;;  %v8818_v24 = vmov 76  }
 0x3b3   : > { %5007 = vset.pattern.permute.xlu1 %v8814_v38 }
 0x3b4   : > { %2545 = vperm.xlu1 %5007, %v6426_v32   ;;  %v6793_v3 = vpop.permute.xlu1 %2222 }
 0x3b5   : > { %8815 = vst [vmem:[#allocation223_spill] sm:$0xff] %v6793_v3  ;;  %v8491_v3 = vmov 89  }
 0x3b6   : > { %5034 = vset.pattern.permute.xlu0 %v8491_v3 }
 0x3b8   : > { %2549 = vperm.xlu1 %5007, %v6392_v48   ;;  %v6796_v11 = vpop.permute.xlu1 %2230 }
 0x3b9   : > { %8816 = vst [vmem:[#allocation224_spill] sm:$0xff] %v6796_v11  ;;  %v6810_v11 = vpop.permute.xlu0 %1994  ;;  %2947 = vperm.xlu0 %5034, %v6405_v2  }
 0x3ba   : > { %8821 = vst [vmem:[#allocation228_spill] sm:$0xff] %v6810_v11  ;;  %v8492_v11 = vmov 90  }
 0x3bc   : > { %5008 = vset.pattern.permute.xlu1 %v8818_v24  ;;  %v6803_v62 = vpop.permute.xlu1 %2234 }
 0x3bd   : > { %8819 = vst [vmem:[#allocation226_spill] sm:$0xff] %v6803_v62  ;;  %2570 = vperm.xlu1 %5008, %v6405_v2   ;;  %v6816_v24 = vpop.permute.xlu0 %2019  ;;  %2959 = vperm.xlu0 %5034, %v6416_v6   ;;  %v8824_v62 = vmov 77  }
 0x3be   : > { %8823 = vst [vmem:[#allocation230_spill] sm:$0xff] %v6816_v24 }
 0x3c1   : > { %2578 = vperm.xlu1 %5008, %v6392_v48   ;;  %v6807_v38 = vpop.permute.xlu1 %2255  ;;  %5037 = vset.pattern.permute.xlu0 %v8492_v11  ;;  %v6827_v5 = vpop.permute.xlu0 %2031 }
 0x3c2   : > { %8820 = vst [vmem:[#allocation227_spill] sm:$0xff] %v6807_v38  ;;  %8827 = vst [vmem:[#allocation233_spill] sm:$0xff] %v6827_v5  ;;  %2980 = vperm.xlu0 %5037, %v6426_v32  }
 0x3c5   : > { %2582 = vperm.xlu1 %5008, %v6416_v6   ;;  %v6814_v40 = vpop.permute.xlu1 %2259 }
 0x3c6   : > { %8822 = vst [vmem:[#allocation229_spill] sm:$0xff] %v6814_v40  ;;  %v8828_v40 = vmov 78  }
 0x3c9   : > { %5011 = vset.pattern.permute.xlu1 %v8824_v62 }
 0x3ca   : > { %2603 = vperm.xlu1 %5011, %v6426_v32   ;;  %v6821_v38 = vpop.permute.xlu1 %2280 }
 0x3cb   : > { %8825 = vst [vmem:[#allocation231_spill] sm:$0xff] %v6821_v38  ;;  %v8493_v38 = vmov 91  }
 0x3cc   : > { %5038 = vset.pattern.permute.xlu0 %v8493_v38 }
 0x3ce   : > { %2607 = vperm.xlu1 %5011, %v6392_v48   ;;  %v6824_v3 = vpop.permute.xlu1 %2288 }
 0x3cf   : > { %8826 = vst [vmem:[#allocation232_spill] sm:$0xff] %v6824_v3  ;;  %v6838_v3 = vpop.permute.xlu0 %2052  ;;  %3005 = vperm.xlu0 %5038, %v6405_v2  }
 0x3d0   : > { %8831 = vst [vmem:[#allocation236_spill] sm:$0xff] %v6838_v3  ;;  %v8494_v3 = vmov 92  }
 0x3d2   : > { %5012 = vset.pattern.permute.xlu1 %v8828_v40  ;;  %v6831_v24 = vpop.permute.xlu1 %2292 }
 0x3d3   : > { %8829 = vst [vmem:[#allocation234_spill] sm:$0xff] %v6831_v24  ;;  %2628 = vperm.xlu1 %5012, %v6405_v2   ;;  %v6844_v40 = vpop.permute.xlu0 %2077  ;;  %3017 = vperm.xlu0 %5038, %v6416_v6   ;;  %v8834_v24 = vmov 79  }
 0x3d4   : > { %8833 = vst [vmem:[#allocation238_spill] sm:$0xff] %v6844_v40 }
 0x3d7   : > { %2636 = vperm.xlu1 %5012, %v6392_v48   ;;  %v6835_v62 = vpop.permute.xlu1 %2313  ;;  %5041 = vset.pattern.permute.xlu0 %v8494_v3  ;;  %v6855_v5 = vpop.permute.xlu0 %2089 }
 0x3d8   : > { %8830 = vst [vmem:[#allocation235_spill] sm:$0xff] %v6835_v62  ;;  %8837 = vst [vmem:[#allocation241_spill] sm:$0xff] %v6855_v5  ;;  %3038 = vperm.xlu0 %5041, %v6426_v32  }
 0x3db   : > { %2640 = vperm.xlu1 %5012, %v6416_v6   ;;  %v6842_v11 = vpop.permute.xlu1 %2317 }
 0x3dc   : > { %8832 = vst [vmem:[#allocation237_spill] sm:$0xff] %v6842_v11  ;;  %v8838_v11 = vmov 80  }
 0x3df   : > { %5015 = vset.pattern.permute.xlu1 %v8834_v24 }
 0x3e0   : > { %2661 = vperm.xlu1 %5015, %v6426_v32   ;;  %v6849_v62 = vpop.permute.xlu1 %2338 }
 0x3e1   : > { %8835 = vst [vmem:[#allocation239_spill] sm:$0xff] %v6849_v62  ;;  %v8495_v62 = vmov 93  }
 0x3e2   : > { %5042 = vset.pattern.permute.xlu0 %v8495_v62 }
 0x3e4   : > { %2665 = vperm.xlu1 %5015, %v6392_v48   ;;  %v6852_v38 = vpop.permute.xlu1 %2346 }
 0x3e5   : > { %8836 = vst [vmem:[#allocation240_spill] sm:$0xff] %v6852_v38  ;;  %v6866_v38 = vpop.permute.xlu0 %2110  ;;  %3063 = vperm.xlu0 %5042, %v6405_v2  }
 0x3e6   : > { %8841 = vst [vmem:[#allocation244_spill] sm:$0xff] %v6866_v38  ;;  %v8496_v38 = vmov 94  }
 0x3e8   : > { %5016 = vset.pattern.permute.xlu1 %v8838_v11  ;;  %v6859_v40 = vpop.permute.xlu1 %2350 }
 0x3e9   : > { %8839 = vst [vmem:[#allocation242_spill] sm:$0xff] %v6859_v40  ;;  %2686 = vperm.xlu1 %5016, %v6405_v2   ;;  %v6872_v11 = vpop.permute.xlu0 %2135  ;;  %3075 = vperm.xlu0 %5042, %v6416_v6   ;;  %v8844_v40 = vmov 81  }
 0x3ea   : > { %8843 = vst [vmem:[#allocation246_spill] sm:$0xff] %v6872_v11 }
 0x3ed   : > { %2694 = vperm.xlu1 %5016, %v6392_v48   ;;  %v6863_v24 = vpop.permute.xlu1 %2371  ;;  %5045 = vset.pattern.permute.xlu0 %v8496_v38  ;;  %v6884_v5 = vpop.permute.xlu0 %2147  ;;  %v4410_v38 = vld [vmem:[%s5813_s3 + $0x2] ss:$0 sm:$0xff] }
 0x3ee   : > { %8840 = vst [vmem:[#allocation243_spill] sm:$0xff] %v6863_v24  ;;  %8847 = vst [vmem:[#allocation249_spill] sm:$0xff] %v6884_v5  ;;  %3096 = vperm.xlu0 %5045, %v6426_v32   ;;  %v446_v37 = vmul.f32 %v4410_v38, %v5927_v34  ;;  %v444_v10 = vmul.f32 %v4410_v38, %v6041_v13  ;;  %v475_v34 = vmul.f32 %v4411_v36, %v6059_v20 }
 0x3f1   : > { %2698 = vperm.xlu1 %5016, %v6416_v6   ;;  %v6870_v3 = vpop.permute.xlu1 %2375 }
 0x3f2   : > { %8842 = vst [vmem:[#allocation245_spill] sm:$0xff] %v6870_v3  ;;  %v4408_v3 = vld [vmem:[%s5813_s3] ss:$0 sm:$0xff]  ;;  %5046 = vset.pattern.permute.xlu0 %v8504_v44  ;;  %v8918_v44 = vld [vmem:[#allocation98_spill] sm:$0xff] }
 0x3f3   : > { %v388_v11 = vmul.f32 %v4408_v3, %v5904_v25  ;;  %v386_v18 = vmul.f32 %v4408_v3, %v6014_v63  ;;  %v415_v25 = vmul.f32 %v4409_v56, %v5909_v27  ;;  %v385_v63 = vmul.f32 %v4408_v3, %v6008_v61 }
 0x3f4   : > { %v473_v61 = vmul.f32 %v4411_v36, %v5933_v35  ;;  %v414_v3 = vmul.f32 %v4409_v56, %v6023_v7  ;;  %v443_v7 = vmul.f32 %v4410_v38, %v5919_v30 }
 0x3f5   : > { %5019 = vset.pattern.permute.xlu1 %v8844_v40  ;;  %v355_v40 = vld [vmem:[#allocation2 + $0x8] sm:$0xff] }
 0x3f6   : > { %2719 = vperm.xlu1 %5019, %v6426_v32   ;;  %v6877_v24 = vpop.permute.xlu1 %2396  ;;  %v392_v5 = vmax.f32 %v355_v40, %v388_v11  ;;  %v4413_v40 = vld [vmem:[%s5813_s3 + $0x5] ss:$0 sm:$0xff] }
 0x3f7   : > { %8845 = vst [vmem:[#allocation247_spill] sm:$0xff] %v6877_v24  ;;  %v8848_v24 = vmov 82   ;;  %v533_v56 = vmul.f32 %v4413_v40, %v6087_v42 }
 0x3f8   : > { %v421_v59 = vmax.f32 %v392_v5, %v417_v19  ;;  %v4412_v19 = vld [vmem:[%s5813_s3 + $0x4] ss:$0 sm:$0xff] }
 0x3f9   : > { %v504_v13 = vmul.f32 %v4412_v19, %v5949_v41  ;;  %v502_v35 = vmul.f32 %v4412_v19, %v6070_v26  ;;  %v501_v38 = vmul.f32 %v4412_v19, %v5942_v39  ;;  %v4416_v39 = vld [vmem:[%s5813_s3 + $0x8] ss:$0 sm:$0xff] }
 0x3fa   : > { %2723 = vperm.xlu1 %5019, %v6392_v48   ;;  %v6880_v62 = vpop.permute.xlu1 %2404  ;;  %v450_v11 = vmax.f32 %v421_v59, %v446_v37 }
 0x3fb   : > { %8846 = vst [vmem:[#allocation248_spill] sm:$0xff] %v6880_v62  ;;  %v353_v62 = vld [vmem:[#allocation2] sm:$0xff] }
 0x3fc   : > { %v390_v33 = vmax.f32 %v353_v62, %v386_v18  ;;  %v6906_v18 = vpop.permute.xlu0 %2168  ;;  %3121 = vperm.xlu0 %5046, %v6405_v2   ;;  %v479_v20 = vmax.f32 %v450_v11, %v475_v34  ;;  %v472_v34 = vmul.f32 %v4411_v36, %v6049_v16  ;;  %v8503_v36 = vmov 96  }
 0x3fe   : > { %5020 = vset.pattern.permute.xlu1 %v8848_v24  ;;  %v6891_v49 = vpop.permute.xlu1 %2408  ;;  %v419_v27 = vmax.f32 %v390_v33, %v415_v25  ;;  %v508_v41 = vmax.f32 %v479_v20, %v504_v13  ;;  %v8851_v25 = vmov 83   ;;  %v530_v20 = vmul.f32 %v4413_v40, %v6076_v31 }
 0x3ff   : > { %8849 = vst [vmem:[#allocation250_spill] sm:$0xff] %v6891_v49  ;;  %2744 = vperm.xlu1 %5020, %v6405_v2   ;;  %v352_v49 = vld [vmem:[#allocation2 + $0x10] sm:$0xff] }
 0x400   : > { %v389_v5 = vmax.f32 %v352_v49, %v385_v63  ;;  %v448_v59 = vmax.f32 %v419_v27, %v444_v10  ;;  %v6916_v62 = vpop.permute.xlu0 %2193  ;;  %3133 = vperm.xlu0 %5046, %v6416_v6   ;;  %v531_v63 = vmul.f32 %v4413_v40, %v5955_v43  ;;  %v4414_v10 = vld [vmem:[%s5813_s3 + $0x6] ss:$0 sm:$0xff]  ;;  %v4418_v40 = vld [vmem:[%s5813_s3 + $0xa] ss:$0 sm:$0xff] }
 0x401   : > { %v562_v26 = vmul.f32 %v4414_v10, %v5975_v50 }
 0x402   : > { %v477_v33 = vmax.f32 %v448_v59, %v473_v61  ;;  %v418_v49 = vmax.f32 %v389_v5, %v414_v3  ;;  %v537_v61 = vmax.f32 %v508_v41, %v533_v56  ;;  %v560_v5 = vmul.f32 %v4414_v10, %v6098_v15  ;;  %v4415_v3 = vld [vmem:[%s5813_s3 + $0x7] ss:$0 sm:$0xff] }
 0x403   : > { %2752 = vperm.xlu1 %5020, %v6392_v48   ;;  %v6900_v24 = vpop.permute.xlu1 %2429  ;;  %v591_v16 = vmul.f32 %v4415_v3, %v6115_v0  ;;  %v589_v50 = vmul.f32 %v4415_v3, %v5980_v51  ;;  %v618_v56 = vmul.f32 %v4416_v39, %v6126_v54  ;;  %v8502_v54 = vmov 97  }
 0x404   : > { %v506_v27 = vmax.f32 %v477_v33, %v502_v35  ;;  %v447_v30 = vmax.f32 %v418_v49, %v443_v7  ;;  %v566_v59 = vmax.f32 %v537_v61, %v562_v26  ;;  %5049 = vset.pattern.permute.xlu0 %v8503_v36  ;;  %v6941_v19 = vpop.permute.xlu0 %2205  ;;  %v620_v33 = vmul.f32 %v4416_v39, %v6000_v58 }
 0x405   : > { %3154 = vperm.xlu0 %5049, %v6426_v32   ;;  %v8853_v49 = vmov 84   ;;  %v559_v7 = vmul.f32 %v4414_v10, %v5965_v46  ;;  %v678_v46 = vmul.f32 %v4418_v40, %v6030_v9  ;;  %v4419_v9 = vld [vmem:[%s5813_s3 + $0xb] ss:$0 sm:$0xff] }
 0x406   : > { %v535_v42 = vmax.f32 %v506_v27, %v531_v63  ;;  %v476_v13 = vmax.f32 %v447_v30, %v472_v34  ;;  %v595_v41 = vmax.f32 %v566_v59, %v591_v16  ;;  %v588_v27 = vmul.f32 %v4415_v3, %v6104_v47 }
 0x407   : > { %2756 = vperm.xlu1 %5020, %v6416_v6   ;;  %v6914_v37 = vpop.permute.xlu1 %2433  ;;  %v676_v47 = vmul.f32 %v4418_v40, %v6154_v57 }
 0x408   : > { %8850 = vst [vmem:[#allocation251_spill] sm:$0xff] %v6914_v37  ;;  %v505_v15 = vmax.f32 %v476_v13, %v501_v38  ;;  %v564_v35 = vmax.f32 %v535_v42, %v560_v5  ;;  %v624_v34 = vmax.f32 %v595_v41, %v620_v33  ;;  %v707_v5 = vmul.f32 %v4419_v9, %v6171_v53  ;;  %v4420_v13 = vld [vmem:[%s5813_s3 + $0xc] ss:$0 sm:$0xff]  ;;  %v4421_v33 = vld [vmem:[%s5813_s3 + $0xd] ss:$0 sm:$0xff]  ;;  %v8961_v37 = vld [vmem:[#allocation172_spill] sm:$0xff] }
 0x409   : > { %5050 = vset.pattern.permute.xlu0 %v8502_v54  ;;  %v675_v53 = vmul.f32 %v4418_v40, %v6020_v1  ;;  %v4422_v1 = vld [vmem:[%s5813_s3 + $0xe] ss:$0 sm:$0xff]  ;;  %v704_v41 = vmul.f32 %v4419_v9, %v6160_v4 }
 0x40a   : > { %v593_v51 = vmax.f32 %v564_v35, %v589_v50  ;;  %v534_v63 = vmax.f32 %v505_v15, %v530_v20  ;;  %v8855_v15 = vmov 85   ;;  %v792_v4 = vmul.f32 %v4422_v1, %v6210_v45  ;;  %v8915_v54 = vld [vmem:[#allocation129_spill] sm:$0xff] }
 0x40b   : > { %5023 = vset.pattern.permute.xlu1 %v8851_v25  ;;  %v4417_v25 = vld [vmem:[%s5813_s3 + $0x9] ss:$0 sm:$0xff] }
 0x40c   : > { %2777 = vperm.xlu1 %5023, %v6426_v32   ;;  %v6927_v11 = vpop.permute.xlu1 %2454  ;;  %v649_v31 = vmul.f32 %v4417_v25, %v6143_v28  ;;  %v647_v58 = vmul.f32 %v4417_v25, %v6006_v60  ;;  %v563_v26 = vmax.f32 %v534_v63, %v559_v7  ;;  %v622_v30 = vmax.f32 %v593_v51, %v618_v56  ;;  %v6963_v60 = vpop.permute.xlu0 %2226 }
 0x40d   : > { %v617_v28 = vmul.f32 %v4416_v39, %v5991_v55  ;;  %3179 = vperm.xlu0 %5050, %v6405_v2   ;;  %v705_v55 = vmul.f32 %v4419_v9, %v6038_v12  ;;  %v646_v16 = vmul.f32 %v4417_v25, %v6132_v52  ;;  %v734_v12 = vmul.f32 %v4420_v13, %v6182_v14  ;;  %v6992_v14 = vld [vmem:[%s5820_s16 + $0x10] sm:$0xff] }
 0x40e   : > { %v653_v38 = vmax.f32 %v624_v34, %v649_v31  ;;  %v651_v61 = vmax.f32 %v622_v30, %v647_v58  ;;  %v592_v42 = vmax.f32 %v563_v26, %v588_v27  ;;  %v794_v51 = vmul.f32 %v4422_v1, %v6091_v23  ;;  %v4423_v31 = vld [vmem:[%s5813_s3 + $0xf] ss:$0 sm:$0xff]  ;;  %v8857_v27 = vld [vmem:[#allocation40_spill] sm:$0xff] }
 0x40f   : > { %v733_v63 = vmul.f32 %v4420_v13, %v6052_v17  ;;  %v8501_v34 = vmov 98   ;;  %v823_v26 = vmul.f32 %v4423_v31, %v6227_v8  ;;  %v821_v17 = vmul.f32 %v4423_v31, %v8857_v27 }
 0x410   : > { %2781 = vperm.xlu1 %5023, %v6392_v48   ;;  %v6935_v43 = vpop.permute.xlu1 %2462  ;;  %v621_v59 = vmax.f32 %v592_v42, %v617_v28  ;;  %v6976_v57 = vpop.permute.xlu0 %2251  ;;  %v680_v50 = vmax.f32 %v651_v61, %v676_v47  ;;  %v8858_v30 = vmov 86   ;;  %v8859_v61 = vld [vmem:[#allocation57_spill] sm:$0xff]  ;;  %v8860_v47 = vld [vmem:[#allocation44_spill] sm:$0xff] }
 0x411   : > { %8852 = vst [vmem:[#allocation252_spill] sm:$0xff] %v6935_v43  ;;  %3191 = vperm.xlu0 %5050, %v6416_v6   ;;  %v762_v45 = vmul.f32 %v4421_v33, %v8859_v61  ;;  %v7013_v42 = vld [vmem:[%s5820_s16] sm:$0xff] }
 0x412   : > { %v709_v20 = vmax.f32 %v680_v50, %v705_v55 }
 0x414   : > { %5024 = vset.pattern.permute.xlu1 %v8853_v49  ;;  %v6947_v0 = vpop.permute.xlu1 %2466  ;;  %v765_v49 = vmul.f32 %v4421_v33, %v6199_v29  ;;  %v738_v56 = vmax.f32 %v709_v20, %v734_v12  ;;  %v7001_v23 = vpop.permute.xlu0 %2263  ;;  %v8864_v20 = vld [vmem:[#allocation45_spill] sm:$0xff] }
 0x415   : > { %2802 = vperm.xlu1 %5024, %v6405_v2   ;;  %v736_v2 = vmul.f32 %v4420_v13, %v6063_v21  ;;  %v650_v21 = vmax.f32 %v621_v59, %v646_v16  ;;  %5053 = vset.pattern.permute.xlu0 %v8501_v34  ;;  %v8862_v13 = vld [vmem:[#allocation68_spill] sm:$0xff]  ;;  %v4425_v16 = vld [vmem:[%s5813_s3 + $0x11] ss:$0 sm:$0xff]  ;;  %v4439_v34 = vld [vmem:[%s5813_s3 + $0x1f] ss:$0 sm:$0xff] }
 0x416   : > { %3212 = vperm.xlu0 %5053, %v6426_v32   ;;  %v879_v12 = vmul.f32 %v4425_v16, %v8864_v20 }
 0x417   : > { %v679_v7 = vmax.f32 %v650_v21, %v675_v53  ;;  %v8863_v53 = vld [vmem:[#allocation73_spill] sm:$0xff]  ;;  %v8499_v21 = vmov 99  }
 0x419   : > { %2810 = vperm.xlu1 %5024, %v6392_v48   ;;  %v6959_v10 = vpop.permute.xlu1 %2487  ;;  %v682_v48 = vmax.f32 %v653_v38, %v678_v46  ;;  %v708_v58 = vmax.f32 %v679_v7, %v704_v41  ;;  %v4424_v46 = vld [vmem:[%s5813_s3 + $0x10] ss:$0 sm:$0xff]  ;;  %v7028_v41 = vpop.permute.xlu0 %2284 }
 0x41a   : > { %v852_v9 = vmul.f32 %v4424_v46, %v8860_v47  ;;  %v850_v59 = vmul.f32 %v4424_v46, %v8862_v13  ;;  %5054 = vset.pattern.permute.xlu0 %v8499_v21  ;;  %v4428_v47 = vld [vmem:[%s5813_s3 + $0x14] ss:$0 sm:$0xff] }
 0x41b   : > { %v711_v39 = vmax.f32 %v682_v48, %v707_v5  ;;  %v737_v38 = vmax.f32 %v708_v58, %v733_v63  ;;  %v8861_v48 = vld [vmem:[#allocation38_spill] sm:$0xff]  ;;  %3237 = vperm.xlu0 %5054, %v7013_v42  }
 0x41c   : > { %v791_v8 = vmul.f32 %v4422_v1, %v8861_v48  ;;  %v8866_v1 = vld [vmem:[#allocation49_spill] sm:$0xff] }
 0x41d   : > { %2814 = vperm.xlu1 %5024, %v6416_v6   ;;  %v6970_v3 = vpop.permute.xlu1 %2491  ;;  %v740_v35 = vmax.f32 %v711_v39, %v736_v2  ;;  %v763_v6 = vmul.f32 %v4421_v33, %v6067_v22  ;;  %v766_v2 = vmax.f32 %v737_v38, %v762_v45  ;;  %v881_v39 = vmul.f32 %v4425_v16, %v8863_v53  ;;  %v4426_v33 = vld [vmem:[%s5813_s3 + $0x12] ss:$0 sm:$0xff]  ;;  %v7041_v61 = vpop.permute.xlu0 %2309 }
 0x41e   : > { %8854 = vst [vmem:[#allocation253_spill] sm:$0xff] %v6970_v3  ;;  %v910_v7 = vmul.f32 %v4426_v33, %v8866_v1  ;;  %v8878_v1 = vld [vmem:[#allocation89_spill] sm:$0xff] }
 0x41f   : > { %v769_v29 = vmax.f32 %v740_v35, %v765_v49  ;;  %v767_v22 = vmax.f32 %v738_v56, %v763_v6  ;;  %v795_v35 = vmax.f32 %v766_v2, %v791_v8  ;;  %v8865_v49 = vld [vmem:[#allocation63_spill] sm:$0xff]  ;;  %v8867_v56 = vld [vmem:[#allocation42_spill] sm:$0xff] }
 0x420   : > { %v820_v6 = vmul.f32 %v4423_v31, %v8865_v49  ;;  %v849_v63 = vmul.f32 %v4424_v46, %v8867_v56  ;;  %v8869_v31 = vld [vmem:[#allocation76_spill] sm:$0xff]  ;;  %v8871_v46 = vld [vmem:[#allocation50_spill] sm:$0xff] }
 0x421   : > { %5027 = vset.pattern.permute.xlu1 %v8855_v15  ;;  %v798_v40 = vmax.f32 %v769_v29, %v794_v51  ;;  %v8873_v8 = vld [vmem:[#allocation54_spill] sm:$0xff] }
 0x422   : > { %2835 = vperm.xlu1 %5027, %v6426_v32   ;;  %v6984_v52 = vpop.permute.xlu1 %2512  ;;  %v796_v32 = vmax.f32 %v767_v22, %v792_v4  ;;  %v7033_v22 = vld [vmem:[%s5820_s16 + $0x18] sm:$0xff]  ;;  %v824_v27 = vmax.f32 %v795_v35, %v820_v6  ;;  %v4429_v49 = vld [vmem:[%s5813_s3 + $0x15] ss:$0 sm:$0xff] }
 0x423   : > { %v827_v5 = vmax.f32 %v798_v40, %v823_v26  ;;  %v908_v40 = vmul.f32 %v4426_v33, %v8869_v31  ;;  %v4427_v26 = vld [vmem:[%s5813_s3 + $0x13] ss:$0 sm:$0xff]  ;;  %3249 = vperm.xlu0 %5054, %v7033_v22  }
 0x424   : > { %v825_v55 = vmax.f32 %v796_v32, %v821_v17  ;;  %v937_v45 = vmul.f32 %v4427_v26, %v8871_v46  ;;  %v8872_v32 = vld [vmem:[#allocation70_spill] sm:$0xff]  ;;  %v8883_v46 = vld [vmem:[#allocation52_spill] sm:$0xff] }
 0x425   : > { %v856_v50 = vmax.f32 %v827_v5, %v852_v9  ;;  %v853_v9 = vmax.f32 %v824_v27, %v849_v63  ;;  %v878_v48 = vmul.f32 %v4425_v16, %v8872_v32  ;;  %v968_v5 = vmul.f32 %v4428_v47, %v8873_v8  ;;  %v4430_v63 = vld [vmem:[%s5813_s3 + $0x16] ss:$0 sm:$0xff] }
 0x426   : > { %2839 = vperm.xlu1 %5027, %v6992_v14   ;;  %v6995_v25 = vpop.permute.xlu1 %2520  ;;  %v854_v51 = vmax.f32 %v825_v55, %v850_v59  ;;  %v8874_v55 = vmov 87   ;;  %v7050_v59 = vld [vmem:[%s5820_s16 + $0x8] sm:$0xff]  ;;  %v8881_v31 = vld [vmem:[#allocation78_spill] sm:$0xff] }
 0x427   : > { %8856 = vst [vmem:[#allocation254_spill] sm:$0xff] %v6995_v25  ;;  %v885_v29 = vmax.f32 %v856_v50, %v881_v39  ;;  %v8876_v50 = vld [vmem:[#allocation47_spill] sm:$0xff]  ;;  %v882_v16 = vmax.f32 %v853_v9, %v878_v48  ;;  %v8884_v48 = vld [vmem:[#allocation92_spill] sm:$0xff] }
 0x428   : > { %v883_v58 = vmax.f32 %v854_v51, %v879_v12  ;;  %v907_v53 = vmul.f32 %v4426_v33, %v8876_v50  ;;  %v8877_v12 = vld [vmem:[#allocation84_spill] sm:$0xff]  ;;  %v8879_v51 = vld [vmem:[#allocation55_spill] sm:$0xff]  ;;  %v936_v33 = vmul.f32 %v4427_v26, %v8881_v31  ;;  %v1024_v8 = vmul.f32 %v4430_v63, %v8884_v48  ;;  %v8892_v48 = vld [vmem:[#allocation105_spill] sm:$0xff] }
 0x429   : > { %v914_v17 = vmax.f32 %v885_v29, %v910_v7  ;;  %v966_v35 = vmul.f32 %v4428_v47, %v8877_v12  ;;  %v997_v7 = vmul.f32 %v4429_v49, %v8878_v1  ;;  %v995_v56 = vmul.f32 %v4429_v49, %v8879_v51  ;;  %v8889_v1 = vld [vmem:[#allocation66_spill] sm:$0xff] }
 0x42a   : > { %5028 = vset.pattern.permute.xlu1 %v8858_v30  ;;  %v7008_v28 = vpop.permute.xlu1 %2524  ;;  %v8870_v30 = vld [vmem:[#allocation81_spill] sm:$0xff]  ;;  %v912_v13 = vmax.f32 %v883_v58, %v908_v40  ;;  %v911_v58 = vmax.f32 %v882_v16, %v907_v53  ;;  %v8882_v40 = vld [vmem:[#allocation60_spill] sm:$0xff]  ;;  %v8888_v16 = vld [vmem:[#allocation86_spill] sm:$0xff] }
 0x42b   : > { %2860 = vperm.xlu1 %5028, %v7013_v42   ;;  %v939_v38 = vmul.f32 %v4427_v26, %v8870_v30  ;;  %v1026_v27 = vmul.f32 %v4430_v63, %v8882_v40  ;;  %v8886_v53 = vld [vmem:[#allocation97_spill] sm:$0xff] }
 0x42c   : > { %v941_v20 = vmax.f32 %v912_v13, %v937_v45  ;;  %v965_v45 = vmul.f32 %v4428_v47, %v8883_v46  ;;  %v940_v13 = vmax.f32 %v911_v58, %v936_v33  ;;  %v4433_v46 = vld [vmem:[%s5813_s3 + $0x19] ss:$0 sm:$0xff] }
 0x42d   : > { %v943_v39 = vmax.f32 %v914_v17, %v939_v38  ;;  %v8498_v17 = vmov 100   ;;  %v7067_v38 = vpop.permute.xlu0 %2321 }
 0x42e   : > { %5057 = vset.pattern.permute.xlu0 %v8498_v17  ;;  %v970_v30 = vmax.f32 %v941_v20, %v966_v35  ;;  %v8887_v20 = vld [vmem:[#allocation61_spill] sm:$0xff]  ;;  %v4432_v35 = vld [vmem:[%s5813_s3 + $0x18] ss:$0 sm:$0xff]  ;;  %v969_v47 = vmax.f32 %v940_v13, %v965_v45  ;;  %v4434_v13 = vld [vmem:[%s5813_s3 + $0x1a] ss:$0 sm:$0xff] }
 0x42f   : > { %2868 = vperm.xlu1 %5028, %v6992_v14   ;;  %v7021_v15 = vpop.permute.xlu1 %2545  ;;  %v972_v6 = vmax.f32 %v943_v39, %v968_v5  ;;  %3270 = vperm.xlu0 %5057, %v7050_v59   ;;  %v4431_v5 = vld [vmem:[%s5813_s3 + $0x17] ss:$0 sm:$0xff] }
 0x430   : > { %v999_v32 = vmax.f32 %v970_v30, %v995_v56  ;;  %v1055_v39 = vmul.f32 %v4431_v5, %v8886_v53  ;;  %v1053_v12 = vmul.f32 %v4431_v5, %v8887_v20  ;;  %v8890_v56 = vld [vmem:[#allocation58_spill] sm:$0xff] }
 0x431   : > { %v1001_v9 = vmax.f32 %v972_v6, %v997_v7  ;;  %v994_v6 = vmul.f32 %v4429_v49, %v8888_v16  ;;  %v1084_v7 = vmul.f32 %v4432_v35, %v8889_v1  ;;  %v1023_v31 = vmul.f32 %v4430_v63, %v8890_v56  ;;  %v8893_v63 = vld [vmem:[#allocation67_spill] sm:$0xff]  ;;  %v8894_v53 = vld [vmem:[#allocation94_spill] sm:$0xff] }
 0x432   : > { %v1028_v51 = vmax.f32 %v999_v32, %v1024_v8  ;;  %v7090_v32 = vpop.permute.xlu0 %2342  ;;  %v1111_v8 = vmul.f32 %v4433_v46, %v8893_v63  ;;  %v8895_v20 = vld [vmem:[#allocation74_spill] sm:$0xff] }
 0x433   : > { %2872 = vperm.xlu1 %5028, %v7033_v22   ;;  %v7036_v4 = vpop.permute.xlu1 %2549  ;;  %v1030_v50 = vmax.f32 %v1001_v9, %v1026_v27  ;;  %v8891_v27 = vld [vmem:[#allocation100_spill] sm:$0xff]  ;;  %v8497_v9 = vmov 101   ;;  %v998_v45 = vmax.f32 %v969_v47, %v994_v6 }
 0x434   : > { %8868 = vst [vmem:[#allocation40_spill] sm:$0xff] %v7036_v4  ;;  %v1057_v33 = vmax.f32 %v1028_v51, %v1053_v12  ;;  %v1082_v30 = vmul.f32 %v4432_v35, %v8891_v27  ;;  %5058 = vset.pattern.permute.xlu0 %v8497_v9  ;;  %v1142_v12 = vmul.f32 %v4434_v13, %v8895_v20  ;;  %v8897_v6 = vld [vmem:[#allocation64_spill] sm:$0xff]  ;;  %v4435_v27 = vld [vmem:[%s5813_s3 + $0x1b] ss:$0 sm:$0xff]  ;;  %v4437_v9 = vld [vmem:[%s5813_s3 + $0x1d] ss:$0 sm:$0xff] }
 0x435   : > { %v1059_v40 = vmax.f32 %v1030_v50, %v1055_v39  ;;  %3295 = vperm.xlu0 %5058, %v7013_v42   ;;  %v1027_v50 = vmax.f32 %v998_v45, %v1023_v31  ;;  %v1052_v39 = vmul.f32 %v4431_v5, %v8894_v53  ;;  %v1081_v1 = vmul.f32 %v4432_v35, %v8897_v6  ;;  %v8901_v20 = vld [vmem:[#allocation75_spill] sm:$0xff] }
 0x436   : > { %v1086_v16 = vmax.f32 %v1057_v33, %v1082_v30  ;;  %v7101_v51 = vpop.permute.xlu0 %2367  ;;  %v8900_v53 = vmov 89   ;;  %v1169_v33 = vmul.f32 %v4435_v27, %v8901_v20  ;;  %v4436_v30 = vld [vmem:[%s5813_s3 + $0x1c] ss:$0 sm:$0xff] }
 0x437   : > { %5031 = vset.pattern.permute.xlu1 %v8874_v55  ;;  %v8885_v55 = vmov 88   ;;  %v1088_v49 = vmax.f32 %v1059_v40, %v1084_v7  ;;  %v8898_v40 = vld [vmem:[#allocation108_spill] sm:$0xff]  ;;  %v1056_v5 = vmax.f32 %v1027_v50, %v1052_v39  ;;  %v8905_v39 = vld [vmem:[#allocation71_spill] sm:$0xff] }
 0x438   : > { %2893 = vperm.xlu1 %5031, %v7050_v59   ;;  %v7053_v2 = vpop.permute.xlu1 %2570  ;;  %v1115_v56 = vmax.f32 %v1086_v16, %v1111_v8  ;;  %v1140_v31 = vmul.f32 %v4434_v13, %v8898_v40  ;;  %v8904_v16 = vld [vmem:[#allocation82_spill] sm:$0xff] }
 0x439   : > { %8875 = vst [vmem:[#allocation57_spill] sm:$0xff] %v7053_v2  ;;  %3307 = vperm.xlu0 %5058, %v7033_v22   ;;  %v1200_v6 = vmul.f32 %v4436_v30, %v8904_v16  ;;  %v8911_v16 = vld [vmem:[#allocation90_spill] sm:$0xff] }
 0x43a   : > { %v1144_v50 = vmax.f32 %v1115_v56, %v1140_v31  ;;  %v7125_v31 = vpop.permute.xlu0 %2379 }
 0x43c   : > { %2897 = vperm.xlu1 %5031, %v6992_v14   ;;  %v7062_v29 = vpop.permute.xlu1 %2578  ;;  %v1173_v40 = vmax.f32 %v1144_v50, %v1169_v33 }
 0x43d   : > { %8880 = vst [vmem:[#allocation44_spill] sm:$0xff] %v7062_v29 }
 0x440   : > { %5032 = vset.pattern.permute.xlu1 %v8885_v55  ;;  %v7074_v26 = vpop.permute.xlu1 %2582  ;;  %v1113_v55 = vmul.f32 %v4433_v46, %v8892_v48  ;;  %v8899_v48 = vld [vmem:[#allocation113_spill] sm:$0xff] }
 0x441   : > { %2918 = vperm.xlu1 %5032, %v7013_v42   ;;  %v1171_v63 = vmul.f32 %v4435_v27, %v8899_v48  ;;  %v8906_v48 = vld [vmem:[#allocation116_spill] sm:$0xff] }
 0x442   : > { %v1117_v7 = vmax.f32 %v1088_v49, %v1113_v55  ;;  %v1085_v49 = vmax.f32 %v1056_v5, %v1081_v1  ;;  %v8903_v55 = vld [vmem:[#allocation102_spill] sm:$0xff]  ;;  %v8908_v1 = vld [vmem:[#allocation121_spill] sm:$0xff] }
 0x443   : > { %v1110_v8 = vmul.f32 %v4433_v46, %v8903_v55  ;;  %v1229_v5 = vmul.f32 %v4437_v9, %v8908_v1  ;;  %v8500_v46 = vmov 102   ;;  %v8909_v55 = vld [vmem:[#allocation83_spill] sm:$0xff] }
 0x444   : > { %v1146_v45 = vmax.f32 %v1117_v7, %v1142_v12  ;;  %v1139_v12 = vmul.f32 %v4434_v13, %v8905_v39  ;;  %5061 = vset.pattern.permute.xlu0 %v8500_v46  ;;  %v1227_v56 = vmul.f32 %v4437_v9, %v8909_v55  ;;  %v4438_v13 = vld [vmem:[%s5813_s3 + $0x1e] ss:$0 sm:$0xff]  ;;  %v8914_v55 = vld [vmem:[#allocation124_spill] sm:$0xff] }
 0x445   : > { %2926 = vperm.xlu1 %5032, %v6992_v14   ;;  %v7084_v58 = vpop.permute.xlu1 %2603  ;;  %v1114_v17 = vmax.f32 %v1085_v49, %v1110_v8  ;;  %3328 = vperm.xlu0 %5061, %v7050_v59   ;;  %v1258_v49 = vmul.f32 %v4438_v13, %v8911_v16  ;;  %v8913_v39 = vld [vmem:[#allocation79_spill] sm:$0xff]  ;;  %v1256_v46 = vmul.f32 %v4438_v13, %v8914_v55  ;;  %v8922_v55 = vld [vmem:[#allocation137_spill] sm:$0xff] }
 0x446   : > { %v1175_v7 = vmax.f32 %v1146_v45, %v1171_v63  ;;  %v8910_v63 = vld [vmem:[#allocation110_spill] sm:$0xff] }
 0x447   : > { %v1143_v45 = vmax.f32 %v1114_v17, %v1139_v12  ;;  %v1168_v33 = vmul.f32 %v4435_v27, %v8910_v63  ;;  %v1287_v27 = vmul.f32 %v4439_v34, %v8915_v54  ;;  %v8916_v63 = vld [vmem:[#allocation91_spill] sm:$0xff] }
 0x448   : > { %v1204_v21 = vmax.f32 %v1175_v7, %v1200_v6  ;;  %v8912_v6 = vmov 90   ;;  %v1197_v7 = vmul.f32 %v4436_v30, %v8913_v39  ;;  %v1285_v16 = vmul.f32 %v4439_v34, %v8916_v63  ;;  %v8920_v54 = vld [vmem:[#allocation87_spill] sm:$0xff] }
 0x449   : > { %2930 = vperm.xlu1 %5032, %v7033_v22   ;;  %v7098_v47 = vpop.permute.xlu1 %2607  ;;  %v1172_v17 = vmax.f32 %v1143_v45, %v1168_v33  ;;  %v8505_v45 = vmov 103   ;;  %v1255_v33 = vmul.f32 %v4438_v13, %v8920_v54 }
 0x44a   : > { %8896 = vst [vmem:[#allocation38_spill] sm:$0xff] %v7098_v47  ;;  %5062 = vset.pattern.permute.xlu0 %v8505_v45  ;;  %v8936_v47 = vld [vmem:[#allocation103_spill] sm:$0xff] }
 0x44d   : > { %5035 = vset.pattern.permute.xlu1 %v8900_v53  ;;  %v1198_v53 = vmul.f32 %v4436_v30, %v8906_v48  ;;  %v1233_v48 = vmax.f32 %v1204_v21, %v1229_v5  ;;  %v7142_v21 = vpop.permute.xlu0 %2400  ;;  %3353 = vperm.xlu0 %5062, %v7013_v42  }
 0x44e   : > { %2951 = vperm.xlu1 %5035, %v7050_v59   ;;  %v7111_v35 = vpop.permute.xlu1 %2628 }
 0x44f   : > { %8902 = vst [vmem:[#allocation68_spill] sm:$0xff] %v7111_v35  ;;  %v1202_v8 = vmax.f32 %v1173_v40, %v1198_v53  ;;  %v1262_v12 = vmax.f32 %v1233_v48, %v1258_v49  ;;  %v4440_v40 = vld [vmem:[%s5813_s3 + $0x20] ss:$0 sm:$0xff]  ;;  %v1201_v53 = vmax.f32 %v1172_v17, %v1197_v7 }
 0x450   : > { %v1316_v30 = vmul.f32 %v4440_v40, %v8918_v44  ;;  %v4441_v44 = vld [vmem:[%s5813_s3 + $0x21] ss:$0 sm:$0xff] }
 0x451   : > { %v1231_v1 = vmax.f32 %v1202_v8, %v1227_v56  ;;  %v1291_v49 = vmax.f32 %v1262_v12, %v1287_v27  ;;  %v1345_v17 = vmul.f32 %v4441_v44, %v8922_v55  ;;  %v7153_v63 = vpop.permute.xlu0 %2425  ;;  %v4442_v12 = vld [vmem:[%s5813_s3 + $0x22] ss:$0 sm:$0xff]  ;;  %3365 = vperm.xlu0 %5062, %v7033_v22   ;;  %v8928_v55 = vmov 91  }
 0x452   : > { %2955 = vperm.xlu1 %5035, %v6992_v14   ;;  %v7119_v20 = vpop.permute.xlu1 %2636 }
 0x453   : > { %8907 = vst [vmem:[#allocation73_spill] sm:$0xff] %v7119_v20  ;;  %v1260_v56 = vmax.f32 %v1231_v1, %v1256_v46  ;;  %v1320_v48 = vmax.f32 %v1291_v49, %v1316_v30  ;;  %v8924_v1 = vld [vmem:[#allocation99_spill] sm:$0xff]  ;;  %v4443_v20 = vld [vmem:[%s5813_s3 + $0x23] ss:$0 sm:$0xff] }
 0x454   : > { %v1343_v13 = vmul.f32 %v4441_v44, %v8924_v1 }
 0x455   : > { %v1289_v8 = vmax.f32 %v1260_v56, %v1285_v16  ;;  %v8926_v56 = vld [vmem:[#allocation106_spill] sm:$0xff]  ;;  %v1349_v49 = vmax.f32 %v1320_v48, %v1345_v17 }
 0x456   : > { %5036 = vset.pattern.permute.xlu1 %v8912_v6  ;;  %v7131_v50 = vpop.permute.xlu1 %2640  ;;  %v8917_v6 = vld [vmem:[#allocation118_spill] sm:$0xff]  ;;  %v1374_v54 = vmul.f32 %v4442_v12, %v8926_v56 }
 0x457   : > { %2976 = vperm.xlu1 %5036, %v7013_v42   ;;  %v1226_v36 = vmul.f32 %v4437_v9, %v8917_v6  ;;  %v8921_v9 = vld [vmem:[#allocation132_spill] sm:$0xff]  ;;  %v8925_v6 = vld [vmem:[#allocation126_spill] sm:$0xff] }
 0x458   : > { %v1314_v39 = vmul.f32 %v4440_v40, %v8921_v9  ;;  %v1284_v16 = vmul.f32 %v4439_v34, %v8925_v6  ;;  %v7164_v9 = vpop.permute.xlu0 %2437  ;;  %v8931_v6 = vld [vmem:[#allocation145_spill] sm:$0xff]  ;;  %v8933_v17 = vld [vmem:[#allocation134_spill] sm:$0xff] }
 0x459   : > { %v1230_v7 = vmax.f32 %v1201_v53, %v1226_v36  ;;  %v8927_v53 = vld [vmem:[#allocation95_spill] sm:$0xff]  ;;  %v1403_v56 = vmul.f32 %v4443_v20, %v8931_v6 }
 0x45a   : > { %v1318_v36 = vmax.f32 %v1289_v8, %v1314_v39  ;;  %v1313_v30 = vmul.f32 %v4440_v40, %v8927_v53  ;;  %v8932_v8 = vld [vmem:[#allocation107_spill] sm:$0xff]  ;;  %v4444_v39 = vld [vmem:[%s5813_s3 + $0x24] ss:$0 sm:$0xff]  ;;  %v1342_v53 = vmul.f32 %v4441_v44, %v8933_v17  ;;  %v4445_v44 = vld [vmem:[%s5813_s3 + $0x25] ss:$0 sm:$0xff] }
 0x45b   : > { %2984 = vperm.xlu1 %5036, %v6992_v14   ;;  %v7145_v5 = vpop.permute.xlu1 %2661  ;;  %v1259_v27 = vmax.f32 %v1230_v7, %v1255_v33  ;;  %v1378_v7 = vmax.f32 %v1349_v49, %v1374_v54  ;;  %v1401_v40 = vmul.f32 %v4443_v20, %v8932_v8  ;;  %v8506_v49 = vmov 104   ;;  %v8938_v8 = vld [vmem:[#allocation153_spill] sm:$0xff] }
 0x45c   : > { %8919 = vst [vmem:[#allocation45_spill] sm:$0xff] %v7145_v5  ;;  %v1347_v45 = vmax.f32 %v1318_v36, %v1343_v13  ;;  %v7181_v54 = vpop.permute.xlu0 %2458  ;;  %5065 = vset.pattern.permute.xlu0 %v8506_v49  ;;  %v1461_v17 = vmul.f32 %v4445_v44, %v8938_v8  ;;  %v8942_v49 = vld [vmem:[#allocation142_spill] sm:$0xff] }
 0x45d   : > { %v1288_v33 = vmax.f32 %v1259_v27, %v1284_v16  ;;  %v1371_v27 = vmul.f32 %v4442_v12, %v8936_v47  ;;  %v1407_v16 = vmax.f32 %v1378_v7, %v1403_v56  ;;  %3386 = vperm.xlu0 %5065, %v7050_v59   ;;  %v4446_v47 = vld [vmem:[%s5813_s3 + $0x26] ss:$0 sm:$0xff]  ;;  %v4459_v5 = vld [vmem:[%s5813_s3 + $0x33] ss:$0 sm:$0xff] }
 0x45f   : > { %2988 = vperm.xlu1 %5036, %v7033_v22   ;;  %v7156_v46 = vpop.permute.xlu1 %2665  ;;  %v1317_v48 = vmax.f32 %v1288_v33, %v1313_v30  ;;  %v8937_v30 = vld [vmem:[#allocation148_spill] sm:$0xff] }
 0x460   : > { %8923 = vst [vmem:[#allocation63_spill] sm:$0xff] %v7156_v46  ;;  %v8929_v46 = vld [vmem:[#allocation140_spill] sm:$0xff]  ;;  %v1430_v33 = vmul.f32 %v4444_v39, %v8937_v30  ;;  %v7195_v29 = vpop.permute.xlu0 %2483 }
 0x461   : > { %v1372_v1 = vmul.f32 %v4442_v12, %v8929_v46  ;;  %v8940_v12 = vmov 92  }
 0x463   : > { %5039 = vset.pattern.permute.xlu1 %v8928_v55  ;;  %v8934_v55 = vld [vmem:[#allocation114_spill] sm:$0xff]  ;;  %v1376_v36 = vmax.f32 %v1347_v45, %v1372_v1  ;;  %v1346_v45 = vmax.f32 %v1317_v48, %v1342_v53  ;;  %v8944_v53 = vld [vmem:[#allocation111_spill] sm:$0xff] }
 0x464   : > { %3009 = vperm.xlu1 %5039, %v7050_v59   ;;  %v7170_v34 = vpop.permute.xlu1 %2686  ;;  %v1432_v13 = vmul.f32 %v4444_v39, %v8934_v55  ;;  %v8939_v55 = vld [vmem:[#allocation115_spill] sm:$0xff] }
 0x465   : > { %8930 = vst [vmem:[#allocation49_spill] sm:$0xff] %v7170_v34  ;;  %v1405_v6 = vmax.f32 %v1376_v36, %v1401_v40  ;;  %v1375_v56 = vmax.f32 %v1346_v45, %v1371_v27  ;;  %v1400_v40 = vmul.f32 %v4443_v20, %v8942_v49  ;;  %v8943_v36 = vld [vmem:[#allocation122_spill] sm:$0xff]  ;;  %v8946_v27 = vld [vmem:[#allocation161_spill] sm:$0xff]  ;;  %v7202_v20 = vpop.permute.xlu0 %2495 }
 0x466   : > { %v1436_v1 = vmax.f32 %v1407_v16, %v1432_v13  ;;  %v1490_v30 = vmul.f32 %v4446_v47, %v8943_v36  ;;  %v1429_v13 = vmul.f32 %v4444_v39, %v8944_v53  ;;  %v8948_v36 = vld [vmem:[#allocation123_spill] sm:$0xff]  ;;  %v8507_v39 = vmov 105   ;;  %v8962_v34 = vld [vmem:[#allocation177_spill] sm:$0xff] }
 0x467   : > { %v1434_v48 = vmax.f32 %v1405_v6, %v1430_v33  ;;  %v1404_v25 = vmax.f32 %v1375_v56, %v1400_v40  ;;  %v4448_v33 = vld [vmem:[%s5813_s3 + $0x28] ss:$0 sm:$0xff]  ;;  %5066 = vset.pattern.permute.xlu0 %v8507_v39  ;;  %v8950_v56 = vld [vmem:[#allocation130_spill] sm:$0xff]  ;;  %v4449_v39 = vld [vmem:[%s5813_s3 + $0x29] ss:$0 sm:$0xff] }
 0x468   : > { %3013 = vperm.xlu1 %5039, %v6992_v14   ;;  %v7178_v46 = vpop.permute.xlu1 %2694  ;;  %v1465_v16 = vmax.f32 %v1436_v1, %v1461_v17  ;;  %v8949_v1 = vld [vmem:[#allocation150_spill] sm:$0xff]  ;;  %v1548_v40 = vmul.f32 %v4448_v33, %v8950_v56  ;;  %3411 = vperm.xlu0 %5066, %v7013_v42  }
 0x469   : > { %8935 = vst [vmem:[#allocation42_spill] sm:$0xff] %v7178_v46  ;;  %v1459_v46 = vmul.f32 %v4445_v44, %v8939_v55  ;;  %v8945_v55 = vld [vmem:[#allocation156_spill] sm:$0xff]  ;;  %v1458_v17 = vmul.f32 %v4445_v44, %v8949_v1  ;;  %v8954_v44 = vld [vmem:[#allocation169_spill] sm:$0xff]  ;;  %v7220_v56 = vpop.permute.xlu0 %2516 }
 0x46a   : > { %v1488_v4 = vmul.f32 %v4446_v47, %v8945_v55  ;;  %v1494_v3 = vmax.f32 %v1465_v16, %v1490_v30  ;;  %v1577_v1 = vmul.f32 %v4449_v39, %v8954_v44 }
 0x46b   : > { %v1463_v8 = vmax.f32 %v1434_v48, %v1459_v46  ;;  %v1433_v46 = vmax.f32 %v1404_v25, %v1429_v13  ;;  %v8951_v48 = vld [vmem:[#allocation119_spill] sm:$0xff] }
 0x46c   : > { %5040 = vset.pattern.permute.xlu1 %v8940_v12  ;;  %v7191_v7 = vpop.permute.xlu1 %2698  ;;  %v4447_v12 = vld [vmem:[%s5813_s3 + $0x27] ss:$0 sm:$0xff]  ;;  %v1487_v53 = vmul.f32 %v4446_v47, %v8951_v48  ;;  %3423 = vperm.xlu0 %5066, %v7033_v22  }
 0x46d   : > { %8941 = vst [vmem:[#allocation76_spill] sm:$0xff] %v7191_v7  ;;  %3034 = vperm.xlu1 %5040, %v7013_v42   ;;  %v1519_v45 = vmul.f32 %v4447_v12, %v8946_v27  ;;  %v1517_v6 = vmul.f32 %v4447_v12, %v8948_v36  ;;  %v1492_v30 = vmax.f32 %v1463_v8, %v1488_v4  ;;  %v8953_v36 = vld [vmem:[#allocation164_spill] sm:$0xff]  ;;  %v8955_v4 = vld [vmem:[#allocation131_spill] sm:$0xff]  ;;  %v7232_v44 = vpop.permute.xlu0 %2541 }
 0x46e   : > { %v1546_v43 = vmul.f32 %v4448_v33, %v8953_v36  ;;  %v1462_v25 = vmax.f32 %v1433_v46, %v1458_v17  ;;  %v1575_v47 = vmul.f32 %v4449_v39, %v8955_v4 }
 0x46f   : > { %v1523_v16 = vmax.f32 %v1494_v3, %v1519_v45  ;;  %v1521_v27 = vmax.f32 %v1492_v30, %v1517_v6  ;;  %v4450_v3 = vld [vmem:[%s5813_s3 + $0x2a] ss:$0 sm:$0xff]  ;;  %v8956_v45 = vld [vmem:[#allocation158_spill] sm:$0xff]  ;;  %v8958_v30 = vmov 93  }
 0x470   : > { %v1491_v8 = vmax.f32 %v1462_v25, %v1487_v53  ;;  %v1516_v48 = vmul.f32 %v4447_v12, %v8956_v45  ;;  %v1604_v53 = vmul.f32 %v4450_v3, %v8961_v37  ;;  %v4451_v25 = vld [vmem:[%s5813_s3 + $0x2b] ss:$0 sm:$0xff]  ;;  %v8508_v37 = vmov 106  }
 0x471   : > { %3042 = vperm.xlu1 %5040, %v6992_v14   ;;  %v7205_v49 = vpop.permute.xlu1 %2719  ;;  %v1552_v13 = vmax.f32 %v1523_v16, %v1548_v40  ;;  %v1550_v46 = vmax.f32 %v1521_v27, %v1546_v43  ;;  %v8960_v40 = vld [vmem:[#allocation127_spill] sm:$0xff]  ;;  %v4452_v43 = vld [vmem:[%s5813_s3 + $0x2c] ss:$0 sm:$0xff]  ;;  %5069 = vset.pattern.permute.xlu0 %v8508_v37  ;;  %v4454_v37 = vld [vmem:[%s5813_s3 + $0x2e] ss:$0 sm:$0xff] }
 0x472   : > { %8947 = vst [vmem:[#allocation81_spill] sm:$0xff] %v7205_v49  ;;  %v1545_v16 = vmul.f32 %v4448_v33, %v8960_v40  ;;  %v1520_v12 = vmax.f32 %v1491_v8, %v1516_v48  ;;  %v8963_v49 = vld [vmem:[#allocation139_spill] sm:$0xff]  ;;  %v8966_v40 = vld [vmem:[#allocation146_spill] sm:$0xff]  ;;  %3444 = vperm.xlu0 %5069, %v7050_v59  }
 0x473   : > { %v1581_v36 = vmax.f32 %v1552_v13, %v1577_v1  ;;  %v1579_v4 = vmax.f32 %v1550_v46, %v1575_v47  ;;  %v8965_v13 = vld [vmem:[#allocation166_spill] sm:$0xff]  ;;  %v1664_v47 = vmul.f32 %v4452_v43, %v8966_v40  ;;  %v7244_v46 = vpop.permute.xlu0 %2553 }
 0x474   : > { %v1549_v33 = vmax.f32 %v1520_v12, %v1545_v16  ;;  %v1574_v1 = vmul.f32 %v4449_v39, %v8965_v13  ;;  %v4453_v16 = vld [vmem:[%s5813_s3 + $0x2d] ss:$0 sm:$0xff]  ;;  %v8969_v12 = vmov 94  }
 0x475   : > { %3046 = vperm.xlu1 %5040, %v7033_v22   ;;  %v7215_v55 = vpop.permute.xlu1 %2723 }
 0x476   : > { %8952 = vst [vmem:[#allocation50_spill] sm:$0xff] %v7215_v55  ;;  %v8957_v55 = vld [vmem:[#allocation138_spill] sm:$0xff]  ;;  %v1578_v13 = vmax.f32 %v1549_v33, %v1574_v1 }
 0x477   : > { %v1606_v6 = vmul.f32 %v4450_v3, %v8957_v55  ;;  %v1635_v55 = vmul.f32 %v4451_v25, %v8962_v34  ;;  %v1608_v34 = vmax.f32 %v1579_v4, %v1604_v53  ;;  %v8972_v4 = vld [vmem:[#allocation147_spill] sm:$0xff] }
 0x478   : > { %v1691_v53 = vmul.f32 %v4453_v16, %v8972_v4 }
 0x479   : > { %5043 = vset.pattern.permute.xlu1 %v8958_v30  ;;  %v1610_v45 = vmax.f32 %v1581_v36, %v1606_v6  ;;  %v1633_v30 = vmul.f32 %v4451_v25, %v8963_v49  ;;  %v8967_v49 = vld [vmem:[#allocation135_spill] sm:$0xff]  ;;  %v8968_v36 = vld [vmem:[#allocation180_spill] sm:$0xff] }
 0x47a   : > { %3067 = vperm.xlu1 %5043, %v7050_v59   ;;  %v7229_v17 = vpop.permute.xlu1 %2744  ;;  %v1603_v8 = vmul.f32 %v4450_v3, %v8967_v49  ;;  %v7260_v49 = vpop.permute.xlu0 %2574 }
 0x47b   : > { %8959 = vst [vmem:[#allocation70_spill] sm:$0xff] %v7229_v17  ;;  %v1639_v48 = vmax.f32 %v1610_v45, %v1635_v55  ;;  %v1637_v6 = vmax.f32 %v1608_v34, %v1633_v30  ;;  %v8971_v17 = vld [vmem:[#allocation185_spill] sm:$0xff]  ;;  %v8973_v45 = vld [vmem:[#allocation174_spill] sm:$0xff] }
 0x47c   : > { %v1693_v35 = vmul.f32 %v4453_v16, %v8971_v17  ;;  %v1607_v3 = vmax.f32 %v1578_v13, %v1603_v8  ;;  %v1632_v55 = vmul.f32 %v4451_v25, %v8973_v45  ;;  %v8974_v30 = vld [vmem:[#allocation154_spill] sm:$0xff]  ;;  %v8509_v8 = vmov 107   ;;  %v8978_v45 = vld [vmem:[#allocation193_spill] sm:$0xff] }
 0x47d   : > { %v1668_v40 = vmax.f32 %v1639_v48, %v1664_v47  ;;  %v1722_v34 = vmul.f32 %v4454_v37, %v8974_v30  ;;  %v8977_v48 = vld [vmem:[#allocation188_spill] sm:$0xff]  ;;  %5070 = vset.pattern.permute.xlu0 %v8509_v8 }
 0x47e   : > { %3071 = vperm.xlu1 %5043, %v6992_v14   ;;  %v7240_v27 = vpop.permute.xlu1 %2752  ;;  %v1720_v4 = vmul.f32 %v4454_v37, %v8977_v48  ;;  %v1636_v25 = vmax.f32 %v1607_v3, %v1632_v55  ;;  %3469 = vperm.xlu0 %5070, %v7013_v42  }
 0x47f   : > { %8964 = vst [vmem:[#allocation54_spill] sm:$0xff] %v7240_v27  ;;  %v1662_v27 = vmul.f32 %v4452_v43, %v8968_v36  ;;  %v1697_v1 = vmax.f32 %v1668_v40, %v1693_v35  ;;  %v8980_v35 = vld [vmem:[#allocation155_spill] sm:$0xff] }
 0x481   : > { %v1666_v36 = vmax.f32 %v1637_v6, %v1662_v27  ;;  %v1726_v13 = vmax.f32 %v1697_v1, %v1722_v34  ;;  %v7270_v27 = vpop.permute.xlu0 %2599  ;;  %v4456_v6 = vld [vmem:[%s5813_s3 + $0x30] ss:$0 sm:$0xff]  ;;  %v8984_v34 = vld [vmem:[#allocation151_spill] sm:$0xff] }
 0x482   : > { %5044 = vset.pattern.permute.xlu1 %v8969_v12  ;;  %v7252_v39 = vpop.permute.xlu1 %2756  ;;  %v8975_v12 = vld [vmem:[#allocation143_spill] sm:$0xff]  ;;  %8979 = vst [vmem:[#allocation89_spill] sm:$0xff] %v7270_v27  ;;  %v1719_v1 = vmul.f32 %v4454_v37, %v8984_v34  ;;  %3481 = vperm.xlu0 %5070, %v7033_v22   ;;  %v8987_v27 = vmov 95  }
 0x483   : > { %8970 = vst [vmem:[#allocation47_spill] sm:$0xff] %v7252_v39  ;;  %3092 = vperm.xlu1 %5044, %v7013_v42   ;;  %v1661_v33 = vmul.f32 %v4452_v43, %v8975_v12  ;;  %v1695_v47 = vmax.f32 %v1666_v36, %v1691_v53  ;;  %v4455_v39 = vld [vmem:[%s5813_s3 + $0x2f] ss:$0 sm:$0xff]  ;;  %v8981_v53 = vld [vmem:[#allocation182_spill] sm:$0xff] }
 0x484   : > { %v1751_v30 = vmul.f32 %v4455_v39, %v8978_v45  ;;  %v1749_v43 = vmul.f32 %v4455_v39, %v8980_v35  ;;  %v1690_v36 = vmul.f32 %v4453_v16, %v8981_v53  ;;  %v8982_v12 = vld [vmem:[#allocation162_spill] sm:$0xff] }
 0x485   : > { %v1665_v40 = vmax.f32 %v1636_v25, %v1661_v33  ;;  %v1780_v48 = vmul.f32 %v4456_v6, %v8982_v12  ;;  %v1724_v55 = vmax.f32 %v1695_v47, %v1720_v4  ;;  %v7281_v8 = vpop.permute.xlu0 %2611  ;;  %v4457_v25 = vld [vmem:[%s5813_s3 + $0x31] ss:$0 sm:$0xff]  ;;  %v4458_v4 = vld [vmem:[%s5813_s3 + $0x32] ss:$0 sm:$0xff] }
 0x486   : > { %v1755_v45 = vmax.f32 %v1726_v13, %v1751_v30  ;;  %v8986_v12 = vld [vmem:[#allocation201_spill] sm:$0xff]  ;;  %v8990_v30 = vld [vmem:[#allocation190_spill] sm:$0xff] }
 0x487   : > { %3100 = vperm.xlu1 %5044, %v6992_v14   ;;  %v7264_v17 = vpop.permute.xlu1 %2777  ;;  %v1753_v35 = vmax.f32 %v1724_v55, %v1749_v43  ;;  %v1694_v16 = vmax.f32 %v1665_v40, %v1690_v36  ;;  %v1809_v7 = vmul.f32 %v4457_v25, %v8986_v12  ;;  %v1748_v43 = vmul.f32 %v4455_v39, %v8990_v30  ;;  %v8991_v55 = vld [vmem:[#allocation170_spill] sm:$0xff]  ;;  %v8992_v36 = vld [vmem:[#allocation159_spill] sm:$0xff]  ;;  %v8994_v12 = vld [vmem:[#allocation204_spill] sm:$0xff] }
 0x488   : > { %8976 = vst [vmem:[#allocation84_spill] sm:$0xff] %v7264_v17  ;;  %v8985_v17 = vld [vmem:[#allocation196_spill] sm:$0xff]  ;;  %v1784_v53 = vmax.f32 %v1755_v45, %v1780_v48  ;;  %v1777_v48 = vmul.f32 %v4456_v6, %v8992_v36  ;;  %v8996_v39 = vld [vmem:[#allocation209_spill] sm:$0xff] }
 0x489   : > { %v1778_v33 = vmul.f32 %v4456_v6, %v8985_v17  ;;  %v1723_v13 = vmax.f32 %v1694_v16, %v1719_v1  ;;  %v1838_v17 = vmul.f32 %v4458_v4, %v8991_v55  ;;  %v7296_v45 = vpop.permute.xlu0 %2632  ;;  %v1867_v30 = vmul.f32 %v4459_v5, %v8996_v39  ;;  %v4460_v6 = vld [vmem:[%s5813_s3 + $0x34] ss:$0 sm:$0xff] }
 0x48a   : > { %v1813_v34 = vmax.f32 %v1784_v53, %v1809_v7  ;;  %8993 = vst [vmem:[#allocation60_spill] sm:$0xff] %v7296_v45  ;;  %v8510_v55 = vmov 108   ;;  %v8998_v53 = vld [vmem:[#allocation198_spill] sm:$0xff] }
 0x48b   : > { %3104 = vperm.xlu1 %5044, %v7033_v22   ;;  %v7278_v3 = vpop.permute.xlu1 %2781  ;;  %v1782_v40 = vmax.f32 %v1753_v35, %v1778_v33  ;;  %v1752_v1 = vmax.f32 %v1723_v13, %v1748_v43  ;;  %5073 = vset.pattern.permute.xlu0 %v8510_v55  ;;  %v8997_v35 = vld [vmem:[#allocation171_spill] sm:$0xff]  ;;  %v9001_v43 = vmov 96  }
 0x48c   : > { %8983 = vst [vmem:[#allocation55_spill] sm:$0xff] %v7278_v3  ;;  %v8988_v3 = vld [vmem:[#allocation163_spill] sm:$0xff]  ;;  %v1842_v16 = vmax.f32 %v1813_v34, %v1838_v17  ;;  %v1865_v7 = vmul.f32 %v4459_v5, %v8997_v35  ;;  %3502 = vperm.xlu0 %5073, %v7050_v59  }
 0x48d   : > { %v1807_v47 = vmul.f32 %v4457_v25, %v8988_v3  ;;  %v1836_v3 = vmul.f32 %v4458_v4, %v8994_v12  ;;  %v1781_v33 = vmax.f32 %v1752_v1, %v1777_v48  ;;  %v7310_v12 = vpop.permute.xlu0 %2657  ;;  %v9003_v34 = vld [vmem:[#allocation167_spill] sm:$0xff]  ;;  %v4461_v1 = vld [vmem:[%s5813_s3 + $0x35] ss:$0 sm:$0xff] }
 0x48e   : > { %9000 = vst [vmem:[#allocation92_spill] sm:$0xff] %v7310_v12  ;;  %v1835_v39 = vmul.f32 %v4458_v4, %v9003_v34  ;;  %v1871_v55 = vmax.f32 %v1842_v16, %v1867_v30  ;;  %v9008_v12 = vld [vmem:[#allocation206_spill] sm:$0xff]  ;;  %v9012_v34 = vld [vmem:[#allocation220_spill] sm:$0xff] }
 0x48f   : > { %5047 = vset.pattern.permute.xlu1 %v8987_v27  ;;  %v1811_v27 = vmax.f32 %v1782_v40, %v1807_v47  ;;  %v1806_v47 = vmul.f32 %v4457_v25, %v8998_v53  ;;  %v8999_v40 = vld [vmem:[#allocation178_spill] sm:$0xff]  ;;  %v1864_v4 = vmul.f32 %v4459_v5, %v9008_v12 }
 0x490   : > { %3125 = vperm.xlu1 %5047, %v7050_v59   ;;  %v7291_v37 = vpop.permute.xlu1 %2802  ;;  %v1896_v36 = vmul.f32 %v4460_v6, %v8999_v40  ;;  %v9005_v40 = vld [vmem:[#allocation217_spill] sm:$0xff]  ;;  %v9009_v16 = vld [vmem:[#allocation186_spill] sm:$0xff] }
 0x491   : > { %8989 = vst [vmem:[#allocation78_spill] sm:$0xff] %v7291_v37  ;;  %v1840_v13 = vmax.f32 %v1811_v27, %v1836_v3  ;;  %v1810_v25 = vmax.f32 %v1781_v33, %v1806_v47  ;;  %v1925_v37 = vmul.f32 %v4461_v1, %v9005_v40  ;;  %v7320_v45 = vpop.permute.xlu0 %2669  ;;  %v9007_v27 = vld [vmem:[#allocation179_spill] sm:$0xff]  ;;  %v4463_v5 = vld [vmem:[%s5813_s3 + $0x37] ss:$0 sm:$0xff]  ;;  %v9013_v40 = vld [vmem:[#allocation225_spill] sm:$0xff] }
 0x492   : > { %v1900_v53 = vmax.f32 %v1871_v55, %v1896_v36  ;;  %9006 = vst [vmem:[#allocation61_spill] sm:$0xff] %v7320_v45  ;;  %v1923_v3 = vmul.f32 %v4461_v1, %v9007_v27  ;;  %v8511_v55 = vmov 109   ;;  %v9011_v33 = vld [vmem:[#allocation175_spill] sm:$0xff]  ;;  %v1983_v27 = vmul.f32 %v4463_v5, %v9013_v40 }
 0x493   : > { %v1869_v35 = vmax.f32 %v1840_v13, %v1865_v7  ;;  %5074 = vset.pattern.permute.xlu0 %v8511_v55  ;;  %v1893_v47 = vmul.f32 %v4460_v6, %v9011_v33  ;;  %v9017_v33 = vld [vmem:[#allocation214_spill] sm:$0xff]  ;;  %v9021_v55 = vmov 97  }
 0x494   : > { %3129 = vperm.xlu1 %5047, %v6992_v14   ;;  %v7301_v2 = vpop.permute.xlu1 %2810  ;;  %v1929_v36 = vmax.f32 %v1900_v53, %v1925_v37  ;;  %3527 = vperm.xlu0 %5074, %v7013_v42   ;;  %v4464_v37 = vld [vmem:[%s5813_s3 + $0x38] ss:$0 sm:$0xff] }
 0x495   : > { %8995 = vst [vmem:[#allocation52_spill] sm:$0xff] %v7301_v2  ;;  %v9004_v2 = vld [vmem:[#allocation212_spill] sm:$0xff] }
 0x496   : > { %v1894_v48 = vmul.f32 %v4460_v6, %v9004_v2 }
 0x498   : > { %5048 = vset.pattern.permute.xlu1 %v9001_v43  ;;  %v7313_v17 = vpop.permute.xlu1 %2814  ;;  %v4462_v43 = vld [vmem:[%s5813_s3 + $0x36] ss:$0 sm:$0xff]  ;;  %v1898_v2 = vmax.f32 %v1869_v35, %v1894_v48  ;;  %v9016_v48 = vld [vmem:[#allocation187_spill] sm:$0xff]  ;;  %3539 = vperm.xlu0 %5074, %v7033_v22  }
 0x499   : > { %9002 = vst [vmem:[#allocation97_spill] sm:$0xff] %v7313_v17  ;;  %3150 = vperm.xlu1 %5048, %v7013_v42   ;;  %v1839_v17 = vmax.f32 %v1810_v25, %v1835_v39  ;;  %v1954_v30 = vmul.f32 %v4462_v43, %v9009_v16  ;;  %v1952_v39 = vmul.f32 %v4462_v43, %v9012_v34  ;;  %v7335_v16 = vpop.permute.xlu0 %2690 }
 0x49a   : > { %v1927_v13 = vmax.f32 %v1898_v2, %v1923_v3  ;;  %9014 = vst [vmem:[#allocation66_spill] sm:$0xff] %v7335_v16  ;;  %v1981_v6 = vmul.f32 %v4463_v5, %v9016_v48  ;;  %v1922_v3 = vmul.f32 %v4461_v1, %v9017_v33  ;;  %v9018_v2 = vld [vmem:[#allocation194_spill] sm:$0xff]  ;;  %v9024_v33 = vld [vmem:[#allocation233_spill] sm:$0xff] }
 0x49b   : > { %v1868_v12 = vmax.f32 %v1839_v17, %v1864_v4  ;;  %v1958_v25 = vmax.f32 %v1929_v36, %v1954_v30  ;;  %v2012_v34 = vmul.f32 %v4464_v37, %v9018_v2  ;;  %v9019_v4 = vld [vmem:[#allocation183_spill] sm:$0xff]  ;;  %v4465_v16 = vld [vmem:[%s5813_s3 + $0x39] ss:$0 sm:$0xff] }
 0x49c   : > { %v1956_v17 = vmax.f32 %v1927_v13, %v1952_v39  ;;  %v1951_v30 = vmul.f32 %v4462_v43, %v9019_v4  ;;  %v2041_v2 = vmul.f32 %v4465_v16, %v9024_v33  ;;  %v9025_v13 = vld [vmem:[#allocation195_spill] sm:$0xff] }
 0x49d   : > { %3158 = vperm.xlu1 %5048, %v6992_v14   ;;  %v7327_v7 = vpop.permute.xlu1 %2835  ;;  %v1897_v53 = vmax.f32 %v1868_v12, %v1893_v47  ;;  %v1987_v36 = vmax.f32 %v1958_v25, %v1983_v27  ;;  %v7346_v40 = vpop.permute.xlu0 %2715  ;;  %v2039_v43 = vmul.f32 %v4465_v16, %v9025_v13  ;;  %v4466_v39 = vld [vmem:[%s5813_s3 + $0x3a] ss:$0 sm:$0xff]  ;;  %v9026_v27 = vld [vmem:[#allocation222_spill] sm:$0xff] }
 0x49e   : > { %9010 = vst [vmem:[#allocation86_spill] sm:$0xff] %v7327_v7  ;;  %9020 = vst [vmem:[#allocation100_spill] sm:$0xff] %v7346_v40  ;;  %v9022_v7 = vld [vmem:[#allocation228_spill] sm:$0xff]  ;;  %v1980_v4 = vmul.f32 %v4463_v5, %v9026_v27  ;;  %v4467_v5 = vld [vmem:[%s5813_s3 + $0x3b] ss:$0 sm:$0xff] }
 0x49f   : > { %v2010_v48 = vmul.f32 %v4464_v37, %v9022_v7  ;;  %v1926_v47 = vmax.f32 %v1897_v53, %v1922_v3  ;;  %v2016_v12 = vmax.f32 %v1987_v36, %v2012_v34  ;;  %v9030_v53 = vld [vmem:[#allocation191_spill] sm:$0xff]  ;;  %v8512_v36 = vmov 110  }
 0x4a0   : > { %v2009_v3 = vmul.f32 %v4464_v37, %v9030_v53  ;;  %5077 = vset.pattern.permute.xlu0 %v8512_v36 }
 0x4a1   : > { %3162 = vperm.xlu1 %5048, %v7033_v22   ;;  %v7338_v35 = vpop.permute.xlu1 %2839  ;;  %v1955_v25 = vmax.f32 %v1926_v47, %v1951_v30  ;;  %v2045_v34 = vmax.f32 %v2016_v12, %v2041_v2  ;;  %v9031_v30 = vld [vmem:[#allocation236_spill] sm:$0xff]  ;;  %3560 = vperm.xlu0 %5077, %v7050_v59   ;;  %v9036_v2 = vld [vmem:[#allocation230_spill] sm:$0xff] }
 0x4a2   : > { %9015 = vst [vmem:[#allocation58_spill] sm:$0xff] %v7338_v35  ;;  %v1985_v35 = vmax.f32 %v1956_v17, %v1981_v6  ;;  %v7359_v17 = vpop.permute.xlu0 %2727  ;;  %v2068_v47 = vmul.f32 %v4466_v39, %v9031_v30 }
 0x4a3   : > { %9028 = vst [vmem:[#allocation67_spill] sm:$0xff] %v7359_v17  ;;  %v1984_v13 = vmax.f32 %v1955_v25, %v1980_v4  ;;  %v9034_v17 = vmov 98   ;;  %v9039_v4 = vld [vmem:[#allocation199_spill] sm:$0xff] }
 0x4a4   : > { %v2014_v7 = vmax.f32 %v1985_v35, %v2010_v48  ;;  %v9033_v48 = vld [vmem:[#allocation203_spill] sm:$0xff] }
 0x4a5   : > { %5051 = vset.pattern.permute.xlu1 %v9021_v55  ;;  %v9027_v55 = vld [vmem:[#allocation202_spill] sm:$0xff]  ;;  %v2097_v40 = vmul.f32 %v4467_v5, %v9033_v48  ;;  %v2013_v12 = vmax.f32 %v1984_v13, %v2009_v3  ;;  %v9040_v48 = vld [vmem:[#allocation244_spill] sm:$0xff]  ;;  %v9041_v3 = vld [vmem:[#allocation249_spill] sm:$0xff] }
 0x4a6   : > { %3183 = vperm.xlu1 %5051, %v7050_v59   ;;  %v7352_v1 = vpop.permute.xlu1 %2860  ;;  %v2070_v6 = vmul.f32 %v4466_v39, %v9027_v55  ;;  %v2043_v33 = vmax.f32 %v2014_v7, %v2039_v43  ;;  %v9032_v55 = vld [vmem:[#allocation241_spill] sm:$0xff]  ;;  %v2038_v43 = vmul.f32 %v4465_v16, %v9036_v2  ;;  %v9037_v7 = vld [vmem:[#allocation210_spill] sm:$0xff]  ;;  %v7377_v30 = vpop.permute.xlu0 %2748 }
 0x4a7   : > { %9023 = vst [vmem:[#allocation105_spill] sm:$0xff] %v7352_v1  ;;  %v2099_v35 = vmul.f32 %v4467_v5, %v9032_v55  ;;  %9038 = vst [vmem:[#allocation64_spill] sm:$0xff] %v7377_v30 }
 0x4a8   : > { %v2074_v27 = vmax.f32 %v2045_v34, %v2070_v6  ;;  %v2072_v25 = vmax.f32 %v2043_v33, %v2068_v47  ;;  %v2067_v6 = vmul.f32 %v4466_v39, %v9039_v4  ;;  %v2042_v45 = vmax.f32 %v2013_v12, %v2038_v43  ;;  %v4470_v33 = vld [vmem:[%s5813_s3 + $0x3e] ss:$0 sm:$0xff]  ;;  %v9043_v47 = vld [vmem:[#allocation238_spill] sm:$0xff] }
 0x4a9   : > { %v8514_v39 = vmov 111  }
 0x4aa   : > { %3187 = vperm.xlu1 %5051, %v6992_v14   ;;  %v7362_v1 = vpop.permute.xlu1 %2868  ;;  %v2103_v34 = vmax.f32 %v2074_v27, %v2099_v35  ;;  %v2101_v55 = vmax.f32 %v2072_v25, %v2097_v40  ;;  %v7384_v16 = vpop.permute.xlu0 %2773  ;;  %5078 = vset.pattern.permute.xlu0 %v8514_v39  ;;  %v2071_v40 = vmax.f32 %v2042_v45, %v2067_v6  ;;  %v9044_v35 = vld [vmem:[#allocation218_spill] sm:$0xff]  ;;  %v4471_v6 = vld [vmem:[%s5813_s3 + $0x3f] ss:$0 sm:$0xff]  ;;  %v9061_v39 = vld [vmem:[#allocation25_spill] sm:$0xff] }
 0x4ab   : > { %9029 = vst [vmem:[#allocation94_spill] sm:$0xff] %v7362_v1  ;;  %v4468_v1 = vld [vmem:[%s5813_s3 + $0x3c] ss:$0 sm:$0xff]  ;;  %v2096_v27 = vmul.f32 %v4467_v5, %v9043_v47  ;;  %v2186_v12 = vmul.f32 %v4470_v33, %v9044_v35  ;;  %3585 = vperm.xlu0 %5078, %v7013_v42   ;;  %v2184_v45 = vmul.f32 %v4470_v33, %v6906_v18  ;;  %v9049_v47 = vld [vmem:[#allocation226_spill] sm:$0xff] }
 0x4ac   : > { %v2128_v53 = vmul.f32 %v4468_v1, %v9037_v7  ;;  %v2126_v36 = vmul.f32 %v4468_v1, %v9040_v48  ;;  %v9042_v7 = vld [vmem:[#allocation211_spill] sm:$0xff] }
 0x4ad   : > { %v2100_v5 = vmax.f32 %v2071_v40, %v2096_v27 }
 0x4ae   : > { %5052 = vset.pattern.permute.xlu1 %v9034_v17  ;;  %v7373_v37 = vpop.permute.xlu1 %2872  ;;  %v4469_v17 = vld [vmem:[%s5813_s3 + $0x3d] ss:$0 sm:$0xff]  ;;  %v2130_v43 = vmax.f32 %v2101_v55, %v2126_v36  ;;  %v7396_v4 = vpop.permute.xlu0 %2785  ;;  %v4472_v36 = vld [vmem:[%s5813_s3 + $0x40] ss:$0 sm:$0xff]  ;;  %v9048_v55 = vld [vmem:[#allocation246_spill] sm:$0xff] }
 0x4af   : > { %9035 = vst [vmem:[#allocation74_spill] sm:$0xff] %v7373_v37  ;;  %3208 = vperm.xlu1 %5052, %v7013_v42   ;;  %v2132_v37 = vmax.f32 %v2103_v34, %v2128_v53  ;;  %v2157_v13 = vmul.f32 %v4469_v17, %v9041_v3  ;;  %v2155_v30 = vmul.f32 %v4469_v17, %v9042_v7  ;;  %v9045_v53 = vld [vmem:[#allocation207_spill] sm:$0xff] }
 0x4b0   : > { %v2215_v7 = vmul.f32 %v4471_v6, %v6941_v19  ;;  %3597 = vperm.xlu0 %5078, %v7033_v22   ;;  %v9047_v42 = vld [vmem:[#allocation219_spill] sm:$0xff]  ;;  %v2244_v35 = vmul.f32 %v4472_v36, %v9049_v47 }
 0x4b1   : > { %v2161_v25 = vmax.f32 %v2132_v37, %v2157_v13  ;;  %v2159_v48 = vmax.f32 %v2130_v43, %v2155_v30  ;;  %v2154_v13 = vmul.f32 %v4469_v17, %v9048_v55  ;;  %v9050_v30 = vmov 99   ;;  %v9051_v19 = vld [vmem:[#allocation215_spill] sm:$0xff] }
 0x4b2   : > { %v2183_v27 = vmul.f32 %v4470_v33, %v9051_v19  ;;  %v4473_v17 = vld [vmem:[%s5813_s3 + $0x41] ss:$0 sm:$0xff] }
 0x4b3   : > { %3216 = vperm.xlu1 %5052, %v6992_v14   ;;  %v7387_v2 = vpop.permute.xlu1 %2893  ;;  %v2125_v14 = vmul.f32 %v4468_v1, %v9045_v53  ;;  %v2190_v3 = vmax.f32 %v2161_v25, %v2186_v12  ;;  %v2213_v1 = vmul.f32 %v4471_v6, %v9047_v42  ;;  %v2188_v18 = vmax.f32 %v2159_v48, %v2184_v45  ;;  %v7414_v12 = vpop.permute.xlu0 %2806  ;;  %v9052_v42 = vld [vmem:[#allocation227_spill] sm:$0xff]  ;;  %v4474_v48 = vld [vmem:[%s5813_s3 + $0x42] ss:$0 sm:$0xff]  ;;  %v7422_v45 = vld [vmem:[%s5820_s16 + $0x10] sm:$0xff] }
 0x4b4   : > { %v2242_v53 = vmul.f32 %v4472_v36, %v6963_v60  ;;  %v2271_v55 = vmul.f32 %v4473_v17, %v9052_v42  ;;  %v2300_v19 = vmul.f32 %v4474_v48, %v7028_v41 }
 0x4b5   : > { %v2129_v37 = vmax.f32 %v2100_v5, %v2125_v14  ;;  %v2217_v43 = vmax.f32 %v2188_v18, %v2213_v1  ;;  %v2273_v5 = vmul.f32 %v4473_v17, %v7001_v23  ;;  %v9054_v1 = vld [vmem:[#allocation234_spill] sm:$0xff] }
 0x4b6   : > { %v2302_v60 = vmul.f32 %v4474_v48, %v9054_v1 }
 0x4b7   : > { %3220 = vperm.xlu1 %5052, %v7033_v22   ;;  %v7399_v34 = vpop.permute.xlu1 %2897  ;;  %v2219_v22 = vmax.f32 %v2190_v3, %v2215_v7  ;;  %v2158_v14 = vmax.f32 %v2129_v37, %v2154_v13  ;;  %v2212_v7 = vmul.f32 %v4471_v6, %v6916_v62  ;;  %v7429_v47 = vpop.permute.xlu0 %2831  ;;  %v8513_v37 = vmov 112   ;;  %v9055_v13 = vld [vmem:[#allocation223_spill] sm:$0xff]  ;;  %v4475_v62 = vld [vmem:[%s5813_s3 + $0x43] ss:$0 sm:$0xff] }
 0x4b8   : > { %9046 = vst [vmem:[#allocation108_spill] sm:$0xff] %v7399_v34  ;;  %5081 = vset.pattern.permute.xlu0 %v8513_v37  ;;  %v2246_v23 = vmax.f32 %v2217_v43, %v2242_v53  ;;  %v9056_v6 = vmov 100   ;;  %v2331_v42 = vmul.f32 %v4475_v62, %v7067_v38  ;;  %v9072_v34 = vld [vmem:[#allocation30_spill] sm:$0xff] }
 0x4b9   : > { %v2248_v25 = vmax.f32 %v2219_v22, %v2244_v35  ;;  %v2187_v3 = vmax.f32 %v2158_v14, %v2183_v27  ;;  %3618 = vperm.xlu0 %5081, %v7050_v59   ;;  %v2241_v35 = vmul.f32 %v4472_v36, %v9055_v13  ;;  %v9057_v36 = vld [vmem:[#allocation235_spill] sm:$0xff] }
 0x4ba   : > { %v2275_v18 = vmax.f32 %v2246_v23, %v2271_v55  ;;  %v2329_v53 = vmul.f32 %v4475_v62, %v9057_v36  ;;  %v9058_v55 = vld [vmem:[#allocation242_spill] sm:$0xff]  ;;  %v9060_v13 = vld [vmem:[#allocation231_spill] sm:$0xff] }
 0x4bb   : > { %5055 = vset.pattern.permute.xlu1 %v9050_v30  ;;  %v2277_v30 = vmax.f32 %v2248_v25, %v2273_v5  ;;  %v2216_v22 = vmax.f32 %v2187_v3, %v2212_v7  ;;  %v7440_v43 = vpop.permute.xlu0 %2843  ;;  %v4476_v25 = vld [vmem:[%s5813_s3 + $0x44] ss:$0 sm:$0xff]  ;;  %v2270_v5 = vmul.f32 %v4473_v17, %v6976_v57  ;;  %v5122_v3 = vld [vmem:[%s5813_s3] ss:$0 sm:$0xff]  ;;  %v354_v23 = vld [vmem:[#allocation2 + $0x18] sm:$0xff] }
 0x4bc   : > { %3241 = vperm.xlu1 %5055, %v7050_v59   ;;  %v7411_v40 = vpop.permute.xlu1 %2918  ;;  %v7443_v59 = vld [vmem:[%s5820_s16] sm:$0xff]  ;;  %v2360_v1 = vmul.f32 %v4476_v25, %v9058_v55  ;;  %v2304_v38 = vmax.f32 %v2275_v18, %v2300_v19  ;;  %v2358_v17 = vmul.f32 %v4476_v25, %v7090_v32  ;;  %v8515_v55 = vmov 113  }
 0x4bd   : > { %v2306_v14 = vmax.f32 %v2277_v30, %v2302_v60  ;;  %v2245_v41 = vmax.f32 %v2216_v22, %v2241_v35  ;;  %v9059_v7 = vld [vmem:[#allocation24_spill] sm:$0xff]  ;;  %v2299_v30 = vmul.f32 %v4474_v48, %v9060_v13  ;;  %v5123_v36 = vld [vmem:[%s5813_s3 + $0x1] ss:$0 sm:$0xff]  ;;  %5082 = vset.pattern.permute.xlu0 %v8515_v55  ;;  %v9064_v55 = vld [vmem:[#allocation250_spill] sm:$0xff] }
 0x4be   : > { %v387_v60 = vmul.f32 %v5122_v3, %v9059_v7  ;;  %v416_v35 = vmul.f32 %v5123_v36, %v9061_v39  ;;  %v2333_v57 = vmax.f32 %v2304_v38, %v2329_v53  ;;  %v4477_v22 = vld [vmem:[%s5813_s3 + $0x45] ss:$0 sm:$0xff]  ;;  %3643 = vperm.xlu0 %5082, %v7443_v59   ;;  %v5124_v3 = vld [vmem:[%s5813_s3 + $0x2] ss:$0 sm:$0xff]  ;;  %v9062_v39 = vld [vmem:[#allocation26_spill] sm:$0xff]  ;;  %v2328_v36 = vmul.f32 %v4475_v62, %v7041_v61 }
 0x4bf   : > { %v2274_v18 = vmax.f32 %v2245_v41, %v2270_v5  ;;  %v2389_v19 = vmul.f32 %v4477_v22, %v7125_v31  ;;  %v445_v53 = vmul.f32 %v5124_v3, %v9062_v39  ;;  %v9063_v7 = vld [vmem:[#allocation243_spill] sm:$0xff]  ;;  %v4478_v38 = vld [vmem:[%s5813_s3 + $0x46] ss:$0 sm:$0xff] }
 0x4c0   : > { %3245 = vperm.xlu1 %5055, %v7422_v45   ;;  %v7425_v33 = vpop.permute.xlu1 %2926  ;;  %v2387_v32 = vmul.f32 %v4477_v22, %v9063_v7  ;;  %v2418_v41 = vmul.f32 %v4478_v38, %v9064_v55  ;;  %v7472_v31 = vld [vmem:[%s5820_s16 + $0x18] sm:$0xff]  ;;  %v2416_v7 = vmul.f32 %v4478_v38, %v7142_v21 }
 0x4c1   : > { %9053 = vst [vmem:[#allocation113_spill] sm:$0xff] %v7425_v33  ;;  %v2303_v13 = vmax.f32 %v2274_v18, %v2299_v30  ;;  %v9067_v39 = vld [vmem:[#allocation239_spill] sm:$0xff]  ;;  %v4479_v33 = vld [vmem:[%s5813_s3 + $0x47] ss:$0 sm:$0xff] }
 0x4c2   : > { %v2357_v30 = vmul.f32 %v4476_v25, %v9067_v39  ;;  %3655 = vperm.xlu0 %5082, %v7472_v31   ;;  %v9069_v25 = vmov 101   ;;  %v9071_v39 = vld [vmem:[#allocation247_spill] sm:$0xff] }
 0x4c4   : > { %5056 = vset.pattern.permute.xlu1 %v9056_v6  ;;  %v7437_v27 = vpop.permute.xlu1 %2930  ;;  %v2335_v6 = vmax.f32 %v2306_v14, %v2331_v42  ;;  %v7462_v14 = vpop.permute.xlu0 %2864  ;;  %v391_v42 = vmax.f32 %v354_v23, %v387_v60  ;;  %v2362_v60 = vmax.f32 %v2333_v57, %v2358_v17  ;;  %v5126_v23 = vld [vmem:[%s5813_s3 + $0x3] ss:$0 sm:$0xff]  ;;  %v2332_v17 = vmax.f32 %v2303_v13, %v2328_v36 }
 0x4c5   : > { %3266 = vperm.xlu1 %5056, %v7443_v59   ;;  %v2386_v13 = vmul.f32 %v4477_v22, %v7101_v51 }
 0x4c6   : > { %v2364_v48 = vmax.f32 %v2335_v6, %v2360_v1  ;;  %v420_v1 = vmax.f32 %v391_v42, %v416_v35  ;;  %v9066_v6 = vld [vmem:[#allocation27_spill] sm:$0xff]  ;;  %v2391_v18 = vmax.f32 %v2362_v60, %v2387_v32  ;;  %v9068_v35 = vld [vmem:[#allocation28_spill] sm:$0xff] }
 0x4c7   : > { %v474_v3 = vmul.f32 %v5126_v23, %v9066_v6  ;;  %v2447_v23 = vmul.f32 %v4479_v33, %v7164_v9 }
 0x4c8   : > { %v2393_v61 = vmax.f32 %v2364_v48, %v2389_v19  ;;  %v7480_v62 = vpop.permute.xlu0 %2889  ;;  %v449_v55 = vmax.f32 %v420_v1, %v445_v53  ;;  %v2445_v48 = vmul.f32 %v4479_v33, %v6900_v24  ;;  %v7491_v19 = vld [vmem:[%s5813_s3 + $0x48] ss:$0 sm:$0xff]  ;;  %v5129_v24 = vld [vmem:[%s5813_s3 + $0x5] ss:$0 sm:$0xff]  ;;  %v2420_v60 = vmax.f32 %v2391_v18, %v2416_v7 }
 0x4c9   : > { %3274 = vperm.xlu1 %5056, %v7422_v45   ;;  %v7454_v37 = vpop.permute.xlu1 %2951  ;;  %v7494_v53 = vld [vmem:[%s5820_s16 + $0x8] sm:$0xff]  ;;  %v2476_v9 = vmul.f32 %v7491_v19, %v6947_v0  ;;  %v2474_v51 = vmul.f32 %v7491_v19, %v7181_v54  ;;  %v8518_v7 = vmov 114  }
 0x4ca   : > { %v2422_v42 = vmax.f32 %v2393_v61, %v2418_v41  ;;  %v478_v32 = vmax.f32 %v449_v55, %v474_v3  ;;  %v9070_v41 = vld [vmem:[#allocation29_spill] sm:$0xff]  ;;  %v2415_v61 = vmul.f32 %v4478_v38, %v9071_v39  ;;  %v7512_v0 = vld [vmem:[%s5813_s3 + $0x49] ss:$0 sm:$0xff]  ;;  %5085 = vset.pattern.permute.xlu0 %v8518_v7 }
 0x4cb   : > { %v532_v1 = vmul.f32 %v5129_v24, %v9070_v41  ;;  %v2505_v38 = vmul.f32 %v7512_v0, %v7202_v20  ;;  %v2503_v54 = vmul.f32 %v7512_v0, %v6959_v10  ;;  %3676 = vperm.xlu0 %5085, %v7494_v53   ;;  %v9075_v24 = vld [vmem:[#allocation32_spill] sm:$0xff]  ;;  %v9076_v10 = vmov 102   ;;  %v9077_v39 = vld [vmem:[#allocation33_spill] sm:$0xff] }
 0x4cc   : > { %v7502_v36 = vpop.permute.xlu0 %2901 }
 0x4cd   : > { %3278 = vperm.xlu1 %5056, %v7472_v31   ;;  %v7475_v5 = vpop.permute.xlu1 %2955 }
 0x4ce   : > { %9065 = vst [vmem:[#allocation75_spill] sm:$0xff] %v7475_v5  ;;  %v5127_v5 = vld [vmem:[%s5813_s3 + $0x4] ss:$0 sm:$0xff] }
 0x4cf   : > { %v503_v57 = vmul.f32 %v5127_v5, %v9068_v35  ;;  %v2361_v5 = vmax.f32 %v2332_v17, %v2357_v30  ;;  %v2451_v35 = vmax.f32 %v2422_v42, %v2447_v23  ;;  %v2449_v30 = vmax.f32 %v2420_v60, %v2445_v48  ;;  %v9074_v17 = vld [vmem:[#allocation31_spill] sm:$0xff]  ;;  %v7525_v23 = vld [vmem:[%s5813_s3 + $0x4a] ss:$0 sm:$0xff] }
 0x4d0   : > { %v2534_v20 = vmul.f32 %v7525_v23, %v7008_v28 }
 0x4d1   : > { %5059 = vset.pattern.permute.xlu1 %v9069_v25  ;;  %v507_v6 = vmax.f32 %v478_v32, %v503_v57  ;;  %v5130_v25 = vld [vmem:[%s5813_s3 + $0x6] ss:$0 sm:$0xff]  ;;  %v2390_v55 = vmax.f32 %v2361_v5, %v2386_v13  ;;  %v2480_v18 = vmax.f32 %v2451_v35, %v2476_v9  ;;  %v5131_v57 = vld [vmem:[%s5813_s3 + $0x7] ss:$0 sm:$0xff]  ;;  %v2444_v32 = vmul.f32 %v4479_v33, %v7153_v63  ;;  %v7531_v5 = vpop.permute.xlu0 %2922  ;;  %v5132_v9 = vld [vmem:[%s5813_s3 + $0x8] ss:$0 sm:$0xff] }
 0x4d2   : > { %3299 = vperm.xlu1 %5059, %v7494_v53   ;;  %v7497_v21 = vpop.permute.xlu1 %2976  ;;  %v561_v3 = vmul.f32 %v5130_v25, %v9072_v34  ;;  %v590_v42 = vmul.f32 %v5131_v57, %v9074_v17  ;;  %v619_v41 = vmul.f32 %v5132_v9, %v9075_v24  ;;  %v5133_v33 = vld [vmem:[%s5813_s3 + $0x9] ss:$0 sm:$0xff]  ;;  %v2532_v25 = vmul.f32 %v7525_v23, %v7220_v56 }
 0x4d3   : > { %v536_v34 = vmax.f32 %v507_v6, %v532_v1  ;;  %v2419_v48 = vmax.f32 %v2390_v55, %v2415_v61  ;;  %v2478_v1 = vmax.f32 %v2449_v30, %v2474_v51  ;;  %v2473_v6 = vmul.f32 %v7491_v19, %v6927_v11 }
 0x4d4   : > { %v2509_v63 = vmax.f32 %v2480_v18, %v2505_v38  ;;  %v648_v61 = vmul.f32 %v5133_v33, %v9077_v39  ;;  %v5134_v38 = vld [vmem:[%s5813_s3 + $0xa] ss:$0 sm:$0xff]  ;;  %v8517_v24 = vmov 115   ;;  %v7579_v39 = vld [vmem:[%s5813_s3 + $0x4d] ss:$0 sm:$0xff] }
 0x4d5   : > { %v565_v13 = vmax.f32 %v536_v34, %v561_v3  ;;  %v2507_v35 = vmax.f32 %v2478_v1, %v2503_v54  ;;  %v7546_v3 = vld [vmem:[%s5813_s3 + $0x4b] ss:$0 sm:$0xff]  ;;  %v2448_v30 = vmax.f32 %v2419_v48, %v2444_v32  ;;  %v7550_v55 = vpop.permute.xlu0 %2947  ;;  %v9078_v34 = vld [vmem:[#allocation34_spill] sm:$0xff]  ;;  %v2502_v54 = vmul.f32 %v7512_v0, %v7195_v29  ;;  %5086 = vset.pattern.permute.xlu0 %v8517_v24 }
 0x4d6   : > { %3303 = vperm.xlu1 %5059, %v7422_v45   ;;  %v7515_v22 = vpop.permute.xlu1 %2984  ;;  %v2538_v51 = vmax.f32 %v2509_v63, %v2534_v20  ;;  %v2563_v11 = vmul.f32 %v7546_v3, %v7244_v46  ;;  %v677_v57 = vmul.f32 %v5134_v38, %v9078_v34  ;;  %v2561_v17 = vmul.f32 %v7546_v3, %v7021_v15  ;;  %v5135_v20 = vld [vmem:[%s5813_s3 + $0xb] ss:$0 sm:$0xff]  ;;  %v7591_v38 = vld [vmem:[%s5813_s3 + $0x4e] ss:$0 sm:$0xff] }
 0x4d7   : > { %9073 = vst [vmem:[#allocation102_spill] sm:$0xff] %v7515_v22  ;;  %v594_v28 = vmax.f32 %v565_v13, %v590_v42  ;;  %v7557_v42 = vld [vmem:[%s5813_s3 + $0x4c] ss:$0 sm:$0xff]  ;;  %v2477_v56 = vmax.f32 %v2448_v30, %v2473_v6  ;;  %v9079_v13 = vld [vmem:[#allocation35_spill] sm:$0xff]  ;;  %v2536_v15 = vmax.f32 %v2507_v35, %v2532_v25  ;;  %3701 = vperm.xlu0 %5086, %v7443_v59   ;;  %v9080_v6 = vld [vmem:[#allocation36_spill] sm:$0xff] }
 0x4d8   : > { %v2592_v48 = vmul.f32 %v7557_v42, %v7074_v26  ;;  %v706_v9 = vmul.f32 %v5135_v20, %v9079_v13  ;;  %v2567_v29 = vmax.f32 %v2538_v51, %v2563_v11  ;;  %v2590_v33 = vmul.f32 %v7557_v42, %v7260_v49  ;;  %v5137_v51 = vld [vmem:[%s5813_s3 + $0xd] ss:$0 sm:$0xff]  ;;  %v9110_v22 = vld [vmem:[#allocation64_spill] sm:$0xff] }
 0x4d9   : > { %v623_v18 = vmax.f32 %v594_v28, %v619_v41  ;;  %v2531_v41 = vmul.f32 %v7525_v23, %v6984_v52  ;;  %v7571_v1 = vpop.permute.xlu0 %2959  ;;  %v2565_v28 = vmax.f32 %v2536_v15, %v2561_v17  ;;  %v2621_v35 = vmul.f32 %v7579_v39, %v7281_v8  ;;  %v9082_v11 = vld [vmem:[#allocation37_spill] sm:$0xff] }
 0x4da   : > { %5060 = vset.pattern.permute.xlu1 %v9076_v10  ;;  %v7536_v60 = vpop.permute.xlu1 %2988  ;;  %v5136_v10 = vld [vmem:[%s5813_s3 + $0xc] ss:$0 sm:$0xff]  ;;  %v2596_v52 = vmax.f32 %v2567_v29, %v2592_v48  ;;  %v2619_v49 = vmul.f32 %v7579_v39, %v7084_v58  ;;  %v2650_v8 = vmul.f32 %v7591_v38, %v7131_v50  ;;  %v9085_v15 = vmov 103  }
 0x4db   : > { %3324 = vperm.xlu1 %5060, %v7443_v59   ;;  %v652_v32 = vmax.f32 %v623_v18, %v648_v61  ;;  %v735_v63 = vmul.f32 %v5136_v10, %v9080_v6  ;;  %v2506_v61 = vmax.f32 %v2477_v56, %v2502_v54  ;;  %v764_v18 = vmul.f32 %v5137_v51, %v9082_v11  ;;  %v5138_v56 = vld [vmem:[%s5813_s3 + $0xe] ss:$0 sm:$0xff]  ;;  %v9083_v54 = vld [vmem:[#allocation39_spill] sm:$0xff]  ;;  %v9087_v10 = vld [vmem:[#allocation60_spill] sm:$0xff] }
 0x4dc   : > { %3713 = vperm.xlu0 %5086, %v7472_v31   ;;  %v793_v48 = vmul.f32 %v5138_v56, %v9083_v54  ;;  %v9084_v20 = vld [vmem:[#allocation57_spill] sm:$0xff]  ;;  %v2625_v13 = vmax.f32 %v2596_v52, %v2621_v35  ;;  %v2648_v6 = vmul.f32 %v7591_v38, %v9087_v10  ;;  %v9090_v11 = vld [vmem:[#allocation43_spill] sm:$0xff]  ;;  %v9096_v10 = vld [vmem:[#allocation68_spill] sm:$0xff] }
 0x4dd   : > { %v681_v26 = vmax.f32 %v652_v32, %v677_v57  ;;  %v2535_v34 = vmax.f32 %v2506_v61, %v2531_v41  ;;  %v2560_v57 = vmul.f32 %v7546_v3, %v7232_v44  ;;  %v2594_v32 = vmax.f32 %v2565_v28, %v2590_v33  ;;  %v5139_v41 = vld [vmem:[%s5813_s3 + $0xf] ss:$0 sm:$0xff]  ;;  %v5140_v51 = vld [vmem:[%s5813_s3 + $0x10] ss:$0 sm:$0xff] }
 0x4de   : > { %v2589_v58 = vmul.f32 %v7557_v42, %v9084_v20  ;;  %v9086_v50 = vld [vmem:[#allocation41_spill] sm:$0xff]  ;;  %v2654_v61 = vmax.f32 %v2625_v13, %v2650_v8  ;;  %v9094_v13 = vld [vmem:[#allocation46_spill] sm:$0xff] }
 0x4df   : > { %3332 = vperm.xlu1 %5060, %v7422_v45   ;;  %v7564_v46 = vpop.permute.xlu1 %3009  ;;  %v710_v30 = vmax.f32 %v681_v26, %v706_v9  ;;  %v7602_v9 = vpop.permute.xlu0 %2980  ;;  %v822_v29 = vmul.f32 %v5139_v41, %v9086_v50  ;;  %v2623_v26 = vmax.f32 %v2594_v32, %v2619_v49  ;;  %v2564_v33 = vmax.f32 %v2535_v34, %v2560_v57  ;;  %v9089_v52 = vld [vmem:[#allocation61_spill] sm:$0xff] }
 0x4e0   : > { %v9091_v49 = vld [vmem:[#allocation45_spill] sm:$0xff] }
 0x4e1   : > { %v739_v17 = vmax.f32 %v710_v30, %v735_v63  ;;  %v7610_v63 = vld [vmem:[%s5813_s3 + $0x4f] ss:$0 sm:$0xff]  ;;  %v7622_v56 = vld [vmem:[%s5813_s3 + $0x50] ss:$0 sm:$0xff]  ;;  %v2593_v54 = vmax.f32 %v2564_v33, %v2589_v58  ;;  %v2652_v41 = vmax.f32 %v2623_v26, %v2648_v6  ;;  %v2647_v58 = vmul.f32 %v7591_v38, %v9096_v10  ;;  %v7643_v6 = vld [vmem:[%s5813_s3 + $0x51] ss:$0 sm:$0xff] }
 0x4e2   : > { %9088 = vst [vmem:[#allocation71_spill] sm:$0xff] %v7610_v63  ;;  %v2679_v35 = vmul.f32 %v7610_v63, %v9089_v52  ;;  %v9092_v32 = vld [vmem:[#allocation89_spill] sm:$0xff]  ;;  %v8516_v52 = vmov 116   ;;  %9099 = vst [vmem:[#allocation121_spill] sm:$0xff] %v7643_v6  ;;  %v9101_v10 = vld [vmem:[#allocation51_spill] sm:$0xff] }
 0x4e3   : > { %3336 = vperm.xlu1 %5060, %v7472_v31   ;;  %v7584_v25 = vpop.permute.xlu1 %3013  ;;  %v768_v44 = vmax.f32 %v739_v17, %v764_v18  ;;  %v851_v18 = vmul.f32 %v5140_v51, %v9090_v11  ;;  %v2677_v17 = vmul.f32 %v7610_v63, %v9091_v49  ;;  %v2618_v20 = vmul.f32 %v7579_v39, %v9092_v32  ;;  %v7628_v57 = vpop.permute.xlu0 %3005  ;;  %v5142_v11 = vld [vmem:[%s5813_s3 + $0x12] ss:$0 sm:$0xff]  ;;  %v9108_v24 = vld [vmem:[#allocation49_spill] sm:$0xff] }
 0x4e4   : > { %9081 = vst [vmem:[#allocation82_spill] sm:$0xff] %v7584_v25  ;;  %v2683_v33 = vmax.f32 %v2654_v61, %v2679_v35  ;;  %5089 = vset.pattern.permute.xlu0 %v8516_v52  ;;  %v9098_v32 = vld [vmem:[#allocation66_spill] sm:$0xff]  ;;  %v9100_v61 = vld [vmem:[#allocation67_spill] sm:$0xff] }
 0x4e5   : > { %v797_v30 = vmax.f32 %v768_v44, %v793_v48  ;;  %v5141_v48 = vld [vmem:[%s5813_s3 + $0x11] ss:$0 sm:$0xff]  ;;  %v2681_v49 = vmax.f32 %v2652_v41, %v2677_v17  ;;  %v2706_v26 = vmul.f32 %v7622_v56, %v9098_v32  ;;  %3734 = vperm.xlu0 %5089, %v7494_v53   ;;  %v2737_v35 = vmul.f32 %v7643_v6, %v9100_v61  ;;  %v9106_v61 = vld [vmem:[#allocation47_spill] sm:$0xff] }
 0x4e6   : > { %v880_v44 = vmul.f32 %v5141_v48, %v9094_v13  ;;  %v9102_v17 = vld [vmem:[#allocation81_spill] sm:$0xff]  ;;  %v9104_v32 = vmov 104  }
 0x4e7   : > { %5063 = vset.pattern.permute.xlu1 %v9085_v15  ;;  %v9093_v15 = vld [vmem:[#allocation76_spill] sm:$0xff]  ;;  %v826_v8 = vmax.f32 %v797_v30, %v822_v29  ;;  %v7648_v13 = vpop.permute.xlu0 %3017  ;;  %v2735_v41 = vmul.f32 %v7643_v6, %v9102_v17  ;;  %v2710_v52 = vmax.f32 %v2681_v49, %v2706_v26 }
 0x4e8   : > { %3357 = vperm.xlu1 %5063, %v7494_v53   ;;  %v7613_v28 = vpop.permute.xlu1 %3034  ;;  %v2708_v34 = vmul.f32 %v7622_v56, %v9093_v15  ;;  %v9097_v29 = vld [vmem:[#allocation48_spill] sm:$0xff]  ;;  %v2622_v15 = vmax.f32 %v2593_v54, %v2618_v20 }
 0x4e9   : > { %v855_v51 = vmax.f32 %v826_v8, %v851_v18  ;;  %v909_v30 = vmul.f32 %v5142_v11, %v9097_v29  ;;  %v5143_v8 = vld [vmem:[%s5813_s3 + $0x13] ss:$0 sm:$0xff]  ;;  %v7655_v29 = vld [vmem:[%s5813_s3 + $0x52] ss:$0 sm:$0xff]  ;;  %v2739_v25 = vmax.f32 %v2710_v52, %v2735_v41  ;;  %v9112_v52 = vld [vmem:[#allocation59_spill] sm:$0xff] }
 0x4ea   : > { %v2712_v48 = vmax.f32 %v2683_v33, %v2708_v34  ;;  %v938_v11 = vmul.f32 %v5143_v8, %v9101_v10  ;;  %9103 = vst [vmem:[#allocation83_spill] sm:$0xff] %v7655_v29  ;;  %v2651_v20 = vmax.f32 %v2622_v15, %v2647_v58  ;;  %v9105_v34 = vld [vmem:[#allocation92_spill] sm:$0xff]  ;;  %v5144_v8 = vld [vmem:[%s5813_s3 + $0x14] ss:$0 sm:$0xff]  ;;  %v9107_v10 = vld [vmem:[#allocation53_spill] sm:$0xff] }
 0x4eb   : > { %v884_v18 = vmax.f32 %v855_v51, %v880_v44  ;;  %v2676_v33 = vmul.f32 %v7610_v63, %v9105_v34  ;;  %v2766_v44 = vmul.f32 %v7655_v29, %v9106_v61  ;;  %v967_v17 = vmul.f32 %v5144_v8, %v9107_v10  ;;  %v5145_v58 = vld [vmem:[%s5813_s3 + $0x15] ss:$0 sm:$0xff]  ;;  %v9109_v15 = vld [vmem:[#allocation56_spill] sm:$0xff]  ;;  %v7674_v63 = vld [vmem:[%s5813_s3 + $0x53] ss:$0 sm:$0xff]  ;;  %v7678_v26 = vpop.permute.xlu0 %3038 }
 0x4ec   : > { %3361 = vperm.xlu1 %5063, %v7422_v45   ;;  %v7633_v50 = vpop.permute.xlu1 %3042  ;;  %v2741_v7 = vmax.f32 %v2712_v48, %v2737_v35  ;;  %v996_v34 = vmul.f32 %v5145_v58, %v9109_v15  ;;  %v2764_v61 = vmul.f32 %v7655_v29, %v9110_v22  ;;  %9111 = vst [vmem:[#allocation110_spill] sm:$0xff] %v7674_v63  ;;  %v5146_v35 = vld [vmem:[%s5813_s3 + $0x16] ss:$0 sm:$0xff]  ;;  %v9113_v41 = vld [vmem:[#allocation84_spill] sm:$0xff]  ;;  %v5147_v10 = vld [vmem:[%s5813_s3 + $0x17] ss:$0 sm:$0xff] }
 0x4ed   : > { %9095 = vst [vmem:[#allocation116_spill] sm:$0xff] %v7633_v50  ;;  %v913_v51 = vmax.f32 %v884_v18, %v909_v30  ;;  %v2680_v30 = vmax.f32 %v2651_v20, %v2676_v33  ;;  %v2795_v49 = vmul.f32 %v7674_v63, %v7396_v4  ;;  %v2793_v22 = vmul.f32 %v7674_v63, %v9113_v41  ;;  %v9114_v20 = vld [vmem:[#allocation100_spill] sm:$0xff] }
 0x4ee   : > { %v2770_v18 = vmax.f32 %v2741_v7, %v2766_v44  ;;  %v8520_v7 = vmov 117   ;;  %v2734_v33 = vmul.f32 %v7643_v6, %v9114_v20  ;;  %v9115_v44 = vld [vmem:[#allocation97_spill] sm:$0xff]  ;;  %v2768_v15 = vmax.f32 %v2739_v25, %v2764_v61  ;;  %v7710_v61 = vld [vmem:[%s5813_s3 + $0x55] ss:$0 sm:$0xff]  ;;  %v5152_v6 = vld [vmem:[%s5813_s3 + $0x1c] ss:$0 sm:$0xff] }
 0x4ef   : > { %v942_v50 = vmax.f32 %v913_v51, %v938_v11  ;;  %v1025_v11 = vmul.f32 %v5146_v35, %v9112_v52  ;;  %v7688_v51 = vld [vmem:[%s5813_s3 + $0x54] ss:$0 sm:$0xff]  ;;  %5090 = vset.pattern.permute.xlu0 %v8520_v7  ;;  %v9119_v7 = vld [vmem:[#allocation65_spill] sm:$0xff] }
 0x4f0   : > { %5064 = vset.pattern.permute.xlu1 %v9104_v32  ;;  %v7658_v54 = vpop.permute.xlu1 %3046  ;;  %v2705_v32 = vmul.f32 %v7622_v56, %v9108_v24  ;;  %v2824_v8 = vmul.f32 %v7688_v51, %v9115_v44  ;;  %3759 = vperm.xlu0 %5090, %v7443_v59   ;;  %v9117_v35 = vld [vmem:[#allocation70_spill] sm:$0xff]  ;;  %v2799_v41 = vmax.f32 %v2770_v18, %v2795_v49 }
 0x4f1   : > { %3382 = vperm.xlu1 %5064, %v7443_v59   ;;  %v971_v48 = vmax.f32 %v942_v50, %v967_v17  ;;  %v9116_v17 = vld [vmem:[#allocation62_spill] sm:$0xff]  ;;  %v2763_v52 = vmul.f32 %v7655_v29, %v9117_v35  ;;  %v2822_v25 = vmul.f32 %v7688_v51, %v7414_v12  ;;  %v2853_v49 = vmul.f32 %v7710_v61, %v7440_v43 }
 0x4f2   : > { %v2709_v4 = vmax.f32 %v2680_v30, %v2705_v32  ;;  %v1054_v58 = vmul.f32 %v5147_v10, %v9116_v17  ;;  %v7700_v32 = vpop.permute.xlu0 %3063  ;;  %v5148_v44 = vld [vmem:[%s5813_s3 + $0x18] ss:$0 sm:$0xff]  ;;  %v2828_v18 = vmax.f32 %v2799_v41, %v2824_v8  ;;  %v5149_v35 = vld [vmem:[%s5813_s3 + $0x19] ss:$0 sm:$0xff]  ;;  %v5150_v41 = vld [vmem:[%s5813_s3 + $0x1a] ss:$0 sm:$0xff] }
 0x4f3   : > { %v1000_v50 = vmax.f32 %v971_v48, %v996_v34  ;;  %v1083_v34 = vmul.f32 %v5148_v44, %v9119_v7  ;;  %v2797_v48 = vmax.f32 %v2768_v15, %v2793_v22  ;;  %v7720_v7 = vld [vmem:[%s5813_s3 + $0x56] ss:$0 sm:$0xff] }
 0x4f4   : > { %v2738_v10 = vmax.f32 %v2709_v4, %v2734_v33  ;;  %3771 = vperm.xlu0 %5090, %v7472_v31   ;;  %v2792_v4 = vmul.f32 %v7674_v63, %v7384_v16  ;;  %v9122_v33 = vld [vmem:[#allocation74_spill] sm:$0xff]  ;;  %v9126_v63 = vld [vmem:[#allocation77_spill] sm:$0xff] }
 0x4f5   : > { %3390 = vperm.xlu1 %5064, %v7422_v45   ;;  %v7681_v24 = vpop.permute.xlu1 %3067  ;;  %v1029_v20 = vmax.f32 %v1000_v50, %v1025_v11  ;;  %v9120_v11 = vld [vmem:[#allocation69_spill] sm:$0xff]  ;;  %v2882_v8 = vmul.f32 %v7720_v7, %v9122_v33  ;;  %v5151_v33 = vld [vmem:[%s5813_s3 + $0x1b] ss:$0 sm:$0xff] }
 0x4f6   : > { %v1112_v50 = vmul.f32 %v5149_v35, %v9120_v11  ;;  %v2767_v12 = vmax.f32 %v2738_v10, %v2763_v52  ;;  %v7726_v43 = vpop.permute.xlu0 %3075  ;;  %v9125_v10 = vld [vmem:[#allocation78_spill] sm:$0xff]  ;;  %v2857_v35 = vmax.f32 %v2828_v18, %v2853_v49  ;;  %v1170_v29 = vmul.f32 %v5151_v33, %v9126_v63 }
 0x4f7   : > { %v1058_v17 = vmax.f32 %v1029_v20, %v1054_v58  ;;  %v9123_v58 = vmov 105   ;;  %v9124_v20 = vld [vmem:[#allocation72_spill] sm:$0xff]  ;;  %v2821_v16 = vmul.f32 %v7688_v51, %v9125_v10  ;;  %v7750_v63 = vld [vmem:[%s5813_s3 + $0x58] ss:$0 sm:$0xff] }
 0x4f8   : > { %v1141_v44 = vmul.f32 %v5150_v41, %v9124_v20  ;;  %v9127_v10 = vld [vmem:[#allocation80_spill] sm:$0xff] }
 0x4f9   : > { %3394 = vperm.xlu1 %5064, %v7472_v31   ;;  %v7703_v30 = vpop.permute.xlu1 %3071  ;;  %v1087_v15 = vmax.f32 %v1058_v17, %v1083_v34  ;;  %v2880_v34 = vmul.f32 %v7720_v7, %v7462_v14  ;;  %v7741_v17 = vld [vmem:[%s5813_s3 + $0x57] ss:$0 sm:$0xff]  ;;  %v1199_v18 = vmul.f32 %v5152_v6, %v9127_v10  ;;  %v5548_v6 = vmov 118  }
 0x4fa   : > { %9118 = vst [vmem:[#allocation90_spill] sm:$0xff] %v7703_v30  ;;  %v9121_v30 = vld [vmem:[#allocation86_spill] sm:$0xff]  ;;  %v2911_v41 = vmul.f32 %v7741_v17, %v7502_v36  ;;  %v2909_v49 = vmul.f32 %v7741_v17, %v7387_v2  ;;  %v2940_v36 = vmul.f32 %v7750_v63, %v7437_v27  ;;  %5093 = vset.pattern.permute.xlu0 %v5548_v6  ;;  %v5154_v27 = vld [vmem:[%s5813_s3 + $0x1e] ss:$0 sm:$0xff]  ;;  %v9131_v10 = vmov 106  }
 0x4fb   : > { %v2851_v22 = vmul.f32 %v7710_v61, %v9121_v30  ;;  %v2826_v30 = vmax.f32 %v2797_v48, %v2822_v25  ;;  %v1116_v11 = vmax.f32 %v1087_v15, %v1112_v50  ;;  %v2796_v48 = vmax.f32 %v2767_v12, %v2792_v4  ;;  %v7759_v12 = vpop.permute.xlu0 %3096  ;;  %v5153_v4 = vld [vmem:[%s5813_s3 + $0x1d] ss:$0 sm:$0xff]  ;;  %3792 = vperm.xlu0 %5093, %v7494_v53  }
 0x4fc   : > { %v2886_v25 = vmax.f32 %v2857_v35, %v2882_v8  ;;  %v9128_v8 = vld [vmem:[#allocation85_spill] sm:$0xff] }
 0x4fd   : > { %5067 = vset.pattern.permute.xlu1 %v9123_v58  ;;  %v2855_v58 = vmax.f32 %v2826_v30, %v2851_v22  ;;  %v1145_v20 = vmax.f32 %v1116_v11, %v1141_v44  ;;  %v2825_v50 = vmax.f32 %v2796_v48, %v2821_v16  ;;  %v2850_v22 = vmul.f32 %v7710_v61, %v7429_v47  ;;  %v9129_v30 = vld [vmem:[#allocation105_spill] sm:$0xff]  ;;  %v9130_v11 = vld [vmem:[#allocation88_spill] sm:$0xff] }
 0x4fe   : > { %3415 = vperm.xlu1 %5067, %v7494_v53   ;;  %v7732_v52 = vpop.permute.xlu1 %3092  ;;  %v1228_v15 = vmul.f32 %v5153_v4, %v9128_v8  ;;  %v2879_v16 = vmul.f32 %v7720_v7, %v9129_v30  ;;  %v2915_v47 = vmax.f32 %v2886_v25, %v2911_v41  ;;  %v1257_v33 = vmul.f32 %v5154_v27, %v9130_v11 }
 0x4ff   : > { %v1174_v2 = vmax.f32 %v1145_v20, %v1170_v29  ;;  %v2884_v44 = vmax.f32 %v2855_v58, %v2880_v34  ;;  %v2938_v29 = vmul.f32 %v7750_v63, %v7531_v5  ;;  %v7772_v20 = vld [vmem:[%s5813_s3 + $0x59] ss:$0 sm:$0xff]  ;;  %v2854_v34 = vmax.f32 %v2825_v50, %v2850_v22  ;;  %v7779_v41 = vpop.permute.xlu0 %3121 }
 0x500   : > { %v2944_v4 = vmax.f32 %v2915_v47, %v2940_v36  ;;  %v2969_v25 = vmul.f32 %v7772_v20, %v7571_v1  ;;  %v2967_v8 = vmul.f32 %v7772_v20, %v7454_v37  ;;  %v2908_v50 = vmul.f32 %v7741_v17, %v7480_v62  ;;  %v5156_v36 = vld [vmem:[%s5813_s3 + $0x20] ss:$0 sm:$0xff] }
 0x501   : > { %v1203_v35 = vmax.f32 %v1174_v2, %v1199_v18  ;;  %v2913_v48 = vmax.f32 %v2884_v44, %v2909_v49  ;;  %v5155_v49 = vld [vmem:[%s5813_s3 + $0x1f] ss:$0 sm:$0xff]  ;;  %v9132_v2 = vld [vmem:[#allocation93_spill] sm:$0xff]  ;;  %v7787_v44 = vld [vmem:[%s5813_s3 + $0x5a] ss:$0 sm:$0xff]  ;;  %v2883_v30 = vmax.f32 %v2854_v34, %v2879_v16  ;;  %v2937_v27 = vmul.f32 %v7750_v63, %v7411_v40 }
 0x502   : > { %3419 = vperm.xlu1 %5067, %v7422_v45   ;;  %v7753_v14 = vpop.permute.xlu1 %3100  ;;  %v1286_v5 = vmul.f32 %v5155_v49, %v9132_v2  ;;  %v2998_v1 = vmul.f32 %v7787_v44, %v7536_v60  ;;  %v2973_v11 = vmax.f32 %v2944_v4, %v2969_v25  ;;  %v9134_v60 = vld [vmem:[#allocation101_spill] sm:$0xff]  ;;  %v5549_v40 = vmov 119   ;;  %v5158_v2 = vld [vmem:[%s5813_s3 + $0x22] ss:$0 sm:$0xff] }
 0x503   : > { %v1232_v18 = vmax.f32 %v1203_v35, %v1228_v15  ;;  %v9133_v15 = vld [vmem:[#allocation96_spill] sm:$0xff]  ;;  %v2942_v35 = vmax.f32 %v2913_v48, %v2938_v29  ;;  %v7797_v37 = vpop.permute.xlu0 %3133  ;;  %v2996_v48 = vmul.f32 %v7787_v44, %v7602_v9  ;;  %v7807_v29 = vld [vmem:[%s5813_s3 + $0x5b] ss:$0 sm:$0xff]  ;;  %5094 = vset.pattern.permute.xlu0 %v5549_v40  ;;  %v2912_v4 = vmax.f32 %v2883_v30, %v2908_v50 }
 0x504   : > { %v1315_v47 = vmul.f32 %v5156_v36, %v9133_v15  ;;  %v3002_v25 = vmax.f32 %v2973_v11, %v2998_v1  ;;  %3817 = vperm.xlu0 %5094, %v7443_v59   ;;  %v3025_v9 = vmul.f32 %v7807_v29, %v7564_v46  ;;  %v2966_v30 = vmul.f32 %v7772_v20, %v7550_v55 }
 0x505   : > { %v1261_v22 = vmax.f32 %v1232_v18, %v1257_v33  ;;  %v2971_v34 = vmax.f32 %v2942_v35, %v2967_v8  ;;  %v3027_v18 = vmul.f32 %v7807_v29, %v7648_v13  ;;  %v2941_v36 = vmax.f32 %v2912_v4, %v2937_v27  ;;  %v9136_v35 = vld [vmem:[#allocation109_spill] sm:$0xff] }
 0x506   : > { %5068 = vset.pattern.permute.xlu1 %v9131_v10  ;;  %v7775_v58 = vpop.permute.xlu1 %3104  ;;  %v5157_v10 = vld [vmem:[%s5813_s3 + $0x21] ss:$0 sm:$0xff]  ;;  %v2995_v27 = vmul.f32 %v7787_v44, %v7497_v21 }
 0x507   : > { %3440 = vperm.xlu1 %5068, %v7443_v59   ;;  %v1290_v62 = vmax.f32 %v1261_v22, %v1286_v5  ;;  %v1344_v33 = vmul.f32 %v5157_v10, %v9134_v60  ;;  %v9135_v5 = vld [vmem:[#allocation104_spill] sm:$0xff]  ;;  %v7818_v22 = vld [vmem:[%s5813_s3 + $0x5c] ss:$0 sm:$0xff]  ;;  %v3000_v15 = vmax.f32 %v2971_v34, %v2996_v48  ;;  %v3031_v11 = vmax.f32 %v3002_v25, %v3027_v18  ;;  %v7835_v60 = vld [vmem:[%s5813_s3 + $0x5d] ss:$0 sm:$0xff] }
 0x508   : > { %v1373_v8 = vmul.f32 %v5158_v2, %v9135_v5  ;;  %v3056_v13 = vmul.f32 %v7818_v22, %v7658_v54  ;;  %3829 = vperm.xlu0 %5094, %v7472_v31   ;;  %v3054_v54 = vmul.f32 %v7818_v22, %v7678_v26  ;;  %v9137_v34 = vld [vmem:[#allocation112_spill] sm:$0xff]  ;;  %v2970_v4 = vmax.f32 %v2941_v36, %v2966_v30  ;;  %v7845_v2 = vld [vmem:[%s5813_s3 + $0x5e] ss:$0 sm:$0xff] }
 0x509   : > { %v1319_v49 = vmax.f32 %v1290_v62, %v1315_v47  ;;  %v5159_v47 = vld [vmem:[%s5813_s3 + $0x23] ss:$0 sm:$0xff]  ;;  %v3155_v62 = vpop.permute.xlu0 %3154  ;;  %v3029_v10 = vmax.f32 %v3000_v15, %v3025_v9  ;;  %v3085_v21 = vmul.f32 %v7835_v60, %v7726_v43  ;;  %v9138_v25 = vmov 107   ;;  %v5161_v30 = vld [vmem:[%s5813_s3 + $0x25] ss:$0 sm:$0xff] }
 0x50a   : > { %v1402_v46 = vmul.f32 %v5159_v47, %v9136_v35  ;;  %v3083_v18 = vmul.f32 %v7835_v60, %v7681_v24  ;;  %v3024_v9 = vmul.f32 %v7807_v29, %v7628_v57  ;;  %v3114_v43 = vmul.f32 %v7845_v2, %v7775_v58  ;;  %v7865_v58 = vld [vmem:[%s5813_s3 + $0x5f] ss:$0 sm:$0xff] }
 0x50b   : > { %3448 = vperm.xlu1 %5068, %v7422_v45   ;;  %v7800_v16 = vpop.permute.xlu1 %3125  ;;  %v1348_v1 = vmax.f32 %v1319_v49, %v1344_v33  ;;  %v5160_v33 = vld [vmem:[%s5813_s3 + $0x24] ss:$0 sm:$0xff]  ;;  %v3060_v49 = vmax.f32 %v3031_v11, %v3056_v13  ;;  %v9139_v13 = vld [vmem:[#allocation117_spill] sm:$0xff]  ;;  %v3053_v47 = vmul.f32 %v7818_v22, %v7613_v28  ;;  %v3112_v57 = vmul.f32 %v7845_v2, %v7759_v12  ;;  %v5163_v12 = vld [vmem:[%s5813_s3 + $0x27] ss:$0 sm:$0xff] }
 0x50c   : > { %v1431_v48 = vmul.f32 %v5160_v33, %v9137_v34  ;;  %v1460_v24 = vmul.f32 %v5161_v30, %v9139_v13  ;;  %v3143_v28 = vmul.f32 %v7865_v58, %v7797_v37 }
 0x50d   : > { %v1377_v55 = vmax.f32 %v1348_v1, %v1373_v8  ;;  %v2999_v8 = vmax.f32 %v2970_v4, %v2995_v27  ;;  %v7854_v36 = vpop.permute.xlu0 %3179  ;;  %v3058_v1 = vmax.f32 %v3029_v10, %v3054_v54  ;;  %v3089_v35 = vmax.f32 %v3060_v49, %v3085_v21  ;;  %v9140_v27 = vld [vmem:[#allocation120_spill] sm:$0xff]  ;;  %v9141_v49 = vld [vmem:[#allocation125_spill] sm:$0xff] }
 0x50e   : > { %v1518_v21 = vmul.f32 %v5163_v12, %v9141_v49  ;;  %v5165_v49 = vld [vmem:[%s5813_s3 + $0x29] ss:$0 sm:$0xff] }
 0x50f   : > { %3452 = vperm.xlu1 %5068, %v7472_v31   ;;  %v7825_v50 = vpop.permute.xlu1 %3129  ;;  %v1406_v5 = vmax.f32 %v1377_v55, %v1402_v46  ;;  %v5162_v46 = vld [vmem:[%s5813_s3 + $0x26] ss:$0 sm:$0xff]  ;;  %v3087_v55 = vmax.f32 %v3058_v1, %v3083_v18  ;;  %v3028_v10 = vmax.f32 %v2999_v8, %v3024_v9  ;;  %v3118_v54 = vmax.f32 %v3089_v35, %v3114_v43  ;;  %v7881_v8 = vld [vmem:[%s5813_s3 + $0x60] ss:$0 sm:$0xff]  ;;  %v5164_v9 = vld [vmem:[%s5813_s3 + $0x28] ss:$0 sm:$0xff] }
 0x510   : > { %v1489_v11 = vmul.f32 %v5162_v46, %v9140_v27  ;;  %v9142_v43 = vld [vmem:[#allocation128_spill] sm:$0xff]  ;;  %v9143_v1 = vmov 108  }
 0x511   : > { %v1435_v15 = vmax.f32 %v1406_v5, %v1431_v48  ;;  %v3192_v34 = vpop.permute.xlu0 %3191  ;;  %v5550_v48 = vmov 120   ;;  %v3057_v18 = vmax.f32 %v3028_v10, %v3053_v47  ;;  %v3082_v5 = vmul.f32 %v7835_v60, %v7700_v32  ;;  %v7896_v10 = vld [vmem:[%s5813_s3 + $0x62] ss:$0 sm:$0xff] }
 0x512   : > { %5097 = vset.pattern.permute.xlu0 %v5550_v48  ;;  %v1547_v30 = vmul.f32 %v5164_v9, %v9142_v43  ;;  %v3116_v13 = vmax.f32 %v3087_v55, %v3112_v57  ;;  %v3147_v47 = vmax.f32 %v3118_v54, %v3143_v28  ;;  %v3140_v9 = vmul.f32 %v7865_v58, %v7779_v41 }
 0x513   : > { %5071 = vset.pattern.permute.xlu1 %v9138_v25  ;;  %v1464_v4 = vmax.f32 %v1435_v15, %v1460_v24  ;;  %v3141_v25 = vmul.f32 %v7865_v58, %v7800_v16  ;;  %3850 = vperm.xlu0 %5097, %v7494_v53   ;;  %v7886_v24 = vld [vmem:[%s5813_s3 + $0x61] ss:$0 sm:$0xff]  ;;  %v3111_v15 = vmul.f32 %v7845_v2, %v7732_v52  ;;  %v9144_v52 = vld [vmem:[#allocation133_spill] sm:$0xff] }
 0x514   : > { %3473 = vperm.xlu1 %5071, %v7494_v53   ;;  %v7848_v26 = vpop.permute.xlu1 %3150  ;;  %v3201_v35 = vmul.f32 %v7886_v24, %v3192_v34  ;;  %v3086_v55 = vmax.f32 %v3057_v18, %v3082_v5  ;;  %v1576_v54 = vmul.f32 %v5165_v49, %v9144_v52  ;;  %v5169_v49 = vld [vmem:[%s5813_s3 + $0x2d] ss:$0 sm:$0xff] }
 0x515   : > { %v1493_v37 = vmax.f32 %v1464_v4, %v1489_v11  ;;  %v3145_v27 = vmax.f32 %v3116_v13, %v3141_v25  ;;  %v3170_v11 = vmul.f32 %v7881_v8, %v3155_v62  ;;  %v3213_v4 = vpop.permute.xlu0 %3212  ;;  %v5166_v62 = vld [vmem:[%s5813_s3 + $0x2a] ss:$0 sm:$0xff]  ;;  %v9145_v25 = vld [vmem:[#allocation136_spill] sm:$0xff]  ;;  %v3169_v41 = vmul.f32 %v7881_v8, %v7848_v26 }
 0x516   : > { %v3115_v28 = vmax.f32 %v3086_v55, %v3111_v15  ;;  %v1605_v18 = vmul.f32 %v5166_v62, %v9145_v25  ;;  %v7909_v43 = vmul.f32 %v7896_v10, %v3213_v4  ;;  %v3198_v4 = vmul.f32 %v7886_v24, %v7854_v36  ;;  %v9148_v52 = vld [vmem:[#allocation149_spill] sm:$0xff] }
 0x517   : > { %v1522_v46 = vmax.f32 %v1493_v37, %v1518_v21  ;;  %v3174_v5 = vmax.f32 %v3145_v27, %v3170_v11  ;;  %v5168_v27 = vld [vmem:[%s5813_s3 + $0x2c] ss:$0 sm:$0xff]  ;;  %v9147_v11 = vld [vmem:[#allocation144_spill] sm:$0xff]  ;;  %v5170_v25 = vld [vmem:[%s5813_s3 + $0x2e] ss:$0 sm:$0xff] }
 0x518   : > { %3477 = vperm.xlu1 %5071, %v7422_v45   ;;  %v7868_v33 = vpop.permute.xlu1 %3158  ;;  %v1663_v26 = vmul.f32 %v5168_v27, %v9147_v11  ;;  %v5172_v11 = vld [vmem:[%s5813_s3 + $0x30] ss:$0 sm:$0xff] }
 0x519   : > { %v1551_v12 = vmax.f32 %v1522_v46, %v1547_v30  ;;  %v8528_v30 = vmov 121  }
 0x51a   : > { %5098 = vset.pattern.permute.xlu0 %v8528_v30 }
 0x51b   : > { %3875 = vperm.xlu0 %5098, %v7443_v59   ;;  %v1580_v13 = vmax.f32 %v1551_v12, %v1576_v54  ;;  %v1692_v54 = vmul.f32 %v5169_v49, %v9148_v52  ;;  %v8526_v52 = vmov 122  }
 0x51c   : > { %5072 = vset.pattern.permute.xlu1 %v9143_v1  ;;  %v3163_v16 = vpop.permute.xlu1 %3162  ;;  %v5167_v1 = vld [vmem:[%s5813_s3 + $0x2b] ss:$0 sm:$0xff] }
 0x51d   : > { %v3172_v32 = vmul.f32 %v7881_v8, %v3163_v16  ;;  %3498 = vperm.xlu1 %5072, %v7443_v59   ;;  %v9146_v16 = vld [vmem:[#allocation141_spill] sm:$0xff]  ;;  %v1609_v46 = vmax.f32 %v1580_v13, %v1605_v18  ;;  %v9150_v18 = vld [vmem:[#allocation152_spill] sm:$0xff] }
 0x51e   : > { %v1634_v15 = vmul.f32 %v5167_v1, %v9146_v16  ;;  %v5171_v16 = vld [vmem:[%s5813_s3 + $0x2f] ss:$0 sm:$0xff] }
 0x51f   : > { %v3176_v57 = vmax.f32 %v3147_v47, %v3172_v32  ;;  %v3144_v32 = vmax.f32 %v3115_v28, %v3140_v9  ;;  %3887 = vperm.xlu0 %5098, %v7472_v31   ;;  %v7932_v28 = vld [vmem:[%s5813_s3 + $0x63] ss:$0 sm:$0xff]  ;;  %v3238_v9 = vpop.permute.xlu0 %3237 }
 0x520   : > { %v1638_v12 = vmax.f32 %v1609_v46, %v1634_v15  ;;  %v3256_v13 = vmul.f32 %v7932_v28, %v3238_v9  ;;  %v9151_v15 = vld [vmem:[#allocation157_spill] sm:$0xff] }
 0x521   : > { %v7902_v34 = vmax.f32 %v3176_v57, %v3201_v35  ;;  %3506 = vperm.xlu1 %5072, %v7422_v45   ;;  %v3184_v21 = vpop.permute.xlu1 %3183  ;;  %v3173_v57 = vmax.f32 %v3144_v32, %v3169_v41  ;;  %v1750_v32 = vmul.f32 %v5171_v16, %v9151_v15  ;;  %v5173_v9 = vld [vmem:[%s5813_s3 + $0x31] ss:$0 sm:$0xff]  ;;  %v5175_v15 = vld [vmem:[%s5813_s3 + $0x33] ss:$0 sm:$0xff] }
 0x522   : > { %v3199_v37 = vmul.f32 %v7886_v24, %v3184_v21  ;;  %v9149_v21 = vmov 109   ;;  %v1667_v62 = vmax.f32 %v1638_v12, %v1663_v26  ;;  %v9152_v26 = vld [vmem:[#allocation160_spill] sm:$0xff] }
 0x523   : > { %v1779_v12 = vmul.f32 %v5172_v11, %v9152_v26  ;;  %5101 = vset.pattern.permute.xlu0 %v8526_v52  ;;  %v7963_v11 = vld [vmem:[%s5813_s3 + $0x64] ss:$0 sm:$0xff] }
 0x524   : > { %v7917_v47 = vmax.f32 %v3174_v5, %v3199_v37  ;;  %v1721_v5 = vmul.f32 %v5170_v25, %v9150_v18  ;;  %v3202_v37 = vmax.f32 %v3173_v57, %v3198_v4  ;;  %v1696_v1 = vmax.f32 %v1667_v62, %v1692_v54  ;;  %v3250_v4 = vpop.permute.xlu0 %3249  ;;  %3908 = vperm.xlu0 %5101, %v7494_v53   ;;  %v5174_v18 = vld [vmem:[%s5813_s3 + $0x32] ss:$0 sm:$0xff] }
 0x525   : > { %3510 = vperm.xlu1 %5072, %v7472_v31   ;;  %v7920_v35 = vpop.permute.xlu1 %3187 }
 0x526   : > { %v3232_v55 = vmax.f32 %v7917_v47, %v7909_v43  ;;  %v1725_v27 = vmax.f32 %v1696_v1, %v1721_v5  ;;  %v9154_v5 = vld [vmem:[#allocation168_spill] sm:$0xff]  ;;  %v3259_v1 = vmul.f32 %v7932_v28, %v3250_v4 }
 0x527   : > { %v9161_v43 = vld [vmem:[#allocation192_spill] sm:$0xff] }
 0x528   : > { %v1754_v54 = vmax.f32 %v1725_v27, %v1750_v32  ;;  %v9156_v32 = vld [vmem:[#allocation173_spill] sm:$0xff]  ;;  %v3271_v26 = vpop.permute.xlu0 %3270 }
 0x529   : > { %5075 = vset.pattern.permute.xlu1 %v9149_v21  ;;  %v9153_v21 = vld [vmem:[#allocation165_spill] sm:$0xff] }
 0x52a   : > { %3531 = vperm.xlu1 %5075, %v7494_v53   ;;  %v3209_v36 = vpop.permute.xlu1 %3208  ;;  %v1808_v62 = vmul.f32 %v5173_v9, %v9153_v21  ;;  %v1783_v25 = vmax.f32 %v1754_v54, %v1779_v12  ;;  %v5176_v54 = vld [vmem:[%s5813_s3 + $0x34] ss:$0 sm:$0xff]  ;;  %v9157_v9 = vld [vmem:[#allocation176_spill] sm:$0xff] }
 0x52b   : > { %v3227_v41 = vmul.f32 %v7896_v10, %v3209_v36  ;;  %v1837_v36 = vmul.f32 %v5174_v18, %v9154_v5  ;;  %v1895_v21 = vmul.f32 %v5176_v54, %v9157_v9 }
 0x52c   : > { %v1812_v16 = vmax.f32 %v1783_v25, %v1808_v62  ;;  %v5177_v62 = vld [vmem:[%s5813_s3 + $0x35] ss:$0 sm:$0xff]  ;;  %v9158_v25 = vld [vmem:[#allocation181_spill] sm:$0xff] }
 0x52d   : > { %v3231_v46 = vmax.f32 %v3202_v37, %v3227_v41  ;;  %v9155_v37 = vmov 110  }
 0x52e   : > { %3535 = vperm.xlu1 %5075, %v7422_v45   ;;  %v7945_v49 = vpop.permute.xlu1 %3216  ;;  %v1841_v12 = vmax.f32 %v1812_v16, %v1837_v36  ;;  %v8525_v36 = vmov 123  }
 0x52f   : > { %v7947_v57 = vmax.f32 %v3231_v46, %v3256_v13  ;;  %v1866_v46 = vmul.f32 %v5175_v15, %v9156_v32  ;;  %5102 = vset.pattern.permute.xlu0 %v8525_v36 }
 0x530   : > { %3933 = vperm.xlu0 %5102, %v7443_v59  }
 0x531   : > { %v1870_v4 = vmax.f32 %v1841_v12, %v1866_v46 }
 0x532   : > { %5076 = vset.pattern.permute.xlu1 %v9155_v37  ;;  %v3221_v41 = vpop.permute.xlu1 %3220  ;;  %v1924_v37 = vmul.f32 %v5177_v62, %v9158_v25  ;;  %v5181_v25 = vld [vmem:[%s5813_s3 + $0x39] ss:$0 sm:$0xff] }
 0x533   : > { %v3230_v13 = vmul.f32 %v7896_v10, %v3221_v41  ;;  %3556 = vperm.xlu1 %5076, %v7443_v59   ;;  %v7974_v41 = vmul.f32 %v7963_v11, %v3271_v26  ;;  %v9160_v26 = vld [vmem:[#allocation189_spill] sm:$0xff] }
 0x534   : > { %3945 = vperm.xlu0 %5102, %v7472_v31  }
 0x535   : > { %v3234_v27 = vmax.f32 %v7902_v34, %v3230_v13  ;;  %v1899_v13 = vmax.f32 %v1870_v4, %v1895_v21  ;;  %v5180_v21 = vld [vmem:[%s5813_s3 + $0x38] ss:$0 sm:$0xff]  ;;  %v9162_v4 = vmov 111  }
 0x536   : > { %v2011_v47 = vmul.f32 %v5180_v21, %v9161_v43 }
 0x537   : > { %v7967_v18 = vmax.f32 %v3234_v27, %v3259_v1  ;;  %3564 = vperm.xlu1 %5076, %v7422_v45   ;;  %v3242_v5 = vpop.permute.xlu1 %3241  ;;  %v5178_v45 = vld [vmem:[%s5813_s3 + $0x36] ss:$0 sm:$0xff]  ;;  %v9159_v1 = vld [vmem:[#allocation184_spill] sm:$0xff]  ;;  %v1928_v46 = vmax.f32 %v1899_v13, %v1924_v37  ;;  %v5179_v27 = vld [vmem:[%s5813_s3 + $0x37] ss:$0 sm:$0xff] }
 0x538   : > { %v3257_v34 = vmul.f32 %v7932_v28, %v3242_v5  ;;  %v1953_v16 = vmul.f32 %v5178_v45, %v9159_v1  ;;  %v1982_v12 = vmul.f32 %v5179_v27, %v9160_v26  ;;  %v3296_v5 = vpop.permute.xlu0 %3295  ;;  %v9163_v37 = vld [vmem:[#allocation197_spill] sm:$0xff]  ;;  %v9164_v27 = vld [vmem:[#allocation200_spill] sm:$0xff] }
 0x53a   : > { %v7983_v15 = vmax.f32 %v3232_v55, %v3257_v34  ;;  %v1957_v9 = vmax.f32 %v1928_v46, %v1953_v16  ;;  %v7996_v55 = vld [vmem:[%s5813_s3 + $0x65] ss:$0 sm:$0xff]  ;;  %v2040_v34 = vmul.f32 %v5181_v25, %v9163_v37  ;;  %v5182_v46 = vld [vmem:[%s5813_s3 + $0x3a] ss:$0 sm:$0xff]  ;;  %v8010_v25 = vld [vmem:[%s5820_s16 + $0x10] sm:$0xff] }
 0x53b   : > { %3568 = vperm.xlu1 %5076, %v7472_v31   ;;  %v7986_v32 = vpop.permute.xlu1 %3245  ;;  %v3314_v1 = vmul.f32 %v7996_v55, %v3296_v5  ;;  %v2069_v26 = vmul.f32 %v5182_v46, %v9164_v27  ;;  %v5186_v46 = vld [vmem:[%s5813_s3 + $0x3d] ss:$0 sm:$0xff]  ;;  %v9167_v27 = vld [vmem:[#allocation213_spill] sm:$0xff] }
 0x53c   : > { %v3290_v54 = vmax.f32 %v7983_v15, %v7974_v41  ;;  %v1986_v62 = vmax.f32 %v1957_v9, %v1982_v12  ;;  %v5183_v12 = vld [vmem:[%s5813_s3 + $0x3b] ss:$0 sm:$0xff]  ;;  %v9165_v9 = vld [vmem:[#allocation205_spill] sm:$0xff]  ;;  %v3308_v5 = vpop.permute.xlu0 %3307 }
 0x53d   : > { %v9174_v41 = vld [vmem:[#allocation237_spill] sm:$0xff] }
 0x53e   : > { %v2015_v16 = vmax.f32 %v1986_v62, %v2011_v47  ;;  %v8524_v47 = vmov 124  }
 0x53f   : > { %5079 = vset.pattern.permute.xlu1 %v9162_v4  ;;  %v2098_v4 = vmul.f32 %v5183_v12, %v9165_v9  ;;  %5105 = vset.pattern.permute.xlu0 %v8524_v47  ;;  %v2156_v12 = vmul.f32 %v5186_v46, %v9167_v27  ;;  %v9168_v9 = vmov 112   ;;  %v5187_v47 = vld [vmem:[%s5813_s3 + $0x3e] ss:$0 sm:$0xff]  ;;  %v5188_v27 = vld [vmem:[%s5813_s3 + $0x3f] ss:$0 sm:$0xff] }
 0x540   : > { %3589 = vperm.xlu1 %5079, %v7494_v53   ;;  %v3267_v13 = vpop.permute.xlu1 %3266  ;;  %v2044_v43 = vmax.f32 %v2015_v16, %v2040_v34  ;;  %v9166_v34 = vld [vmem:[#allocation208_spill] sm:$0xff]  ;;  %3966 = vperm.xlu0 %5105, %v7494_v53  }
 0x541   : > { %v3285_v45 = vmul.f32 %v7963_v11, %v3267_v13 }
 0x542   : > { %v2073_v62 = vmax.f32 %v2044_v43, %v2069_v26  ;;  %v3317_v26 = vmul.f32 %v7996_v55, %v3308_v5 }
 0x543   : > { %v3289_v21 = vmax.f32 %v7947_v57, %v3285_v45  ;;  %v5185_v57 = vld [vmem:[%s5813_s3 + $0x3c] ss:$0 sm:$0xff] }
 0x544   : > { %3593 = vperm.xlu1 %5079, %v8010_v25   ;;  %v8013_v37 = vpop.permute.xlu1 %3274  ;;  %v2127_v45 = vmul.f32 %v5185_v57, %v9166_v34  ;;  %v2102_v16 = vmax.f32 %v2073_v62, %v2098_v4  ;;  %v9169_v57 = vld [vmem:[#allocation216_spill] sm:$0xff]  ;;  %v3329_v62 = vpop.permute.xlu0 %3328 }
 0x545   : > { %v8015_v13 = vmax.f32 %v3289_v21, %v3314_v1  ;;  %v2185_v34 = vmul.f32 %v5187_v47, %v9169_v57  ;;  %v8031_v4 = vld [vmem:[%s5813_s3 + $0x66] ss:$0 sm:$0xff]  ;;  %v9172_v57 = vld [vmem:[#allocation229_spill] sm:$0xff] }
 0x546   : > { %v2131_v43 = vmax.f32 %v2102_v16, %v2127_v45  ;;  %v5189_v45 = vld [vmem:[%s5813_s3 + $0x40] ss:$0 sm:$0xff]  ;;  %v9171_v47 = vld [vmem:[#allocation224_spill] sm:$0xff] }
 0x547   : > { %v2243_v16 = vmul.f32 %v5189_v45, %v9171_v47  ;;  %v5193_v47 = vld [vmem:[%s5813_s3 + $0x43] ss:$0 sm:$0xff] }
 0x548   : > { %5080 = vset.pattern.permute.xlu1 %v9168_v9  ;;  %v3279_v1 = vpop.permute.xlu1 %3278  ;;  %v2160_v46 = vmax.f32 %v2131_v43, %v2156_v12  ;;  %v9170_v9 = vld [vmem:[#allocation221_spill] sm:$0xff]  ;;  %v8527_v12 = vmov 125   ;;  %v8046_v43 = vld [vmem:[%s5820_s16] sm:$0xff]  ;;  %v2330_v15 = vmul.f32 %v5193_v47, %v9174_v41 }
 0x549   : > { %v3288_v21 = vmul.f32 %v7963_v11, %v3279_v1  ;;  %3614 = vperm.xlu1 %5080, %v7443_v59   ;;  %v2214_v1 = vmul.f32 %v5188_v27, %v9170_v9  ;;  %5106 = vset.pattern.permute.xlu0 %v8527_v12  ;;  %v5192_v9 = vld [vmem:[%s5813_s3 + $0x42] ss:$0 sm:$0xff] }
 0x54a   : > { %v2189_v5 = vmax.f32 %v2160_v46, %v2185_v34  ;;  %3991 = vperm.xlu0 %5106, %v8046_v43  }
 0x54b   : > { %v3292_v36 = vmax.f32 %v7967_v18, %v3288_v21  ;;  %v8042_v21 = vmul.f32 %v8031_v4, %v3329_v62 }
 0x54d   : > { %v8035_v52 = vmax.f32 %v3292_v36, %v3317_v26  ;;  %3622 = vperm.xlu1 %5080, %v8010_v25   ;;  %v3300_v59 = vpop.permute.xlu1 %3299  ;;  %v2218_v36 = vmax.f32 %v2189_v5, %v2214_v1  ;;  %v5191_v26 = vld [vmem:[%s5813_s3 + $0x41] ss:$0 sm:$0xff] }
 0x54e   : > { %v3315_v18 = vmul.f32 %v7996_v55, %v3300_v59  ;;  %v2272_v34 = vmul.f32 %v5191_v26, %v9172_v57  ;;  %v9173_v59 = vld [vmem:[#allocation232_spill] sm:$0xff]  ;;  %4003 = vperm.xlu0 %5106, %v7472_v31   ;;  %v9175_v26 = vmov 113  }
 0x54f   : > { %v2247_v27 = vmax.f32 %v2218_v36, %v2243_v16  ;;  %v2301_v45 = vmul.f32 %v5192_v9, %v9173_v59  ;;  %v5194_v36 = vld [vmem:[%s5813_s3 + $0x44] ss:$0 sm:$0xff]  ;;  %v9177_v59 = vld [vmem:[#allocation245_spill] sm:$0xff] }
 0x550   : > { %v8054_v46 = vmax.f32 %v3290_v54, %v3315_v18  ;;  %v8067_v54 = vld [vmem:[%s5813_s3 + $0x67] ss:$0 sm:$0xff]  ;;  %v3354_v18 = vpop.permute.xlu0 %3353 }
 0x551   : > { %3626 = vperm.xlu1 %5080, %v7472_v31   ;;  %v8057_v62 = vpop.permute.xlu1 %3303  ;;  %v2276_v5 = vmax.f32 %v2247_v27, %v2272_v34  ;;  %v9176_v57 = vld [vmem:[#allocation240_spill] sm:$0xff]  ;;  %v3372_v31 = vmul.f32 %v8067_v54, %v3354_v18 }
 0x552   : > { %v3348_v1 = vmax.f32 %v8054_v46, %v8042_v21  ;;  %v2359_v9 = vmul.f32 %v5194_v36, %v9176_v57  ;;  %v5195_v27 = vld [vmem:[%s5813_s3 + $0x45] ss:$0 sm:$0xff]  ;;  %v5197_v18 = vld [vmem:[%s5813_s3 + $0x47] ss:$0 sm:$0xff] }
 0x553   : > { %v2305_v16 = vmax.f32 %v2276_v5, %v2301_v45  ;;  %v2388_v47 = vmul.f32 %v5195_v27, %v9177_v59  ;;  %v9178_v45 = vld [vmem:[#allocation248_spill] sm:$0xff] }
 0x554   : > { %v3366_v30 = vpop.permute.xlu0 %3365 }
 0x555   : > { %5083 = vset.pattern.permute.xlu1 %v9175_v26  ;;  %v2334_v34 = vmax.f32 %v2305_v16, %v2330_v15  ;;  %v5196_v26 = vld [vmem:[%s5813_s3 + $0x46] ss:$0 sm:$0xff]  ;;  %v9179_v16 = vld [vmem:[#allocation251_spill] sm:$0xff] }
 0x556   : > { %3647 = vperm.xlu1 %5083, %v7494_v53   ;;  %v3325_v21 = vpop.permute.xlu1 %3324  ;;  %v2417_v5 = vmul.f32 %v5196_v26, %v9178_v45  ;;  %v2446_v27 = vmul.f32 %v5197_v18, %v9179_v16 }
 0x557   : > { %v3343_v46 = vmul.f32 %v8031_v4, %v3325_v21  ;;  %v2363_v12 = vmax.f32 %v2334_v34, %v2359_v9  ;;  %v8530_v21 = vmov 126   ;;  %v9180_v9 = vld [vmem:[#allocation252_spill] sm:$0xff]  ;;  %v9181_v34 = vmov 114  }
 0x558   : > { %5109 = vset.pattern.permute.xlu0 %v8530_v21  ;;  %v9197_v21 = vld [vmem:[#allocation110_spill] sm:$0xff] }
 0x559   : > { %v3347_v41 = vmax.f32 %v8015_v13, %v3343_v46  ;;  %v2392_v15 = vmax.f32 %v2363_v12, %v2388_v47  ;;  %4024 = vperm.xlu0 %5109, %v7494_v53   ;;  %v2475_v46 = vmul.f32 %v7491_v19, %v9180_v9  ;;  %v9182_v12 = vld [vmem:[#allocation253_spill] sm:$0xff]  ;;  %v8097_v53 = vld [vmem:[%s5813_s3 + $0x68] ss:$0 sm:$0xff] }
 0x55a   : > { %3651 = vperm.xlu1 %5083, %v8010_v25   ;;  %v8081_v36 = vpop.permute.xlu1 %3332  ;;  %v2504_v47 = vmul.f32 %v7512_v0, %v9182_v12  ;;  %v9186_v12 = vld [vmem:[#allocation38_spill] sm:$0xff] }
 0x55b   : > { %v3376_v57 = vmax.f32 %v3347_v41, %v3372_v31  ;;  %v2421_v13 = vmax.f32 %v2392_v15, %v2417_v5  ;;  %v3375_v41 = vmul.f32 %v8067_v54, %v3366_v30  ;;  %v3387_v5 = vpop.permute.xlu0 %3386  ;;  %v9183_v15 = vld [vmem:[#allocation254_spill] sm:$0xff]  ;;  %v9184_v30 = vld [vmem:[#allocation40_spill] sm:$0xff] }
 0x55c   : > { %v2533_v18 = vmul.f32 %v7525_v23, %v9183_v15  ;;  %v9185_v23 = vld [vmem:[#allocation44_spill] sm:$0xff] }
 0x55d   : > { %v2450_v26 = vmax.f32 %v2421_v13, %v2446_v27  ;;  %v2562_v27 = vmul.f32 %v7546_v3, %v9184_v30  ;;  %v8529_v13 = vmov 127   ;;  %v9190_v30 = vld [vmem:[#allocation71_spill] sm:$0xff] }
 0x55e   : > { %5084 = vset.pattern.permute.xlu1 %v9181_v34  ;;  %v3337_v59 = vpop.permute.xlu1 %3336  ;;  %5110 = vset.pattern.permute.xlu0 %v8529_v13  ;;  %v9195_v13 = vld [vmem:[#allocation83_spill] sm:$0xff] }
 0x55f   : > { %v3346_v31 = vmul.f32 %v8031_v4, %v3337_v59  ;;  %3672 = vperm.xlu1 %5084, %v8046_v43   ;;  %v2479_v19 = vmax.f32 %v2450_v26, %v2475_v46  ;;  %4049 = vperm.xlu0 %5110, %v8046_v43   ;;  %v2591_v59 = vmul.f32 %v7557_v42, %v9185_v23  ;;  %v8122_v42 = vld [vmem:[%s5813_s3 + $0x69] ss:$0 sm:$0xff] }
 0x561   : > { %v3350_v45 = vmax.f32 %v8035_v52, %v3346_v31  ;;  %v2508_v34 = vmax.f32 %v2479_v19, %v2504_v47  ;;  %v3402_v52 = vmul.f32 %v8097_v53, %v3387_v5  ;;  %v2620_v47 = vmul.f32 %v7579_v39, %v9186_v12  ;;  %v9187_v19 = vld [vmem:[#allocation73_spill] sm:$0xff]  ;;  %v9192_v12 = vld [vmem:[#allocation50_spill] sm:$0xff] }
 0x562   : > { %v2649_v15 = vmul.f32 %v7591_v38, %v9187_v19  ;;  %v9191_v38 = vld [vmem:[#allocation42_spill] sm:$0xff] }
 0x563   : > { %v3379_v16 = vmax.f32 %v3350_v45, %v3375_v41  ;;  %3680 = vperm.xlu1 %5084, %v8010_v25   ;;  %v3358_v9 = vpop.permute.xlu1 %3357  ;;  %v2537_v46 = vmax.f32 %v2508_v34, %v2533_v18  ;;  %v8111_v41 = vld [vmem:[%s5820_s16 + $0x18] sm:$0xff]  ;;  %v9188_v18 = vmov 115  }
 0x564   : > { %v3373_v0 = vmul.f32 %v8067_v54, %v3358_v9  ;;  %4061 = vperm.xlu0 %5110, %v8111_v41   ;;  %v9189_v34 = vld [vmem:[#allocation63_spill] sm:$0xff] }
 0x565   : > { %v2566_v26 = vmax.f32 %v2537_v46, %v2562_v27  ;;  %v8128_v27 = vld [vmem:[%s5820_s16 + $0x8] sm:$0xff]  ;;  %s9219_s16 = sld [smem:[#allocation258_spill]] (!%p4536_p11) }
 0x566   : > { %v3377_v31 = vmax.f32 %v3348_v1, %v3373_v0  ;;  %v3412_v1 = vpop.permute.xlu0 %3411  ;;  %v2678_v0 = vmul.f32 %v9190_v30, %v9189_v34 }
 0x567   : > { %3684 = vperm.xlu1 %5084, %v8111_v41   ;;  %v8114_v3 = vpop.permute.xlu1 %3361  ;;  %v2595_v5 = vmax.f32 %v2566_v26, %v2591_v59  ;;  %v3430_v46 = vmul.f32 %v8122_v42, %v3412_v1  ;;  %v2707_v59 = vmul.f32 %v7622_v56, %v9191_v38 }
 0x568   : > { %v3406_v45 = vmax.f32 %v3377_v31, %v3402_v52 }
 0x569   : > { %v2624_v9 = vmax.f32 %v2595_v5, %v2620_v47  ;;  %v9193_v47 = vld [vmem:[#allocation121_spill] sm:$0xff] }
 0x56a   : > { %v2736_v5 = vmul.f32 %v9193_v47, %v9192_v12  ;;  %v3424_v34 = vpop.permute.xlu0 %3423  ;;  %v9200_v47 = vld [vmem:[#allocation58_spill] sm:$0xff] }
 0x56b   : > { %5087 = vset.pattern.permute.xlu1 %v9188_v18  ;;  %v2653_v23 = vmax.f32 %v2624_v9, %v2649_v15  ;;  %v9196_v9 = vld [vmem:[#allocation55_spill] sm:$0xff] }
 0x56c   : > { %3705 = vperm.xlu1 %5087, %v8128_v27   ;;  %v3383_v39 = vpop.permute.xlu1 %3382  ;;  %v2794_v56 = vmul.f32 %v9197_v21, %v9196_v9  ;;  %v2852_v21 = vmul.f32 %v7710_v61, %v9200_v47  ;;  %v9201_v9 = vld [vmem:[#allocation94_spill] sm:$0xff] }
 0x56d   : > { %v3401_v52 = vmul.f32 %v8097_v53, %v3383_v39  ;;  %v2682_v26 = vmax.f32 %v2653_v23, %v2678_v0  ;;  %v9194_v39 = vld [vmem:[#allocation54_spill] sm:$0xff]  ;;  %v3433_v23 = vmul.f32 %v8122_v42, %v3424_v34  ;;  %v2881_v34 = vmul.f32 %v7720_v7, %v9201_v9  ;;  %v9204_v7 = vld [vmem:[#allocation75_spill] sm:$0xff] }
 0x56e   : > { %v2765_v1 = vmul.f32 %v9195_v13, %v9194_v39  ;;  %v3445_v13 = vpop.permute.xlu0 %3444  ;;  %v9207_v9 = vld [vmem:[#allocation82_spill] sm:$0xff] }
 0x56f   : > { %v3405_v31 = vmax.f32 %v3376_v57, %v3401_v52  ;;  %v2711_v30 = vmax.f32 %v2682_v26, %v2707_v59  ;;  %v9198_v57 = vmov 116   ;;  %v8151_v26 = vld [vmem:[%s5813_s3 + $0x6a] ss:$0 sm:$0xff] }
 0x570   : > { %3709 = vperm.xlu1 %5087, %v8010_v25   ;;  %v8138_v19 = vpop.permute.xlu1 %3390 }
 0x571   : > { %v3434_v18 = vmax.f32 %v3405_v31, %v3430_v46  ;;  %v2740_v15 = vmax.f32 %v2711_v30, %v2736_v5  ;;  %v9199_v46 = vld [vmem:[#allocation52_spill] sm:$0xff] }
 0x572   : > { %v2823_v59 = vmul.f32 %v7688_v51, %v9199_v46  ;;  %v3460_v51 = vmul.f32 %v8151_v26, %v3445_v13  ;;  %v3470_v13 = vpop.permute.xlu0 %3469 }
 0x573   : > { %v2769_v38 = vmax.f32 %v2740_v15, %v2765_v1  ;;  %v9202_v15 = vld [vmem:[#allocation108_spill] sm:$0xff] }
 0x574   : > { %5088 = vset.pattern.permute.xlu1 %v9198_v57  ;;  %v3395_v0 = vpop.permute.xlu1 %3394 }
 0x575   : > { %v3404_v52 = vmul.f32 %v8097_v53, %v3395_v0  ;;  %3730 = vperm.xlu1 %5088, %v8046_v43   ;;  %v2798_v12 = vmax.f32 %v2769_v38, %v2794_v56  ;;  %v2910_v56 = vmul.f32 %v7741_v17, %v9202_v15 }
 0x577   : > { %v3408_v31 = vmax.f32 %v3379_v16, %v3404_v52  ;;  %v2827_v39 = vmax.f32 %v2798_v12, %v2823_v59  ;;  %v9203_v52 = vld [vmem:[#allocation113_spill] sm:$0xff]  ;;  %v2968_v59 = vmul.f32 %v7772_v20, %v9204_v7  ;;  %v9205_v12 = vmov 117  }
 0x578   : > { %v3026_v20 = vmul.f32 %v7807_v29, %v9207_v9  ;;  %v3113_v29 = vmul.f32 %v7845_v2, %v7753_v14  ;;  %v3171_v14 = vmul.f32 %v7881_v8, %v7868_v33 }
 0x579   : > { %v3437_v5 = vmax.f32 %v3408_v31, %v3433_v23  ;;  %3738 = vperm.xlu1 %5088, %v8010_v25   ;;  %v3416_v30 = vpop.permute.xlu1 %3415  ;;  %v2856_v16 = vmax.f32 %v2827_v39, %v2852_v21  ;;  %v2939_v23 = vmul.f32 %v7750_v63, %v9203_v52  ;;  %v8170_v31 = vld [vmem:[%s5813_s3 + $0x6b] ss:$0 sm:$0xff] }
 0x57a   : > { %v3431_v1 = vmul.f32 %v8122_v42, %v3416_v30  ;;  %v3488_v63 = vmul.f32 %v8170_v31, %v3470_v13 }
 0x57b   : > { %v2885_v0 = vmax.f32 %v2856_v16, %v2881_v34 }
 0x57c   : > { %v3435_v57 = vmax.f32 %v3406_v45, %v3431_v1  ;;  %v9206_v45 = vld [vmem:[#allocation102_spill] sm:$0xff] }
 0x57d   : > { %3742 = vperm.xlu1 %5088, %v8111_v41   ;;  %v8163_v61 = vpop.permute.xlu1 %3419  ;;  %v2914_v46 = vmax.f32 %v2885_v0, %v2910_v56  ;;  %v2997_v47 = vmul.f32 %v7787_v44, %v9206_v45  ;;  %v3482_v56 = vpop.permute.xlu0 %3481  ;;  %v9209_v0 = vld [vmem:[#allocation90_spill] sm:$0xff] }
 0x57e   : > { %v3464_v38 = vmax.f32 %v3435_v57, %v3460_v51  ;;  %v9208_v51 = vld [vmem:[#allocation116_spill] sm:$0xff]  ;;  %v3084_v52 = vmul.f32 %v7835_v60, %v9209_v0  ;;  %v3432_v0 = vmul.f32 %v8122_v42, %v8163_v61 }
 0x57f   : > { %v2943_v17 = vmax.f32 %v2914_v46, %v2939_v23  ;;  %v3055_v16 = vmul.f32 %v7818_v22, %v9208_v51  ;;  %v3491_v46 = vmul.f32 %v8170_v31, %v3482_v56  ;;  %v3403_v56 = vmul.f32 %v8097_v53, %v8138_v19 }
 0x581   : > { %5091 = vset.pattern.permute.xlu1 %v9205_v12  ;;  %v2972_v39 = vmax.f32 %v2943_v17, %v2968_v59  ;;  %v3142_v59 = vmul.f32 %v7865_v58, %v7825_v50  ;;  %v4516_v12 = vld [vmem:[%s5813_s3 + $0x6c] ss:$0 sm:$0xff]  ;;  %v3503_v60 = vpop.permute.xlu0 %3502  ;;  %v3229_v58 = vmul.f32 %v7896_v10, %v7945_v49  ;;  %v3316_v10 = vmul.f32 %v7996_v55, %v8057_v62 }
 0x582   : > { %3763 = vperm.xlu1 %5091, %v8128_v27   ;;  %v3441_v21 = vpop.permute.xlu1 %3440 }
 0x583   : > { %v3459_v30 = vmul.f32 %v8151_v26, %v3441_v21  ;;  %v3001_v1 = vmax.f32 %v2972_v39, %v2997_v47  ;;  %v3200_v47 = vmul.f32 %v7886_v24, %v7920_v35  ;;  %v3287_v24 = vmul.f32 %v7963_v11, %v8013_v37  ;;  %v4517_v35 = vld [vmem:[%s5813_s3 + $0x6d] ss:$0 sm:$0xff] }
 0x584   : > { %v3374_v11 = vmul.f32 %v8067_v54, %v8114_v3 }
 0x585   : > { %v3463_v34 = vmax.f32 %v3434_v18, %v3459_v30  ;;  %v3030_v57 = vmax.f32 %v3001_v1, %v3026_v20  ;;  %v3518_v30 = vmul.f32 %v4516_v12, %v3503_v60  ;;  %v3528_v20 = vpop.permute.xlu0 %3527 }
 0x586   : > { %3767 = vperm.xlu1 %5091, %v8010_v25   ;;  %v8183_v44 = vpop.permute.xlu1 %3448  ;;  %v3546_v1 = vmul.f32 %v4517_v35, %v3528_v20 }
 0x587   : > { %v3492_v15 = vmax.f32 %v3463_v34, %v3488_v63  ;;  %v3059_v23 = vmax.f32 %v3030_v57, %v3055_v16  ;;  %v3258_v63 = vmul.f32 %v7932_v28, %v7986_v32  ;;  %v3345_v28 = vmul.f32 %v8031_v4, %v8081_v36 }
 0x589   : > { %v3088_v7 = vmax.f32 %v3059_v23, %v3084_v52  ;;  %v3540_v55 = vpop.permute.xlu0 %3539  ;;  %v4518_v23 = vld [vmem:[%s5813_s3 + $0x6e] ss:$0 sm:$0xff] }
 0x58a   : > { %5092 = vset.pattern.permute.xlu1 %v5548_v6  ;;  %v3453_v18 = vpop.permute.xlu1 %3452  ;;  %v3549_v54 = vmul.f32 %v4517_v35, %v3540_v55 }
 0x58b   : > { %v3462_v22 = vmul.f32 %v8151_v26, %v3453_v18  ;;  %3788 = vperm.xlu1 %5092, %v8046_v43   ;;  %v3117_v17 = vmax.f32 %v3088_v7, %v3113_v29 }
 0x58d   : > { %v3466_v13 = vmax.f32 %v3437_v5, %v3462_v22  ;;  %v3146_v45 = vmax.f32 %v3117_v17, %v3142_v59  ;;  %v3561_v29 = vpop.permute.xlu0 %3560 }
 0x58f   : > { %v3495_v2 = vmax.f32 %v3466_v13, %v3491_v46  ;;  %3796 = vperm.xlu1 %5092, %v8010_v25   ;;  %v3474_v6 = vpop.permute.xlu1 %3473  ;;  %v3175_v50 = vmax.f32 %v3146_v45, %v3171_v14  ;;  %v3576_v46 = vmul.f32 %v4518_v23, %v3561_v29  ;;  %v4519_v14 = vld [vmem:[%s5813_s3 + $0x6f] ss:$0 sm:$0xff] }
 0x590   : > { %v3489_v21 = vmul.f32 %v8170_v31, %v3474_v6 }
 0x591   : > { %v3204_v8 = vmax.f32 %v3175_v50, %v3200_v47 }
 0x592   : > { %v3493_v5 = vmax.f32 %v3464_v38, %v3489_v21 }
 0x593   : > { %3800 = vperm.xlu1 %5092, %v8111_v41   ;;  %v3478_v33 = vpop.permute.xlu1 %3477  ;;  %v3233_v9 = vmax.f32 %v3204_v8, %v3229_v58 }
 0x594   : > { %v3522_v39 = vmax.f32 %v3493_v5, %v3518_v30  ;;  %v3490_v53 = vmul.f32 %v8170_v31, %v3478_v33  ;;  %v3586_v31 = vpop.permute.xlu0 %3585  ;;  %v9211_v33 = vmov 122  }
 0x595   : > { %v3262_v34 = vmax.f32 %v3233_v9, %v3258_v63  ;;  %v3604_v45 = vmul.f32 %v4519_v14, %v3586_v31 }
 0x597   : > { %5095 = vset.pattern.permute.xlu1 %v5549_v40  ;;  %v3291_v51 = vmax.f32 %v3262_v34, %v3287_v24  ;;  %v4520_v24 = vld [vmem:[%s5813_s3 + $0x70] ss:$0 sm:$0xff] }
 0x598   : > { %3821 = vperm.xlu1 %5095, %v8128_v27   ;;  %v3499_v49 = vpop.permute.xlu1 %3498  ;;  %v3598_v58 = vpop.permute.xlu0 %3597 }
 0x599   : > { %v3517_v38 = vmul.f32 %v4516_v12, %v3499_v49  ;;  %v3320_v16 = vmax.f32 %v3291_v51, %v3316_v10 }
 0x59b   : > { %v3521_v32 = vmax.f32 %v3492_v15, %v3517_v38  ;;  %v3349_v62 = vmax.f32 %v3320_v16, %v3345_v28  ;;  %v3461_v15 = vmul.f32 %v8151_v26, %v8183_v44  ;;  %v9212_v16 = vmov 123  }
 0x59c   : > { %3825 = vperm.xlu1 %5095, %v8010_v25   ;;  %v3507_v40 = vpop.permute.xlu1 %3506 }
 0x59d   : > { %v3550_v37 = vmax.f32 %v3521_v32, %v3546_v1  ;;  %v3378_v57 = vmax.f32 %v3349_v62, %v3374_v11  ;;  %v3519_v61 = vmul.f32 %v4516_v12, %v3507_v40 }
 0x59f   : > { %v3407_v3 = vmax.f32 %v3378_v57, %v3403_v56  ;;  %v9213_v57 = vmov 124  }
 0x5a0   : > { %5096 = vset.pattern.permute.xlu1 %v5550_v48  ;;  %v3511_v4 = vpop.permute.xlu1 %3510 }
 0x5a1   : > { %v3520_v36 = vmul.f32 %v4516_v12, %v3511_v4  ;;  %3846 = vperm.xlu1 %5096, %v8046_v43   ;;  %v3436_v18 = vmax.f32 %v3407_v3, %v3432_v0 }
 0x5a3   : > { %v3524_v52 = vmax.f32 %v3495_v2, %v3520_v36  ;;  %v3465_v42 = vmax.f32 %v3436_v18, %v3461_v15  ;;  %v9210_v2 = vmov 121  }
 0x5a5   : > { %v3553_v19 = vmax.f32 %v3524_v52, %v3549_v54  ;;  %3854 = vperm.xlu1 %5096, %v8010_v25   ;;  %v3532_v48 = vpop.permute.xlu1 %3531  ;;  %v3494_v7 = vmax.f32 %v3465_v42, %v3490_v53  ;;  %v4521_v54 = vld [vmem:[%s5813_s3 + $0x71] ss:$0 sm:$0xff]  ;;  %v4522_v42 = vld [vmem:[%s5813_s3 + $0x72] ss:$0 sm:$0xff] }
 0x5a6   : > { %v3547_v22 = vmul.f32 %v4517_v35, %v3532_v48  ;;  %v9214_v48 = vmov 125  }
 0x5a7   : > { %v3523_v44 = vmax.f32 %v3494_v7, %v3519_v61 }
 0x5a8   : > { %v3551_v59 = vmax.f32 %v3522_v39, %v3547_v22  ;;  %v3607_v39 = vmul.f32 %v4519_v14, %v3598_v58 }
 0x5a9   : > { %3858 = vperm.xlu1 %5096, %v8111_v41   ;;  %v3536_v26 = vpop.permute.xlu1 %3535 }
 0x5aa   : > { %v3580_v13 = vmax.f32 %v3551_v59, %v3576_v46  ;;  %v3548_v60 = vmul.f32 %v4517_v35, %v3536_v26  ;;  %v3619_v35 = vpop.permute.xlu0 %3618 }
 0x5ab   : > { %v3634_v49 = vmul.f32 %v4520_v24, %v3619_v35 }
 0x5ac   : > { %v3552_v17 = vmax.f32 %v3523_v44, %v3548_v60 }
 0x5ad   : > { %5099 = vset.pattern.permute.xlu1 %v9210_v2 }
 0x5ae   : > { %3879 = vperm.xlu1 %5099, %v8128_v27   ;;  %v3557_v6 = vpop.permute.xlu1 %3556  ;;  %v3644_v52 = vpop.permute.xlu0 %3643 }
 0x5af   : > { %v3575_v12 = vmul.f32 %v4518_v23, %v3557_v6  ;;  %v3662_v53 = vmul.f32 %v4521_v54, %v3644_v52 }
 0x5b1   : > { %v3579_v47 = vmax.f32 %v3550_v37, %v3575_v12 }
 0x5b2   : > { %3883 = vperm.xlu1 %5099, %v8010_v25   ;;  %v3565_v21 = vpop.permute.xlu1 %3564  ;;  %v3656_v46 = vpop.permute.xlu0 %3655 }
 0x5b3   : > { %v3608_v30 = vmax.f32 %v3579_v47, %v3604_v45  ;;  %v3577_v50 = vmul.f32 %v4518_v23, %v3565_v21  ;;  %v3665_v44 = vmul.f32 %v4521_v54, %v3656_v46  ;;  %v4523_v47 = vld [vmem:[%s5813_s3 + $0x73] ss:$0 sm:$0xff] }
 0x5b5   : > { %v3581_v5 = vmax.f32 %v3552_v17, %v3577_v50 }
 0x5b6   : > { %5100 = vset.pattern.permute.xlu1 %v9211_v33  ;;  %v3569_v8 = vpop.permute.xlu1 %3568  ;;  %v3677_v60 = vpop.permute.xlu0 %3676 }
 0x5b7   : > { %v3578_v63 = vmul.f32 %v4518_v23, %v3569_v8  ;;  %3904 = vperm.xlu1 %5100, %v8046_v43   ;;  %v3692_v12 = vmul.f32 %v4522_v42, %v3677_v60 }
 0x5b9   : > { %v3582_v9 = vmax.f32 %v3553_v19, %v3578_v63 }
 0x5ba   : > { %v3702_v58 = vpop.permute.xlu0 %3701 }
 0x5bb   : > { %v3611_v20 = vmax.f32 %v3582_v9, %v3607_v39  ;;  %3912 = vperm.xlu1 %5100, %v8010_v25   ;;  %v3590_v34 = vpop.permute.xlu1 %3589  ;;  %v3720_v63 = vmul.f32 %v4523_v47, %v3702_v58  ;;  %v9216_v9 = vmov 127  }
 0x5bc   : > { %v3605_v10 = vmul.f32 %v4519_v14, %v3590_v34 }
 0x5be   : > { %v3609_v38 = vmax.f32 %v3580_v13, %v3605_v10 }
 0x5bf   : > { %3916 = vperm.xlu1 %5100, %v8111_v41   ;;  %v3594_v1 = vpop.permute.xlu1 %3593 }
 0x5c0   : > { %v3638_v51 = vmax.f32 %v3609_v38, %v3634_v49  ;;  %v3606_v28 = vmul.f32 %v4519_v14, %v3594_v1  ;;  %v9215_v14 = vmov 126  }
 0x5c2   : > { %v3610_v32 = vmax.f32 %v3581_v5, %v3606_v28 }
 0x5c3   : > { %5103 = vset.pattern.permute.xlu1 %v9212_v16 }
 0x5c4   : > { %3937 = vperm.xlu1 %5103, %v8128_v27   ;;  %v3615_v11 = vpop.permute.xlu1 %3614 }
 0x5c5   : > { %v3633_v40 = vmul.f32 %v4520_v24, %v3615_v11 }
 0x5c7   : > { %v3637_v37 = vmax.f32 %v3608_v30, %v3633_v40 }
 0x5c8   : > { %3941 = vperm.xlu1 %5103, %v8010_v25   ;;  %v3623_v55 = vpop.permute.xlu1 %3622 }
 0x5c9   : > { %v3635_v62 = vmul.f32 %v4520_v24, %v3623_v55  ;;  %v3666_v22 = vmax.f32 %v3637_v37, %v3662_v53 }
 0x5cb   : > { %v3639_v56 = vmax.f32 %v3610_v32, %v3635_v62 }
 0x5cc   : > { %5104 = vset.pattern.permute.xlu1 %v9213_v57  ;;  %v3627_v0 = vpop.permute.xlu1 %3626 }
 0x5cd   : > { %v3636_v4 = vmul.f32 %v4520_v24, %v3627_v0  ;;  %3962 = vperm.xlu1 %5104, %v8046_v43  }
 0x5cf   : > { %v3640_v36 = vmax.f32 %v3611_v20, %v3636_v4  ;;  %v3714_v20 = vpop.permute.xlu0 %3713 }
 0x5d0   : > { %v3723_v38 = vmul.f32 %v4523_v47, %v3714_v20 }
 0x5d1   : > { %3970 = vperm.xlu1 %5104, %v8010_v25   ;;  %v3648_v3 = vpop.permute.xlu1 %3647  ;;  %v3669_v2 = vmax.f32 %v3640_v36, %v3665_v44 }
 0x5d2   : > { %v3663_v15 = vmul.f32 %v4521_v54, %v3648_v3 }
 0x5d3   : > { %v3735_v1 = vpop.permute.xlu0 %3734 }
 0x5d4   : > { %v3667_v23 = vmax.f32 %v3638_v51, %v3663_v15 }
 0x5d5   : > { %3974 = vperm.xlu1 %5104, %v8111_v41   ;;  %v3652_v29 = vpop.permute.xlu1 %3651 }
 0x5d6   : > { %v3664_v18 = vmul.f32 %v4521_v54, %v3652_v29  ;;  %v3696_v30 = vmax.f32 %v3667_v23, %v3692_v12  ;;  %v4526_v54 = vld [vmem:[%s5813_s3 + $0x76] ss:$0 sm:$0xff] }
 0x5d8   : > { %v3668_v19 = vmax.f32 %v3639_v56, %v3664_v18  ;;  %v3760_v56 = vpop.permute.xlu0 %3759 }
 0x5d9   : > { %5107 = vset.pattern.permute.xlu1 %v9214_v48 }
 0x5da   : > { %3995 = vperm.xlu1 %5107, %v8128_v27   ;;  %v3673_v61 = vpop.permute.xlu1 %3672 }
 0x5db   : > { %v3691_v7 = vmul.f32 %v4522_v42, %v3673_v61 }
 0x5dc   : > { %v3772_v52 = vpop.permute.xlu0 %3771 }
 0x5dd   : > { %v3695_v59 = vmax.f32 %v3666_v22, %v3691_v7 }
 0x5de   : > { %3999 = vperm.xlu1 %5107, %v8010_v25   ;;  %v3681_v26 = vpop.permute.xlu1 %3680 }
 0x5df   : > { %v3693_v13 = vmul.f32 %v4522_v42, %v3681_v26  ;;  %v3724_v35 = vmax.f32 %v3695_v59, %v3720_v63  ;;  %v4527_v26 = vld [vmem:[%s5813_s3 + $0x77] ss:$0 sm:$0xff] }
 0x5e0   : > { %v3793_v48 = vpop.permute.xlu0 %3792 }
 0x5e1   : > { %v3697_v17 = vmax.f32 %v3668_v19, %v3693_v13  ;;  %v3808_v7 = vmul.f32 %v4526_v54, %v3793_v48 }
 0x5e2   : > { %5108 = vset.pattern.permute.xlu1 %v9215_v14  ;;  %v3685_v31 = vpop.permute.xlu1 %3684 }
 0x5e3   : > { %v3694_v6 = vmul.f32 %v4522_v42, %v3685_v31  ;;  %4020 = vperm.xlu1 %5108, %v8046_v43   ;;  %v4524_v43 = vld [vmem:[%s5813_s3 + $0x74] ss:$0 sm:$0xff] }
 0x5e4   : > { %v3750_v11 = vmul.f32 %v4524_v43, %v3735_v1  ;;  %v4529_v1 = vld [vmem:[%s5813_s3 + $0x79] ss:$0 sm:$0xff] }
 0x5e5   : > { %v3698_v45 = vmax.f32 %v3669_v2, %v3694_v6 }
 0x5e7   : > { %4028 = vperm.xlu1 %5108, %v8010_v25   ;;  %v3706_v21 = vpop.permute.xlu1 %3705  ;;  %v3727_v32 = vmax.f32 %v3698_v45, %v3723_v38  ;;  %v3818_v45 = vpop.permute.xlu0 %3817 }
 0x5e8   : > { %v3721_v50 = vmul.f32 %v4523_v47, %v3706_v21 }
 0x5ea   : > { %v3725_v5 = vmax.f32 %v3696_v30, %v3721_v50 }
 0x5eb   : > { %4032 = vperm.xlu1 %5108, %v8111_v41   ;;  %v3710_v33 = vpop.permute.xlu1 %3709  ;;  %v3830_v21 = vpop.permute.xlu0 %3829 }
 0x5ec   : > { %v3722_v8 = vmul.f32 %v4523_v47, %v3710_v33  ;;  %v3754_v55 = vmax.f32 %v3725_v5, %v3750_v11 }
 0x5ee   : > { %v3726_v39 = vmax.f32 %v3697_v17, %v3722_v8 }
 0x5ef   : > { %5111 = vset.pattern.permute.xlu1 %v9216_v9  ;;  %v3851_v58 = vpop.permute.xlu0 %3850 }
 0x5f0   : > { %4053 = vperm.xlu1 %5111, %v8128_v27   ;;  %v3731_v24 = vpop.permute.xlu1 %3730  ;;  %v4525_v27 = vld [vmem:[%s5813_s3 + $0x75] ss:$0 sm:$0xff] }
 0x5f1   : > { %v3749_v34 = vmul.f32 %v4524_v43, %v3731_v24  ;;  %v3781_v53 = vmul.f32 %v4525_v27, %v3772_v52 }
 0x5f3   : > { %v3753_v10 = vmax.f32 %v3724_v35, %v3749_v34  ;;  %v3876_v5 = vpop.permute.xlu0 %3875 }
 0x5f4   : > { %4057 = vperm.xlu1 %5111, %v8010_v25   ;;  %v3739_v49 = vpop.permute.xlu1 %3738  ;;  %v3778_v25 = vmul.f32 %v4525_v27, %v3760_v56  ;;  %v3894_v11 = vmul.f32 %v4529_v1, %v3876_v5 }
 0x5f5   : > { %v3751_v41 = vmul.f32 %v4524_v43, %v3739_v49  ;;  %v4528_v49 = vld [vmem:[%s5813_s3 + $0x78] ss:$0 sm:$0xff] }
 0x5f6   : > { %v3782_v15 = vmax.f32 %v3753_v10, %v3778_v25  ;;  %v3836_v10 = vmul.f32 %v4527_v26, %v3818_v45  ;;  %v4534_v45 = vld [vmem:[%s5813_s3 + $0x7e] ss:$0 sm:$0xff] }
 0x5f7   : > { %v3755_v51 = vmax.f32 %v3726_v39, %v3751_v41  ;;  %v3888_v8 = vpop.permute.xlu0 %3887 }
 0x5f8   : > { %v3743_v28 = vpop.permute.xlu1 %3742 }
 0x5f9   : > { %v3752_v16 = vmul.f32 %v4524_v43, %v3743_v28 }
 0x5fb   : > { %v3756_v40 = vmax.f32 %v3727_v32, %v3752_v16  ;;  %v3909_v9 = vpop.permute.xlu0 %3908 }
 0x5fd   : > { %v3764_v37 = vpop.permute.xlu1 %3763  ;;  %v3785_v22 = vmax.f32 %v3756_v40, %v3781_v53  ;;  %v4530_v40 = vld [vmem:[%s5813_s3 + $0x7a] ss:$0 sm:$0xff]  ;;  %v4533_v53 = vld [vmem:[%s5813_s3 + $0x7d] ss:$0 sm:$0xff] }
 0x5fe   : > { %v3779_v62 = vmul.f32 %v4525_v27, %v3764_v37  ;;  %v3839_v37 = vmul.f32 %v4527_v26, %v3830_v21 }
 0x5ff   : > { %v3934_v24 = vpop.permute.xlu0 %3933 }
 0x600   : > { %v3783_v57 = vmax.f32 %v3754_v55, %v3779_v62  ;;  %v4531_v62 = vld [vmem:[%s5813_s3 + $0x7b] ss:$0 sm:$0xff] }
 0x601   : > { %v3768_v0 = vpop.permute.xlu1 %3767 }
 0x602   : > { %v3780_v4 = vmul.f32 %v4525_v27, %v3768_v0  ;;  %v3812_v13 = vmax.f32 %v3783_v57, %v3808_v7 }
 0x603   : > { %v3946_v20 = vpop.permute.xlu0 %3945 }
 0x604   : > { %v3784_v36 = vmax.f32 %v3755_v51, %v3780_v4 }
 0x606   : > { %v3789_v3 = vpop.permute.xlu1 %3788 }
 0x607   : > { %v3807_v23 = vmul.f32 %v4526_v54, %v3789_v3  ;;  %v3967_v38 = vpop.permute.xlu0 %3966  ;;  %v3866_v3 = vmul.f32 %v4528_v49, %v3851_v58 }
 0x609   : > { %v3811_v29 = vmax.f32 %v3782_v15, %v3807_v23  ;;  %v4532_v15 = vld [vmem:[%s5813_s3 + $0x7c] ss:$0 sm:$0xff]  ;;  %v3897_v23 = vmul.f32 %v4529_v1, %v3888_v8 }
 0x60a   : > { %v3797_v18 = vpop.permute.xlu1 %3796 }
 0x60b   : > { %v3809_v19 = vmul.f32 %v4526_v54, %v3797_v18  ;;  %v3840_v28 = vmax.f32 %v3811_v29, %v3836_v10  ;;  %v3992_v32 = vpop.permute.xlu0 %3991 }
 0x60d   : > { %v3813_v42 = vmax.f32 %v3784_v36, %v3809_v19  ;;  %v3952_v36 = vmul.f32 %v4531_v62, %v3934_v24 }
 0x60e   : > { %v3801_v61 = vpop.permute.xlu1 %3800 }
 0x60f   : > { %v3810_v46 = vmul.f32 %v4526_v54, %v3801_v61  ;;  %v4004_v56 = vpop.permute.xlu0 %4003 }
 0x611   : > { %v3814_v59 = vmax.f32 %v3785_v22, %v3810_v46 }
 0x613   : > { %v3822_v44 = vpop.permute.xlu1 %3821  ;;  %v3843_v4 = vmax.f32 %v3814_v59, %v3839_v37  ;;  %v4025_v19 = vpop.permute.xlu0 %4024  ;;  %v4010_v59 = vmul.f32 %v4533_v53, %v3992_v32 }
 0x614   : > { %v3837_v60 = vmul.f32 %v4527_v26, %v3822_v44  ;;  %v3924_v44 = vmul.f32 %v4530_v40, %v3909_v9  ;;  %v3982_v9 = vmul.f32 %v4532_v15, %v3967_v38 }
 0x616   : > { %v3841_v17 = vmax.f32 %v3812_v13, %v3837_v60  ;;  %v4535_v13 = vld [vmem:[%s5813_s3 + $0x7f] ss:$0 sm:$0xff]  ;;  %s9221_s3 = smov (!%p4536_p11), %s9220_s8 }
 0x617   : > { %v3826_v14 = vpop.permute.xlu1 %3825  ;;  %v4050_v60 = vpop.permute.xlu0 %4049 }
 0x618   : > { %v3838_v31 = vmul.f32 %v4527_v26, %v3826_v14  ;;  %v3870_v22 = vmax.f32 %v3841_v17, %v3866_v3  ;;  %v4068_v5 = vmul.f32 %v4535_v13, %v4050_v60 }
 0x61a   : > { %v8264_v2 = vmax.f32 %v3813_v42, %v3838_v31  ;;  %v3955_v31 = vmul.f32 %v4531_v62, %v3946_v20 }
 0x61c   : > { %v3847_v6 = vpop.permute.xlu1 %3846 }
 0x61d   : > { %v3865_v41 = vmul.f32 %v4528_v49, %v3847_v6 }
 0x61f   : > { %v3869_v16 = vmax.f32 %v3840_v28, %v3865_v41  ;;  %v4013_v28 = vmul.f32 %v4533_v53, %v4004_v56 }
 0x620   : > { %v8266_v12 = vpop.permute.xlu1 %3854 }
 0x621   : > { %v3898_v57 = vmax.f32 %v3869_v16, %v3894_v11  ;;  %v4062_v11 = vpop.permute.xlu0 %4061 }
 0x624   : > { %v3859_v47 = vpop.permute.xlu1 %3858 }
 0x625   : > { %v3868_v0 = vmul.f32 %v4528_v49, %v3859_v47 }
 0x627   : > { %v3872_v52 = vmax.f32 %v3843_v4, %v3868_v0  ;;  %v4040_v0 = vmul.f32 %v4534_v45, %v4025_v19 }
 0x629   : > { %v3880_v30 = vpop.permute.xlu1 %3879  ;;  %v3901_v46 = vmax.f32 %v3872_v52, %v3897_v23 }
 0x62a   : > { %v3895_v18 = vmul.f32 %v4529_v1, %v3880_v30 }
 0x62c   : > { %v3899_v26 = vmax.f32 %v3870_v22, %v3895_v18 }
 0x62d   : > { %v8268_v50 = vpop.permute.xlu1 %3883 }
 0x62e   : > { %v3928_v8 = vmax.f32 %v3899_v26, %v3924_v44  ;;  %v3896_v24 = vmul.f32 %v4529_v1, %v8268_v50  ;;  %v4071_v1 = vmul.f32 %v4535_v13, %v4062_v11 }
 0x632   : > { %v3905_v33 = vpop.permute.xlu1 %3904 }
 0x633   : > { %v3923_v55 = vmul.f32 %v4530_v40, %v3905_v33  ;;  %v3867_v33 = vmul.f32 %v4528_v49, %v8266_v12 }
 0x635   : > { %v3927_v25 = vmax.f32 %v3898_v57, %v3923_v55 }
 0x636   : > { %v8270_v63 = vpop.permute.xlu1 %3912 }
 0x637   : > { %v3956_v48 = vmax.f32 %v3927_v25, %v3952_v36  ;;  %v3925_v32 = vmul.f32 %v4530_v40, %v8270_v63 }
 0x63a   : > { %v3917_v39 = vpop.permute.xlu1 %3916 }
 0x63b   : > { %v3926_v42 = vmul.f32 %v4530_v40, %v3917_v39 }
 0x63d   : > { %v3930_v14 = vmax.f32 %v3901_v46, %v3926_v42 }
 0x63f   : > { %v3938_v43 = vpop.permute.xlu1 %3937  ;;  %v3959_v17 = vmax.f32 %v3930_v14, %v3955_v31 }
 0x640   : > { %v3953_v6 = vmul.f32 %v4531_v62, %v3938_v43  ;;  %v3871_v43 = vmax.f32 %v8264_v2, %v3867_v33 }
 0x643   : > { %v8272_v35 = vpop.permute.xlu1 %3941 }
 0x644   : > { %v3954_v49 = vmul.f32 %v4531_v62, %v8272_v35 }
 0x648   : > { %v3963_v34 = vpop.permute.xlu1 %3962 }
 0x649   : > { %v3981_v29 = vmul.f32 %v4532_v15, %v3963_v34  ;;  %v3957_v34 = vmax.f32 %v3928_v8, %v3953_v6 }
 0x64b   : > { %v3985_v7 = vmax.f32 %v3956_v48, %v3981_v29  ;;  %v3986_v12 = vmax.f32 %v3957_v34, %v3982_v9 }
 0x64c   : > { %v8276_v51 = vpop.permute.xlu1 %3970 }
 0x64d   : > { %v4014_v21 = vmax.f32 %v3985_v7, %v4010_v59  ;;  %v3983_v57 = vmul.f32 %v4532_v15, %v8276_v51 }
 0x650   : > { %v3975_v27 = vpop.permute.xlu1 %3974 }
 0x651   : > { %v3984_v30 = vmul.f32 %v4532_v15, %v3975_v27  ;;  %v3900_v27 = vmax.f32 %v3871_v43, %v3896_v24 }
 0x653   : > { %v3988_v41 = vmax.f32 %v3959_v17, %v3984_v30  ;;  %v3929_v38 = vmax.f32 %v3900_v27, %v3925_v32 }
 0x655   : > { %v3996_v54 = vpop.permute.xlu1 %3995  ;;  %v4017_v55 = vmax.f32 %v3988_v41, %v4013_v28  ;;  %v3958_v2 = vmax.f32 %v3929_v38, %v3954_v49 }
 0x656   : > { %v4011_v16 = vmul.f32 %v4533_v53, %v3996_v54 }
 0x657   : > { %v3987_v36 = vmax.f32 %v3958_v2, %v3983_v57 }
 0x658   : > { %v4015_v56 = vmax.f32 %v3986_v12, %v4011_v16 }
 0x659   : > { %v4000_v61 = vpop.permute.xlu1 %3999 }
 0x65a   : > { %v4012_v25 = vmul.f32 %v4533_v53, %v4000_v61  ;;  %v4044_v54 = vmax.f32 %v4015_v56, %v4040_v0 }
 0x65c   : > { %v4016_v35 = vmax.f32 %v3987_v36, %v4012_v25 }
 0x65e   : > { %v4021_v47 = vpop.permute.xlu1 %4020 }
 0x65f   : > { %v4039_v58 = vmul.f32 %v4534_v45, %v4021_v47 }
 0x661   : > { %v4043_v39 = vmax.f32 %v4014_v21, %v4039_v58 }
 0x662   : > { %v4029_v10 = vpop.permute.xlu1 %4028 }
 0x663   : > { %v4072_v20 = vmax.f32 %v4043_v39, %v4068_v5  ;;  %v4041_v3 = vmul.f32 %v4534_v45, %v4029_v10 }
 0x665   : > { %4076 = vst [vmem:[#allocation2 + $0x10] sm:$0xff] %v4072_v20  ;;  %v4045_v29 = vmax.f32 %v4016_v35, %v4041_v3 }
 0x666   : > { %v4033_v37 = vpop.permute.xlu1 %4032 }
 0x667   : > { %v4042_v50 = vmul.f32 %v4534_v45, %v4033_v37 }
 0x669   : > { %v4046_v4 = vmax.f32 %v4017_v55, %v4042_v50 }
 0x66b   : > { %v4075_v63 = vmax.f32 %v4046_v4, %v4071_v1  ;;  %v4054_v40 = vpop.permute.xlu1 %4053 }
 0x66c   : > { %v4069_v52 = vmul.f32 %v4535_v13, %v4054_v40 }
 0x66d   : > { %4079 = vst [vmem:[#allocation2 + $0x8] sm:$0xff] %v4075_v63 }
 0x66e   : > { %v4073_v62 = vmax.f32 %v4044_v54, %v4069_v52 }
 0x66f   : > { %v4058_v23 = vpop.permute.xlu1 %4057 }
 0x670   : > { %4077 = vst [vmem:[#allocation2] sm:$0xff] %v4073_v62  ;;  %v4070_v18 = vmul.f32 %v4535_v13, %v4058_v23  ;;  %4083 = sbr.rel (%p4536_p11) target bundleno = 1884 (0x75c), region = 60 }
 0x672   : > { %v4074_v48 = vmax.f32 %v4045_v29, %v4070_v18 }
 0x674   : > { %4078 = vst [vmem:[#allocation2 + $0x18] sm:$0xff] %v4074_v48 }
 0x675   : > { %4554 = vmatprep.subr.mxu0 %v4075_v63  ;;  %4568 = vmatprep.subr.mxu1 %v4075_v63  ;;  %v4084_v51 = vld [vmem:[%s9218_s14] sm:$0xff]  ;;  %vm4112_vm0 = vcmask 261120   ;;  %v4086_v15 = vld [vmem:[%s9218_s14 + $0x10] sm:$0xff]  ;;  %v4085_v53 = vld [vmem:[%s9218_s14 + $0x8] sm:$0xff]  ;;  %v5558_v22 = vmov 0   ;;  %v4257_v49 = vlaneseq }
 0x676   : > { %4555 = vmatpush3.msra.mxu0 %v4075_v63  ;;  %4572 = vmatpush3.msra.mxu1 %v4075_v63  ;;  %v4087_v19 = vld [vmem:[%s9218_s14 + $0x18] sm:$0xff]  ;;  %v4088_v42 = vld [vmem:[%s9219_s16] sm:$0xff]  ;;  %v4090_v61 = vld [vmem:[%s9219_s16 + $0x10] sm:$0xff] }
 0x677   : > { %4556 = vmatprep.subr.mxu0 %v4074_v48  ;;  %4569 = vmatprep.subr.mxu1 %v4074_v48  ;;  %v4089_v46 = vld [vmem:[%s9219_s16 + $0x8] sm:$0xff]  ;;  %v4091_v7 = vld [vmem:[%s9219_s16 + $0x18] sm:$0xff]  ;;  %v4214_v59 = vld [vmem:[%s9220_s8] sm:$0xff]  ;;  %v4258_v50 = vshrl.u32 %v4257_v49, 7 }
 0x678   : > { %4557 = vmatpush3.msra.mxu0 %v4074_v48  ;;  %4573 = vmatpush3.msra.mxu1 %v4074_v48  ;;  %v4215_v26 = vld [vmem:[%s9221_s3 + $0x8] sm:$0xff]  ;;  %v4216_v44 = vld [vmem:[%s9221_s3 + $0x10] sm:$0xff]  ;;  %v4217_v13 = vld [vmem:[%s9221_s3 + $0x18] sm:$0xff] }
 0x679   : > { %4558 = vmatprep.subr.mxu0 %v4073_v62  ;;  %4570 = vmatprep.subr.mxu1 %v4073_v62  ;;  %v4251_v60 = vld [vmem:[#allocation3] sm:$0x1]  ;;  %v4259_v57 = vsub.s32 0, %v4258_v50 }
 0x67a   : > { %4559 = vmatpush3.msra.mxu0 %v4073_v62  ;;  %4574 = vmatpush3.msra.mxu1 %v4073_v62 }
 0x67b   : > { %4560 = vmatprep.subr.mxu0 %v4072_v20  ;;  %4571 = vmatprep.subr.mxu1 %v4072_v20 }
 0x67c   : > { %4561 = vmatpush3.msra.mxu0 %v4072_v20  ;;  %4575 = vmatpush3.msra.mxu1 %v4072_v20 }
 0x67d   : > { %4562 = vmatprep.mubr.msk.f32.mxu0 %vm4112_vm0, %v4084_v51  ;;  %4565 = vmatprep.mubr.msk.f32.mxu1 %vm4112_vm0, %v4086_v15 }
 0x67e   : > { %4563 = vmatmul.mubr.msk.f32.vlgmr.msra.gmra.mxu0 %vm4112_vm0, %v4085_v53  ;;  %4566 = vmatmul.mubr.msk.f32.vlgmr.msra.gmra.mxu1 %vm4112_vm0, %v4087_v19 }
 0x67f   : > { %5200 = vset.pattern.permute.xlu0 %v5558_v22  ;;  %5201 = vset.pattern.permute.xlu1 %v5558_v22 }
 0x680   : > { %4094 = vperm.xlu0 %5200, %v4088_v42   ;;  %4104 = vperm.xlu1 %5201, %v4090_v61  }
 0x684   : > { %4099 = vperm.xlu0 %5200, %v4089_v46   ;;  %4109 = vperm.xlu1 %5201, %v4091_v7  }
 0x688   : > { %4220 = vperm.xlu0 %5200, %v4214_v59   ;;  %4225 = vperm.xlu1 %5201, %v4215_v26  }
 0x68c   : > { %4230 = vperm.xlu0 %5200, %v4216_v44   ;;  %4235 = vperm.xlu1 %5201, %v4217_v13  }
 0x690   : > { %4254 = vperm.xlu0 %5200, %v4251_v60  }
 0x6fb   : > { %v4095_v14 = vpop.permute.xlu0 %4094  ;;  %v4105_v31 = vpop.permute.xlu1 %4104 }
 0x6ff   : > { %v4100_v6 = vpop.permute.xlu0 %4099  ;;  %v4110_v45 = vpop.permute.xlu1 %4109 }
 0x703   : > { %v4221_v30 = vpop.permute.xlu0 %4220  ;;  %v4226_v34 = vpop.permute.xlu1 %4225 }
 0x707   : > { %v4231_v43 = vpop.permute.xlu0 %4230  ;;  %v4236_v11 = vpop.permute.xlu1 %4235 }
 0x70b   : > { %v4255_v0 = vpop.permute.xlu0 %4254 }
 0x70c   : > { %v4260_v2 = vrot.slane %v4255_v0, %v4259_v57 }
 0x73e   : > { %v4564_v47 = vpop.f32.mrf.mxu0  ;;  %v4567_v21 = vpop.f32.mrf.mxu1 }
 0x73f   : > { %v4197_v58 = vadd.f32 %v4564_v47, %v4100_v6  ;;  %v4207_v17 = vadd.f32 %v4567_v21, %v4110_v45 }
 0x740   : > { %v4191_v5 = vpop.f32.mrf.mxu0  ;;  %v4201_v33 = vpop.f32.mrf.mxu1 }
 0x741   : > { %v4211_v8 = vmax.f32 %v4197_v58, 0.0  ;;  %v4192_v39 = vadd.f32 %v4191_v5, %v4095_v14  ;;  %v4202_v24 = vadd.f32 %v4201_v33, %v4105_v31  ;;  %v4213_v28 = vmax.f32 %v4207_v17, 0.0 }
 0x743   : > { %v4210_v9 = vmax.f32 %v4192_v39, 0.0  ;;  %v4212_v10 = vmax.f32 %v4202_v24, 0.0  ;;  %v4239_v41 = vmul.f32 %v4226_v34, %v4211_v8  ;;  %v4241_v27 = vmul.f32 %v4236_v11, %v4213_v28 }
 0x745   : > { %v4238_v20 = vmul.f32 %v4221_v30, %v4210_v9  ;;  %v4240_v16 = vmul.f32 %v4231_v43, %v4212_v10 }
 0x747   : > { %v4242_v32 = vadd.f32 %v4239_v41, %v4238_v20 }
 0x749   : > { %v4243_v12 = vadd.f32 %v4242_v32, %v4240_v16 }
 0x74b   : > { %v4244_v37 = vadd.f32 %v4243_v12, %v4241_v27 }
 0x74d   : > { %v4245_v55 = vrot.slane %v4244_v37, 4 }
 0x74f   : > { %v4246_v1 = vadd.f32 %v4245_v55, %v4244_v37 }
 0x751   : > { %v4247_v38 = vrot.slane %v4246_v1, 2 }
 0x753   : > { %v4248_v56 = vadd.f32 %v4247_v38, %v4246_v1 }
 0x755   : > { %v4249_v4 = vrot.slane %v4248_v56, 1 }
 0x757   : > { %v4250_v25 = vadd.f32 %v4249_v4, %v4248_v56 }
 0x759   : > { %v4261_v63 = vadd.f32 %v4260_v2, %v4250_v25 }
 0x75b   : > { %4262 = vst [vmem:[%s5829_s15] sm:$0x1] %v4261_v63 }
 0x75c PF: > { %s9222_s4 = sld [smem:[#allocation17_spill]]  ;;  %s4278_s24 = sshll.u32 %s5829_s15, 4  ;;  %s4279_s24 = int_to_ptr.vmem [resolvable:$true] %s4278_s24 }
 0x75d   : > { %s9223_s9 = sld [smem:[#allocation16_spill]]  ;;  %s4264_s0 = scalar_lea.sflag [#allocation6], %s341_s20 }
 0x75e   : > { %s9225_s2 = sld [smem:[#allocation22_spill]]  ;;  %s5258_s1 = scalar_lea.vmem %s4279_s24, 16 }
 0x75f   : > { %s9226_s22 = sld [smem:[#allocation260_spill]]  ;;  %p5259_p8 = scmp.ne.s32.totalorder %s4279_s24, %s5258_s1 }
 0x760   : > { %s5559_s3 = smov [#allocation9]  }
 0x761   : > { %s5262_s14 = sshll.u32 %s5559_s3, 4  ;;  %s5263_s14 = int_to_ptr.vmem [resolvable:$false] %s5262_s14 }
 0x762   : > { %s4541_s17 = sshll.u32 %s9222_s4, 1  ;;  %s5264_s16 = scalar_lea.vmem %s5263_s14, 32 }
 0x763   : > { %s4274_s8 = sadd.s32 %s9223_s9, %s4541_s17  ;;  %p5265_p3 = scmp.lt.s32.totalorder %s4279_s24, %s5263_s14 }
 0x764   : > { %s4542_s26 = sshll.u32 %s4274_s8, 4  ;;  %p9227_p0 = scmp.ne.s32.totalorder %s9225_s2, 0 }
 0x765   : > { %s4276_s23 = scalar_lea.hbm %s9226_s22, %s4542_s26  ;;  %p5266_p6 = scmp.lt.s32.totalorder %s5264_s16, %s5258_s1 }
 0x766   : > { %p5260_p13 = pnand %p5259_p8, %p9227_p0 }
 0x767   : > { %p5267_p2 = por %p5266_p6, %p5265_p3 }
 0x768   : > { %p5261_p1 = pneg %p5260_p13 }
 0x76a   : > { %p5268_p5 = pnand %p5267_p2, %p5261_p1 }
 0x76c   : > { %5271 = shalt.err (!%p5268_p5)
}
 0x76d   : > { %s5272_s15 = scalar_lea.hbm %s4276_s23, 16  ;;  %s5276_s9 = scalar_lea.hbm %s9226_s22, 64 }
 0x76e   : > { %p5273_p4 = scmp.ne.s32.totalorder %s4276_s23, %s5272_s15  ;;  %p5277_p9 = scmp.lt.s32.totalorder %s4276_s23, %s9226_s22 }
 0x76f   : > { %p5278_p7 = scmp.lt.s32.totalorder %s5276_s9, %s5272_s15 }
 0x770   : > { %p5274_p10 = pnand %p5273_p4, %p9227_p0 }
 0x771   : > { %p5279_p11 = por %p5278_p7, %p5277_p9 }
 0x772   : > { %p5275_p12 = pneg %p5274_p10 }
 0x774   : > { %p5280_p8 = pnand %p5279_p11, %p5275_p12 }
 0x776   : > { %5283 = shalt.err (!%p5280_p8)
}
 0x777   : > { %4580 = dma.vmem_to_hbm [thread:$0]  (%p9227_p0), %s4279_s24, 16, %s4276_s23, %s4264_s0  }
 0x778 PF: > { %s9228_s1 = sld [smem:[#allocation13_spill]]  ;;  %p4594_p13 = scmp.ge.s32.totalorder %s5422_s13, 2 }
 0x779   : > { %s9229_s14 = sld [smem:[#allocation23_spill]] }
 0x77e   : > { %s4290_s16 = sand.u32 1, %s9228_s1  }
 0x77f   : > { %p9230_p1 = scmp.ne.s32.totalorder %s9229_s14, 0  ;;  %s4291_s3 = scalar_lea.sflag [#allocation6], %s4290_s16 }
 0x781   : > { %p4590_p3 = pnand %p4594_p13, %p9230_p1 }
 0x783   : > { %p4591_p6 = pneg %p4590_p3 }
 0x785   : > { %5357 = dma.done.wait (%p4591_p6), %s4291_s3, 16  }
 0x786   : > { %5359 = vsyncadd (%p4591_p6), %s4291_s3, 4294967280  ;;  %s27_s13 = sadd.s32 1, %s5422_s13   ;;  %s9232_s23 = sld [smem:[#allocation14_spill]] }
 0x787   : > { %p8353_p2 = scmp.ge.s32.totalorder %s27_s13, 10   ;;  %s9233_s0 = sld [smem:[#allocation18_spill]] }
 0x788   : > { %s9234_s2 = sld [smem:[#allocation19_spill]]  ;;  %s9237_s24 = smov %s5370_s25 }
 0x789   : > { %s9235_s21 = sld [smem:[#allocation21_spill]]  ;;  %s9238_s25 = smov %s5742_s18 }
 0x78a   : > { %s9239_s26 = smov %s5378_s27  ;;  %s9240_s27 = smov %s5382_s28 }
 0x78b   : > { %s9241_s28 = smov %s5777_s19  ;;  %s9242_s5 = smov %s5390_s29 }
 0x78c   : > { %s9243_s29 = smov %s5394_s30  ;;  %s9244_s30 = smov %s5739_s6 }
 0x78d   : > { %s9245_s7 = smov %s5410_s10  ;;  %s9246_s8 = smov %s5414_s11 }
 0x78e   : > { %s9247_s9 = smov %s5418_s12  ;;  %s9248_s10 = smov %s9233_s0 }
 0x78f   : > { %s9249_s11 = smov %s9234_s2  ;;  %s9250_s12 = smov %s9235_s21 }
 0x790   :  { %26 = sbr.rel (!%p8353_p2) target bundleno = 20 (0x14), region = 110 }
 0x795   :  { %4295 = vsyncpa [#allocation5], 1 }
 0x796   :  { %4297 = vsyncpa [#allocation5 + $0x1], 1 }
 0x797   :  { %4298 = vsyncpa [#allocation8], 1 }
 0x798   :  { %4300 = vsyncpa [#allocation8 + $0x1], 1 }
 0x799   :  { %4301 = vsyncpa [#allocation6], 1 }
 0x79a   :  { %4303 = vsyncpa [#allocation6 + $0x1], 1 }

</bundles_post_ra>
